<compile_context>
chip_gen: v7x
topology: tpu7x:2x2x1
jax: 0.10.0
libtpu: 0.0.40
codegen_flags: <defaults>
</compile_context>

<pallas_src>
import jax
import jax.numpy as jnp
import numpy as np
from jax.experimental import pallas as pl
from jax.experimental.pallas import tpu as pltpu


# ----------------------------------------------------------------------------
# Pallas kernels
# ----------------------------------------------------------------------------
def _conv_stage_kernel(x_ref, t1_ref, b1_ref, t2_ref, b2_ref, o_ref, p2_ref):
    """conv1 -> ReLU -> pool -> conv2 -> ReLU -> pool for one image.

    x_ref  : (1, 32, 32)     f32   zero-padded 28x28 input image (pad=2)
    t1_ref : (2, 5, 32, 280) bf16  conv1 Toeplitz weights [w-phase, kh, j, (wo,co)]
    b1_ref : (1, 280)        f32   conv1 bias tiled over wo
    t2_ref : (2, 5, 280, 350) bf16 conv2 Toeplitz weights [w-phase, kh, (wm,ci), (wo,co)]
    b2_ref : (1, 350)        f32   conv2 bias tiled over wo
    o_ref  : (1, 7, 350)     bf16  pooled conv2 output [ho, (wo, co)]
    p2_ref : (18, 280) f32 VMEM    h-padded conv2 input rows [h, (w, ci)]
    """
    f32 = jnp.float32

    # ---- conv1 (1 -> 20, 5x5, pad 2): 2 pool-phases x 5 kh-taps of MXU matmuls
    acc_e = jnp.zeros((28, 280), f32)
    acc_o = jnp.zeros((28, 280), f32)
    for kh in range(5):
        rows = x_ref[0, kh:kh + 28, :].astype(jnp.bfloat16)          # (28, 32)
        acc_e = acc_e + jnp.dot(rows, t1_ref[0, kh], preferred_element_type=f32)
        acc_o = acc_o + jnp.dot(rows, t1_ref[1, kh], preferred_element_type=f32)
    m = jnp.maximum(acc_e, acc_o)              # max over the w pair -> (28, 280)

    # max over the h pair: 0/1 row-selection matmuls picking rows 2*ho, 2*ho+1
    r = jax.lax.broadcasted_iota(jnp.int32, (14, 28), 0)
    c = jax.lax.broadcasted_iota(jnp.int32, (14, 28), 1)
    sel_e = (c == 2 * r).astype(f32)
    sel_o = (c == 2 * r + 1).astype(f32)
    pooled1 = jnp.maximum(jnp.dot(sel_e, m, preferred_element_type=f32),
                          jnp.dot(sel_o, m, preferred_element_type=f32))  # (14, 280)
    # bias + ReLU commute with max-pool (bias is constant per channel)
    y1 = jnp.maximum(pooled1 + b1_ref[...], 0.0)                     # (14, 280)

    # ---- conv2 input slab: zero h-padding rows live in VMEM scratch
    p2_ref[...] = jnp.zeros_like(p2_ref)
    p2_ref[2:16, :] = y1

    # ---- conv2 (20 -> 50, 5x5, pad 2): same Toeplitz trick
    acc2_e = jnp.zeros((14, 350), f32)
    acc2_o = jnp.zeros((14, 350), f32)
    for kh in range(5):
        rows = p2_ref[kh:kh + 14, :].astype(jnp.bfloat16)            # (14, 280)
        acc2_e = acc2_e + jnp.dot(rows, t2_ref[0, kh], preferred_element_type=f32)
        acc2_o = acc2_o + jnp.dot(rows, t2_ref[1, kh], preferred_element_type=f32)
    m2 = jnp.maximum(acc2_e, acc2_o)                                 # (14, 350)

    r2 = jax.lax.broadcasted_iota(jnp.int32, (7, 14), 0)
    c2 = jax.lax.broadcasted_iota(jnp.int32, (7, 14), 1)
    sel2_e = (c2 == 2 * r2).astype(f32)
    sel2_o = (c2 == 2 * r2 + 1).astype(f32)
    pooled2 = jnp.maximum(jnp.dot(sel2_e, m2, preferred_element_type=f32),
                          jnp.dot(sel2_o, m2, preferred_element_type=f32))  # (7, 350)
    y2 = jnp.maximum(pooled2 + b2_ref[...], 0.0)

    o_ref[0] = y2.astype(o_ref.dtype)


def _fc_kernel(x_ref, w1_ref, b1_ref, w2_ref, b2_ref, o_ref):
    """log_softmax(relu(x @ w1 + b1) @ w2 + b2), everything VMEM-resident."""
    h = jnp.dot(x_ref[...], w1_ref[...], preferred_element_type=jnp.float32)
    h = jnp.maximum(h + b1_ref[...], 0.0)
    logits = jnp.dot(h.astype(w2_ref.dtype), w2_ref[...],
                     preferred_element_type=jnp.float32) + b2_ref[...]
    mx = jnp.max(logits, axis=-1, keepdims=True)
    s = logits - mx
    lse = jnp.log(jnp.sum(jnp.exp(s), axis=-1, keepdims=True))
    o_ref[...] = s - lse


# ----------------------------------------------------------------------------
# Pallas wrappers
# ----------------------------------------------------------------------------
def conv_stage_pallas(x_pad, t1, b1, t2, b2):
    """x_pad: (B, 32, 32) f32 padded images -> (B, 7, 350) bf16 pooled features."""
    B = x_pad.shape[0]
    return pl.pallas_call(
        _conv_stage_kernel,
        out_shape=jax.ShapeDtypeStruct((B, 7, 350), jnp.bfloat16),
        grid_spec=pltpu.PrefetchScalarGridSpec(
            num_scalar_prefetch=0,
            grid=(B,),
            in_specs=[
                pl.BlockSpec((1, 32, 32), lambda b: (b, 0, 0)),        # image
                pl.BlockSpec((2, 5, 32, 280), lambda b: (0, 0, 0, 0)),  # conv1 T
                pl.BlockSpec((1, 280), lambda b: (0, 0)),               # conv1 bias
                pl.BlockSpec((2, 5, 280, 350), lambda b: (0, 0, 0, 0)),  # conv2 T
                pl.BlockSpec((1, 350), lambda b: (0, 0)),               # conv2 bias
            ],
            out_specs=pl.BlockSpec((1, 7, 350), lambda b: (b, 0, 0)),
            scratch_shapes=[pltpu.VMEM((18, 280), jnp.float32)],
        ),
        compiler_params=pltpu.CompilerParams(
            dimension_semantics=("parallel",)),
    )(x_pad, t1, b1, t2, b2)


def fc_pallas(x, w1, b1, w2, b2):
    """Fused fc1+ReLU+fc2+log_softmax; single block (all operands fit VMEM)."""
    B = x.shape[0]
    return pl.pallas_call(
        _fc_kernel,
        out_shape=jax.ShapeDtypeStruct((B, 10), jnp.float32),
    )(x, w1, b1, w2, b2)


# ----------------------------------------------------------------------------
# Parameters: torch-layout init + one-time conversion into kernel layout
# ----------------------------------------------------------------------------
def init_params(key):
    """Deterministic torch-layout parameters (uniform +-1/sqrt(fan_in))."""
    def u(key, shape, fan_in):
        bound = 1.0 / jnp.sqrt(fan_in)
        return jax.random.uniform(key, shape, jnp.float32, -bound, bound)

    ks = jax.random.split(key, 8)
    p = {}
    p["w_conv1"] = u(ks[0], (20, 1, 5, 5), 1 * 25)        # (Cout, Cin, kh, kw)
    p["b_conv1"] = u(ks[1], (20,), 1 * 25)
    p["w_conv2"] = u(ks[2], (50, 20, 5, 5), 20 * 25)
    p["b_conv2"] = u(ks[3], (50,), 20 * 25)
    p["w_fc1"] = u(ks[4], (500, 7 * 7 * 50), 7 * 7 * 50)  # (out, in), in = (c,h,w)
    p["b_fc1"] = u(ks[5], (500,), 7 * 7 * 50)
    p["w_fc2"] = u(ks[6], (10, 500), 500)
    p["b_fc2"] = u(ks[7], (10,), 500)
    return p


def prepare_params(tp):
    """Torch-layout params -> kernel-ready layout (Toeplitz conv weights, bf16)."""
    w1 = np.asarray(tp["w_conv1"], np.float32)     # (20, 1, 5, 5)
    b1 = np.asarray(tp["b_conv1"], np.float32)     # (20,)
    w2 = np.asarray(tp["w_conv2"], np.float32)     # (50, 20, 5, 5)
    b2 = np.asarray(tp["b_conv2"], np.float32)     # (50,)

    # conv1 Toeplitz: T1[kh][j, w*20 + co] = w1[co, 0, kh, j - w] for 0 <= j-w < 5.
    # lhs rows are the zero-padded image rows, so output columns are (w, co).
    T1 = np.zeros((5, 32, 28 * 20), np.float32)
    for kh in range(5):
        for kw in range(5):
            for w in range(28):
                T1[kh, w + kw, w * 20:(w + 1) * 20] = w1[:, 0, kh, kw]
    T1 = T1.reshape(5, 32, 28, 20)
    t1 = np.stack([T1[:, :, 0::2, :].reshape(5, 32, 14 * 20),     # even w phase
                   T1[:, :, 1::2, :].reshape(5, 32, 14 * 20)], 0)  # odd  w phase

    # conv2 Toeplitz: rows indexed by the UNPADDED conv2 input columns (wm, ci);
    # T2[kh][wm*20 + ci, w*50 + co] = w2[co, ci, kh, kw] with wm = w + kw - 2
    # (out-of-range wm hits the zero w-padding, so those terms are simply absent).
    T2 = np.zeros((5, 14 * 20, 14 * 50), np.float32)
    for kh in range(5):
        for kw in range(5):
            blk = w2[:, :, kh, kw].T               # (ci=20, co=50)
            for w in range(14):
                wm = w + kw - 2
                if 0 <= wm < 14:
                    T2[kh, wm * 20:(wm + 1) * 20, w * 50:(w + 1) * 50] = blk
    T2 = T2.reshape(5, 280, 14, 50)
    t2 = np.stack([T2[:, :, 0::2, :].reshape(5, 280, 7 * 50),
                   T2[:, :, 1::2, :].reshape(5, 280, 7 * 50)], 0)

    p = {}
    p["t1"] = jnp.asarray(t1, jnp.bfloat16)                        # (2,5,32,280)
    p["b1"] = jnp.asarray(np.tile(b1, 14)[None, :], jnp.float32)   # (1,280)
    p["t2"] = jnp.asarray(t2, jnp.bfloat16)                        # (2,5,280,350)
    p["b2"] = jnp.asarray(np.tile(b2, 7)[None, :], jnp.float32)    # (1,350)

    # fc1 columns permuted from torch's NCHW flatten (c,h,w) to the kernel's
    # NHWC flatten (h,w,c); weights bf16 for the MXU, biases f32.
    wf1 = np.asarray(tp["w_fc1"], np.float32).reshape(500, 50, 7, 7)
    p["w_fc1"] = jnp.asarray(wf1.transpose(2, 3, 1, 0).reshape(7 * 7 * 50, 500),
                             jnp.bfloat16)
    p["b_fc1"] = jnp.asarray(np.asarray(tp["b_fc1"], np.float32)[None, :])
    p["w_fc2"] = jnp.asarray(np.asarray(tp["w_fc2"], np.float32).T, jnp.bfloat16)
    p["b_fc2"] = jnp.asarray(np.asarray(tp["b_fc2"], np.float32)[None, :])
    return p


# ----------------------------------------------------------------------------
# Full forward pass
# ----------------------------------------------------------------------------
def deepnet_forward(params, x_nchw):
    """x_nchw: (B, 1, 28, 28) float32 -> (B, 10) log-probabilities."""
    B = x_nchw.shape[0]
    # C=1, so NCHW == (B, H, W); pad=2 on each spatial side (tiny XLA op).
    x_pad = jnp.pad(x_nchw.reshape(B, 28, 28), ((0, 0), (2, 2), (2, 2)))

    # Fused conv trunk: (B, 7, 350) bf16 with columns ordered (wo, co).
    feats = conv_stage_pallas(x_pad, params["t1"], params["b1"],
                              params["t2"], params["b2"])

    # NHWC flatten (ho, wo, co) -- matches the permuted fc1 weight rows.
    flat = feats.reshape(B, 7 * 7 * 50)

    # Fused fc1 + ReLU + fc2 + log_softmax.
    return fc_pallas(flat, params["w_fc1"], params["b_fc1"],
                     params["w_fc2"], params["b_fc2"])


if __name__ == "__main__":
    key = jax.random.PRNGKey(0)
    k_x, k_p = jax.random.split(key)

    # DeepNet's fc1 hard-codes 7*7*50, so spatial must be 28x28, channels=1.
    x = jax.random.normal(k_x, (2, 1, 28, 28), jnp.float32)
    params = prepare_params(init_params(k_p))

    fwd = jax.jit(deepnet_forward)
    out = jax.block_until_ready(fwd(params, x))

    assert out.shape == (2, 10)
    assert bool(jnp.all(jnp.isfinite(out)))
    # log_softmax self-consistency: rows exponentiate & sum to 1
    assert bool(jnp.allclose(jnp.sum(jnp.exp(out), axis=1), 1.0, atol=1e-3))

    print("KERNEL_OK")
</pallas_src>

<mosaic_0001>
module attributes {stable_mosaic.version = 11 : i64} {
  func.func @_conv_stage_kernel(%arg0: i32, %arg1: memref<1x32x32xf32, #tpu.memory_space<vmem>>, %arg2: memref<2x5x32x280xbf16, #tpu.memory_space<vmem>>, %arg3: memref<1x280xf32, #tpu.memory_space<vmem>>, %arg4: memref<2x5x280x350xbf16, #tpu.memory_space<vmem>>, %arg5: memref<1x350xf32, #tpu.memory_space<vmem>>, %arg6: memref<1x7x350xbf16, #tpu.memory_space<vmem>>, %arg7: memref<18x280xf32, #tpu.memory_space<vmem>>) attributes {dimension_semantics = [#tpu.dimension_semantics<parallel>], iteration_bounds = array<i64: 2>, scalar_prefetch = 0 : i64, scratch_operands = 1 : i64, tpu.core_type = #tpu.core_type<tc>, window_params = [{transform_indices = @transform_0, window_bounds = array<i64: 1, 32, 32>}, {pipeline_mode = #tpu.pipeline_mode<synchronous>, transform_indices = @transform_1, window_bounds = array<i64: 2, 5, 32, 280>}, {pipeline_mode = #tpu.pipeline_mode<synchronous>, transform_indices = @transform_2, window_bounds = array<i64: 1, 280>}, {pipeline_mode = #tpu.pipeline_mode<synchronous>, transform_indices = @transform_3, window_bounds = array<i64: 2, 5, 280, 350>}, {pipeline_mode = #tpu.pipeline_mode<synchronous>, transform_indices = @transform_4, window_bounds = array<i64: 1, 350>}, {transform_indices = @transform_5, window_bounds = array<i64: 1, 7, 350>}]} {
    %cst = arith.constant 0.000000e+00 : f32
    %0 = vector.broadcast %cst : f32 to vector<28x280xf32>
    %cst_0 = arith.constant 0.000000e+00 : f32
    %1 = vector.broadcast %cst_0 : f32 to vector<28x280xf32>
    %c0 = arith.constant 0 : index
    %c0_1 = arith.constant 0 : index
    %c0_2 = arith.constant 0 : index
    %2 = vector.load %arg1[%c0, %c0_1, %c0_2] : memref<1x32x32xf32, #tpu.memory_space<vmem>>, vector<1x28x32xf32>
    %3 = vector.shape_cast %2 : vector<1x28x32xf32> to vector<28x32xf32>
    %4 = arith.truncf %3 : vector<28x32xf32> to vector<28x32xbf16>
    %c0_3 = arith.constant 0 : index
    %c0_4 = arith.constant 0 : index
    %c0_5 = arith.constant 0 : index
    %c0_6 = arith.constant 0 : index
    %5 = vector.load %arg2[%c0_3, %c0_4, %c0_5, %c0_6] : memref<2x5x32x280xbf16, #tpu.memory_space<vmem>>, vector<1x1x32x280xbf16>
    %6 = vector.shape_cast %5 : vector<1x1x32x280xbf16> to vector<32x280xbf16>
    %cst_7 = arith.constant dense<0.000000e+00> : vector<28x280xf32>
    %7 = tpu.matmul %4, %6, %cst_7 {dimension_numbers = #tpu.dot_dimension_numbers<[1], [0], [0], [1], [0, 0, 1, 1], [], []>} : vector<28x32xbf16>, vector<32x280xbf16>, vector<28x280xf32> -> vector<28x280xf32>
    %8 = arith.addf %0, %7 : vector<28x280xf32>
    %c1 = arith.constant 1 : index
    %c0_8 = arith.constant 0 : index
    %c0_9 = arith.constant 0 : index
    %c0_10 = arith.constant 0 : index
    %9 = vector.load %arg2[%c1, %c0_8, %c0_9, %c0_10] : memref<2x5x32x280xbf16, #tpu.memory_space<vmem>>, vector<1x1x32x280xbf16>
    %10 = vector.shape_cast %9 : vector<1x1x32x280xbf16> to vector<32x280xbf16>
    %cst_11 = arith.constant dense<0.000000e+00> : vector<28x280xf32>
    %11 = tpu.matmul %4, %10, %cst_11 {dimension_numbers = #tpu.dot_dimension_numbers<[1], [0], [0], [1], [0, 0, 1, 1], [], []>} : vector<28x32xbf16>, vector<32x280xbf16>, vector<28x280xf32> -> vector<28x280xf32>
    %12 = arith.addf %1, %11 : vector<28x280xf32>
    %c0_12 = arith.constant 0 : index
    %c1_13 = arith.constant 1 : index
    %c0_14 = arith.constant 0 : index
    %13 = vector.load %arg1[%c0_12, %c1_13, %c0_14] : memref<1x32x32xf32, #tpu.memory_space<vmem>>, vector<1x28x32xf32>
    %14 = vector.shape_cast %13 : vector<1x28x32xf32> to vector<28x32xf32>
    %15 = arith.truncf %14 : vector<28x32xf32> to vector<28x32xbf16>
    %c0_15 = arith.constant 0 : index
    %c1_16 = arith.constant 1 : index
    %c0_17 = arith.constant 0 : index
    %c0_18 = arith.constant 0 : index
    %16 = vector.load %arg2[%c0_15, %c1_16, %c0_17, %c0_18] : memref<2x5x32x280xbf16, #tpu.memory_space<vmem>>, vector<1x1x32x280xbf16>
    %17 = vector.shape_cast %16 : vector<1x1x32x280xbf16> to vector<32x280xbf16>
    %cst_19 = arith.constant dense<0.000000e+00> : vector<28x280xf32>
    %18 = tpu.matmul %15, %17, %cst_19 {dimension_numbers = #tpu.dot_dimension_numbers<[1], [0], [0], [1], [0, 0, 1, 1], [], []>} : vector<28x32xbf16>, vector<32x280xbf16>, vector<28x280xf32> -> vector<28x280xf32>
    %19 = arith.addf %8, %18 : vector<28x280xf32>
    %c1_20 = arith.constant 1 : index
    %c1_21 = arith.constant 1 : index
    %c0_22 = arith.constant 0 : index
    %c0_23 = arith.constant 0 : index
    %20 = vector.load %arg2[%c1_20, %c1_21, %c0_22, %c0_23] : memref<2x5x32x280xbf16, #tpu.memory_space<vmem>>, vector<1x1x32x280xbf16>
    %21 = vector.shape_cast %20 : vector<1x1x32x280xbf16> to vector<32x280xbf16>
    %cst_24 = arith.constant dense<0.000000e+00> : vector<28x280xf32>
    %22 = tpu.matmul %15, %21, %cst_24 {dimension_numbers = #tpu.dot_dimension_numbers<[1], [0], [0], [1], [0, 0, 1, 1], [], []>} : vector<28x32xbf16>, vector<32x280xbf16>, vector<28x280xf32> -> vector<28x280xf32>
    %23 = arith.addf %12, %22 : vector<28x280xf32>
    %c0_25 = arith.constant 0 : index
    %c2 = arith.constant 2 : index
    %c0_26 = arith.constant 0 : index
    %24 = vector.load %arg1[%c0_25, %c2, %c0_26] : memref<1x32x32xf32, #tpu.memory_space<vmem>>, vector<1x28x32xf32>
    %25 = vector.shape_cast %24 : vector<1x28x32xf32> to vector<28x32xf32>
    %26 = arith.truncf %25 : vector<28x32xf32> to vector<28x32xbf16>
    %c0_27 = arith.constant 0 : index
    %c2_28 = arith.constant 2 : index
    %c0_29 = arith.constant 0 : index
    %c0_30 = arith.constant 0 : index
    %27 = vector.load %arg2[%c0_27, %c2_28, %c0_29, %c0_30] : memref<2x5x32x280xbf16, #tpu.memory_space<vmem>>, vector<1x1x32x280xbf16>
    %28 = vector.shape_cast %27 : vector<1x1x32x280xbf16> to vector<32x280xbf16>
    %cst_31 = arith.constant dense<0.000000e+00> : vector<28x280xf32>
    %29 = tpu.matmul %26, %28, %cst_31 {dimension_numbers = #tpu.dot_dimension_numbers<[1], [0], [0], [1], [0, 0, 1, 1], [], []>} : vector<28x32xbf16>, vector<32x280xbf16>, vector<28x280xf32> -> vector<28x280xf32>
    %30 = arith.addf %19, %29 : vector<28x280xf32>
    %c1_32 = arith.constant 1 : index
    %c2_33 = arith.constant 2 : index
    %c0_34 = arith.constant 0 : index
    %c0_35 = arith.constant 0 : index
    %31 = vector.load %arg2[%c1_32, %c2_33, %c0_34, %c0_35] : memref<2x5x32x280xbf16, #tpu.memory_space<vmem>>, vector<1x1x32x280xbf16>
    %32 = vector.shape_cast %31 : vector<1x1x32x280xbf16> to vector<32x280xbf16>
    %cst_36 = arith.constant dense<0.000000e+00> : vector<28x280xf32>
    %33 = tpu.matmul %26, %32, %cst_36 {dimension_numbers = #tpu.dot_dimension_numbers<[1], [0], [0], [1], [0, 0, 1, 1], [], []>} : vector<28x32xbf16>, vector<32x280xbf16>, vector<28x280xf32> -> vector<28x280xf32>
    %34 = arith.addf %23, %33 : vector<28x280xf32>
    %c0_37 = arith.constant 0 : index
    %c3 = arith.constant 3 : index
    %c0_38 = arith.constant 0 : index
    %35 = vector.load %arg1[%c0_37, %c3, %c0_38] : memref<1x32x32xf32, #tpu.memory_space<vmem>>, vector<1x28x32xf32>
    %36 = vector.shape_cast %35 : vector<1x28x32xf32> to vector<28x32xf32>
    %37 = arith.truncf %36 : vector<28x32xf32> to vector<28x32xbf16>
    %c0_39 = arith.constant 0 : index
    %c3_40 = arith.constant 3 : index
    %c0_41 = arith.constant 0 : index
    %c0_42 = arith.constant 0 : index
    %38 = vector.load %arg2[%c0_39, %c3_40, %c0_41, %c0_42] : memref<2x5x32x280xbf16, #tpu.memory_space<vmem>>, vector<1x1x32x280xbf16>
    %39 = vector.shape_cast %38 : vector<1x1x32x280xbf16> to vector<32x280xbf16>
    %cst_43 = arith.constant dense<0.000000e+00> : vector<28x280xf32>
    %40 = tpu.matmul %37, %39, %cst_43 {dimension_numbers = #tpu.dot_dimension_numbers<[1], [0], [0], [1], [0, 0, 1, 1], [], []>} : vector<28x32xbf16>, vector<32x280xbf16>, vector<28x280xf32> -> vector<28x280xf32>
    %41 = arith.addf %30, %40 : vector<28x280xf32>
    %c1_44 = arith.constant 1 : index
    %c3_45 = arith.constant 3 : index
    %c0_46 = arith.constant 0 : index
    %c0_47 = arith.constant 0 : index
    %42 = vector.load %arg2[%c1_44, %c3_45, %c0_46, %c0_47] : memref<2x5x32x280xbf16, #tpu.memory_space<vmem>>, vector<1x1x32x280xbf16>
    %43 = vector.shape_cast %42 : vector<1x1x32x280xbf16> to vector<32x280xbf16>
    %cst_48 = arith.constant dense<0.000000e+00> : vector<28x280xf32>
    %44 = tpu.matmul %37, %43, %cst_48 {dimension_numbers = #tpu.dot_dimension_numbers<[1], [0], [0], [1], [0, 0, 1, 1], [], []>} : vector<28x32xbf16>, vector<32x280xbf16>, vector<28x280xf32> -> vector<28x280xf32>
    %45 = arith.addf %34, %44 : vector<28x280xf32>
    %c0_49 = arith.constant 0 : index
    %c4 = arith.constant 4 : index
    %c0_50 = arith.constant 0 : index
    %46 = vector.load %arg1[%c0_49, %c4, %c0_50] : memref<1x32x32xf32, #tpu.memory_space<vmem>>, vector<1x28x32xf32>
    %47 = vector.shape_cast %46 : vector<1x28x32xf32> to vector<28x32xf32>
    %48 = arith.truncf %47 : vector<28x32xf32> to vector<28x32xbf16>
    %c0_51 = arith.constant 0 : index
    %c4_52 = arith.constant 4 : index
    %c0_53 = arith.constant 0 : index
    %c0_54 = arith.constant 0 : index
    %49 = vector.load %arg2[%c0_51, %c4_52, %c0_53, %c0_54] : memref<2x5x32x280xbf16, #tpu.memory_space<vmem>>, vector<1x1x32x280xbf16>
    %50 = vector.shape_cast %49 : vector<1x1x32x280xbf16> to vector<32x280xbf16>
    %cst_55 = arith.constant dense<0.000000e+00> : vector<28x280xf32>
    %51 = tpu.matmul %48, %50, %cst_55 {dimension_numbers = #tpu.dot_dimension_numbers<[1], [0], [0], [1], [0, 0, 1, 1], [], []>} : vector<28x32xbf16>, vector<32x280xbf16>, vector<28x280xf32> -> vector<28x280xf32>
    %52 = arith.addf %41, %51 : vector<28x280xf32>
    %c1_56 = arith.constant 1 : index
    %c4_57 = arith.constant 4 : index
    %c0_58 = arith.constant 0 : index
    %c0_59 = arith.constant 0 : index
    %53 = vector.load %arg2[%c1_56, %c4_57, %c0_58, %c0_59] : memref<2x5x32x280xbf16, #tpu.memory_space<vmem>>, vector<1x1x32x280xbf16>
    %54 = vector.shape_cast %53 : vector<1x1x32x280xbf16> to vector<32x280xbf16>
    %cst_60 = arith.constant dense<0.000000e+00> : vector<28x280xf32>
    %55 = tpu.matmul %48, %54, %cst_60 {dimension_numbers = #tpu.dot_dimension_numbers<[1], [0], [0], [1], [0, 0, 1, 1], [], []>} : vector<28x32xbf16>, vector<32x280xbf16>, vector<28x280xf32> -> vector<28x280xf32>
    %56 = arith.addf %45, %55 : vector<28x280xf32>
    %57 = arith.maximumf %52, %56 : vector<28x280xf32>
    %58 = tpu.iota {dimensions = array<i32: 0>} : vector<14x28xi32>
    %59 = tpu.iota {dimensions = array<i32: 1>} : vector<14x28xi32>
    %c2_i32 = arith.constant 2 : i32
    %60 = vector.broadcast %c2_i32 : i32 to vector<14x28xi32>
    %61 = arith.muli %60, %58 : vector<14x28xi32>
    %62 = arith.cmpi eq, %59, %61 : vector<14x28xi32>
    %63 = arith.extui %62 : vector<14x28xi1> to vector<14x28xi32>
    %64 = arith.sitofp %63 : vector<14x28xi32> to vector<14x28xf32>
    %c2_i32_61 = arith.constant 2 : i32
    %65 = vector.broadcast %c2_i32_61 : i32 to vector<14x28xi32>
    %66 = arith.muli %65, %58 : vector<14x28xi32>
    %c1_i32 = arith.constant 1 : i32
    %67 = vector.broadcast %c1_i32 : i32 to vector<14x28xi32>
    %68 = arith.addi %66, %67 : vector<14x28xi32>
    %69 = arith.cmpi eq, %59, %68 : vector<14x28xi32>
    %70 = arith.extui %69 : vector<14x28xi1> to vector<14x28xi32>
    %71 = arith.sitofp %70 : vector<14x28xi32> to vector<14x28xf32>
    %cst_62 = arith.constant dense<0.000000e+00> : vector<14x280xf32>
    %72 = tpu.matmul %64, %57, %cst_62 {dimension_numbers = #tpu.dot_dimension_numbers<[1], [0], [0], [1], [0, 0, 1, 1], [], []>} : vector<14x28xf32>, vector<28x280xf32>, vector<14x280xf32> -> vector<14x280xf32>
    %cst_63 = arith.constant dense<0.000000e+00> : vector<14x280xf32>
    %73 = tpu.matmul %71, %57, %cst_63 {dimension_numbers = #tpu.dot_dimension_numbers<[1], [0], [0], [1], [0, 0, 1, 1], [], []>} : vector<14x28xf32>, vector<28x280xf32>, vector<14x280xf32> -> vector<14x280xf32>
    %74 = arith.maximumf %72, %73 : vector<14x280xf32>
    %c0_64 = arith.constant 0 : index
    %c0_65 = arith.constant 0 : index
    %75 = vector.load %arg3[%c0_64, %c0_65] : memref<1x280xf32, #tpu.memory_space<vmem>>, vector<1x280xf32>
    %76 = vector.broadcast %75 : vector<1x280xf32> to vector<14x280xf32>
    %77 = arith.addf %74, %76 : vector<14x280xf32>
    %cst_66 = arith.constant 0.000000e+00 : f32
    %78 = vector.broadcast %cst_66 : f32 to vector<14x280xf32>
    %79 = arith.maximumf %77, %78 : vector<14x280xf32>
    %cst_67 = arith.constant 0.000000e+00 : f32
    %80 = vector.broadcast %cst_67 : f32 to vector<18x280xf32>
    %c0_68 = arith.constant 0 : index
    %c0_69 = arith.constant 0 : index
    %81 = vector.load %arg7[%c0_68, %c0_69] : memref<18x280xf32, #tpu.memory_space<vmem>>, vector<18x280xf32>
    tpu.vector_store %arg7[%c0_68, %c0_69], %80 {strides = array<i32>} : memref<18x280xf32, #tpu.memory_space<vmem>>, vector<18x280xf32>,
    %c2_70 = arith.constant 2 : index
    %c0_71 = arith.constant 0 : index
    %82 = vector.load %arg7[%c2_70, %c0_71] : memref<18x280xf32, #tpu.memory_space<vmem>>, vector<14x280xf32>
    tpu.vector_store %arg7[%c2_70, %c0_71], %79 {strides = array<i32>} : memref<18x280xf32, #tpu.memory_space<vmem>>, vector<14x280xf32>,
    %cst_72 = arith.constant 0.000000e+00 : f32
    %83 = vector.broadcast %cst_72 : f32 to vector<14x350xf32>
    %cst_73 = arith.constant 0.000000e+00 : f32
    %84 = vector.broadcast %cst_73 : f32 to vector<14x350xf32>
    %c0_74 = arith.constant 0 : index
    %c0_75 = arith.constant 0 : index
    %85 = vector.load %arg7[%c0_74, %c0_75] : memref<18x280xf32, #tpu.memory_space<vmem>>, vector<14x280xf32>
    %86 = arith.truncf %85 : vector<14x280xf32> to vector<14x280xbf16>
    %c0_76 = arith.constant 0 : index
    %c0_77 = arith.constant 0 : index
    %c0_78 = arith.constant 0 : index
    %c0_79 = arith.constant 0 : index
    %87 = vector.load %arg4[%c0_76, %c0_77, %c0_78, %c0_79] : memref<2x5x280x350xbf16, #tpu.memory_space<vmem>>, vector<1x1x280x350xbf16>
    %88 = vector.shape_cast %87 : vector<1x1x280x350xbf16> to vector<280x350xbf16>
    %cst_80 = arith.constant dense<0.000000e+00> : vector<14x350xf32>
    %89 = tpu.matmul %86, %88, %cst_80 {dimension_numbers = #tpu.dot_dimension_numbers<[1], [0], [0], [1], [0, 0, 1, 1], [], []>} : vector<14x280xbf16>, vector<280x350xbf16>, vector<14x350xf32> -> vector<14x350xf32>
    %90 = arith.addf %83, %89 : vector<14x350xf32>
    %c1_81 = arith.constant 1 : index
    %c0_82 = arith.constant 0 : index
    %c0_83 = arith.constant 0 : index
    %c0_84 = arith.constant 0 : index
    %91 = vector.load %arg4[%c1_81, %c0_82, %c0_83, %c0_84] : memref<2x5x280x350xbf16, #tpu.memory_space<vmem>>, vector<1x1x280x350xbf16>
    %92 = vector.shape_cast %91 : vector<1x1x280x350xbf16> to vector<280x350xbf16>
    %cst_85 = arith.constant dense<0.000000e+00> : vector<14x350xf32>
    %93 = tpu.matmul %86, %92, %cst_85 {dimension_numbers = #tpu.dot_dimension_numbers<[1], [0], [0], [1], [0, 0, 1, 1], [], []>} : vector<14x280xbf16>, vector<280x350xbf16>, vector<14x350xf32> -> vector<14x350xf32>
    %94 = arith.addf %84, %93 : vector<14x350xf32>
    %c1_86 = arith.constant 1 : index
    %c0_87 = arith.constant 0 : index
    %95 = vector.load %arg7[%c1_86, %c0_87] : memref<18x280xf32, #tpu.memory_space<vmem>>, vector<14x280xf32>
    %96 = arith.truncf %95 : vector<14x280xf32> to vector<14x280xbf16>
    %c0_88 = arith.constant 0 : index
    %c1_89 = arith.constant 1 : index
    %c0_90 = arith.constant 0 : index
    %c0_91 = arith.constant 0 : index
    %97 = vector.load %arg4[%c0_88, %c1_89, %c0_90, %c0_91] : memref<2x5x280x350xbf16, #tpu.memory_space<vmem>>, vector<1x1x280x350xbf16>
    %98 = vector.shape_cast %97 : vector<1x1x280x350xbf16> to vector<280x350xbf16>
    %cst_92 = arith.constant dense<0.000000e+00> : vector<14x350xf32>
    %99 = tpu.matmul %96, %98, %cst_92 {dimension_numbers = #tpu.dot_dimension_numbers<[1], [0], [0], [1], [0, 0, 1, 1], [], []>} : vector<14x280xbf16>, vector<280x350xbf16>, vector<14x350xf32> -> vector<14x350xf32>
    %100 = arith.addf %90, %99 : vector<14x350xf32>
    %c1_93 = arith.constant 1 : index
    %c1_94 = arith.constant 1 : index
    %c0_95 = arith.constant 0 : index
    %c0_96 = arith.constant 0 : index
    %101 = vector.load %arg4[%c1_93, %c1_94, %c0_95, %c0_96] : memref<2x5x280x350xbf16, #tpu.memory_space<vmem>>, vector<1x1x280x350xbf16>
    %102 = vector.shape_cast %101 : vector<1x1x280x350xbf16> to vector<280x350xbf16>
    %cst_97 = arith.constant dense<0.000000e+00> : vector<14x350xf32>
    %103 = tpu.matmul %96, %102, %cst_97 {dimension_numbers = #tpu.dot_dimension_numbers<[1], [0], [0], [1], [0, 0, 1, 1], [], []>} : vector<14x280xbf16>, vector<280x350xbf16>, vector<14x350xf32> -> vector<14x350xf32>
    %104 = arith.addf %94, %103 : vector<14x350xf32>
    %c2_98 = arith.constant 2 : index
    %c0_99 = arith.constant 0 : index
    %105 = vector.load %arg7[%c2_98, %c0_99] : memref<18x280xf32, #tpu.memory_space<vmem>>, vector<14x280xf32>
    %106 = arith.truncf %105 : vector<14x280xf32> to vector<14x280xbf16>
    %c0_100 = arith.constant 0 : index
    %c2_101 = arith.constant 2 : index
    %c0_102 = arith.constant 0 : index
    %c0_103 = arith.constant 0 : index
    %107 = vector.load %arg4[%c0_100, %c2_101, %c0_102, %c0_103] : memref<2x5x280x350xbf16, #tpu.memory_space<vmem>>, vector<1x1x280x350xbf16>
    %108 = vector.shape_cast %107 : vector<1x1x280x350xbf16> to vector<280x350xbf16>
    %cst_104 = arith.constant dense<0.000000e+00> : vector<14x350xf32>
    %109 = tpu.matmul %106, %108, %cst_104 {dimension_numbers = #tpu.dot_dimension_numbers<[1], [0], [0], [1], [0, 0, 1, 1], [], []>} : vector<14x280xbf16>, vector<280x350xbf16>, vector<14x350xf32> -> vector<14x350xf32>
    %110 = arith.addf %100, %109 : vector<14x350xf32>
    %c1_105 = arith.constant 1 : index
    %c2_106 = arith.constant 2 : index
    %c0_107 = arith.constant 0 : index
    %c0_108 = arith.constant 0 : index
    %111 = vector.load %arg4[%c1_105, %c2_106, %c0_107, %c0_108] : memref<2x5x280x350xbf16, #tpu.memory_space<vmem>>, vector<1x1x280x350xbf16>
    %112 = vector.shape_cast %111 : vector<1x1x280x350xbf16> to vector<280x350xbf16>
    %cst_109 = arith.constant dense<0.000000e+00> : vector<14x350xf32>
    %113 = tpu.matmul %106, %112, %cst_109 {dimension_numbers = #tpu.dot_dimension_numbers<[1], [0], [0], [1], [0, 0, 1, 1], [], []>} : vector<14x280xbf16>, vector<280x350xbf16>, vector<14x350xf32> -> vector<14x350xf32>
    %114 = arith.addf %104, %113 : vector<14x350xf32>
    %c3_110 = arith.constant 3 : index
    %c0_111 = arith.constant 0 : index
    %115 = vector.load %arg7[%c3_110, %c0_111] : memref<18x280xf32, #tpu.memory_space<vmem>>, vector<14x280xf32>
    %116 = arith.truncf %115 : vector<14x280xf32> to vector<14x280xbf16>
    %c0_112 = arith.constant 0 : index
    %c3_113 = arith.constant 3 : index
    %c0_114 = arith.constant 0 : index
    %c0_115 = arith.constant 0 : index
    %117 = vector.load %arg4[%c0_112, %c3_113, %c0_114, %c0_115] : memref<2x5x280x350xbf16, #tpu.memory_space<vmem>>, vector<1x1x280x350xbf16>
    %118 = vector.shape_cast %117 : vector<1x1x280x350xbf16> to vector<280x350xbf16>
    %cst_116 = arith.constant dense<0.000000e+00> : vector<14x350xf32>
    %119 = tpu.matmul %116, %118, %cst_116 {dimension_numbers = #tpu.dot_dimension_numbers<[1], [0], [0], [1], [0, 0, 1, 1], [], []>} : vector<14x280xbf16>, vector<280x350xbf16>, vector<14x350xf32> -> vector<14x350xf32>
    %120 = arith.addf %110, %119 : vector<14x350xf32>
    %c1_117 = arith.constant 1 : index
    %c3_118 = arith.constant 3 : index
    %c0_119 = arith.constant 0 : index
    %c0_120 = arith.constant 0 : index
    %121 = vector.load %arg4[%c1_117, %c3_118, %c0_119, %c0_120] : memref<2x5x280x350xbf16, #tpu.memory_space<vmem>>, vector<1x1x280x350xbf16>
    %122 = vector.shape_cast %121 : vector<1x1x280x350xbf16> to vector<280x350xbf16>
    %cst_121 = arith.constant dense<0.000000e+00> : vector<14x350xf32>
    %123 = tpu.matmul %116, %122, %cst_121 {dimension_numbers = #tpu.dot_dimension_numbers<[1], [0], [0], [1], [0, 0, 1, 1], [], []>} : vector<14x280xbf16>, vector<280x350xbf16>, vector<14x350xf32> -> vector<14x350xf32>
    %124 = arith.addf %114, %123 : vector<14x350xf32>
    %c4_122 = arith.constant 4 : index
    %c0_123 = arith.constant 0 : index
    %125 = vector.load %arg7[%c4_122, %c0_123] : memref<18x280xf32, #tpu.memory_space<vmem>>, vector<14x280xf32>
    %126 = arith.truncf %125 : vector<14x280xf32> to vector<14x280xbf16>
    %c0_124 = arith.constant 0 : index
    %c4_125 = arith.constant 4 : index
    %c0_126 = arith.constant 0 : index
    %c0_127 = arith.constant 0 : index
    %127 = vector.load %arg4[%c0_124, %c4_125, %c0_126, %c0_127] : memref<2x5x280x350xbf16, #tpu.memory_space<vmem>>, vector<1x1x280x350xbf16>
    %128 = vector.shape_cast %127 : vector<1x1x280x350xbf16> to vector<280x350xbf16>
    %cst_128 = arith.constant dense<0.000000e+00> : vector<14x350xf32>
    %129 = tpu.matmul %126, %128, %cst_128 {dimension_numbers = #tpu.dot_dimension_numbers<[1], [0], [0], [1], [0, 0, 1, 1], [], []>} : vector<14x280xbf16>, vector<280x350xbf16>, vector<14x350xf32> -> vector<14x350xf32>
    %130 = arith.addf %120, %129 : vector<14x350xf32>
    %c1_129 = arith.constant 1 : index
    %c4_130 = arith.constant 4 : index
    %c0_131 = arith.constant 0 : index
    %c0_132 = arith.constant 0 : index
    %131 = vector.load %arg4[%c1_129, %c4_130, %c0_131, %c0_132] : memref<2x5x280x350xbf16, #tpu.memory_space<vmem>>, vector<1x1x280x350xbf16>
    %132 = vector.shape_cast %131 : vector<1x1x280x350xbf16> to vector<280x350xbf16>
    %cst_133 = arith.constant dense<0.000000e+00> : vector<14x350xf32>
    %133 = tpu.matmul %126, %132, %cst_133 {dimension_numbers = #tpu.dot_dimension_numbers<[1], [0], [0], [1], [0, 0, 1, 1], [], []>} : vector<14x280xbf16>, vector<280x350xbf16>, vector<14x350xf32> -> vector<14x350xf32>
    %134 = arith.addf %124, %133 : vector<14x350xf32>
    %135 = arith.maximumf %130, %134 : vector<14x350xf32>
    %136 = tpu.iota {dimensions = array<i32: 0>} : vector<7x14xi32>
    %137 = tpu.iota {dimensions = array<i32: 1>} : vector<7x14xi32>
    %c2_i32_134 = arith.constant 2 : i32
    %138 = vector.broadcast %c2_i32_134 : i32 to vector<7x14xi32>
    %139 = arith.muli %138, %136 : vector<7x14xi32>
    %140 = arith.cmpi eq, %137, %139 : vector<7x14xi32>
    %141 = arith.extui %140 : vector<7x14xi1> to vector<7x14xi32>
    %142 = arith.sitofp %141 : vector<7x14xi32> to vector<7x14xf32>
    %c2_i32_135 = arith.constant 2 : i32
    %143 = vector.broadcast %c2_i32_135 : i32 to vector<7x14xi32>
    %144 = arith.muli %143, %136 : vector<7x14xi32>
    %c1_i32_136 = arith.constant 1 : i32
    %145 = vector.broadcast %c1_i32_136 : i32 to vector<7x14xi32>
    %146 = arith.addi %144, %145 : vector<7x14xi32>
    %147 = arith.cmpi eq, %137, %146 : vector<7x14xi32>
    %148 = arith.extui %147 : vector<7x14xi1> to vector<7x14xi32>
    %149 = arith.sitofp %148 : vector<7x14xi32> to vector<7x14xf32>
    %cst_137 = arith.constant dense<0.000000e+00> : vector<7x350xf32>
    %150 = tpu.matmul %142, %135, %cst_137 {dimension_numbers = #tpu.dot_dimension_numbers<[1], [0], [0], [1], [0, 0, 1, 1], [], []>} : vector<7x14xf32>, vector<14x350xf32>, vector<7x350xf32> -> vector<7x350xf32>
    %cst_138 = arith.constant dense<0.000000e+00> : vector<7x350xf32>
    %151 = tpu.matmul %149, %135, %cst_138 {dimension_numbers = #tpu.dot_dimension_numbers<[1], [0], [0], [1], [0, 0, 1, 1], [], []>} : vector<7x14xf32>, vector<14x350xf32>, vector<7x350xf32> -> vector<7x350xf32>
    %152 = arith.maximumf %150, %151 : vector<7x350xf32>
    %c0_139 = arith.constant 0 : index
    %c0_140 = arith.constant 0 : index
    %153 = vector.load %arg5[%c0_139, %c0_140] : memref<1x350xf32, #tpu.memory_space<vmem>>, vector<1x350xf32>
    %154 = vector.broadcast %153 : vector<1x350xf32> to vector<7x350xf32>
    %155 = arith.addf %152, %154 : vector<7x350xf32>
    %cst_141 = arith.constant 0.000000e+00 : f32
    %156 = vector.broadcast %cst_141 : f32 to vector<7x350xf32>
    %157 = arith.maximumf %155, %156 : vector<7x350xf32>
    %158 = arith.truncf %157 : vector<7x350xf32> to vector<7x350xbf16>
    %c0_142 = arith.constant 0 : index
    %c0_143 = arith.constant 0 : index
    %c0_144 = arith.constant 0 : index
    %159 = vector.load %arg6[%c0_142, %c0_143, %c0_144] : memref<1x7x350xbf16, #tpu.memory_space<vmem>>, vector<1x7x350xbf16>
    %160 = vector.shape_cast %159 : vector<1x7x350xbf16> to vector<7x350xbf16>
    %161 = vector.shape_cast %158 : vector<7x350xbf16> to vector<1x7x350xbf16>
    tpu.vector_store %arg6[%c0_142, %c0_143, %c0_144], %161 {strides = array<i32>} : memref<1x7x350xbf16, #tpu.memory_space<vmem>>, vector<1x7x350xbf16>,
    return
  }
  func.func @transform_0(%arg0: i32) -> (i32, i32, i32) {
    %c0_i32 = arith.constant 0 : i32
    %c0_i32_0 = arith.constant 0 : i32
    %c0_i32_1 = arith.constant 0 : i32
    return %arg0, %c0_i32, %c0_i32_0 : i32, i32, i32
  }
  func.func @transform_1(%arg0: i32) -> (i32, i32, i32, i32) {
    %c0_i32 = arith.constant 0 : i32
    %c0_i32_0 = arith.constant 0 : i32
    %c0_i32_1 = arith.constant 0 : i32
    %c0_i32_2 = arith.constant 0 : i32
    %c0_i32_3 = arith.constant 0 : i32
    return %c0_i32, %c0_i32_0, %c0_i32_1, %c0_i32_2 : i32, i32, i32, i32
  }
  func.func @transform_2(%arg0: i32) -> (i32, i32) {
    %c0_i32 = arith.constant 0 : i32
    %c0_i32_0 = arith.constant 0 : i32
    %c0_i32_1 = arith.constant 0 : i32
    return %c0_i32, %c0_i32_0 : i32, i32
  }
  func.func @transform_3(%arg0: i32) -> (i32, i32, i32, i32) {
    %c0_i32 = arith.constant 0 : i32
    %c0_i32_0 = arith.constant 0 : i32
    %c0_i32_1 = arith.constant 0 : i32
    %c0_i32_2 = arith.constant 0 : i32
    %c0_i32_3 = arith.constant 0 : i32
    return %c0_i32, %c0_i32_0, %c0_i32_1, %c0_i32_2 : i32, i32, i32, i32
  }
  func.func @transform_4(%arg0: i32) -> (i32, i32) {
    %c0_i32 = arith.constant 0 : i32
    %c0_i32_0 = arith.constant 0 : i32
    %c0_i32_1 = arith.constant 0 : i32
    return %c0_i32, %c0_i32_0 : i32, i32
  }
  func.func @transform_5(%arg0: i32) -> (i32, i32, i32) {
    %c0_i32 = arith.constant 0 : i32
    %c0_i32_0 = arith.constant 0 : i32
    %c0_i32_1 = arith.constant 0 : i32
    return %arg0, %c0_i32, %c0_i32_0 : i32, i32, i32
  }
}

module attributes {stable_mosaic.version = 11 : i64} {
  func.func @_fc_kernel(%arg0: memref<2x2450xbf16, #tpu.memory_space<vmem>>, %arg1: memref<2450x500xbf16, #tpu.memory_space<vmem>>, %arg2: memref<1x500xf32, #tpu.memory_space<vmem>>, %arg3: memref<500x10xbf16, #tpu.memory_space<vmem>>, %arg4: memref<1x10xf32, #tpu.memory_space<vmem>>, %arg5: memref<2x10xf32, #tpu.memory_space<vmem>>) attributes {dimension_semantics = [], scalar_prefetch = 0 : i64, scratch_operands = 0 : i64, tpu.core_type = #tpu.core_type<tc>} {
    %c0 = arith.constant 0 : index
    %c0_0 = arith.constant 0 : index
    %0 = vector.load %arg0[%c0, %c0_0] : memref<2x2450xbf16, #tpu.memory_space<vmem>>, vector<2x2450xbf16>
    %c0_1 = arith.constant 0 : index
    %c0_2 = arith.constant 0 : index
    %1 = vector.load %arg1[%c0_1, %c0_2] : memref<2450x500xbf16, #tpu.memory_space<vmem>>, vector<2450x500xbf16>
    %cst = arith.constant dense<0.000000e+00> : vector<2x500xf32>
    %2 = tpu.matmul %0, %1, %cst {dimension_numbers = #tpu.dot_dimension_numbers<[1], [0], [0], [1], [0, 0, 1, 1], [], []>} : vector<2x2450xbf16>, vector<2450x500xbf16>, vector<2x500xf32> -> vector<2x500xf32>
    %c0_3 = arith.constant 0 : index
    %c0_4 = arith.constant 0 : index
    %3 = vector.load %arg2[%c0_3, %c0_4] : memref<1x500xf32, #tpu.memory_space<vmem>>, vector<1x500xf32>
    %4 = vector.broadcast %3 : vector<1x500xf32> to vector<2x500xf32>
    %5 = arith.addf %2, %4 : vector<2x500xf32>
    %cst_5 = arith.constant 0.000000e+00 : f32
    %6 = vector.broadcast %cst_5 : f32 to vector<2x500xf32>
    %7 = arith.maximumf %5, %6 : vector<2x500xf32>
    %8 = arith.truncf %7 : vector<2x500xf32> to vector<2x500xbf16>
    %c0_6 = arith.constant 0 : index
    %c0_7 = arith.constant 0 : index
    %9 = vector.load %arg3[%c0_6, %c0_7] : memref<500x10xbf16, #tpu.memory_space<vmem>>, vector<500x10xbf16>
    %cst_8 = arith.constant dense<0.000000e+00> : vector<2x10xf32>
    %10 = tpu.matmul %8, %9, %cst_8 {dimension_numbers = #tpu.dot_dimension_numbers<[1], [0], [0], [1], [0, 0, 1, 1], [], []>} : vector<2x500xbf16>, vector<500x10xbf16>, vector<2x10xf32> -> vector<2x10xf32>
    %c0_9 = arith.constant 0 : index
    %c0_10 = arith.constant 0 : index
    %11 = vector.load %arg4[%c0_9, %c0_10] : memref<1x10xf32, #tpu.memory_space<vmem>>, vector<1x10xf32>
    %12 = vector.broadcast %11 : vector<1x10xf32> to vector<2x10xf32>
    %13 = arith.addf %10, %12 : vector<2x10xf32>
    %cst_11 = arith.constant dense<0xFF800000> : vector<2xf32>
    %14 = vector.multi_reduction <maximumf>, %13, %cst_11 [1] : vector<2x10xf32> to vector<2xf32>
    %15 = vector.shape_cast %14 : vector<2xf32> to vector<2x1xf32>
    %16 = vector.broadcast %15 : vector<2x1xf32> to vector<2x10xf32>
    %17 = arith.subf %13, %16 : vector<2x10xf32>
    %18 = math.exp %17 : vector<2x10xf32>
    %cst_12 = arith.constant dense<0.000000e+00> : vector<2xf32>
    %19 = vector.multi_reduction <add>, %18, %cst_12 [1] : vector<2x10xf32> to vector<2xf32>
    %20 = vector.shape_cast %19 : vector<2xf32> to vector<2x1xf32>
    %21 = math.log %20 : vector<2x1xf32>
    %22 = vector.broadcast %21 : vector<2x1xf32> to vector<2x10xf32>
    %23 = arith.subf %17, %22 : vector<2x10xf32>
    %c0_13 = arith.constant 0 : index
    %c0_14 = arith.constant 0 : index
    %24 = vector.load %arg5[%c0_13, %c0_14] : memref<2x10xf32, #tpu.memory_space<vmem>>, vector<2x10xf32>
    tpu.vector_store %arg5[%c0_13, %c0_14], %23 {strides = array<i32>} : memref<2x10xf32, #tpu.memory_space<vmem>>, vector<2x10xf32>,
    return
  }
}

</mosaic_0001>

<bundles_post_ra>
// kernel: deepnet_forward.3
= control target key start
LH: loop header
LB: loop body
LE: loop exit
PB: predicated region body
PF: predicated region fallthrough
CT: control target
= control target key end

     0   :  { %v641_v36 = vlaneseq  ;;  %v6859_v37 = vmov 1966171168   ;;  %s8963_s0 = inlined_call_operand.vmem [shape: bf16[2,2450], index: 0, kind: input, shape index: {}]   ;;  %s8964_s1 = inlined_call_operand.vmem [shape: bf16[2450,500], index: 1, kind: input, shape index: {}]   ;;  %s8965_s2 = inlined_call_operand.vmem [shape: f32[1,500], index: 2, kind: input, shape index: {}]   ;;  %s8966_s3 = inlined_call_operand.vmem [shape: bf16[500,10], index: 3, kind: input, shape index: {}]   ;;  %s8967_s4 = inlined_call_operand.vmem [shape: f32[1,10], index: 4, kind: input, shape index: {}]   ;;  %s8968_s5 = inlined_call_operand.hbm [shape: f32[2,10], index: 5, kind: output, shape index: {}]  }
   0x1   :  { %v5873_v0 = vld [vmem:[%s8964_s1 + $0x4] ss:$16 sps:$4 sm:$0xff]   ;;  %v5875_v1 = vld [vmem:[%s8964_s1 + $0xc] ss:$16 sps:$4 sm:$0xff]   ;;  %v5877_v2 = vld [vmem:[%s8964_s1] ss:$16 sps:$4 sm:$0xff]   ;;  %v666_v38 = vunpack.c.l.s4 %v6859_v37 }
   0x2   :  { %3892 = vmatprep.subr.bf16.mxu0 %v5873_v0  ;;  %v5878_v3 = vld [vmem:[%s8964_s1 + $0x8] ss:$16 sps:$4 sm:$0xff]   ;;  %4302 = vmatprep.subr.bf16.mxu1 %v5875_v1  ;;  %v5879_v4 = vld [vmem:[%s8964_s1 + $0x24] ss:$16 sps:$4 sm:$0xff]   ;;  %v5881_v5 = vld [vmem:[%s8964_s1 + $0x2c] ss:$16 sps:$4 sm:$0xff]  }
   0x3   :  { %3893 = vmatpush1.bf16.msra.mxu0 %v5877_v2  ;;  %4303 = vmatpush1.bf16.msra.mxu1 %v5878_v3  ;;  %v5883_v6 = vld [vmem:[%s8964_s1 + $0x20] ss:$16 sps:$4 sm:$0xff]   ;;  %v5884_v7 = vld [vmem:[%s8964_s1 + $0x28] ss:$16 sps:$4 sm:$0xff]   ;;  %v5885_v8 = vld [vmem:[%s8964_s1 + $0x44] ss:$16 sps:$4 sm:$0xff]   ;;  %v667_v43 = vunpack.c.0.s8 %v666_v38 }
   0x4   :  { %3894 = vmatprep.subr.bf16.mxu0 %v5879_v4  ;;  %4304 = vmatprep.subr.bf16.mxu1 %v5881_v5  ;;  %v5887_v9 = vld [vmem:[%s8964_s1 + $0x4c] ss:$16 sps:$4 sm:$0xff]   ;;  %v5889_v10 = vld [vmem:[%s8964_s1 + $0x40] ss:$16 sps:$4 sm:$0xff]   ;;  %v5890_v11 = vld [vmem:[%s8964_s1 + $0x48] ss:$16 sps:$4 sm:$0xff]  }
   0x5   :  { %v5891_v12 = vld [vmem:[%s8964_s1 + $0x64] ss:$16 sps:$4 sm:$0xff]   ;;  %v5893_v13 = vld [vmem:[%s8964_s1 + $0x6c] ss:$16 sps:$4 sm:$0xff]   ;;  %v5895_v14 = vld [vmem:[%s8964_s1 + $0x60] ss:$16 sps:$4 sm:$0xff]  }
   0x6   :  { %v5896_v15 = vld [vmem:[%s8964_s1 + $0x68] ss:$16 sps:$4 sm:$0xff]   ;;  %v5897_v16 = vld [vmem:[%s8964_s1 + $0x84] ss:$16 sps:$4 sm:$0xff]   ;;  %v5899_v17 = vld [vmem:[%s8964_s1 + $0x8c] ss:$16 sps:$4 sm:$0xff]  }
   0x7   :  { %3895 = vmatpush1.bf16.msra.mxu0 %v5883_v6  ;;  %4305 = vmatpush1.bf16.msra.mxu1 %v5884_v7  ;;  %v5901_v18 = vld [vmem:[%s8964_s1 + $0x80] ss:$16 sps:$4 sm:$0xff]   ;;  %v5902_v19 = vld [vmem:[%s8964_s1 + $0x88] ss:$16 sps:$4 sm:$0xff]   ;;  %v5903_v20 = vld [vmem:[%s8964_s1 + $0xa4] ss:$16 sps:$4 sm:$0xff]  }
   0x8   :  { %3896 = vmatprep.subr.bf16.mxu0 %v5885_v8  ;;  %4306 = vmatprep.subr.bf16.mxu1 %v5887_v9  ;;  %v5905_v21 = vld [vmem:[%s8964_s1 + $0xac] ss:$16 sps:$4 sm:$0xff]   ;;  %v5907_v22 = vld [vmem:[%s8964_s1 + $0xa0] ss:$16 sps:$4 sm:$0xff]   ;;  %v5908_v23 = vld [vmem:[%s8964_s1 + $0xa8] ss:$16 sps:$4 sm:$0xff]  }
   0x9   :  { %v5909_v24 = vld [vmem:[%s8964_s1 + $0xc4] ss:$16 sps:$4 sm:$0xff]   ;;  %v5911_v25 = vld [vmem:[%s8964_s1 + $0xcc] ss:$16 sps:$4 sm:$0xff]   ;;  %v5913_v26 = vld [vmem:[%s8964_s1 + $0xc0] ss:$16 sps:$4 sm:$0xff]  }
   0xa   :  { %v5914_v27 = vld [vmem:[%s8964_s1 + $0xc8] ss:$16 sps:$4 sm:$0xff]   ;;  %v5915_v28 = vld [vmem:[%s8964_s1 + $0xe4] ss:$16 sps:$4 sm:$0xff]   ;;  %v5917_v29 = vld [vmem:[%s8964_s1 + $0xec] ss:$16 sps:$4 sm:$0xff]  }
   0xb   :  { %3897 = vmatpush1.bf16.msra.mxu0 %v5889_v10  ;;  %4307 = vmatpush1.bf16.msra.mxu1 %v5890_v11  ;;  %v5919_v30 = vld [vmem:[%s8964_s1 + $0xe0] ss:$16 sps:$4 sm:$0xff]   ;;  %v5920_v31 = vld [vmem:[%s8964_s1 + $0xe8] ss:$16 sps:$4 sm:$0xff]   ;;  %v5921_v32 = vld [vmem:[%s8964_s1 + $0x104] ss:$16 sps:$4 sm:$0xff]  }
   0xc   :  { %3898 = vmatprep.subr.bf16.mxu0 %v5891_v12  ;;  %4308 = vmatprep.subr.bf16.mxu1 %v5893_v13  ;;  %v5923_v33 = vld [vmem:[%s8964_s1 + $0x10c] ss:$16 sps:$4 sm:$0xff]   ;;  %v5925_v34 = vld [vmem:[%s8964_s1 + $0x100] ss:$16 sps:$4 sm:$0xff]   ;;  %v5926_v35 = vld [vmem:[%s8964_s1 + $0x108] ss:$16 sps:$4 sm:$0xff]  }
   0xd   :  { %v5927_v39 = vld [vmem:[%s8964_s1 + $0x124] ss:$16 sps:$4 sm:$0xff]   ;;  %v5929_v40 = vld [vmem:[%s8964_s1 + $0x12c] ss:$16 sps:$4 sm:$0xff]   ;;  %v5931_v41 = vld [vmem:[%s8964_s1 + $0x120] ss:$16 sps:$4 sm:$0xff]  }
   0xe   :  { %v7008_v42 = vshrl.u32 %v641_v36, 7  ;;  %v5932_v44 = vld [vmem:[%s8964_s1 + $0x128] ss:$16 sps:$4 sm:$0xff]   ;;  %v5933_v45 = vld [vmem:[%s8964_s1 + $0x144] ss:$16 sps:$4 sm:$0xff]  }
   0xf   :  { %3899 = vmatpush1.bf16.msra.mxu0 %v5895_v14  ;;  %4309 = vmatpush1.bf16.msra.mxu1 %v5896_v15  ;;  %v5935_v46 = vld [vmem:[%s8964_s1 + $0x14c] ss:$16 sps:$4 sm:$0xff]   ;;  %v5937_v47 = vld [vmem:[%s8964_s1 + $0x140] ss:$16 sps:$4 sm:$0xff]   ;;  %v5938_v48 = vld [vmem:[%s8964_s1 + $0x148] ss:$16 sps:$4 sm:$0xff]  }
  0x10   :  { %3900 = vmatprep.subr.bf16.mxu0 %v5897_v16  ;;  %4310 = vmatprep.subr.bf16.mxu1 %v5899_v17  ;;  %v7026_v49 = vsub.s32 %v667_v43, %v7008_v42  ;;  %v5939_v50 = vld [vmem:[%s8964_s1 + $0x164] ss:$16 sps:$4 sm:$0xff]   ;;  %v5941_v51 = vld [vmem:[%s8964_s1 + $0x16c] ss:$16 sps:$4 sm:$0xff]   ;;  %v5943_v53 = vld [vmem:[%s8964_s1 + $0x160] ss:$16 sps:$4 sm:$0xff]  }
  0x11   :  { %v7037_v52 = vld [vmem:[%s8963_s0] sm:$0xff]  ;;  %v5944_v55 = vld [vmem:[%s8964_s1 + $0x168] ss:$16 sps:$4 sm:$0xff]   ;;  %v5947_v57 = vld [vmem:[%s8964_s1 + $0x18c] ss:$16 sps:$4 sm:$0xff]  }
  0x12   :  { %v671_v54 = vrot.slane %v7037_v52, %v7026_v49  ;;  %v5945_v56 = vld [vmem:[%s8964_s1 + $0x184] ss:$16 sps:$4 sm:$0xff]   ;;  %v5949_v59 = vld [vmem:[%s8964_s1 + $0x180] ss:$16 sps:$4 sm:$0xff]   ;;  %v5950_v61 = vld [vmem:[%s8964_s1 + $0x188] ss:$16 sps:$4 sm:$0xff]  }
  0x13   :  { %3901 = vmatpush1.bf16.msra.mxu0 %v5901_v18  ;;  %4311 = vmatpush1.bf16.msra.mxu1 %v5902_v19  ;;  %v5951_v62 = vld [vmem:[%s8964_s1 + $0x1a4] ss:$16 sps:$4 sm:$0xff]   ;;  %v5953_v63 = vld [vmem:[%s8964_s1 + $0x1ac] ss:$16 sps:$4 sm:$0xff]   ;;  %v5955_v0 = vld [vmem:[%s8964_s1 + $0x1a0] ss:$16 sps:$4 sm:$0xff]  }
  0x14   :  { %3902 = vmatprep.subr.bf16.mxu0 %v5903_v20  ;;  %4312 = vmatprep.subr.bf16.mxu1 %v5905_v21  ;;  %v679_v58 = vcombine.high %v671_v54, %v671_v54  ;;  %v5956_v1 = vld [vmem:[%s8964_s1 + $0x1a8] ss:$16 sps:$4 sm:$0xff]   ;;  %v5957_v2 = vld [vmem:[%s8964_s1 + $0x1c4] ss:$16 sps:$4 sm:$0xff]   ;;  %v5959_v3 = vld [vmem:[%s8964_s1 + $0x1cc] ss:$16 sps:$4 sm:$0xff]   ;;  %v7106_v13 = vrot.slane %v671_v54, %v7026_v49 }
  0x15   :  { %v5961_v4 = vld [vmem:[%s8964_s1 + $0x1c0] ss:$16 sps:$4 sm:$0xff]   ;;  %v5962_v5 = vld [vmem:[%s8964_s1 + $0x1c8] ss:$16 sps:$4 sm:$0xff]   ;;  %v5963_v6 = vld [vmem:[%s8964_s1 + $0x1e4] ss:$16 sps:$4 sm:$0xff]  }
  0x16   :  { %v701_v60 = vrot.slane %v679_v58, %v7026_v49  ;;  %v5965_v7 = vld [vmem:[%s8964_s1 + $0x1ec] ss:$16 sps:$4 sm:$0xff]   ;;  %v5967_v8 = vld [vmem:[%s8964_s1 + $0x1e0] ss:$16 sps:$4 sm:$0xff]   ;;  %v5968_v9 = vld [vmem:[%s8964_s1 + $0x1e8] ss:$16 sps:$4 sm:$0xff]  }
  0x17   :  { %3903 = vmatpush1.bf16.msra.mxu0 %v5907_v22  ;;  %4313 = vmatpush1.bf16.msra.mxu1 %v5908_v23  ;;  %v5971_v10 = vld [vmem:[%s8964_s1 + $0x204] ss:$16 sps:$4 sm:$0xff]   ;;  %v5974_v11 = vld [vmem:[%s8964_s1 + $0x20c] ss:$16 sps:$4 sm:$0xff]   ;;  %v5969_v12 = vld [vmem:[%s8964_s1 + $0x200] ss:$16 sps:$4 sm:$0xff]  }
  0x18   :  { %3904 = vmatprep.subr.bf16.mxu0 %v5909_v24  ;;  %4314 = vmatprep.subr.bf16.mxu1 %v5911_v25  ;;  %v5972_v14 = vld [vmem:[%s8964_s1 + $0x208] ss:$16 sps:$4 sm:$0xff]   ;;  %v5977_v15 = vld [vmem:[%s8964_s1 + $0x224] ss:$16 sps:$4 sm:$0xff]   ;;  %v5980_v16 = vld [vmem:[%s8964_s1 + $0x22c] ss:$16 sps:$4 sm:$0xff]   ;;  %v711_v17 = vcombine.high %v701_v60, %v701_v60 }
  0x19   :  { %3924 = vmatprep.mubr.bf16.mxu0 %v701_v60  ;;  %4334 = vmatprep.mubr.bf16.mxu1 %v701_v60  ;;  %v5975_v18 = vld [vmem:[%s8964_s1 + $0x220] ss:$16 sps:$4 sm:$0xff]   ;;  %v5978_v19 = vld [vmem:[%s8964_s1 + $0x228] ss:$16 sps:$4 sm:$0xff]   ;;  %v5983_v20 = vld [vmem:[%s8964_s1 + $0x244] ss:$16 sps:$4 sm:$0xff]  }
  0x1a   :  { %v5986_v21 = vld [vmem:[%s8964_s1 + $0x24c] ss:$16 sps:$4 sm:$0xff]   ;;  %v5981_v22 = vld [vmem:[%s8964_s1 + $0x240] ss:$16 sps:$4 sm:$0xff]   ;;  %v5984_v23 = vld [vmem:[%s8964_s1 + $0x248] ss:$16 sps:$4 sm:$0xff]  }
  0x1b   :  { %3905 = vmatpush1.bf16.msra.mxu0 %v5913_v26  ;;  %4315 = vmatpush1.bf16.msra.mxu1 %v5914_v27  ;;  %v5989_v24 = vld [vmem:[%s8964_s1 + $0x264] ss:$16 sps:$4 sm:$0xff]   ;;  %v5992_v25 = vld [vmem:[%s8964_s1 + $0x26c] ss:$16 sps:$4 sm:$0xff]   ;;  %v5987_v26 = vld [vmem:[%s8964_s1 + $0x260] ss:$16 sps:$4 sm:$0xff]  }
  0x1c   :  { %3906 = vmatprep.subr.bf16.mxu0 %v5915_v28  ;;  %4316 = vmatprep.subr.bf16.mxu1 %v5917_v29  ;;  %v5990_v27 = vld [vmem:[%s8964_s1 + $0x268] ss:$16 sps:$4 sm:$0xff]   ;;  %v5995_v28 = vld [vmem:[%s8964_s1 + $0x284] ss:$16 sps:$4 sm:$0xff]   ;;  %v5998_v29 = vld [vmem:[%s8964_s1 + $0x28c] ss:$16 sps:$4 sm:$0xff]  }
  0x1d   :  { %v6007_v36 = vld [vmem:[%s8964_s1 + $0x2c4] ss:$16 sps:$4 sm:$0xff]   ;;  %v6010_v37 = vld [vmem:[%s8964_s1 + $0x2cc] ss:$16 sps:$4 sm:$0xff]   ;;  %v6005_v38 = vld [vmem:[%s8964_s1 + $0x2c0] ss:$16 sps:$4 sm:$0xff]  }
  0x1e   :  { %v6011_v43 = vld [vmem:[%s8964_s1 + $0x2e0] ss:$16 sps:$4 sm:$0xff]   ;;  %v6026_v54 = vld [vmem:[%s8964_s1 + $0x328] ss:$16 sps:$4 sm:$0xff]   ;;  %v6040_v60 = vld [vmem:[%s8964_s1 + $0x36c] ss:$16 sps:$4 sm:$0xff]  }
  0x1f   :  { %3907 = vmatpush1.bf16.msra.mxu0 %v5919_v30  ;;  %4317 = vmatpush1.bf16.msra.mxu1 %v5920_v31  ;;  %v5993_v30 = vld [vmem:[%s8964_s1 + $0x280] ss:$16 sps:$4 sm:$0xff]   ;;  %v5996_v31 = vld [vmem:[%s8964_s1 + $0x288] ss:$16 sps:$4 sm:$0xff]  }
  0x20   :  { %3908 = vmatprep.subr.bf16.mxu0 %v5921_v32  ;;  %4318 = vmatprep.subr.bf16.mxu1 %v5923_v33  ;;  %v6001_v32 = vld [vmem:[%s8964_s1 + $0x2a4] ss:$16 sps:$4 sm:$0xff]   ;;  %v6004_v33 = vld [vmem:[%s8964_s1 + $0x2ac] ss:$16 sps:$4 sm:$0xff]   ;;  %v6032_v58 = vld [vmem:[%s8964_s1 + $0x348] ss:$16 sps:$4 sm:$0xff]  }
  0x23   :  { %3909 = vmatpush1.bf16.msra.mxu0 %v5925_v34  ;;  %4319 = vmatpush1.bf16.msra.mxu1 %v5926_v35  ;;  %v5999_v34 = vld [vmem:[%s8964_s1 + $0x2a0] ss:$16 sps:$4 sm:$0xff]   ;;  %v6002_v35 = vld [vmem:[%s8964_s1 + $0x2a8] ss:$16 sps:$4 sm:$0xff]  }
  0x24   :  { %3910 = vmatprep.subr.bf16.mxu0 %v5927_v39  ;;  %4320 = vmatprep.subr.bf16.mxu1 %v5929_v40  ;;  %v6008_v39 = vld [vmem:[%s8964_s1 + $0x2c8] ss:$16 sps:$4 sm:$0xff]   ;;  %v6013_v40 = vld [vmem:[%s8964_s1 + $0x2e4] ss:$16 sps:$4 sm:$0xff]  }
  0x27   :  { %3911 = vmatpush1.bf16.msra.mxu0 %v5931_v41  ;;  %4321 = vmatpush1.bf16.msra.mxu1 %v5932_v44  ;;  %v6016_v41 = vld [vmem:[%s8964_s1 + $0x2ec] ss:$16 sps:$4 sm:$0xff]   ;;  %v6014_v44 = vld [vmem:[%s8964_s1 + $0x2e8] ss:$16 sps:$4 sm:$0xff]  }
  0x28   :  { %3912 = vmatprep.subr.bf16.mxu0 %v5933_v45  ;;  %4322 = vmatprep.subr.bf16.mxu1 %v5935_v46  ;;  %v6019_v45 = vld [vmem:[%s8964_s1 + $0x304] ss:$16 sps:$4 sm:$0xff]   ;;  %v6022_v46 = vld [vmem:[%s8964_s1 + $0x30c] ss:$16 sps:$4 sm:$0xff]  }
  0x2b   :  { %3913 = vmatpush1.bf16.msra.mxu0 %v5937_v47  ;;  %4323 = vmatpush1.bf16.msra.mxu1 %v5938_v48  ;;  %v6017_v47 = vld [vmem:[%s8964_s1 + $0x300] ss:$16 sps:$4 sm:$0xff]   ;;  %v6020_v48 = vld [vmem:[%s8964_s1 + $0x308] ss:$16 sps:$4 sm:$0xff]  }
  0x2c   :  { %3914 = vmatprep.subr.bf16.mxu0 %v5939_v50  ;;  %4324 = vmatprep.subr.bf16.mxu1 %v5941_v51  ;;  %v6025_v50 = vld [vmem:[%s8964_s1 + $0x324] ss:$16 sps:$4 sm:$0xff]   ;;  %v6028_v51 = vld [vmem:[%s8964_s1 + $0x32c] ss:$16 sps:$4 sm:$0xff]  }
  0x2f   :  { %3915 = vmatpush1.bf16.msra.mxu0 %v5943_v53  ;;  %4325 = vmatpush1.bf16.msra.mxu1 %v5944_v55  ;;  %v6023_v53 = vld [vmem:[%s8964_s1 + $0x320] ss:$16 sps:$4 sm:$0xff]   ;;  %v6031_v55 = vld [vmem:[%s8964_s1 + $0x344] ss:$16 sps:$4 sm:$0xff]  }
  0x30   :  { %3916 = vmatprep.subr.bf16.mxu0 %v5945_v56  ;;  %4326 = vmatprep.subr.bf16.mxu1 %v5947_v57  ;;  %v6034_v56 = vld [vmem:[%s8964_s1 + $0x34c] ss:$16 sps:$4 sm:$0xff]   ;;  %v6029_v57 = vld [vmem:[%s8964_s1 + $0x340] ss:$16 sps:$4 sm:$0xff]  }
  0x33   :  { %3917 = vmatpush1.bf16.msra.mxu0 %v5949_v59  ;;  %4327 = vmatpush1.bf16.msra.mxu1 %v5950_v61  ;;  %v6037_v59 = vld [vmem:[%s8964_s1 + $0x364] ss:$16 sps:$4 sm:$0xff]   ;;  %v6035_v61 = vld [vmem:[%s8964_s1 + $0x360] ss:$16 sps:$4 sm:$0xff]  }
  0x34   :  { %3918 = vmatprep.subr.bf16.mxu0 %v5951_v62  ;;  %4328 = vmatprep.subr.bf16.mxu1 %v5953_v63  ;;  %v6038_v62 = vld [vmem:[%s8964_s1 + $0x368] ss:$16 sps:$4 sm:$0xff]   ;;  %v6043_v63 = vld [vmem:[%s8964_s1 + $0x384] ss:$16 sps:$4 sm:$0xff]  }
  0x37   :  { %3919 = vmatpush1.bf16.msra.mxu0 %v5955_v0  ;;  %4329 = vmatpush1.bf16.msra.mxu1 %v5956_v1  ;;  %v6046_v0 = vld [vmem:[%s8964_s1 + $0x38c] ss:$16 sps:$4 sm:$0xff]   ;;  %v6041_v1 = vld [vmem:[%s8964_s1 + $0x380] ss:$16 sps:$4 sm:$0xff]  }
  0x38   :  { %3920 = vmatprep.subr.bf16.mxu0 %v5957_v2  ;;  %4330 = vmatprep.subr.bf16.mxu1 %v5959_v3  ;;  %v6044_v2 = vld [vmem:[%s8964_s1 + $0x388] ss:$16 sps:$4 sm:$0xff]   ;;  %v6049_v3 = vld [vmem:[%s8964_s1 + $0x3a4] ss:$16 sps:$4 sm:$0xff]  }
  0x3b   :  { %3921 = vmatpush1.bf16.msra.mxu0 %v5961_v4  ;;  %4331 = vmatpush1.bf16.msra.mxu1 %v5962_v5  ;;  %v6052_v4 = vld [vmem:[%s8964_s1 + $0x3ac] ss:$16 sps:$4 sm:$0xff]   ;;  %v6047_v5 = vld [vmem:[%s8964_s1 + $0x3a0] ss:$16 sps:$4 sm:$0xff]  }
  0x3c   :  { %3922 = vmatprep.subr.bf16.mxu0 %v5963_v6  ;;  %4332 = vmatprep.subr.bf16.mxu1 %v5965_v7  ;;  %v6050_v6 = vld [vmem:[%s8964_s1 + $0x3a8] ss:$16 sps:$4 sm:$0xff]   ;;  %v6055_v7 = vld [vmem:[%s8964_s1 + $0x3c4] ss:$16 sps:$4 sm:$0xff]  }
  0x3f   :  { %3923 = vmatpush1.bf16.msra.mxu0 %v5967_v8  ;;  %4333 = vmatpush1.bf16.msra.mxu1 %v5968_v9  ;;  %v6058_v8 = vld [vmem:[%s8964_s1 + $0x3cc] ss:$16 sps:$4 sm:$0xff]   ;;  %v664_v9 = vcombine.high %v7037_v52, %v7037_v52 }
  0x40   :  { %3933 = vmatprep.subr.bf16.mxu0 %v5971_v10  ;;  %4343 = vmatprep.subr.bf16.mxu1 %v5974_v11  ;;  %v6053_v10 = vld [vmem:[%s8964_s1 + $0x3c0] ss:$16 sps:$4 sm:$0xff]   ;;  %v6056_v11 = vld [vmem:[%s8964_s1 + $0x3c8] ss:$16 sps:$4 sm:$0xff]   ;;  %v6064_v52 = vld [vmem:[%s8964_s1 + $0x3ec] ss:$16 sps:$4 sm:$0xff]  }
  0x42   :  { %3925 = vmatmul.mubr.bf16.vlgmr.msra.gmra.mrb[0].mxu0 %v7106_v13  ;;  %4335 = vmatmul.mubr.bf16.vlgmr.msra.gmra.mrb[0].mxu1 %v7106_v13 }
  0x43   :  { %3934 = vmatpush1.bf16.msra.mxu0 %v5969_v12  ;;  %4344 = vmatpush1.bf16.msra.mxu1 %v5972_v14  ;;  %v6061_v12 = vld [vmem:[%s8964_s1 + $0x3e4] ss:$16 sps:$4 sm:$0xff]   ;;  %v7290_v14 = vrot.slane %v664_v9, %v7026_v49  ;;  %v6140_v9 = vld [vmem:[%s8964_s1 + $0x588] ss:$16 sps:$4 sm:$0xff]  }
  0x44   :  { %3935 = vmatprep.subr.bf16.mxu0 %v5977_v15  ;;  %4345 = vmatprep.subr.bf16.mxu1 %v5980_v16  ;;  %v6059_v15 = vld [vmem:[%s8964_s1 + $0x3e0] ss:$16 sps:$4 sm:$0xff]   ;;  %v6062_v16 = vld [vmem:[%s8964_s1 + $0x3e8] ss:$16 sps:$4 sm:$0xff]  }
  0x45   :  { %3965 = vmatprep.mubr.bf16.mxu0 %v711_v17  ;;  %4375 = vmatprep.mubr.bf16.mxu1 %v711_v17  ;;  %v6067_v17 = vld [vmem:[%s8964_s1 + $0x404] ss:$16 sps:$4 sm:$0xff]  }
  0x47   :  { %3936 = vmatpush1.bf16.msra.mxu0 %v5975_v18  ;;  %4346 = vmatpush1.bf16.msra.mxu1 %v5978_v19  ;;  %v6070_v18 = vld [vmem:[%s8964_s1 + $0x40c] ss:$16 sps:$4 sm:$0xff]   ;;  %v680_v19 = vcombine.high %v7290_v14, %v7290_v14 }
  0x48   :  { %3937 = vmatprep.subr.bf16.mxu0 %v5983_v20  ;;  %4347 = vmatprep.subr.bf16.mxu1 %v5986_v21  ;;  %v6065_v20 = vld [vmem:[%s8964_s1 + $0x400] ss:$16 sps:$4 sm:$0xff]   ;;  %v709_v21 = vcombine.high %v7106_v13, %v7106_v13 }
  0x49   :  { %v6071_v13 = vld [vmem:[%s8964_s1 + $0x420] ss:$16 sps:$4 sm:$0xff]  }
  0x4b   :  { %3938 = vmatpush1.bf16.msra.mxu0 %v5981_v22  ;;  %4348 = vmatpush1.bf16.msra.mxu1 %v5984_v23  ;;  %v6068_v22 = vld [vmem:[%s8964_s1 + $0x408] ss:$16 sps:$4 sm:$0xff]   ;;  %v6073_v23 = vld [vmem:[%s8964_s1 + $0x424] ss:$16 sps:$4 sm:$0xff]  }
  0x4c   :  { %3939 = vmatprep.subr.bf16.mxu0 %v5989_v24  ;;  %4349 = vmatprep.subr.bf16.mxu1 %v5992_v25  ;;  %v6076_v24 = vld [vmem:[%s8964_s1 + $0x42c] ss:$16 sps:$4 sm:$0xff]   ;;  %v7321_v25 = vrot.slane %v680_v19, %v7026_v49  ;;  %v6157_v19 = vld [vmem:[%s8964_s1 + $0x5e4] ss:$16 sps:$4 sm:$0xff]  }
  0x4f   :  { %3940 = vmatpush1.bf16.msra.mxu0 %v5987_v26  ;;  %4350 = vmatpush1.bf16.msra.mxu1 %v5990_v27  ;;  %v6074_v26 = vld [vmem:[%s8964_s1 + $0x428] ss:$16 sps:$4 sm:$0xff]   ;;  %v6079_v27 = vld [vmem:[%s8964_s1 + $0x444] ss:$16 sps:$4 sm:$0xff]  }
  0x50   :  { %3941 = vmatprep.subr.bf16.mxu0 %v5995_v28  ;;  %4351 = vmatprep.subr.bf16.mxu1 %v5998_v29  ;;  %v6082_v28 = vld [vmem:[%s8964_s1 + $0x44c] ss:$16 sps:$4 sm:$0xff]   ;;  %v6077_v29 = vld [vmem:[%s8964_s1 + $0x440] ss:$16 sps:$4 sm:$0xff]  }
  0x53   :  { %3942 = vmatpush1.bf16.msra.mxu0 %v5993_v30  ;;  %4352 = vmatpush1.bf16.msra.mxu1 %v5996_v31  ;;  %v6080_v30 = vld [vmem:[%s8964_s1 + $0x448] ss:$16 sps:$4 sm:$0xff]   ;;  %v6085_v31 = vld [vmem:[%s8964_s1 + $0x464] ss:$16 sps:$4 sm:$0xff]  }
  0x54   :  { %3943 = vmatprep.subr.bf16.mxu0 %v6001_v32  ;;  %4353 = vmatprep.subr.bf16.mxu1 %v6004_v33  ;;  %v6088_v32 = vld [vmem:[%s8964_s1 + $0x46c] ss:$16 sps:$4 sm:$0xff]   ;;  %v6083_v33 = vld [vmem:[%s8964_s1 + $0x460] ss:$16 sps:$4 sm:$0xff]  }
  0x57   :  { %3944 = vmatpush1.bf16.msra.mxu0 %v5999_v34  ;;  %4354 = vmatpush1.bf16.msra.mxu1 %v6002_v35  ;;  %v6086_v34 = vld [vmem:[%s8964_s1 + $0x468] ss:$16 sps:$4 sm:$0xff]   ;;  %v6091_v35 = vld [vmem:[%s8964_s1 + $0x484] ss:$16 sps:$4 sm:$0xff]  }
  0x58   :  { %3945 = vmatprep.subr.bf16.mxu0 %v6007_v36  ;;  %4355 = vmatprep.subr.bf16.mxu1 %v6010_v37  ;;  %v6094_v36 = vld [vmem:[%s8964_s1 + $0x48c] ss:$16 sps:$4 sm:$0xff]   ;;  %v6089_v37 = vld [vmem:[%s8964_s1 + $0x480] ss:$16 sps:$4 sm:$0xff]  }
  0x5b   :  { %3946 = vmatpush1.bf16.msra.mxu0 %v6005_v38  ;;  %4356 = vmatpush1.bf16.msra.mxu1 %v6008_v39  ;;  %v6092_v38 = vld [vmem:[%s8964_s1 + $0x488] ss:$16 sps:$4 sm:$0xff]   ;;  %v6097_v39 = vld [vmem:[%s8964_s1 + $0x4a4] ss:$16 sps:$4 sm:$0xff]  }
  0x5c   :  { %3947 = vmatprep.subr.bf16.mxu0 %v6013_v40  ;;  %4357 = vmatprep.subr.bf16.mxu1 %v6016_v41  ;;  %v6100_v40 = vld [vmem:[%s8964_s1 + $0x4ac] ss:$16 sps:$4 sm:$0xff]   ;;  %v6095_v41 = vld [vmem:[%s8964_s1 + $0x4a0] ss:$16 sps:$4 sm:$0xff]  }
  0x5f   :  { %3948 = vmatpush1.bf16.msra.mxu0 %v6011_v43  ;;  %4358 = vmatpush1.bf16.msra.mxu1 %v6014_v44  ;;  %v6098_v43 = vld [vmem:[%s8964_s1 + $0x4a8] ss:$16 sps:$4 sm:$0xff]   ;;  %v6103_v44 = vld [vmem:[%s8964_s1 + $0x4c4] ss:$16 sps:$4 sm:$0xff]  }
  0x60   :  { %3949 = vmatprep.subr.bf16.mxu0 %v6019_v45  ;;  %4359 = vmatprep.subr.bf16.mxu1 %v6022_v46  ;;  %v6106_v45 = vld [vmem:[%s8964_s1 + $0x4cc] ss:$16 sps:$4 sm:$0xff]   ;;  %v6101_v46 = vld [vmem:[%s8964_s1 + $0x4c0] ss:$16 sps:$4 sm:$0xff]  }
  0x63   :  { %3950 = vmatpush1.bf16.msra.mxu0 %v6017_v47  ;;  %4360 = vmatpush1.bf16.msra.mxu1 %v6020_v48  ;;  %v6104_v47 = vld [vmem:[%s8964_s1 + $0x4c8] ss:$16 sps:$4 sm:$0xff]   ;;  %v6109_v48 = vld [vmem:[%s8964_s1 + $0x4e4] ss:$16 sps:$4 sm:$0xff]  }
  0x64   :  { %3951 = vmatprep.subr.bf16.mxu0 %v6025_v50  ;;  %4361 = vmatprep.subr.bf16.mxu1 %v6028_v51  ;;  %v6112_v50 = vld [vmem:[%s8964_s1 + $0x4ec] ss:$16 sps:$4 sm:$0xff]   ;;  %v6107_v51 = vld [vmem:[%s8964_s1 + $0x4e0] ss:$16 sps:$4 sm:$0xff]  }
  0x67   :  { %3952 = vmatpush1.bf16.msra.mxu0 %v6023_v53  ;;  %4362 = vmatpush1.bf16.msra.mxu1 %v6026_v54  ;;  %v6110_v53 = vld [vmem:[%s8964_s1 + $0x4e8] ss:$16 sps:$4 sm:$0xff]   ;;  %v6115_v54 = vld [vmem:[%s8964_s1 + $0x504] ss:$16 sps:$4 sm:$0xff]  }
  0x68   :  { %3953 = vmatprep.subr.bf16.mxu0 %v6031_v55  ;;  %4363 = vmatprep.subr.bf16.mxu1 %v6034_v56  ;;  %v6118_v55 = vld [vmem:[%s8964_s1 + $0x50c] ss:$16 sps:$4 sm:$0xff]   ;;  %v6113_v56 = vld [vmem:[%s8964_s1 + $0x500] ss:$16 sps:$4 sm:$0xff]  }
  0x6b   :  { %3954 = vmatpush1.bf16.msra.mxu0 %v6029_v57  ;;  %4364 = vmatpush1.bf16.msra.mxu1 %v6032_v58  ;;  %v6116_v57 = vld [vmem:[%s8964_s1 + $0x508] ss:$16 sps:$4 sm:$0xff]   ;;  %v6121_v58 = vld [vmem:[%s8964_s1 + $0x524] ss:$16 sps:$4 sm:$0xff]  }
  0x6c   :  { %3955 = vmatprep.subr.bf16.mxu0 %v6037_v59  ;;  %4365 = vmatprep.subr.bf16.mxu1 %v6040_v60  ;;  %v6124_v59 = vld [vmem:[%s8964_s1 + $0x52c] ss:$16 sps:$4 sm:$0xff]   ;;  %v6119_v60 = vld [vmem:[%s8964_s1 + $0x520] ss:$16 sps:$4 sm:$0xff]  }
  0x6f   :  { %3956 = vmatpush1.bf16.msra.mxu0 %v6035_v61  ;;  %4366 = vmatpush1.bf16.msra.mxu1 %v6038_v62  ;;  %v6122_v61 = vld [vmem:[%s8964_s1 + $0x528] ss:$16 sps:$4 sm:$0xff]   ;;  %v6127_v62 = vld [vmem:[%s8964_s1 + $0x544] ss:$16 sps:$4 sm:$0xff]  }
  0x70   :  { %3957 = vmatprep.subr.bf16.mxu0 %v6043_v63  ;;  %4367 = vmatprep.subr.bf16.mxu1 %v6046_v0  ;;  %v6130_v63 = vld [vmem:[%s8964_s1 + $0x54c] ss:$16 sps:$4 sm:$0xff]   ;;  %v6125_v0 = vld [vmem:[%s8964_s1 + $0x540] ss:$16 sps:$4 sm:$0xff]  }
  0x73   :  { %3958 = vmatpush1.bf16.msra.mxu0 %v6041_v1  ;;  %4368 = vmatpush1.bf16.msra.mxu1 %v6044_v2  ;;  %v6128_v1 = vld [vmem:[%s8964_s1 + $0x548] ss:$16 sps:$4 sm:$0xff]   ;;  %v6133_v2 = vld [vmem:[%s8964_s1 + $0x564] ss:$16 sps:$4 sm:$0xff]  }
  0x74   :  { %3959 = vmatprep.subr.bf16.mxu0 %v6049_v3  ;;  %4369 = vmatprep.subr.bf16.mxu1 %v6052_v4  ;;  %v6136_v3 = vld [vmem:[%s8964_s1 + $0x56c] ss:$16 sps:$4 sm:$0xff]   ;;  %v6131_v4 = vld [vmem:[%s8964_s1 + $0x560] ss:$16 sps:$4 sm:$0xff]  }
  0x77   :  { %3960 = vmatpush1.bf16.msra.mxu0 %v6047_v5  ;;  %4370 = vmatpush1.bf16.msra.mxu1 %v6050_v6  ;;  %v6134_v5 = vld [vmem:[%s8964_s1 + $0x568] ss:$16 sps:$4 sm:$0xff]   ;;  %v6139_v6 = vld [vmem:[%s8964_s1 + $0x584] ss:$16 sps:$4 sm:$0xff]  }
  0x78   :  { %3961 = vmatprep.subr.bf16.mxu0 %v6055_v7  ;;  %4371 = vmatprep.subr.bf16.mxu1 %v6058_v8  ;;  %v6142_v7 = vld [vmem:[%s8964_s1 + $0x58c] ss:$16 sps:$4 sm:$0xff]   ;;  %v6137_v8 = vld [vmem:[%s8964_s1 + $0x580] ss:$16 sps:$4 sm:$0xff]  }
  0x7b   :  { %3962 = vmatpush1.bf16.msra.mxu0 %v6053_v10  ;;  %4372 = vmatpush1.bf16.msra.mxu1 %v6056_v11  ;;  %v6145_v10 = vld [vmem:[%s8964_s1 + $0x5a4] ss:$16 sps:$4 sm:$0xff]   ;;  %v6148_v11 = vld [vmem:[%s8964_s1 + $0x5ac] ss:$16 sps:$4 sm:$0xff]  }
  0x7c   :  { %3963 = vmatprep.subr.bf16.mxu0 %v6061_v12  ;;  %4373 = vmatprep.subr.bf16.mxu1 %v6064_v52  ;;  %v6143_v12 = vld [vmem:[%s8964_s1 + $0x5a0] ss:$16 sps:$4 sm:$0xff]   ;;  %v6146_v52 = vld [vmem:[%s8964_s1 + $0x5a8] ss:$16 sps:$4 sm:$0xff]  }
  0x7f   :  { %3964 = vmatpush1.bf16.msra.mxu0 %v6059_v15  ;;  %4374 = vmatpush1.bf16.msra.mxu1 %v6062_v16  ;;  %v6151_v15 = vld [vmem:[%s8964_s1 + $0x5c4] ss:$16 sps:$4 sm:$0xff]   ;;  %v6154_v16 = vld [vmem:[%s8964_s1 + $0x5cc] ss:$16 sps:$4 sm:$0xff]  }
  0x80   :  { %3974 = vmatprep.subr.bf16.mxu0 %v6067_v17  ;;  %4384 = vmatprep.subr.bf16.mxu1 %v6070_v18  ;;  %v6149_v17 = vld [vmem:[%s8964_s1 + $0x5c0] ss:$16 sps:$4 sm:$0xff]   ;;  %v6152_v18 = vld [vmem:[%s8964_s1 + $0x5c8] ss:$16 sps:$4 sm:$0xff]  }
  0x82   :  { %3966 = vmatmul.mubr.bf16.vlgmr.msra.gmra.mrb[0].mxu0 %v709_v21  ;;  %4376 = vmatmul.mubr.bf16.vlgmr.msra.gmra.mrb[0].mxu1 %v709_v21  ;;  %v6155_v21 = vld [vmem:[%s8964_s1 + $0x5e0] ss:$16 sps:$4 sm:$0xff]  }
  0x83   :  { %3975 = vmatpush1.bf16.msra.mxu0 %v6065_v20  ;;  %4385 = vmatpush1.bf16.msra.mxu1 %v6068_v22  ;;  %v6160_v20 = vld [vmem:[%s8964_s1 + $0x5ec] ss:$16 sps:$4 sm:$0xff]   ;;  %v6158_v22 = vld [vmem:[%s8964_s1 + $0x5e8] ss:$16 sps:$4 sm:$0xff]  }
  0x84   :  { %3976 = vmatprep.subr.bf16.mxu0 %v6073_v23  ;;  %4386 = vmatprep.subr.bf16.mxu1 %v6076_v24  ;;  %v6164_v23 = vld [vmem:[%s8964_s1 + $0x604] ss:$16 sps:$4 sm:$0xff]   ;;  %v6167_v24 = vld [vmem:[%s8964_s1 + $0x60c] ss:$16 sps:$4 sm:$0xff]  }
  0x85   :  { %4006 = vmatprep.mubr.bf16.mxu0 %v7321_v25  ;;  %4416 = vmatprep.mubr.bf16.mxu1 %v7321_v25 }
  0x87   :  { %3977 = vmatpush1.bf16.msra.mxu0 %v6071_v13  ;;  %4387 = vmatpush1.bf16.msra.mxu1 %v6074_v26  ;;  %v6162_v13 = vld [vmem:[%s8964_s1 + $0x600] ss:$16 sps:$4 sm:$0xff]   ;;  %v7510_v26 = vrot.slane %v7290_v14, %v7026_v49  ;;  %v712_v14 = vcombine.high %v7321_v25, %v7321_v25  ;;  %v6176_v25 = vld [vmem:[%s8964_s1 + $0x644] ss:$16 sps:$4 sm:$0xff]  }
  0x88   :  { %3978 = vmatprep.subr.bf16.mxu0 %v6079_v27  ;;  %4388 = vmatprep.subr.bf16.mxu1 %v6082_v28  ;;  %v6165_v27 = vld [vmem:[%s8964_s1 + $0x608] ss:$16 sps:$4 sm:$0xff]   ;;  %v6170_v28 = vld [vmem:[%s8964_s1 + $0x624] ss:$16 sps:$4 sm:$0xff]  }
  0x8b   :  { %3979 = vmatpush1.bf16.msra.mxu0 %v6077_v29  ;;  %4389 = vmatpush1.bf16.msra.mxu1 %v6080_v30  ;;  %v6173_v29 = vld [vmem:[%s8964_s1 + $0x62c] ss:$16 sps:$4 sm:$0xff]   ;;  %v6168_v30 = vld [vmem:[%s8964_s1 + $0x620] ss:$16 sps:$4 sm:$0xff]  }
  0x8c   :  { %3980 = vmatprep.subr.bf16.mxu0 %v6085_v31  ;;  %4390 = vmatprep.subr.bf16.mxu1 %v6088_v32  ;;  %v6171_v31 = vld [vmem:[%s8964_s1 + $0x628] ss:$16 sps:$4 sm:$0xff]   ;;  %v6179_v32 = vld [vmem:[%s8964_s1 + $0x64c] ss:$16 sps:$4 sm:$0xff]  }
  0x8f   :  { %3981 = vmatpush1.bf16.msra.mxu0 %v6083_v33  ;;  %4391 = vmatpush1.bf16.msra.mxu1 %v6086_v34  ;;  %v6174_v33 = vld [vmem:[%s8964_s1 + $0x640] ss:$16 sps:$4 sm:$0xff]   ;;  %v6177_v34 = vld [vmem:[%s8964_s1 + $0x648] ss:$16 sps:$4 sm:$0xff]  }
  0x90   :  { %3982 = vmatprep.subr.bf16.mxu0 %v6091_v35  ;;  %4392 = vmatprep.subr.bf16.mxu1 %v6094_v36  ;;  %v6182_v35 = vld [vmem:[%s8964_s1 + $0x664] ss:$16 sps:$4 sm:$0xff]   ;;  %v6185_v36 = vld [vmem:[%s8964_s1 + $0x66c] ss:$16 sps:$4 sm:$0xff]  }
  0x93   :  { %3983 = vmatpush1.bf16.msra.mxu0 %v6089_v37  ;;  %4393 = vmatpush1.bf16.msra.mxu1 %v6092_v38  ;;  %v6180_v37 = vld [vmem:[%s8964_s1 + $0x660] ss:$16 sps:$4 sm:$0xff]   ;;  %v6183_v38 = vld [vmem:[%s8964_s1 + $0x668] ss:$16 sps:$4 sm:$0xff]  }
  0x94   :  { %3984 = vmatprep.subr.bf16.mxu0 %v6097_v39  ;;  %4394 = vmatprep.subr.bf16.mxu1 %v6100_v40  ;;  %v6188_v39 = vld [vmem:[%s8964_s1 + $0x684] ss:$16 sps:$4 sm:$0xff]   ;;  %v6191_v40 = vld [vmem:[%s8964_s1 + $0x68c] ss:$16 sps:$4 sm:$0xff]  }
  0x97   :  { %3985 = vmatpush1.bf16.msra.mxu0 %v6095_v41  ;;  %4395 = vmatpush1.bf16.msra.mxu1 %v6098_v43  ;;  %v6186_v41 = vld [vmem:[%s8964_s1 + $0x680] ss:$16 sps:$4 sm:$0xff]   ;;  %v6189_v43 = vld [vmem:[%s8964_s1 + $0x688] ss:$16 sps:$4 sm:$0xff]  }
  0x98   :  { %3986 = vmatprep.subr.bf16.mxu0 %v6103_v44  ;;  %4396 = vmatprep.subr.bf16.mxu1 %v6106_v45  ;;  %v6194_v44 = vld [vmem:[%s8964_s1 + $0x6a4] ss:$16 sps:$4 sm:$0xff]   ;;  %v6197_v45 = vld [vmem:[%s8964_s1 + $0x6ac] ss:$16 sps:$4 sm:$0xff]  }
  0x9b   :  { %3987 = vmatpush1.bf16.msra.mxu0 %v6101_v46  ;;  %4397 = vmatpush1.bf16.msra.mxu1 %v6104_v47  ;;  %v6192_v46 = vld [vmem:[%s8964_s1 + $0x6a0] ss:$16 sps:$4 sm:$0xff]   ;;  %v6195_v47 = vld [vmem:[%s8964_s1 + $0x6a8] ss:$16 sps:$4 sm:$0xff]  }
  0x9c   :  { %3988 = vmatprep.subr.bf16.mxu0 %v6109_v48  ;;  %4398 = vmatprep.subr.bf16.mxu1 %v6112_v50  ;;  %v6200_v48 = vld [vmem:[%s8964_s1 + $0x6c4] ss:$16 sps:$4 sm:$0xff]   ;;  %v6203_v50 = vld [vmem:[%s8964_s1 + $0x6cc] ss:$16 sps:$4 sm:$0xff]  }
  0x9f   :  { %3989 = vmatpush1.bf16.msra.mxu0 %v6107_v51  ;;  %4399 = vmatpush1.bf16.msra.mxu1 %v6110_v53  ;;  %v6198_v51 = vld [vmem:[%s8964_s1 + $0x6c0] ss:$16 sps:$4 sm:$0xff]   ;;  %v6201_v53 = vld [vmem:[%s8964_s1 + $0x6c8] ss:$16 sps:$4 sm:$0xff]  }
  0xa0   :  { %3990 = vmatprep.subr.bf16.mxu0 %v6115_v54  ;;  %4400 = vmatprep.subr.bf16.mxu1 %v6118_v55  ;;  %v6206_v54 = vld [vmem:[%s8964_s1 + $0x6e4] ss:$16 sps:$4 sm:$0xff]   ;;  %v6209_v55 = vld [vmem:[%s8964_s1 + $0x6ec] ss:$16 sps:$4 sm:$0xff]  }
  0xa3   :  { %3991 = vmatpush1.bf16.msra.mxu0 %v6113_v56  ;;  %4401 = vmatpush1.bf16.msra.mxu1 %v6116_v57  ;;  %v6204_v56 = vld [vmem:[%s8964_s1 + $0x6e0] ss:$16 sps:$4 sm:$0xff]   ;;  %v6207_v57 = vld [vmem:[%s8964_s1 + $0x6e8] ss:$16 sps:$4 sm:$0xff]  }
  0xa4   :  { %3992 = vmatprep.subr.bf16.mxu0 %v6121_v58  ;;  %4402 = vmatprep.subr.bf16.mxu1 %v6124_v59  ;;  %v6212_v58 = vld [vmem:[%s8964_s1 + $0x704] ss:$16 sps:$4 sm:$0xff]   ;;  %v6215_v59 = vld [vmem:[%s8964_s1 + $0x70c] ss:$16 sps:$4 sm:$0xff]  }
  0xa7   :  { %3993 = vmatpush1.bf16.msra.mxu0 %v6119_v60  ;;  %4403 = vmatpush1.bf16.msra.mxu1 %v6122_v61  ;;  %v6210_v60 = vld [vmem:[%s8964_s1 + $0x700] ss:$16 sps:$4 sm:$0xff]   ;;  %v6213_v61 = vld [vmem:[%s8964_s1 + $0x708] ss:$16 sps:$4 sm:$0xff]  }
  0xa8   :  { %3994 = vmatprep.subr.bf16.mxu0 %v6127_v62  ;;  %4404 = vmatprep.subr.bf16.mxu1 %v6130_v63  ;;  %v6218_v62 = vld [vmem:[%s8964_s1 + $0x724] ss:$16 sps:$4 sm:$0xff]   ;;  %v6221_v63 = vld [vmem:[%s8964_s1 + $0x72c] ss:$16 sps:$4 sm:$0xff]  }
  0xab   :  { %3995 = vmatpush1.bf16.msra.mxu0 %v6125_v0  ;;  %4405 = vmatpush1.bf16.msra.mxu1 %v6128_v1  ;;  %v6216_v0 = vld [vmem:[%s8964_s1 + $0x720] ss:$16 sps:$4 sm:$0xff]   ;;  %v6219_v1 = vld [vmem:[%s8964_s1 + $0x728] ss:$16 sps:$4 sm:$0xff]  }
  0xac   :  { %3996 = vmatprep.subr.bf16.mxu0 %v6133_v2  ;;  %4406 = vmatprep.subr.bf16.mxu1 %v6136_v3  ;;  %v6224_v2 = vld [vmem:[%s8964_s1 + $0x744] ss:$16 sps:$4 sm:$0xff]   ;;  %v6227_v3 = vld [vmem:[%s8964_s1 + $0x74c] ss:$16 sps:$4 sm:$0xff]  }
  0xaf   :  { %3997 = vmatpush1.bf16.msra.mxu0 %v6131_v4  ;;  %4407 = vmatpush1.bf16.msra.mxu1 %v6134_v5  ;;  %v6222_v4 = vld [vmem:[%s8964_s1 + $0x740] ss:$16 sps:$4 sm:$0xff]   ;;  %v6225_v5 = vld [vmem:[%s8964_s1 + $0x748] ss:$16 sps:$4 sm:$0xff]  }
  0xb0   :  { %3998 = vmatprep.subr.bf16.mxu0 %v6139_v6  ;;  %4408 = vmatprep.subr.bf16.mxu1 %v6142_v7  ;;  %v6230_v6 = vld [vmem:[%s8964_s1 + $0x764] ss:$16 sps:$4 sm:$0xff]   ;;  %v6233_v7 = vld [vmem:[%s8964_s1 + $0x76c] ss:$16 sps:$4 sm:$0xff]  }
  0xb3   :  { %3999 = vmatpush1.bf16.msra.mxu0 %v6137_v8  ;;  %4409 = vmatpush1.bf16.msra.mxu1 %v6140_v9  ;;  %v6228_v8 = vld [vmem:[%s8964_s1 + $0x760] ss:$16 sps:$4 sm:$0xff]   ;;  %v6231_v9 = vld [vmem:[%s8964_s1 + $0x768] ss:$16 sps:$4 sm:$0xff]  }
  0xb4   :  { %4000 = vmatprep.subr.bf16.mxu0 %v6145_v10  ;;  %4410 = vmatprep.subr.bf16.mxu1 %v6148_v11  ;;  %v6236_v10 = vld [vmem:[%s8964_s1 + $0x784] ss:$16 sps:$4 sm:$0xff]   ;;  %v6239_v11 = vld [vmem:[%s8964_s1 + $0x78c] ss:$16 sps:$4 sm:$0xff]  }
  0xb7   :  { %4001 = vmatpush1.bf16.msra.mxu0 %v6143_v12  ;;  %4411 = vmatpush1.bf16.msra.mxu1 %v6146_v52  ;;  %v6234_v12 = vld [vmem:[%s8964_s1 + $0x780] ss:$16 sps:$4 sm:$0xff]   ;;  %v6237_v52 = vld [vmem:[%s8964_s1 + $0x788] ss:$16 sps:$4 sm:$0xff]  }
  0xb8   :  { %4002 = vmatprep.subr.bf16.mxu0 %v6151_v15  ;;  %4412 = vmatprep.subr.bf16.mxu1 %v6154_v16  ;;  %v6242_v15 = vld [vmem:[%s8964_s1 + $0x7a4] ss:$16 sps:$4 sm:$0xff]   ;;  %v6245_v16 = vld [vmem:[%s8964_s1 + $0x7ac] ss:$16 sps:$4 sm:$0xff]  }
  0xbb   :  { %4003 = vmatpush1.bf16.msra.mxu0 %v6149_v17  ;;  %4413 = vmatpush1.bf16.msra.mxu1 %v6152_v18  ;;  %v6240_v17 = vld [vmem:[%s8964_s1 + $0x7a0] ss:$16 sps:$4 sm:$0xff]   ;;  %v6243_v18 = vld [vmem:[%s8964_s1 + $0x7a8] ss:$16 sps:$4 sm:$0xff]  }
  0xbc   :  { %4004 = vmatprep.subr.bf16.mxu0 %v6157_v19  ;;  %4414 = vmatprep.subr.bf16.mxu1 %v6160_v20  ;;  %v6248_v19 = vld [vmem:[%s8964_s1 + $0x7c4] ss:$16 sps:$4 sm:$0xff]   ;;  %v6251_v20 = vld [vmem:[%s8964_s1 + $0x7cc] ss:$16 sps:$4 sm:$0xff]  }
  0xbf   :  { %4005 = vmatpush1.bf16.msra.mxu0 %v6155_v21  ;;  %4415 = vmatpush1.bf16.msra.mxu1 %v6158_v22  ;;  %v7684_v21 = vld.sshfl [vmem:[%s8963_s0 + $0x8] sm:$0xff pattern:$0x75316420]  ;;  %v6246_v22 = vld [vmem:[%s8964_s1 + $0x7c0] ss:$16 sps:$4 sm:$0xff]  }
  0xc0   :  { %4015 = vmatprep.subr.bf16.mxu0 %v6164_v23  ;;  %4425 = vmatprep.subr.bf16.mxu1 %v6167_v24  ;;  %v6249_v23 = vld [vmem:[%s8964_s1 + $0x7c8] ss:$16 sps:$4 sm:$0xff]   ;;  %v6254_v24 = vld [vmem:[%s8964_s1 + $0x7e4] ss:$16 sps:$4 sm:$0xff]  }
  0xc2   :  { %4007 = vmatmul.mubr.bf16.vlgmr.msra.gmra.mrb[0].mxu0 %v7510_v26  ;;  %4417 = vmatmul.mubr.bf16.vlgmr.msra.gmra.mrb[0].mxu1 %v7510_v26 }
  0xc3   :  { %4016 = vmatpush1.bf16.msra.mxu0 %v6162_v13  ;;  %4426 = vmatpush1.bf16.msra.mxu1 %v6165_v27  ;;  %v6257_v13 = vld [vmem:[%s8964_s1 + $0x7ec] ss:$16 sps:$4 sm:$0xff]   ;;  %v6252_v27 = vld [vmem:[%s8964_s1 + $0x7e0] ss:$16 sps:$4 sm:$0xff]  }
  0xc4   :  { %4017 = vmatprep.subr.bf16.mxu0 %v6170_v28  ;;  %4427 = vmatprep.subr.bf16.mxu1 %v6173_v29  ;;  %v6255_v28 = vld [vmem:[%s8964_s1 + $0x7e8] ss:$16 sps:$4 sm:$0xff]   ;;  %v6260_v29 = vld [vmem:[%s8964_s1 + $0x804] ss:$16 sps:$4 sm:$0xff]  }
  0xc5   :  { %4047 = vmatprep.mubr.bf16.mxu0 %v712_v14  ;;  %4457 = vmatprep.mubr.bf16.mxu1 %v712_v14  ;;  %v6263_v14 = vld [vmem:[%s8964_s1 + $0x80c] ss:$16 sps:$4 sm:$0xff]  }
  0xc7   :  { %4018 = vmatpush1.bf16.msra.mxu0 %v6168_v30  ;;  %4428 = vmatpush1.bf16.msra.mxu1 %v6171_v31  ;;  %v728_v30 = vcombine.high %v7684_v21, %v7684_v21  ;;  %v710_v31 = vcombine.high %v7510_v26, %v7510_v26  ;;  %v6269_v26 = vld [vmem:[%s8964_s1 + $0x82c] ss:$16 sps:$4 sm:$0xff]  }
  0xc8   :  { %4019 = vmatprep.subr.bf16.mxu0 %v6176_v25  ;;  %4429 = vmatprep.subr.bf16.mxu1 %v6179_v32  ;;  %v6258_v25 = vld [vmem:[%s8964_s1 + $0x800] ss:$16 sps:$4 sm:$0xff]   ;;  %v6261_v32 = vld [vmem:[%s8964_s1 + $0x808] ss:$16 sps:$4 sm:$0xff]  }
  0xcb   :  { %4020 = vmatpush1.bf16.msra.mxu0 %v6174_v33  ;;  %4430 = vmatpush1.bf16.msra.mxu1 %v6177_v34  ;;  %v6266_v33 = vld [vmem:[%s8964_s1 + $0x824] ss:$16 sps:$4 sm:$0xff]   ;;  %v7727_v34 = vrot.slane %v728_v30, %v7026_v49 }
  0xcc   :  { %4021 = vmatprep.subr.bf16.mxu0 %v6182_v35  ;;  %4431 = vmatprep.subr.bf16.mxu1 %v6185_v36  ;;  %v6264_v35 = vld [vmem:[%s8964_s1 + $0x820] ss:$16 sps:$4 sm:$0xff]   ;;  %v6267_v36 = vld [vmem:[%s8964_s1 + $0x828] ss:$16 sps:$4 sm:$0xff]   ;;  %v6350_v30 = vld [vmem:[%s8964_s1 + $0x9e4] ss:$16 sps:$4 sm:$0xff]  }
  0xcf   :  { %4022 = vmatpush1.bf16.msra.mxu0 %v6180_v37  ;;  %4432 = vmatpush1.bf16.msra.mxu1 %v6183_v38  ;;  %v6272_v37 = vld [vmem:[%s8964_s1 + $0x844] ss:$16 sps:$4 sm:$0xff]   ;;  %v6275_v38 = vld [vmem:[%s8964_s1 + $0x84c] ss:$16 sps:$4 sm:$0xff]  }
  0xd0   :  { %4023 = vmatprep.subr.bf16.mxu0 %v6188_v39  ;;  %4433 = vmatprep.subr.bf16.mxu1 %v6191_v40  ;;  %v6270_v39 = vld [vmem:[%s8964_s1 + $0x840] ss:$16 sps:$4 sm:$0xff]   ;;  %v6273_v40 = vld [vmem:[%s8964_s1 + $0x848] ss:$16 sps:$4 sm:$0xff]  }
  0xd3   :  { %4024 = vmatpush1.bf16.msra.mxu0 %v6186_v41  ;;  %4434 = vmatpush1.bf16.msra.mxu1 %v6189_v43  ;;  %v6278_v41 = vld [vmem:[%s8964_s1 + $0x864] ss:$16 sps:$4 sm:$0xff]   ;;  %v6281_v43 = vld [vmem:[%s8964_s1 + $0x86c] ss:$16 sps:$4 sm:$0xff]  }
  0xd4   :  { %4025 = vmatprep.subr.bf16.mxu0 %v6194_v44  ;;  %4435 = vmatprep.subr.bf16.mxu1 %v6197_v45  ;;  %v6276_v44 = vld [vmem:[%s8964_s1 + $0x860] ss:$16 sps:$4 sm:$0xff]   ;;  %v6279_v45 = vld [vmem:[%s8964_s1 + $0x868] ss:$16 sps:$4 sm:$0xff]  }
  0xd7   :  { %4026 = vmatpush1.bf16.msra.mxu0 %v6192_v46  ;;  %4436 = vmatpush1.bf16.msra.mxu1 %v6195_v47  ;;  %v6284_v46 = vld [vmem:[%s8964_s1 + $0x884] ss:$16 sps:$4 sm:$0xff]   ;;  %v6287_v47 = vld [vmem:[%s8964_s1 + $0x88c] ss:$16 sps:$4 sm:$0xff]  }
  0xd8   :  { %4027 = vmatprep.subr.bf16.mxu0 %v6200_v48  ;;  %4437 = vmatprep.subr.bf16.mxu1 %v6203_v50  ;;  %v6282_v48 = vld [vmem:[%s8964_s1 + $0x880] ss:$16 sps:$4 sm:$0xff]   ;;  %v6285_v50 = vld [vmem:[%s8964_s1 + $0x888] ss:$16 sps:$4 sm:$0xff]  }
  0xdb   :  { %4028 = vmatpush1.bf16.msra.mxu0 %v6198_v51  ;;  %4438 = vmatpush1.bf16.msra.mxu1 %v6201_v53  ;;  %v6290_v51 = vld [vmem:[%s8964_s1 + $0x8a4] ss:$16 sps:$4 sm:$0xff]   ;;  %v6293_v53 = vld [vmem:[%s8964_s1 + $0x8ac] ss:$16 sps:$4 sm:$0xff]  }
  0xdc   :  { %4029 = vmatprep.subr.bf16.mxu0 %v6206_v54  ;;  %4439 = vmatprep.subr.bf16.mxu1 %v6209_v55  ;;  %v6288_v54 = vld [vmem:[%s8964_s1 + $0x8a0] ss:$16 sps:$4 sm:$0xff]   ;;  %v6291_v55 = vld [vmem:[%s8964_s1 + $0x8a8] ss:$16 sps:$4 sm:$0xff]  }
  0xdf   :  { %4030 = vmatpush1.bf16.msra.mxu0 %v6204_v56  ;;  %4440 = vmatpush1.bf16.msra.mxu1 %v6207_v57  ;;  %v6296_v56 = vld [vmem:[%s8964_s1 + $0x8c4] ss:$16 sps:$4 sm:$0xff]   ;;  %v6299_v57 = vld [vmem:[%s8964_s1 + $0x8cc] ss:$16 sps:$4 sm:$0xff]  }
  0xe0   :  { %4031 = vmatprep.subr.bf16.mxu0 %v6212_v58  ;;  %4441 = vmatprep.subr.bf16.mxu1 %v6215_v59  ;;  %v6294_v58 = vld [vmem:[%s8964_s1 + $0x8c0] ss:$16 sps:$4 sm:$0xff]   ;;  %v6297_v59 = vld [vmem:[%s8964_s1 + $0x8c8] ss:$16 sps:$4 sm:$0xff]  }
  0xe3   :  { %4032 = vmatpush1.bf16.msra.mxu0 %v6210_v60  ;;  %4442 = vmatpush1.bf16.msra.mxu1 %v6213_v61  ;;  %v6302_v60 = vld [vmem:[%s8964_s1 + $0x8e4] ss:$16 sps:$4 sm:$0xff]   ;;  %v6305_v61 = vld [vmem:[%s8964_s1 + $0x8ec] ss:$16 sps:$4 sm:$0xff]  }
  0xe4   :  { %4033 = vmatprep.subr.bf16.mxu0 %v6218_v62  ;;  %4443 = vmatprep.subr.bf16.mxu1 %v6221_v63  ;;  %v6300_v62 = vld [vmem:[%s8964_s1 + $0x8e0] ss:$16 sps:$4 sm:$0xff]   ;;  %v6303_v63 = vld [vmem:[%s8964_s1 + $0x8e8] ss:$16 sps:$4 sm:$0xff]  }
  0xe7   :  { %4034 = vmatpush1.bf16.msra.mxu0 %v6216_v0  ;;  %4444 = vmatpush1.bf16.msra.mxu1 %v6219_v1  ;;  %v6308_v0 = vld [vmem:[%s8964_s1 + $0x904] ss:$16 sps:$4 sm:$0xff]   ;;  %v6311_v1 = vld [vmem:[%s8964_s1 + $0x90c] ss:$16 sps:$4 sm:$0xff]  }
  0xe8   :  { %4035 = vmatprep.subr.bf16.mxu0 %v6224_v2  ;;  %4445 = vmatprep.subr.bf16.mxu1 %v6227_v3  ;;  %v6306_v2 = vld [vmem:[%s8964_s1 + $0x900] ss:$16 sps:$4 sm:$0xff]   ;;  %v6309_v3 = vld [vmem:[%s8964_s1 + $0x908] ss:$16 sps:$4 sm:$0xff]  }
  0xeb   :  { %4036 = vmatpush1.bf16.msra.mxu0 %v6222_v4  ;;  %4446 = vmatpush1.bf16.msra.mxu1 %v6225_v5  ;;  %v6314_v4 = vld [vmem:[%s8964_s1 + $0x924] ss:$16 sps:$4 sm:$0xff]   ;;  %v6317_v5 = vld [vmem:[%s8964_s1 + $0x92c] ss:$16 sps:$4 sm:$0xff]  }
  0xec   :  { %4037 = vmatprep.subr.bf16.mxu0 %v6230_v6  ;;  %4447 = vmatprep.subr.bf16.mxu1 %v6233_v7  ;;  %v6312_v6 = vld [vmem:[%s8964_s1 + $0x920] ss:$16 sps:$4 sm:$0xff]   ;;  %v6315_v7 = vld [vmem:[%s8964_s1 + $0x928] ss:$16 sps:$4 sm:$0xff]  }
  0xef   :  { %4038 = vmatpush1.bf16.msra.mxu0 %v6228_v8  ;;  %4448 = vmatpush1.bf16.msra.mxu1 %v6231_v9  ;;  %v6320_v8 = vld [vmem:[%s8964_s1 + $0x944] ss:$16 sps:$4 sm:$0xff]   ;;  %v6323_v9 = vld [vmem:[%s8964_s1 + $0x94c] ss:$16 sps:$4 sm:$0xff]  }
  0xf0   :  { %4039 = vmatprep.subr.bf16.mxu0 %v6236_v10  ;;  %4449 = vmatprep.subr.bf16.mxu1 %v6239_v11  ;;  %v6318_v10 = vld [vmem:[%s8964_s1 + $0x940] ss:$16 sps:$4 sm:$0xff]   ;;  %v6321_v11 = vld [vmem:[%s8964_s1 + $0x948] ss:$16 sps:$4 sm:$0xff]  }
  0xf3   :  { %4040 = vmatpush1.bf16.msra.mxu0 %v6234_v12  ;;  %4450 = vmatpush1.bf16.msra.mxu1 %v6237_v52  ;;  %v6326_v12 = vld [vmem:[%s8964_s1 + $0x964] ss:$16 sps:$4 sm:$0xff]   ;;  %v6329_v52 = vld [vmem:[%s8964_s1 + $0x96c] ss:$16 sps:$4 sm:$0xff]  }
  0xf4   :  { %4041 = vmatprep.subr.bf16.mxu0 %v6242_v15  ;;  %4451 = vmatprep.subr.bf16.mxu1 %v6245_v16  ;;  %v6324_v15 = vld [vmem:[%s8964_s1 + $0x960] ss:$16 sps:$4 sm:$0xff]   ;;  %v6327_v16 = vld [vmem:[%s8964_s1 + $0x968] ss:$16 sps:$4 sm:$0xff]  }
  0xf7   :  { %4042 = vmatpush1.bf16.msra.mxu0 %v6240_v17  ;;  %4452 = vmatpush1.bf16.msra.mxu1 %v6243_v18  ;;  %v6332_v17 = vld [vmem:[%s8964_s1 + $0x984] ss:$16 sps:$4 sm:$0xff]   ;;  %v6335_v18 = vld [vmem:[%s8964_s1 + $0x98c] ss:$16 sps:$4 sm:$0xff]  }
  0xf8   :  { %4043 = vmatprep.subr.bf16.mxu0 %v6248_v19  ;;  %4453 = vmatprep.subr.bf16.mxu1 %v6251_v20  ;;  %v6330_v19 = vld [vmem:[%s8964_s1 + $0x980] ss:$16 sps:$4 sm:$0xff]   ;;  %v6333_v20 = vld [vmem:[%s8964_s1 + $0x988] ss:$16 sps:$4 sm:$0xff]  }
  0xfb   :  { %4044 = vmatpush1.bf16.msra.mxu0 %v6246_v22  ;;  %4454 = vmatpush1.bf16.msra.mxu1 %v6249_v23  ;;  %v6338_v22 = vld [vmem:[%s8964_s1 + $0x9a4] ss:$16 sps:$4 sm:$0xff]   ;;  %v6341_v23 = vld [vmem:[%s8964_s1 + $0x9ac] ss:$16 sps:$4 sm:$0xff]  }
  0xfc   :  { %4045 = vmatprep.subr.bf16.mxu0 %v6254_v24  ;;  %4455 = vmatprep.subr.bf16.mxu1 %v6257_v13  ;;  %v6336_v24 = vld [vmem:[%s8964_s1 + $0x9a0] ss:$16 sps:$4 sm:$0xff]   ;;  %v6339_v13 = vld [vmem:[%s8964_s1 + $0x9a8] ss:$16 sps:$4 sm:$0xff]  }
  0xff   :  { %4046 = vmatpush1.bf16.msra.mxu0 %v6252_v27  ;;  %4456 = vmatpush1.bf16.msra.mxu1 %v6255_v28  ;;  %v6344_v27 = vld [vmem:[%s8964_s1 + $0x9c4] ss:$16 sps:$4 sm:$0xff]   ;;  %v6347_v28 = vld [vmem:[%s8964_s1 + $0x9cc] ss:$16 sps:$4 sm:$0xff]  }
 0x100   :  { %4056 = vmatprep.subr.bf16.mxu0 %v6260_v29  ;;  %4466 = vmatprep.subr.bf16.mxu1 %v6263_v14  ;;  %v6342_v29 = vld [vmem:[%s8964_s1 + $0x9c0] ss:$16 sps:$4 sm:$0xff]   ;;  %v6345_v14 = vld [vmem:[%s8964_s1 + $0x9c8] ss:$16 sps:$4 sm:$0xff]  }
 0x102   :  { %4048 = vmatmul.mubr.bf16.vlgmr.msra.gmra.mrb[0].mxu0 %v710_v31  ;;  %4458 = vmatmul.mubr.bf16.vlgmr.msra.gmra.mrb[0].mxu1 %v710_v31  ;;  %v6353_v31 = vld [vmem:[%s8964_s1 + $0x9ec] ss:$16 sps:$4 sm:$0xff]  }
 0x103   :  { %4057 = vmatpush1.bf16.msra.mxu0 %v6258_v25  ;;  %4467 = vmatpush1.bf16.msra.mxu1 %v6261_v32  ;;  %v6348_v25 = vld [vmem:[%s8964_s1 + $0x9e0] ss:$16 sps:$4 sm:$0xff]   ;;  %v6351_v32 = vld [vmem:[%s8964_s1 + $0x9e8] ss:$16 sps:$4 sm:$0xff]  }
 0x104   :  { %4058 = vmatprep.subr.bf16.mxu0 %v6266_v33  ;;  %4468 = vmatprep.subr.bf16.mxu1 %v6269_v26  ;;  %v6356_v33 = vld [vmem:[%s8964_s1 + $0xa04] ss:$16 sps:$4 sm:$0xff]   ;;  %v6359_v26 = vld [vmem:[%s8964_s1 + $0xa0c] ss:$16 sps:$4 sm:$0xff]  }
 0x105   :  { %4088 = vmatprep.mubr.bf16.mxu0 %v7727_v34  ;;  %4498 = vmatprep.mubr.bf16.mxu1 %v7727_v34 }
 0x107   :  { %4059 = vmatpush1.bf16.msra.mxu0 %v6264_v35  ;;  %4469 = vmatpush1.bf16.msra.mxu1 %v6267_v36  ;;  %v7913_v35 = vrot.slane %v7684_v21, %v7026_v49  ;;  %v6354_v36 = vld [vmem:[%s8964_s1 + $0xa00] ss:$16 sps:$4 sm:$0xff]   ;;  %v6365_v21 = vld [vmem:[%s8964_s1 + $0xa2c] ss:$16 sps:$4 sm:$0xff]  }
 0x108   :  { %4060 = vmatprep.subr.bf16.mxu0 %v6272_v37  ;;  %4470 = vmatprep.subr.bf16.mxu1 %v6275_v38  ;;  %v6357_v37 = vld [vmem:[%s8964_s1 + $0xa08] ss:$16 sps:$4 sm:$0xff]   ;;  %v6362_v38 = vld [vmem:[%s8964_s1 + $0xa24] ss:$16 sps:$4 sm:$0xff]  }
 0x10b   :  { %4061 = vmatpush1.bf16.msra.mxu0 %v6270_v39  ;;  %4471 = vmatpush1.bf16.msra.mxu1 %v6273_v40  ;;  %v760_v39 = vcombine.high %v7727_v34, %v7727_v34  ;;  %v6360_v40 = vld [vmem:[%s8964_s1 + $0xa20] ss:$16 sps:$4 sm:$0xff]   ;;  %v6368_v34 = vld [vmem:[%s8964_s1 + $0xa44] ss:$16 sps:$4 sm:$0xff]  }
 0x10c   :  { %4062 = vmatprep.subr.bf16.mxu0 %v6278_v41  ;;  %4472 = vmatprep.subr.bf16.mxu1 %v6281_v43  ;;  %v6363_v41 = vld [vmem:[%s8964_s1 + $0xa28] ss:$16 sps:$4 sm:$0xff]   ;;  %v6371_v43 = vld [vmem:[%s8964_s1 + $0xa4c] ss:$16 sps:$4 sm:$0xff]  }
 0x10f   :  { %4063 = vmatpush1.bf16.msra.mxu0 %v6276_v44  ;;  %4473 = vmatpush1.bf16.msra.mxu1 %v6279_v45  ;;  %v6366_v44 = vld [vmem:[%s8964_s1 + $0xa40] ss:$16 sps:$4 sm:$0xff]   ;;  %v6369_v45 = vld [vmem:[%s8964_s1 + $0xa48] ss:$16 sps:$4 sm:$0xff]  }
 0x110   :  { %4064 = vmatprep.subr.bf16.mxu0 %v6284_v46  ;;  %4474 = vmatprep.subr.bf16.mxu1 %v6287_v47  ;;  %v6374_v46 = vld [vmem:[%s8964_s1 + $0xa64] ss:$16 sps:$4 sm:$0xff]   ;;  %v6377_v47 = vld [vmem:[%s8964_s1 + $0xa6c] ss:$16 sps:$4 sm:$0xff]  }
 0x113   :  { %4065 = vmatpush1.bf16.msra.mxu0 %v6282_v48  ;;  %4475 = vmatpush1.bf16.msra.mxu1 %v6285_v50  ;;  %v6372_v48 = vld [vmem:[%s8964_s1 + $0xa60] ss:$16 sps:$4 sm:$0xff]   ;;  %v6375_v50 = vld [vmem:[%s8964_s1 + $0xa68] ss:$16 sps:$4 sm:$0xff]  }
 0x114   :  { %4066 = vmatprep.subr.bf16.mxu0 %v6290_v51  ;;  %4476 = vmatprep.subr.bf16.mxu1 %v6293_v53  ;;  %v6380_v51 = vld [vmem:[%s8964_s1 + $0xa84] ss:$16 sps:$4 sm:$0xff]   ;;  %v6383_v53 = vld [vmem:[%s8964_s1 + $0xa8c] ss:$16 sps:$4 sm:$0xff]  }
 0x117   :  { %4067 = vmatpush1.bf16.msra.mxu0 %v6288_v54  ;;  %4477 = vmatpush1.bf16.msra.mxu1 %v6291_v55  ;;  %v6378_v54 = vld [vmem:[%s8964_s1 + $0xa80] ss:$16 sps:$4 sm:$0xff]   ;;  %v6381_v55 = vld [vmem:[%s8964_s1 + $0xa88] ss:$16 sps:$4 sm:$0xff]  }
 0x118   :  { %4068 = vmatprep.subr.bf16.mxu0 %v6296_v56  ;;  %4478 = vmatprep.subr.bf16.mxu1 %v6299_v57  ;;  %v6386_v56 = vld [vmem:[%s8964_s1 + $0xaa4] ss:$16 sps:$4 sm:$0xff]   ;;  %v6389_v57 = vld [vmem:[%s8964_s1 + $0xaac] ss:$16 sps:$4 sm:$0xff]  }
 0x11b   :  { %4069 = vmatpush1.bf16.msra.mxu0 %v6294_v58  ;;  %4479 = vmatpush1.bf16.msra.mxu1 %v6297_v59  ;;  %v6384_v58 = vld [vmem:[%s8964_s1 + $0xaa0] ss:$16 sps:$4 sm:$0xff]   ;;  %v6387_v59 = vld [vmem:[%s8964_s1 + $0xaa8] ss:$16 sps:$4 sm:$0xff]  }
 0x11c   :  { %4070 = vmatprep.subr.bf16.mxu0 %v6302_v60  ;;  %4480 = vmatprep.subr.bf16.mxu1 %v6305_v61  ;;  %v6392_v60 = vld [vmem:[%s8964_s1 + $0xac4] ss:$16 sps:$4 sm:$0xff]   ;;  %v6395_v61 = vld [vmem:[%s8964_s1 + $0xacc] ss:$16 sps:$4 sm:$0xff]  }
 0x11f   :  { %4071 = vmatpush1.bf16.msra.mxu0 %v6300_v62  ;;  %4481 = vmatpush1.bf16.msra.mxu1 %v6303_v63  ;;  %v6390_v62 = vld [vmem:[%s8964_s1 + $0xac0] ss:$16 sps:$4 sm:$0xff]   ;;  %v6393_v63 = vld [vmem:[%s8964_s1 + $0xac8] ss:$16 sps:$4 sm:$0xff]  }
 0x120   :  { %4072 = vmatprep.subr.bf16.mxu0 %v6308_v0  ;;  %4482 = vmatprep.subr.bf16.mxu1 %v6311_v1  ;;  %v6398_v0 = vld [vmem:[%s8964_s1 + $0xae4] ss:$16 sps:$4 sm:$0xff]   ;;  %v6401_v1 = vld [vmem:[%s8964_s1 + $0xaec] ss:$16 sps:$4 sm:$0xff]  }
 0x123   :  { %4073 = vmatpush1.bf16.msra.mxu0 %v6306_v2  ;;  %4483 = vmatpush1.bf16.msra.mxu1 %v6309_v3  ;;  %v6396_v2 = vld [vmem:[%s8964_s1 + $0xae0] ss:$16 sps:$4 sm:$0xff]   ;;  %v6399_v3 = vld [vmem:[%s8964_s1 + $0xae8] ss:$16 sps:$4 sm:$0xff]  }
 0x124   :  { %4074 = vmatprep.subr.bf16.mxu0 %v6314_v4  ;;  %4484 = vmatprep.subr.bf16.mxu1 %v6317_v5  ;;  %v6404_v4 = vld [vmem:[%s8964_s1 + $0xb04] ss:$16 sps:$4 sm:$0xff]   ;;  %v6407_v5 = vld [vmem:[%s8964_s1 + $0xb0c] ss:$16 sps:$4 sm:$0xff]  }
 0x127   :  { %4075 = vmatpush1.bf16.msra.mxu0 %v6312_v6  ;;  %4485 = vmatpush1.bf16.msra.mxu1 %v6315_v7  ;;  %v6402_v6 = vld [vmem:[%s8964_s1 + $0xb00] ss:$16 sps:$4 sm:$0xff]   ;;  %v6405_v7 = vld [vmem:[%s8964_s1 + $0xb08] ss:$16 sps:$4 sm:$0xff]  }
 0x128   :  { %4076 = vmatprep.subr.bf16.mxu0 %v6320_v8  ;;  %4486 = vmatprep.subr.bf16.mxu1 %v6323_v9  ;;  %v6410_v8 = vld [vmem:[%s8964_s1 + $0xb24] ss:$16 sps:$4 sm:$0xff]   ;;  %v6413_v9 = vld [vmem:[%s8964_s1 + $0xb2c] ss:$16 sps:$4 sm:$0xff]  }
 0x12b   :  { %4077 = vmatpush1.bf16.msra.mxu0 %v6318_v10  ;;  %4487 = vmatpush1.bf16.msra.mxu1 %v6321_v11  ;;  %v6408_v10 = vld [vmem:[%s8964_s1 + $0xb20] ss:$16 sps:$4 sm:$0xff]   ;;  %v6411_v11 = vld [vmem:[%s8964_s1 + $0xb28] ss:$16 sps:$4 sm:$0xff]  }
 0x12c   :  { %4078 = vmatprep.subr.bf16.mxu0 %v6326_v12  ;;  %4488 = vmatprep.subr.bf16.mxu1 %v6329_v52  ;;  %v6416_v12 = vld [vmem:[%s8964_s1 + $0xb44] ss:$16 sps:$4 sm:$0xff]   ;;  %v6419_v52 = vld [vmem:[%s8964_s1 + $0xb4c] ss:$16 sps:$4 sm:$0xff]  }
 0x12f   :  { %4079 = vmatpush1.bf16.msra.mxu0 %v6324_v15  ;;  %4489 = vmatpush1.bf16.msra.mxu1 %v6327_v16  ;;  %v6414_v15 = vld [vmem:[%s8964_s1 + $0xb40] ss:$16 sps:$4 sm:$0xff]   ;;  %v6417_v16 = vld [vmem:[%s8964_s1 + $0xb48] ss:$16 sps:$4 sm:$0xff]  }
 0x130   :  { %4080 = vmatprep.subr.bf16.mxu0 %v6332_v17  ;;  %4490 = vmatprep.subr.bf16.mxu1 %v6335_v18  ;;  %v6422_v17 = vld [vmem:[%s8964_s1 + $0xb64] ss:$16 sps:$4 sm:$0xff]   ;;  %v6425_v18 = vld [vmem:[%s8964_s1 + $0xb6c] ss:$16 sps:$4 sm:$0xff]  }
 0x133   :  { %4081 = vmatpush1.bf16.msra.mxu0 %v6330_v19  ;;  %4491 = vmatpush1.bf16.msra.mxu1 %v6333_v20  ;;  %v6420_v19 = vld [vmem:[%s8964_s1 + $0xb60] ss:$16 sps:$4 sm:$0xff]   ;;  %v6423_v20 = vld [vmem:[%s8964_s1 + $0xb68] ss:$16 sps:$4 sm:$0xff]  }
 0x134   :  { %4082 = vmatprep.subr.bf16.mxu0 %v6338_v22  ;;  %4492 = vmatprep.subr.bf16.mxu1 %v6341_v23  ;;  %v6428_v22 = vld [vmem:[%s8964_s1 + $0xb84] ss:$16 sps:$4 sm:$0xff]   ;;  %v6431_v23 = vld [vmem:[%s8964_s1 + $0xb8c] ss:$16 sps:$4 sm:$0xff]  }
 0x137   :  { %4083 = vmatpush1.bf16.msra.mxu0 %v6336_v24  ;;  %4493 = vmatpush1.bf16.msra.mxu1 %v6339_v13  ;;  %v6426_v24 = vld [vmem:[%s8964_s1 + $0xb80] ss:$16 sps:$4 sm:$0xff]   ;;  %v6429_v13 = vld [vmem:[%s8964_s1 + $0xb88] ss:$16 sps:$4 sm:$0xff]  }
 0x138   :  { %4084 = vmatprep.subr.bf16.mxu0 %v6344_v27  ;;  %4494 = vmatprep.subr.bf16.mxu1 %v6347_v28  ;;  %v6434_v27 = vld [vmem:[%s8964_s1 + $0xba4] ss:$16 sps:$4 sm:$0xff]   ;;  %v6437_v28 = vld [vmem:[%s8964_s1 + $0xbac] ss:$16 sps:$4 sm:$0xff]  }
 0x13b   :  { %4085 = vmatpush1.bf16.msra.mxu0 %v6342_v29  ;;  %4495 = vmatpush1.bf16.msra.mxu1 %v6345_v14  ;;  %v6432_v29 = vld [vmem:[%s8964_s1 + $0xba0] ss:$16 sps:$4 sm:$0xff]   ;;  %v6435_v14 = vld [vmem:[%s8964_s1 + $0xba8] ss:$16 sps:$4 sm:$0xff]  }
 0x13c   :  { %4086 = vmatprep.subr.bf16.mxu0 %v6350_v30  ;;  %4496 = vmatprep.subr.bf16.mxu1 %v6353_v31  ;;  %v6440_v30 = vld [vmem:[%s8964_s1 + $0xbc4] ss:$16 sps:$4 sm:$0xff]   ;;  %v6443_v31 = vld [vmem:[%s8964_s1 + $0xbcc] ss:$16 sps:$4 sm:$0xff]  }
 0x13f   :  { %4087 = vmatpush1.bf16.msra.mxu0 %v6348_v25  ;;  %4497 = vmatpush1.bf16.msra.mxu1 %v6351_v32  ;;  %v6833_v25 = vld [vmem:[%s8963_s0 + $0x8] sm:$0xff] }
 0x140   :  { %4097 = vmatprep.subr.bf16.mxu0 %v6356_v33  ;;  %4507 = vmatprep.subr.bf16.mxu1 %v6359_v26  ;;  %v713_v32 = vcombine.high %v6833_v25, %v6833_v25  ;;  %v6438_v33 = vld [vmem:[%s8964_s1 + $0xbc0] ss:$16 sps:$4 sm:$0xff]   ;;  %v6441_v26 = vld [vmem:[%s8964_s1 + $0xbc8] ss:$16 sps:$4 sm:$0xff]  }
 0x142   :  { %4089 = vmatmul.mubr.bf16.vlgmr.msra.gmra.mrb[0].mxu0 %v7913_v35  ;;  %4499 = vmatmul.mubr.bf16.vlgmr.msra.gmra.mrb[0].mxu1 %v7913_v35 }
 0x143   :  { %4098 = vmatpush1.bf16.msra.mxu0 %v6354_v36  ;;  %4508 = vmatpush1.bf16.msra.mxu1 %v6357_v37  ;;  %v6446_v36 = vld [vmem:[%s8964_s1 + $0xbe4] ss:$16 sps:$4 sm:$0xff]   ;;  %v6449_v37 = vld [vmem:[%s8964_s1 + $0xbec] ss:$16 sps:$4 sm:$0xff]  }
 0x144   :  { %4099 = vmatprep.subr.bf16.mxu0 %v6362_v38  ;;  %4509 = vmatprep.subr.bf16.mxu1 %v6365_v21  ;;  %v8103_v38 = vrot.slane %v713_v32, %v7026_v49  ;;  %v6444_v21 = vld [vmem:[%s8964_s1 + $0xbe0] ss:$16 sps:$4 sm:$0xff]  }
 0x145   :  { %4129 = vmatprep.mubr.bf16.mxu0 %v760_v39  ;;  %4539 = vmatprep.mubr.bf16.mxu1 %v760_v39  ;;  %v6447_v39 = vld [vmem:[%s8964_s1 + $0xbe8] ss:$16 sps:$4 sm:$0xff]  }
 0x147   :  { %4100 = vmatpush1.bf16.msra.mxu0 %v6360_v40  ;;  %4510 = vmatpush1.bf16.msra.mxu1 %v6363_v41  ;;  %v6452_v40 = vld [vmem:[%s8964_s1 + $0xc04] ss:$16 sps:$4 sm:$0xff]   ;;  %v6455_v41 = vld [vmem:[%s8964_s1 + $0xc0c] ss:$16 sps:$4 sm:$0xff]  }
 0x148   :  { %4101 = vmatprep.subr.bf16.mxu0 %v6368_v34  ;;  %4511 = vmatprep.subr.bf16.mxu1 %v6371_v43  ;;  %v729_v34 = vcombine.high %v8103_v38, %v8103_v38  ;;  %v758_v43 = vcombine.high %v7913_v35, %v7913_v35  ;;  %v6461_v35 = vld [vmem:[%s8964_s1 + $0xc2c] ss:$16 sps:$4 sm:$0xff]  }
 0x14b   :  { %4102 = vmatpush1.bf16.msra.mxu0 %v6366_v44  ;;  %4512 = vmatpush1.bf16.msra.mxu1 %v6369_v45  ;;  %v6450_v44 = vld [vmem:[%s8964_s1 + $0xc00] ss:$16 sps:$4 sm:$0xff]   ;;  %v6453_v45 = vld [vmem:[%s8964_s1 + $0xc08] ss:$16 sps:$4 sm:$0xff]  }
 0x14c   :  { %4103 = vmatprep.subr.bf16.mxu0 %v6374_v46  ;;  %4513 = vmatprep.subr.bf16.mxu1 %v6377_v47  ;;  %v6458_v46 = vld [vmem:[%s8964_s1 + $0xc24] ss:$16 sps:$4 sm:$0xff]   ;;  %v8134_v47 = vrot.slane %v729_v34, %v7026_v49 }
 0x14f   :  { %4104 = vmatpush1.bf16.msra.mxu0 %v6372_v48  ;;  %4514 = vmatpush1.bf16.msra.mxu1 %v6375_v50  ;;  %v6456_v48 = vld [vmem:[%s8964_s1 + $0xc20] ss:$16 sps:$4 sm:$0xff]   ;;  %v6459_v50 = vld [vmem:[%s8964_s1 + $0xc28] ss:$16 sps:$4 sm:$0xff]  }
 0x150   :  { %4105 = vmatprep.subr.bf16.mxu0 %v6380_v51  ;;  %4515 = vmatprep.subr.bf16.mxu1 %v6383_v53  ;;  %v6464_v51 = vld [vmem:[%s8964_s1 + $0xc44] ss:$16 sps:$4 sm:$0xff]   ;;  %v6467_v53 = vld [vmem:[%s8964_s1 + $0xc4c] ss:$16 sps:$4 sm:$0xff]  }
 0x153   :  { %4106 = vmatpush1.bf16.msra.mxu0 %v6378_v54  ;;  %4516 = vmatpush1.bf16.msra.mxu1 %v6381_v55  ;;  %v6462_v54 = vld [vmem:[%s8964_s1 + $0xc40] ss:$16 sps:$4 sm:$0xff]   ;;  %v6465_v55 = vld [vmem:[%s8964_s1 + $0xc48] ss:$16 sps:$4 sm:$0xff]  }
 0x154   :  { %4107 = vmatprep.subr.bf16.mxu0 %v6386_v56  ;;  %4517 = vmatprep.subr.bf16.mxu1 %v6389_v57  ;;  %v6470_v56 = vld [vmem:[%s8964_s1 + $0xc64] ss:$16 sps:$4 sm:$0xff]   ;;  %v6473_v57 = vld [vmem:[%s8964_s1 + $0xc6c] ss:$16 sps:$4 sm:$0xff]  }
 0x157   :  { %4108 = vmatpush1.bf16.msra.mxu0 %v6384_v58  ;;  %4518 = vmatpush1.bf16.msra.mxu1 %v6387_v59  ;;  %v6468_v58 = vld [vmem:[%s8964_s1 + $0xc60] ss:$16 sps:$4 sm:$0xff]   ;;  %v6471_v59 = vld [vmem:[%s8964_s1 + $0xc68] ss:$16 sps:$4 sm:$0xff]  }
 0x158   :  { %4109 = vmatprep.subr.bf16.mxu0 %v6392_v60  ;;  %4519 = vmatprep.subr.bf16.mxu1 %v6395_v61  ;;  %v6476_v60 = vld [vmem:[%s8964_s1 + $0xc84] ss:$16 sps:$4 sm:$0xff]   ;;  %v6479_v61 = vld [vmem:[%s8964_s1 + $0xc8c] ss:$16 sps:$4 sm:$0xff]  }
 0x15b   :  { %4110 = vmatpush1.bf16.msra.mxu0 %v6390_v62  ;;  %4520 = vmatpush1.bf16.msra.mxu1 %v6393_v63  ;;  %v6474_v62 = vld [vmem:[%s8964_s1 + $0xc80] ss:$16 sps:$4 sm:$0xff]   ;;  %v6477_v63 = vld [vmem:[%s8964_s1 + $0xc88] ss:$16 sps:$4 sm:$0xff]  }
 0x15c   :  { %4111 = vmatprep.subr.bf16.mxu0 %v6398_v0  ;;  %4521 = vmatprep.subr.bf16.mxu1 %v6401_v1  ;;  %v6482_v0 = vld [vmem:[%s8964_s1 + $0xca4] ss:$16 sps:$4 sm:$0xff]   ;;  %v6485_v1 = vld [vmem:[%s8964_s1 + $0xcac] ss:$16 sps:$4 sm:$0xff]  }
 0x15f   :  { %4112 = vmatpush1.bf16.msra.mxu0 %v6396_v2  ;;  %4522 = vmatpush1.bf16.msra.mxu1 %v6399_v3 }
 0x160   :  { %4113 = vmatprep.subr.bf16.mxu0 %v6404_v4  ;;  %4523 = vmatprep.subr.bf16.mxu1 %v6407_v5 }
 0x163   :  { %4114 = vmatpush1.bf16.msra.mxu0 %v6402_v6  ;;  %4524 = vmatpush1.bf16.msra.mxu1 %v6405_v7 }
 0x164   :  { %4115 = vmatprep.subr.bf16.mxu0 %v6410_v8  ;;  %4525 = vmatprep.subr.bf16.mxu1 %v6413_v9 }
 0x167   :  { %4116 = vmatpush1.bf16.msra.mxu0 %v6408_v10  ;;  %4526 = vmatpush1.bf16.msra.mxu1 %v6411_v11 }
 0x168   :  { %4117 = vmatprep.subr.bf16.mxu0 %v6416_v12  ;;  %4527 = vmatprep.subr.bf16.mxu1 %v6419_v52 }
 0x16b   :  { %4118 = vmatpush1.bf16.msra.mxu0 %v6414_v15  ;;  %4528 = vmatpush1.bf16.msra.mxu1 %v6417_v16 }
 0x16c   :  { %4119 = vmatprep.subr.bf16.mxu0 %v6422_v17  ;;  %4529 = vmatprep.subr.bf16.mxu1 %v6425_v18 }
 0x16f   :  { %4120 = vmatpush1.bf16.msra.mxu0 %v6420_v19  ;;  %4530 = vmatpush1.bf16.msra.mxu1 %v6423_v20 }
 0x170   :  { %4121 = vmatprep.subr.bf16.mxu0 %v6428_v22  ;;  %4531 = vmatprep.subr.bf16.mxu1 %v6431_v23 }
 0x173   :  { %4122 = vmatpush1.bf16.msra.mxu0 %v6426_v24  ;;  %4532 = vmatpush1.bf16.msra.mxu1 %v6429_v13 }
 0x174   :  { %4123 = vmatprep.subr.bf16.mxu0 %v6434_v27  ;;  %4533 = vmatprep.subr.bf16.mxu1 %v6437_v28 }
 0x177   :  { %4124 = vmatpush1.bf16.msra.mxu0 %v6432_v29  ;;  %4534 = vmatpush1.bf16.msra.mxu1 %v6435_v14 }
 0x178   :  { %4125 = vmatprep.subr.bf16.mxu0 %v6440_v30  ;;  %4535 = vmatprep.subr.bf16.mxu1 %v6443_v31 }
 0x17b   :  { %4126 = vmatpush1.bf16.msra.mxu0 %v6438_v33  ;;  %4536 = vmatpush1.bf16.msra.mxu1 %v6441_v26 }
 0x17c   :  { %4127 = vmatprep.subr.bf16.mxu0 %v6446_v36  ;;  %4537 = vmatprep.subr.bf16.mxu1 %v6449_v37 }
 0x17f   :  { %4128 = vmatpush1.bf16.msra.mxu0 %v6444_v21  ;;  %4538 = vmatpush1.bf16.msra.mxu1 %v6447_v39 }
 0x180   :  { %4138 = vmatprep.subr.bf16.mxu0 %v6452_v40  ;;  %4548 = vmatprep.subr.bf16.mxu1 %v6455_v41 }
 0x182   :  { %4130 = vmatmul.mubr.bf16.vlgmr.msra.gmra.mrb[0].mxu0 %v758_v43  ;;  %4540 = vmatmul.mubr.bf16.vlgmr.msra.gmra.mrb[0].mxu1 %v758_v43 }
 0x183   :  { %4139 = vmatpush1.bf16.msra.mxu0 %v6450_v44  ;;  %4549 = vmatpush1.bf16.msra.mxu1 %v6453_v45 }
 0x184   :  { %4140 = vmatprep.subr.bf16.mxu0 %v6458_v46  ;;  %4550 = vmatprep.subr.bf16.mxu1 %v6461_v35 }
 0x185   :  { %4170 = vmatprep.mubr.bf16.mxu0 %v8134_v47  ;;  %4580 = vmatprep.mubr.bf16.mxu1 %v8134_v47 }
 0x187   :  { %4141 = vmatpush1.bf16.msra.mxu0 %v6456_v48  ;;  %4551 = vmatpush1.bf16.msra.mxu1 %v6459_v50 }
 0x188   :  { %4142 = vmatprep.subr.bf16.mxu0 %v6464_v51  ;;  %4552 = vmatprep.subr.bf16.mxu1 %v6467_v53 }
 0x18b   :  { %4143 = vmatpush1.bf16.msra.mxu0 %v6462_v54  ;;  %4553 = vmatpush1.bf16.msra.mxu1 %v6465_v55 }
 0x18c   :  { %4144 = vmatprep.subr.bf16.mxu0 %v6470_v56  ;;  %4554 = vmatprep.subr.bf16.mxu1 %v6473_v57 }
 0x18f   :  { %4145 = vmatpush1.bf16.msra.mxu0 %v6468_v58  ;;  %4555 = vmatpush1.bf16.msra.mxu1 %v6471_v59 }
 0x190   :  { %4146 = vmatprep.subr.bf16.mxu0 %v6476_v60  ;;  %4556 = vmatprep.subr.bf16.mxu1 %v6479_v61 }
 0x191   :  { %10 = vsyncpa [#allocation3], 0  ;;  %v6480_v2 = vld [vmem:[%s8964_s1 + $0xca0] ss:$16 sps:$4 sm:$0xff]   ;;  %v6483_v3 = vld [vmem:[%s8964_s1 + $0xca8] ss:$16 sps:$4 sm:$0xff]   ;;  %v8320_v48 = vrot.slane %v8103_v38, %v7026_v49  ;;  %v761_v54 = vcombine.high %v8134_v47, %v8134_v47 }
 0x192   :  { %v6488_v4 = vld [vmem:[%s8964_s1 + $0xcc4] ss:$16 sps:$4 sm:$0xff]   ;;  %v6491_v5 = vld [vmem:[%s8964_s1 + $0xccc] ss:$16 sps:$4 sm:$0xff]   ;;  %v6486_v6 = vld [vmem:[%s8964_s1 + $0xcc0] ss:$16 sps:$4 sm:$0xff]  }
 0x193   :  { %4147 = vmatpush1.bf16.msra.mxu0 %v6474_v62  ;;  %4557 = vmatpush1.bf16.msra.mxu1 %v6477_v63  ;;  %v6489_v7 = vld [vmem:[%s8964_s1 + $0xcc8] ss:$16 sps:$4 sm:$0xff]   ;;  %v6494_v8 = vld [vmem:[%s8964_s1 + $0xce4] ss:$16 sps:$4 sm:$0xff]   ;;  %v6497_v9 = vld [vmem:[%s8964_s1 + $0xcec] ss:$16 sps:$4 sm:$0xff]  }
 0x194   :  { %4148 = vmatprep.subr.bf16.mxu0 %v6482_v0  ;;  %4558 = vmatprep.subr.bf16.mxu1 %v6485_v1  ;;  %v6492_v10 = vld [vmem:[%s8964_s1 + $0xce0] ss:$16 sps:$4 sm:$0xff]   ;;  %v6495_v11 = vld [vmem:[%s8964_s1 + $0xce8] ss:$16 sps:$4 sm:$0xff]   ;;  %v6500_v12 = vld [vmem:[%s8964_s1 + $0xd04] ss:$16 sps:$4 sm:$0xff]  }
 0x195   :  { %v6503_v52 = vld [vmem:[%s8964_s1 + $0xd0c] ss:$16 sps:$4 sm:$0xff]   ;;  %v6498_v15 = vld [vmem:[%s8964_s1 + $0xd00] ss:$16 sps:$4 sm:$0xff]   ;;  %v6501_v16 = vld [vmem:[%s8964_s1 + $0xd08] ss:$16 sps:$4 sm:$0xff]  }
 0x196   :  { %v6506_v17 = vld [vmem:[%s8964_s1 + $0xd24] ss:$16 sps:$4 sm:$0xff]   ;;  %v6509_v18 = vld [vmem:[%s8964_s1 + $0xd2c] ss:$16 sps:$4 sm:$0xff]   ;;  %v6504_v19 = vld [vmem:[%s8964_s1 + $0xd20] ss:$16 sps:$4 sm:$0xff]  }
 0x197   :  { %4149 = vmatpush1.bf16.msra.mxu0 %v6480_v2  ;;  %4559 = vmatpush1.bf16.msra.mxu1 %v6483_v3  ;;  %v6507_v20 = vld [vmem:[%s8964_s1 + $0xd28] ss:$16 sps:$4 sm:$0xff]   ;;  %v6512_v22 = vld [vmem:[%s8964_s1 + $0xd44] ss:$16 sps:$4 sm:$0xff]   ;;  %v6515_v23 = vld [vmem:[%s8964_s1 + $0xd4c] ss:$16 sps:$4 sm:$0xff]  }
 0x198   :  { %4150 = vmatprep.subr.bf16.mxu0 %v6488_v4  ;;  %4560 = vmatprep.subr.bf16.mxu1 %v6491_v5  ;;  %v6510_v24 = vld [vmem:[%s8964_s1 + $0xd40] ss:$16 sps:$4 sm:$0xff]   ;;  %v6513_v13 = vld [vmem:[%s8964_s1 + $0xd48] ss:$16 sps:$4 sm:$0xff]   ;;  %v6518_v27 = vld [vmem:[%s8964_s1 + $0xd64] ss:$16 sps:$4 sm:$0xff]  }
 0x199   :  { %v6521_v28 = vld [vmem:[%s8964_s1 + $0xd6c] ss:$16 sps:$4 sm:$0xff]   ;;  %v6516_v29 = vld [vmem:[%s8964_s1 + $0xd60] ss:$16 sps:$4 sm:$0xff]   ;;  %v6519_v14 = vld [vmem:[%s8964_s1 + $0xd68] ss:$16 sps:$4 sm:$0xff]  }
 0x19a   :  { %v6524_v30 = vld [vmem:[%s8964_s1 + $0xd84] ss:$16 sps:$4 sm:$0xff]   ;;  %v6527_v31 = vld [vmem:[%s8964_s1 + $0xd8c] ss:$16 sps:$4 sm:$0xff]   ;;  %v6522_v25 = vld [vmem:[%s8964_s1 + $0xd80] ss:$16 sps:$4 sm:$0xff]  }
 0x19b   :  { %4151 = vmatpush1.bf16.msra.mxu0 %v6486_v6  ;;  %4561 = vmatpush1.bf16.msra.mxu1 %v6489_v7  ;;  %v6525_v32 = vld [vmem:[%s8964_s1 + $0xd88] ss:$16 sps:$4 sm:$0xff]   ;;  %v6530_v33 = vld [vmem:[%s8964_s1 + $0xda4] ss:$16 sps:$4 sm:$0xff]   ;;  %v6533_v26 = vld [vmem:[%s8964_s1 + $0xdac] ss:$16 sps:$4 sm:$0xff]  }
 0x19c   :  { %4152 = vmatprep.subr.bf16.mxu0 %v6494_v8  ;;  %4562 = vmatprep.subr.bf16.mxu1 %v6497_v9  ;;  %v6528_v36 = vld [vmem:[%s8964_s1 + $0xda0] ss:$16 sps:$4 sm:$0xff]   ;;  %v6531_v37 = vld [vmem:[%s8964_s1 + $0xda8] ss:$16 sps:$4 sm:$0xff]   ;;  %v6536_v21 = vld [vmem:[%s8964_s1 + $0xdc4] ss:$16 sps:$4 sm:$0xff]  }
 0x19d   :  { %v6539_v39 = vld [vmem:[%s8964_s1 + $0xdcc] ss:$16 sps:$4 sm:$0xff]   ;;  %v6534_v40 = vld [vmem:[%s8964_s1 + $0xdc0] ss:$16 sps:$4 sm:$0xff]   ;;  %v6537_v41 = vld [vmem:[%s8964_s1 + $0xdc8] ss:$16 sps:$4 sm:$0xff]  }
 0x19e   :  { %v6542_v34 = vld [vmem:[%s8964_s1 + $0xde4] ss:$16 sps:$4 sm:$0xff]   ;;  %v6545_v43 = vld [vmem:[%s8964_s1 + $0xdec] ss:$16 sps:$4 sm:$0xff]   ;;  %v6540_v44 = vld [vmem:[%s8964_s1 + $0xde0] ss:$16 sps:$4 sm:$0xff]  }
 0x19f   :  { %4153 = vmatpush1.bf16.msra.mxu0 %v6492_v10  ;;  %4563 = vmatpush1.bf16.msra.mxu1 %v6495_v11  ;;  %v6543_v45 = vld [vmem:[%s8964_s1 + $0xde8] ss:$16 sps:$4 sm:$0xff]   ;;  %v6549_v46 = vld [vmem:[%s8964_s1 + $0xe04] ss:$16 sps:$4 sm:$0xff]   ;;  %v6552_v35 = vld [vmem:[%s8964_s1 + $0xe0c] ss:$16 sps:$4 sm:$0xff]  }
 0x1a0   :  { %4154 = vmatprep.subr.bf16.mxu0 %v6500_v12  ;;  %4564 = vmatprep.subr.bf16.mxu1 %v6503_v52  ;;  %v6547_v50 = vld [vmem:[%s8964_s1 + $0xe00] ss:$16 sps:$4 sm:$0xff]   ;;  %v6550_v51 = vld [vmem:[%s8964_s1 + $0xe08] ss:$16 sps:$4 sm:$0xff]   ;;  %v6555_v53 = vld [vmem:[%s8964_s1 + $0xe24] ss:$16 sps:$4 sm:$0xff]  }
 0x1a1   :  { %v6558_v38 = vld [vmem:[%s8964_s1 + $0xe2c] ss:$16 sps:$4 sm:$0xff]   ;;  %v6553_v55 = vld [vmem:[%s8964_s1 + $0xe20] ss:$16 sps:$4 sm:$0xff]   ;;  %v6556_v56 = vld [vmem:[%s8964_s1 + $0xe28] ss:$16 sps:$4 sm:$0xff]  }
 0x1a2   :  { %v6561_v47 = vld [vmem:[%s8964_s1 + $0xe44] ss:$16 sps:$4 sm:$0xff]   ;;  %v6564_v57 = vld [vmem:[%s8964_s1 + $0xe4c] ss:$16 sps:$4 sm:$0xff]   ;;  %v6559_v58 = vld [vmem:[%s8964_s1 + $0xe40] ss:$16 sps:$4 sm:$0xff]  }
 0x1a3   :  { %4155 = vmatpush1.bf16.msra.mxu0 %v6498_v15  ;;  %4565 = vmatpush1.bf16.msra.mxu1 %v6501_v16  ;;  %v6562_v59 = vld [vmem:[%s8964_s1 + $0xe48] ss:$16 sps:$4 sm:$0xff]   ;;  %v6567_v60 = vld [vmem:[%s8964_s1 + $0xe64] ss:$16 sps:$4 sm:$0xff]   ;;  %v6570_v61 = vld [vmem:[%s8964_s1 + $0xe6c] ss:$16 sps:$4 sm:$0xff]  }
 0x1a4   :  { %4156 = vmatprep.subr.bf16.mxu0 %v6506_v17  ;;  %4566 = vmatprep.subr.bf16.mxu1 %v6509_v18  ;;  %v6565_v62 = vld [vmem:[%s8964_s1 + $0xe60] ss:$16 sps:$4 sm:$0xff]   ;;  %v6568_v63 = vld [vmem:[%s8964_s1 + $0xe68] ss:$16 sps:$4 sm:$0xff]   ;;  %v6573_v0 = vld [vmem:[%s8964_s1 + $0xe84] ss:$16 sps:$4 sm:$0xff]  }
 0x1a5   :  { %v6576_v1 = vld [vmem:[%s8964_s1 + $0xe8c] ss:$16 sps:$4 sm:$0xff]   ;;  %v6571_v2 = vld [vmem:[%s8964_s1 + $0xe80] ss:$16 sps:$4 sm:$0xff]   ;;  %v6574_v3 = vld [vmem:[%s8964_s1 + $0xe88] ss:$16 sps:$4 sm:$0xff]  }
 0x1a6   :  { %v6579_v4 = vld [vmem:[%s8964_s1 + $0xea4] ss:$16 sps:$4 sm:$0xff]   ;;  %v6582_v5 = vld [vmem:[%s8964_s1 + $0xeac] ss:$16 sps:$4 sm:$0xff]   ;;  %v6577_v6 = vld [vmem:[%s8964_s1 + $0xea0] ss:$16 sps:$4 sm:$0xff]  }
 0x1a7   :  { %4157 = vmatpush1.bf16.msra.mxu0 %v6504_v19  ;;  %4567 = vmatpush1.bf16.msra.mxu1 %v6507_v20  ;;  %v6580_v7 = vld [vmem:[%s8964_s1 + $0xea8] ss:$16 sps:$4 sm:$0xff]   ;;  %v6585_v8 = vld [vmem:[%s8964_s1 + $0xec4] ss:$16 sps:$4 sm:$0xff]   ;;  %v6588_v9 = vld [vmem:[%s8964_s1 + $0xecc] ss:$16 sps:$4 sm:$0xff]  }
 0x1a8   :  { %4158 = vmatprep.subr.bf16.mxu0 %v6512_v22  ;;  %4568 = vmatprep.subr.bf16.mxu1 %v6515_v23  ;;  %v6583_v10 = vld [vmem:[%s8964_s1 + $0xec0] ss:$16 sps:$4 sm:$0xff]   ;;  %v6586_v11 = vld [vmem:[%s8964_s1 + $0xec8] ss:$16 sps:$4 sm:$0xff]   ;;  %v6591_v12 = vld [vmem:[%s8964_s1 + $0xee4] ss:$16 sps:$4 sm:$0xff]  }
 0x1a9   :  { %v6594_v52 = vld [vmem:[%s8964_s1 + $0xeec] ss:$16 sps:$4 sm:$0xff]   ;;  %v6589_v15 = vld [vmem:[%s8964_s1 + $0xee0] ss:$16 sps:$4 sm:$0xff]   ;;  %v6592_v16 = vld [vmem:[%s8964_s1 + $0xee8] ss:$16 sps:$4 sm:$0xff]  }
 0x1aa   :  { %v6597_v17 = vld [vmem:[%s8964_s1 + $0xf04] ss:$16 sps:$4 sm:$0xff]   ;;  %v6600_v18 = vld [vmem:[%s8964_s1 + $0xf0c] ss:$16 sps:$4 sm:$0xff]   ;;  %v6595_v19 = vld [vmem:[%s8964_s1 + $0xf00] ss:$16 sps:$4 sm:$0xff]  }
 0x1ab   :  { %4159 = vmatpush1.bf16.msra.mxu0 %v6510_v24  ;;  %4569 = vmatpush1.bf16.msra.mxu1 %v6513_v13  ;;  %v6598_v20 = vld [vmem:[%s8964_s1 + $0xf08] ss:$16 sps:$4 sm:$0xff]   ;;  %v6603_v22 = vld [vmem:[%s8964_s1 + $0xf24] ss:$16 sps:$4 sm:$0xff]   ;;  %v6606_v23 = vld [vmem:[%s8964_s1 + $0xf2c] ss:$16 sps:$4 sm:$0xff]  }
 0x1ac   :  { %4160 = vmatprep.subr.bf16.mxu0 %v6518_v27  ;;  %4570 = vmatprep.subr.bf16.mxu1 %v6521_v28  ;;  %v6601_v24 = vld [vmem:[%s8964_s1 + $0xf20] ss:$16 sps:$4 sm:$0xff]   ;;  %v6604_v13 = vld [vmem:[%s8964_s1 + $0xf28] ss:$16 sps:$4 sm:$0xff]   ;;  %v6609_v27 = vld [vmem:[%s8964_s1 + $0xf44] ss:$16 sps:$4 sm:$0xff]  }
 0x1ad   :  { %v6612_v28 = vld [vmem:[%s8964_s1 + $0xf4c] ss:$16 sps:$4 sm:$0xff]   ;;  %vm3875_vm0 = vcmask 146432   ;;  %vm3879_vm1 = vcmask 1040384   ;;  %vm4983_vm2 = vcmask 1041408   ;;  %vm4979_vm3 = vcmask 949248  }
 0x1ae   :  { %vm5067_vm4 = vcmask 74752  }
 0x1af   :  { %4161 = vmatpush1.bf16.msra.mxu0 %v6516_v29  ;;  %4571 = vmatpush1.bf16.msra.mxu1 %v6519_v14  ;;  %v6607_v29 = vld [vmem:[%s8964_s1 + $0xf40] ss:$16 sps:$4 sm:$0xff]   ;;  %v6610_v14 = vld [vmem:[%s8964_s1 + $0xf48] ss:$16 sps:$4 sm:$0xff]  }
 0x1b0   :  { %4162 = vmatprep.subr.bf16.mxu0 %v6524_v30  ;;  %4572 = vmatprep.subr.bf16.mxu1 %v6527_v31  ;;  %v6615_v30 = vld [vmem:[%s8964_s1 + $0xf64] ss:$16 sps:$4 sm:$0xff]   ;;  %v6618_v31 = vld [vmem:[%s8964_s1 + $0xf6c] ss:$16 sps:$4 sm:$0xff]  }
 0x1b3   :  { %4163 = vmatpush1.bf16.msra.mxu0 %v6522_v25  ;;  %4573 = vmatpush1.bf16.msra.mxu1 %v6525_v32  ;;  %v6613_v25 = vld [vmem:[%s8964_s1 + $0xf60] ss:$16 sps:$4 sm:$0xff]   ;;  %v6616_v32 = vld [vmem:[%s8964_s1 + $0xf68] ss:$16 sps:$4 sm:$0xff]  }
 0x1b4   :  { %4164 = vmatprep.subr.bf16.mxu0 %v6530_v33  ;;  %4574 = vmatprep.subr.bf16.mxu1 %v6533_v26  ;;  %v6621_v33 = vld [vmem:[%s8964_s1 + $0xf84] ss:$16 sps:$4 sm:$0xff]   ;;  %v6624_v26 = vld [vmem:[%s8964_s1 + $0xf8c] ss:$16 sps:$4 sm:$0xff]  }
 0x1b7   :  { %4165 = vmatpush1.bf16.msra.mxu0 %v6528_v36  ;;  %4575 = vmatpush1.bf16.msra.mxu1 %v6531_v37  ;;  %v6619_v36 = vld [vmem:[%s8964_s1 + $0xf80] ss:$16 sps:$4 sm:$0xff]   ;;  %v6622_v37 = vld [vmem:[%s8964_s1 + $0xf88] ss:$16 sps:$4 sm:$0xff]  }
 0x1b8   :  { %4166 = vmatprep.subr.bf16.mxu0 %v6536_v21  ;;  %4576 = vmatprep.subr.bf16.mxu1 %v6539_v39  ;;  %v6627_v21 = vld [vmem:[%s8964_s1 + $0xfa4] ss:$16 sps:$4 sm:$0xff]   ;;  %v6630_v39 = vld [vmem:[%s8964_s1 + $0xfac] ss:$16 sps:$4 sm:$0xff]  }
 0x1bb   :  { %4167 = vmatpush1.bf16.msra.mxu0 %v6534_v40  ;;  %4577 = vmatpush1.bf16.msra.mxu1 %v6537_v41  ;;  %v6625_v40 = vld [vmem:[%s8964_s1 + $0xfa0] ss:$16 sps:$4 sm:$0xff]   ;;  %v6628_v41 = vld [vmem:[%s8964_s1 + $0xfa8] ss:$16 sps:$4 sm:$0xff]  }
 0x1bc   :  { %4168 = vmatprep.subr.bf16.mxu0 %v6542_v34  ;;  %4578 = vmatprep.subr.bf16.mxu1 %v6545_v43  ;;  %v6633_v34 = vld [vmem:[%s8964_s1 + $0xfc4] ss:$16 sps:$4 sm:$0xff]   ;;  %v6636_v43 = vld [vmem:[%s8964_s1 + $0xfcc] ss:$16 sps:$4 sm:$0xff]  }
 0x1bf   :  { %4169 = vmatpush1.bf16.msra.mxu0 %v6540_v44  ;;  %4579 = vmatpush1.bf16.msra.mxu1 %v6543_v45  ;;  %v6631_v44 = vld [vmem:[%s8964_s1 + $0xfc0] ss:$16 sps:$4 sm:$0xff]   ;;  %v6634_v45 = vld [vmem:[%s8964_s1 + $0xfc8] ss:$16 sps:$4 sm:$0xff]  }
 0x1c0   :  { %4179 = vmatprep.subr.bf16.mxu0 %v6549_v46  ;;  %4589 = vmatprep.subr.bf16.mxu1 %v6552_v35  ;;  %v6639_v46 = vld [vmem:[%s8964_s1 + $0xfe4] ss:$16 sps:$4 sm:$0xff]   ;;  %v6642_v35 = vld [vmem:[%s8964_s1 + $0xfec] ss:$16 sps:$4 sm:$0xff]  }
 0x1c2   :  { %4171 = vmatmul.mubr.bf16.vlgmr.msra.gmra.mrb[0].mxu0 %v8320_v48  ;;  %4581 = vmatmul.mubr.bf16.vlgmr.msra.gmra.mrb[0].mxu1 %v8320_v48 }
 0x1c3   :  { %4180 = vmatpush1.bf16.msra.mxu0 %v6547_v50  ;;  %4590 = vmatpush1.bf16.msra.mxu1 %v6550_v51  ;;  %v8509_v50 = vld.sshfl [vmem:[%s8963_s0 + $0x10] sm:$0x33 pattern:$0x75316420] }
 0x1c4   :  { %4181 = vmatprep.subr.bf16.mxu0 %v6555_v53  ;;  %4591 = vmatprep.subr.bf16.mxu1 %v6558_v38  ;;  %v6637_v51 = vld [vmem:[%s8964_s1 + $0xfe0] ss:$16 sps:$4 sm:$0xff]   ;;  %v6640_v53 = vld [vmem:[%s8964_s1 + $0xfe8] ss:$16 sps:$4 sm:$0xff]   ;;  %v6645_v38 = vld [vmem:[%s8964_s1 + $0x1004] ss:$16 sps:$4 sm:$0xff]  }
 0x1c5   :  { %4211 = vmatprep.mubr.bf16.mxu0 %v761_v54  ;;  %4621 = vmatprep.mubr.bf16.mxu1 %v761_v54  ;;  %v6648_v54 = vld [vmem:[%s8964_s1 + $0x100c] ss:$16 sps:$4 sm:$0xff]  }
 0x1c7   :  { %4182 = vmatpush1.bf16.msra.mxu0 %v6553_v55  ;;  %4592 = vmatpush1.bf16.msra.mxu1 %v6556_v56  ;;  %v769_v55 = vcombine.high %v8509_v50, %v8509_v50  ;;  %v759_v56 = vcombine.high %v8320_v48, %v8320_v48  ;;  %v6654_v48 = vld [vmem:[%s8964_s1 + $0x102c] ss:$16 sps:$4 sm:$0xff]  }
 0x1c8   :  { %4183 = vmatprep.subr.bf16.mxu0 %v6561_v47  ;;  %4593 = vmatprep.subr.bf16.mxu1 %v6564_v57  ;;  %v6643_v47 = vld [vmem:[%s8964_s1 + $0x1000] ss:$16 sps:$4 sm:$0xff]   ;;  %v6646_v57 = vld [vmem:[%s8964_s1 + $0x1008] ss:$16 sps:$4 sm:$0xff]  }
 0x1cb   :  { %4184 = vmatpush1.bf16.msra.mxu0 %v6559_v58  ;;  %4594 = vmatpush1.bf16.msra.mxu1 %v6562_v59  ;;  %v6651_v58 = vld [vmem:[%s8964_s1 + $0x1024] ss:$16 sps:$4 sm:$0xff]   ;;  %v8540_v59 = vrot.slane %v769_v55, %v7026_v49 }
 0x1cc   :  { %4185 = vmatprep.subr.bf16.mxu0 %v6567_v60  ;;  %4595 = vmatprep.subr.bf16.mxu1 %v6570_v61  ;;  %v6649_v60 = vld [vmem:[%s8964_s1 + $0x1020] ss:$16 sps:$4 sm:$0xff]   ;;  %v6652_v61 = vld [vmem:[%s8964_s1 + $0x1028] ss:$16 sps:$4 sm:$0xff]   ;;  %v6735_v55 = vld [vmem:[%s8964_s1 + $0x11e4] ss:$16 sps:$4 sm:$0xff]  }
 0x1cf   :  { %4186 = vmatpush1.bf16.msra.mxu0 %v6565_v62  ;;  %4596 = vmatpush1.bf16.msra.mxu1 %v6568_v63  ;;  %v6657_v62 = vld [vmem:[%s8964_s1 + $0x1044] ss:$16 sps:$4 sm:$0xff]   ;;  %v6660_v63 = vld [vmem:[%s8964_s1 + $0x104c] ss:$16 sps:$4 sm:$0xff]  }
 0x1d0   :  { %4187 = vmatprep.subr.bf16.mxu0 %v6573_v0  ;;  %4597 = vmatprep.subr.bf16.mxu1 %v6576_v1  ;;  %v6655_v0 = vld [vmem:[%s8964_s1 + $0x1040] ss:$16 sps:$4 sm:$0xff]   ;;  %v6658_v1 = vld [vmem:[%s8964_s1 + $0x1048] ss:$16 sps:$4 sm:$0xff]  }
 0x1d3   :  { %4188 = vmatpush1.bf16.msra.mxu0 %v6571_v2  ;;  %4598 = vmatpush1.bf16.msra.mxu1 %v6574_v3  ;;  %v6663_v2 = vld [vmem:[%s8964_s1 + $0x1064] ss:$16 sps:$4 sm:$0xff]   ;;  %v6666_v3 = vld [vmem:[%s8964_s1 + $0x106c] ss:$16 sps:$4 sm:$0xff]  }
 0x1d4   :  { %4189 = vmatprep.subr.bf16.mxu0 %v6579_v4  ;;  %4599 = vmatprep.subr.bf16.mxu1 %v6582_v5  ;;  %v6661_v4 = vld [vmem:[%s8964_s1 + $0x1060] ss:$16 sps:$4 sm:$0xff]   ;;  %v6664_v5 = vld [vmem:[%s8964_s1 + $0x1068] ss:$16 sps:$4 sm:$0xff]  }
 0x1d7   :  { %4190 = vmatpush1.bf16.msra.mxu0 %v6577_v6  ;;  %4600 = vmatpush1.bf16.msra.mxu1 %v6580_v7  ;;  %v6669_v6 = vld [vmem:[%s8964_s1 + $0x1084] ss:$16 sps:$4 sm:$0xff]   ;;  %v6672_v7 = vld [vmem:[%s8964_s1 + $0x108c] ss:$16 sps:$4 sm:$0xff]  }
 0x1d8   :  { %4191 = vmatprep.subr.bf16.mxu0 %v6585_v8  ;;  %4601 = vmatprep.subr.bf16.mxu1 %v6588_v9  ;;  %v6667_v8 = vld [vmem:[%s8964_s1 + $0x1080] ss:$16 sps:$4 sm:$0xff]   ;;  %v6670_v9 = vld [vmem:[%s8964_s1 + $0x1088] ss:$16 sps:$4 sm:$0xff]  }
 0x1db   :  { %4192 = vmatpush1.bf16.msra.mxu0 %v6583_v10  ;;  %4602 = vmatpush1.bf16.msra.mxu1 %v6586_v11  ;;  %v6675_v10 = vld [vmem:[%s8964_s1 + $0x10a4] ss:$16 sps:$4 sm:$0xff]   ;;  %v6678_v11 = vld [vmem:[%s8964_s1 + $0x10ac] ss:$16 sps:$4 sm:$0xff]  }
 0x1dc   :  { %4193 = vmatprep.subr.bf16.mxu0 %v6591_v12  ;;  %4603 = vmatprep.subr.bf16.mxu1 %v6594_v52  ;;  %v6673_v12 = vld [vmem:[%s8964_s1 + $0x10a0] ss:$16 sps:$4 sm:$0xff]   ;;  %v6676_v52 = vld [vmem:[%s8964_s1 + $0x10a8] ss:$16 sps:$4 sm:$0xff]  }
 0x1df   :  { %4194 = vmatpush1.bf16.msra.mxu0 %v6589_v15  ;;  %4604 = vmatpush1.bf16.msra.mxu1 %v6592_v16  ;;  %v6681_v15 = vld [vmem:[%s8964_s1 + $0x10c4] ss:$16 sps:$4 sm:$0xff]   ;;  %v6684_v16 = vld [vmem:[%s8964_s1 + $0x10cc] ss:$16 sps:$4 sm:$0xff]  }
 0x1e0   :  { %4195 = vmatprep.subr.bf16.mxu0 %v6597_v17  ;;  %4605 = vmatprep.subr.bf16.mxu1 %v6600_v18  ;;  %v6679_v17 = vld [vmem:[%s8964_s1 + $0x10c0] ss:$16 sps:$4 sm:$0xff]   ;;  %v6682_v18 = vld [vmem:[%s8964_s1 + $0x10c8] ss:$16 sps:$4 sm:$0xff]  }
 0x1e3   :  { %4196 = vmatpush1.bf16.msra.mxu0 %v6595_v19  ;;  %4606 = vmatpush1.bf16.msra.mxu1 %v6598_v20  ;;  %v6687_v19 = vld [vmem:[%s8964_s1 + $0x10e4] ss:$16 sps:$4 sm:$0xff]   ;;  %v6690_v20 = vld [vmem:[%s8964_s1 + $0x10ec] ss:$16 sps:$4 sm:$0xff]  }
 0x1e4   :  { %4197 = vmatprep.subr.bf16.mxu0 %v6603_v22  ;;  %4607 = vmatprep.subr.bf16.mxu1 %v6606_v23  ;;  %v6685_v22 = vld [vmem:[%s8964_s1 + $0x10e0] ss:$16 sps:$4 sm:$0xff]   ;;  %v6688_v23 = vld [vmem:[%s8964_s1 + $0x10e8] ss:$16 sps:$4 sm:$0xff]  }
 0x1e7   :  { %4198 = vmatpush1.bf16.msra.mxu0 %v6601_v24  ;;  %4608 = vmatpush1.bf16.msra.mxu1 %v6604_v13  ;;  %v6693_v24 = vld [vmem:[%s8964_s1 + $0x1104] ss:$16 sps:$4 sm:$0xff]   ;;  %v6696_v13 = vld [vmem:[%s8964_s1 + $0x110c] ss:$16 sps:$4 sm:$0xff]  }
 0x1e8   :  { %4199 = vmatprep.subr.bf16.mxu0 %v6609_v27  ;;  %4609 = vmatprep.subr.bf16.mxu1 %v6612_v28  ;;  %v6691_v27 = vld [vmem:[%s8964_s1 + $0x1100] ss:$16 sps:$4 sm:$0xff]   ;;  %v6694_v28 = vld [vmem:[%s8964_s1 + $0x1108] ss:$16 sps:$4 sm:$0xff]  }
 0x1eb   :  { %4200 = vmatpush1.bf16.msra.mxu0 %v6607_v29  ;;  %4610 = vmatpush1.bf16.msra.mxu1 %v6610_v14  ;;  %v6699_v29 = vld [vmem:[%s8964_s1 + $0x1124] ss:$16 sps:$4 sm:$0xff]   ;;  %v6702_v14 = vld [vmem:[%s8964_s1 + $0x112c] ss:$16 sps:$4 sm:$0xff]  }
 0x1ec   :  { %4201 = vmatprep.subr.bf16.mxu0 %v6615_v30  ;;  %4611 = vmatprep.subr.bf16.mxu1 %v6618_v31  ;;  %v6697_v30 = vld [vmem:[%s8964_s1 + $0x1120] ss:$16 sps:$4 sm:$0xff]   ;;  %v6700_v31 = vld [vmem:[%s8964_s1 + $0x1128] ss:$16 sps:$4 sm:$0xff]  }
 0x1ef   :  { %4202 = vmatpush1.bf16.msra.mxu0 %v6613_v25  ;;  %4612 = vmatpush1.bf16.msra.mxu1 %v6616_v32  ;;  %v6705_v25 = vld [vmem:[%s8964_s1 + $0x1144] ss:$16 sps:$4 sm:$0xff]   ;;  %v6708_v32 = vld [vmem:[%s8964_s1 + $0x114c] ss:$16 sps:$4 sm:$0xff]  }
 0x1f0   :  { %4203 = vmatprep.subr.bf16.mxu0 %v6621_v33  ;;  %4613 = vmatprep.subr.bf16.mxu1 %v6624_v26  ;;  %v6703_v33 = vld [vmem:[%s8964_s1 + $0x1140] ss:$16 sps:$4 sm:$0xff]   ;;  %v6706_v26 = vld [vmem:[%s8964_s1 + $0x1148] ss:$16 sps:$4 sm:$0xff]  }
 0x1f3   :  { %4204 = vmatpush1.bf16.msra.mxu0 %v6619_v36  ;;  %4614 = vmatpush1.bf16.msra.mxu1 %v6622_v37  ;;  %v6711_v36 = vld [vmem:[%s8964_s1 + $0x1164] ss:$16 sps:$4 sm:$0xff]   ;;  %v6714_v37 = vld [vmem:[%s8964_s1 + $0x116c] ss:$16 sps:$4 sm:$0xff]  }
 0x1f4   :  { %4205 = vmatprep.subr.bf16.mxu0 %v6627_v21  ;;  %4615 = vmatprep.subr.bf16.mxu1 %v6630_v39  ;;  %v6709_v21 = vld [vmem:[%s8964_s1 + $0x1160] ss:$16 sps:$4 sm:$0xff]   ;;  %v6712_v39 = vld [vmem:[%s8964_s1 + $0x1168] ss:$16 sps:$4 sm:$0xff]  }
 0x1f7   :  { %4206 = vmatpush1.bf16.msra.mxu0 %v6625_v40  ;;  %4616 = vmatpush1.bf16.msra.mxu1 %v6628_v41  ;;  %v6717_v40 = vld [vmem:[%s8964_s1 + $0x1184] ss:$16 sps:$4 sm:$0xff]   ;;  %v6720_v41 = vld [vmem:[%s8964_s1 + $0x118c] ss:$16 sps:$4 sm:$0xff]  }
 0x1f8   :  { %4207 = vmatprep.subr.bf16.mxu0 %v6633_v34  ;;  %4617 = vmatprep.subr.bf16.mxu1 %v6636_v43  ;;  %v6715_v34 = vld [vmem:[%s8964_s1 + $0x1180] ss:$16 sps:$4 sm:$0xff]   ;;  %v6718_v43 = vld [vmem:[%s8964_s1 + $0x1188] ss:$16 sps:$4 sm:$0xff]  }
 0x1fb   :  { %4208 = vmatpush1.bf16.msra.mxu0 %v6631_v44  ;;  %4618 = vmatpush1.bf16.msra.mxu1 %v6634_v45  ;;  %v6723_v44 = vld [vmem:[%s8964_s1 + $0x11a4] ss:$16 sps:$4 sm:$0xff]   ;;  %v6726_v45 = vld [vmem:[%s8964_s1 + $0x11ac] ss:$16 sps:$4 sm:$0xff]  }
 0x1fc   :  { %4209 = vmatprep.subr.bf16.mxu0 %v6639_v46  ;;  %4619 = vmatprep.subr.bf16.mxu1 %v6642_v35  ;;  %v6721_v46 = vld [vmem:[%s8964_s1 + $0x11a0] ss:$16 sps:$4 sm:$0xff]   ;;  %v6724_v35 = vld [vmem:[%s8964_s1 + $0x11a8] ss:$16 sps:$4 sm:$0xff]  }
 0x1ff   :  { %4210 = vmatpush1.bf16.msra.mxu0 %v6637_v51  ;;  %4620 = vmatpush1.bf16.msra.mxu1 %v6640_v53  ;;  %v6729_v51 = vld [vmem:[%s8964_s1 + $0x11c4] ss:$16 sps:$4 sm:$0xff]   ;;  %v6732_v53 = vld [vmem:[%s8964_s1 + $0x11cc] ss:$16 sps:$4 sm:$0xff]  }
 0x200   :  { %4220 = vmatprep.subr.bf16.mxu0 %v6645_v38  ;;  %4630 = vmatprep.subr.bf16.mxu1 %v6648_v54  ;;  %v6727_v38 = vld [vmem:[%s8964_s1 + $0x11c0] ss:$16 sps:$4 sm:$0xff]   ;;  %v6730_v54 = vld [vmem:[%s8964_s1 + $0x11c8] ss:$16 sps:$4 sm:$0xff]  }
 0x202   :  { %4212 = vmatmul.mubr.bf16.vlgmr.msra.gmra.mrb[0].mxu0 %v759_v56  ;;  %4622 = vmatmul.mubr.bf16.vlgmr.msra.gmra.mrb[0].mxu1 %v759_v56  ;;  %v6738_v56 = vld [vmem:[%s8964_s1 + $0x11ec] ss:$16 sps:$4 sm:$0xff]  }
 0x203   :  { %4221 = vmatpush1.bf16.msra.mxu0 %v6643_v47  ;;  %4631 = vmatpush1.bf16.msra.mxu1 %v6646_v57  ;;  %v6733_v47 = vld [vmem:[%s8964_s1 + $0x11e0] ss:$16 sps:$4 sm:$0xff]   ;;  %v6736_v57 = vld [vmem:[%s8964_s1 + $0x11e8] ss:$16 sps:$4 sm:$0xff]  }
 0x204   :  { %4222 = vmatprep.subr.bf16.mxu0 %v6651_v58  ;;  %4632 = vmatprep.subr.bf16.mxu1 %v6654_v48  ;;  %v6741_v58 = vld [vmem:[%s8964_s1 + $0x1204] ss:$16 sps:$4 sm:$0xff]   ;;  %v6744_v48 = vld [vmem:[%s8964_s1 + $0x120c] ss:$16 sps:$4 sm:$0xff]  }
 0x205   :  { %4252 = vmatprep.mubr.bf16.mxu0 %v8540_v59  ;;  %4662 = vmatprep.mubr.bf16.mxu1 %v8540_v59 }
 0x207   :  { %4223 = vmatpush1.bf16.msra.mxu0 %v6649_v60  ;;  %4633 = vmatpush1.bf16.msra.mxu1 %v6652_v61  ;;  %v8726_v60 = vrot.slane %v8509_v50, %v7026_v49  ;;  %v6739_v61 = vld [vmem:[%s8964_s1 + $0x1200] ss:$16 sps:$4 sm:$0xff]   ;;  %v6750_v49 = vld [vmem:[%s8964_s1 + $0x122c] ss:$16 sps:$4 sm:$0xff]   ;;  %v785_v50 = vcombine.high %v8540_v59, %v8540_v59  ;;  %v6753_v59 = vld [vmem:[%s8964_s1 + $0x1244] ss:$16 sps:$4 sm:$0xff]  }
 0x208   :  { %4224 = vmatprep.subr.bf16.mxu0 %v6657_v62  ;;  %4634 = vmatprep.subr.bf16.mxu1 %v6660_v63  ;;  %v6742_v62 = vld [vmem:[%s8964_s1 + $0x1208] ss:$16 sps:$4 sm:$0xff]   ;;  %v6747_v63 = vld [vmem:[%s8964_s1 + $0x1224] ss:$16 sps:$4 sm:$0xff]  }
 0x20b   :  { %4225 = vmatpush1.bf16.msra.mxu0 %v6655_v0  ;;  %4635 = vmatpush1.bf16.msra.mxu1 %v6658_v1  ;;  %v6745_v0 = vld [vmem:[%s8964_s1 + $0x1220] ss:$16 sps:$4 sm:$0xff]   ;;  %v6748_v1 = vld [vmem:[%s8964_s1 + $0x1228] ss:$16 sps:$4 sm:$0xff]  }
 0x20c   :  { %4226 = vmatprep.subr.bf16.mxu0 %v6663_v2  ;;  %4636 = vmatprep.subr.bf16.mxu1 %v6666_v3  ;;  %v6756_v2 = vld [vmem:[%s8964_s1 + $0x124c] ss:$16 sps:$4 sm:$0xff]   ;;  %v6751_v3 = vld [vmem:[%s8964_s1 + $0x1240] ss:$16 sps:$4 sm:$0xff]  }
 0x20f   :  { %4227 = vmatpush1.bf16.msra.mxu0 %v6661_v4  ;;  %4637 = vmatpush1.bf16.msra.mxu1 %v6664_v5  ;;  %v6754_v4 = vld [vmem:[%s8964_s1 + $0x1248] ss:$16 sps:$4 sm:$0xff]   ;;  %v6759_v5 = vld [vmem:[%s8964_s1 + $0x1264] ss:$16 sps:$4 sm:$0xff]  }
 0x210   :  { %4228 = vmatprep.subr.bf16.mxu0 %v6669_v6  ;;  %4638 = vmatprep.subr.bf16.mxu1 %v6672_v7  ;;  %v6762_v6 = vld [vmem:[%s8964_s1 + $0x126c] ss:$16 sps:$4 sm:$0xff]   ;;  %v6757_v7 = vld [vmem:[%s8964_s1 + $0x1260] ss:$16 sps:$4 sm:$0xff]  }
 0x213   :  { %4229 = vmatpush1.bf16.msra.mxu0 %v6667_v8  ;;  %4639 = vmatpush1.bf16.msra.mxu1 %v6670_v9  ;;  %v6760_v8 = vld [vmem:[%s8964_s1 + $0x1268] ss:$16 sps:$4 sm:$0xff]   ;;  %v6765_v9 = vld [vmem:[%s8964_s1 + $0x1284] ss:$16 sps:$4 sm:$0xff]  }
 0x214   :  { %4230 = vmatprep.subr.bf16.mxu0 %v6675_v10  ;;  %4640 = vmatprep.subr.bf16.mxu1 %v6678_v11  ;;  %v6768_v10 = vld [vmem:[%s8964_s1 + $0x128c] ss:$16 sps:$4 sm:$0xff]   ;;  %v6763_v11 = vld [vmem:[%s8964_s1 + $0x1280] ss:$16 sps:$4 sm:$0xff]  }
 0x217   :  { %4231 = vmatpush1.bf16.msra.mxu0 %v6673_v12  ;;  %4641 = vmatpush1.bf16.msra.mxu1 %v6676_v52  ;;  %v6766_v12 = vld [vmem:[%s8964_s1 + $0x1288] ss:$16 sps:$4 sm:$0xff]   ;;  %v6771_v52 = vld [vmem:[%s8964_s1 + $0x12a4] ss:$16 sps:$4 sm:$0xff]  }
 0x218   :  { %4232 = vmatprep.subr.bf16.mxu0 %v6681_v15  ;;  %4642 = vmatprep.subr.bf16.mxu1 %v6684_v16  ;;  %v6774_v15 = vld [vmem:[%s8964_s1 + $0x12ac] ss:$16 sps:$4 sm:$0xff]   ;;  %v6769_v16 = vld [vmem:[%s8964_s1 + $0x12a0] ss:$16 sps:$4 sm:$0xff]  }
 0x21b   :  { %4233 = vmatpush1.bf16.msra.mxu0 %v6679_v17  ;;  %4643 = vmatpush1.bf16.msra.mxu1 %v6682_v18  ;;  %v6772_v17 = vld [vmem:[%s8964_s1 + $0x12a8] ss:$16 sps:$4 sm:$0xff]   ;;  %v6777_v18 = vld [vmem:[%s8964_s1 + $0x12c4] ss:$16 sps:$4 sm:$0xff]  }
 0x21c   :  { %4234 = vmatprep.subr.bf16.mxu0 %v6687_v19  ;;  %4644 = vmatprep.subr.bf16.mxu1 %v6690_v20  ;;  %v6780_v19 = vld [vmem:[%s8964_s1 + $0x12cc] ss:$16 sps:$4 sm:$0xff]   ;;  %v6775_v20 = vld [vmem:[%s8964_s1 + $0x12c0] ss:$16 sps:$4 sm:$0xff]  }
 0x21f   :  { %4235 = vmatpush1.bf16.msra.mxu0 %v6685_v22  ;;  %4645 = vmatpush1.bf16.msra.mxu1 %v6688_v23  ;;  %v6778_v22 = vld [vmem:[%s8964_s1 + $0x12c8] ss:$16 sps:$4 sm:$0xff]   ;;  %v6783_v23 = vld [vmem:[%s8964_s1 + $0x12e4] ss:$16 sps:$4 sm:$0xff]  }
 0x220   :  { %4236 = vmatprep.subr.bf16.mxu0 %v6693_v24  ;;  %4646 = vmatprep.subr.bf16.mxu1 %v6696_v13  ;;  %v6786_v24 = vld [vmem:[%s8964_s1 + $0x12ec] ss:$16 sps:$4 sm:$0xff]   ;;  %v6781_v13 = vld [vmem:[%s8964_s1 + $0x12e0] ss:$16 sps:$4 sm:$0xff]  }
 0x223   :  { %4237 = vmatpush1.bf16.msra.mxu0 %v6691_v27  ;;  %4647 = vmatpush1.bf16.msra.mxu1 %v6694_v28  ;;  %v6784_v27 = vld [vmem:[%s8964_s1 + $0x12e8] ss:$16 sps:$4 sm:$0xff]   ;;  %v6789_v28 = vld [vmem:[%s8964_s1 + $0x1304] ss:$16 sps:$4 sm:$0xff]  }
 0x224   :  { %4238 = vmatprep.subr.bf16.mxu0 %v6699_v29  ;;  %4648 = vmatprep.subr.bf16.mxu1 %v6702_v14  ;;  %v6792_v29 = vld [vmem:[%s8964_s1 + $0x130c] ss:$16 sps:$4 sm:$0xff]   ;;  %v637_v14 = vld [vmem:[%s8964_s1 + $0x1320] sm:$0x11] }
 0x227   :  { %4239 = vmatpush1.bf16.msra.mxu0 %v6697_v30  ;;  %4649 = vmatpush1.bf16.msra.mxu1 %v6700_v31  ;;  %v638_v30 = vld [vmem:[%s8964_s1 + $0x1328] sm:$0x11]  ;;  %v6787_v31 = vld [vmem:[%s8964_s1 + $0x1300] ss:$16 sps:$4 sm:$0xff]  }
 0x228   :  { %4240 = vmatprep.subr.bf16.mxu0 %v6705_v25  ;;  %4650 = vmatprep.subr.bf16.mxu1 %v6708_v32  ;;  %v6790_v25 = vld [vmem:[%s8964_s1 + $0x1308] ss:$16 sps:$4 sm:$0xff]   ;;  %v5709_v32 = vcombine.high %v637_v14, %v637_v14 }
 0x22b   :  { %4241 = vmatpush1.bf16.msra.mxu0 %v6703_v33  ;;  %4651 = vmatpush1.bf16.msra.mxu1 %v6706_v26  ;;  %v5711_v33 = vcombine.high %v638_v30, %v638_v30  ;;  %v5708_v26 = vcombine.low %v637_v14, %v637_v14 }
 0x22c   :  { %4242 = vmatprep.subr.bf16.mxu0 %v6711_v36  ;;  %4652 = vmatprep.subr.bf16.mxu1 %v6714_v37  ;;  %v5710_v36 = vcombine.low %v638_v30, %v638_v30 }
 0x22d   :  { %v3881_v37 = vsel %vm3879_vm1, %v5708_v26, 0 }
 0x22f   :  { %4243 = vmatpush1.bf16.msra.mxu0 %v6709_v21  ;;  %4653 = vmatpush1.bf16.msra.mxu1 %v6712_v39  ;;  %v3887_v21 = vsel %vm3879_vm1, %v5710_v36, 0  ;;  %v6797_v39 = vld [vmem:[%s8966_s3 + $0x40] sm:$0xff]  }
 0x230   :  { %4244 = vmatprep.subr.bf16.mxu0 %v6717_v40  ;;  %4654 = vmatprep.subr.bf16.mxu1 %v6720_v41  ;;  %v6798_v40 = vld [vmem:[%s8966_s3 + $0xc0] sm:$0xff]   ;;  %v784_v41 = vcombine.high %v8726_v60, %v8726_v60 }
 0x233   :  { %4245 = vmatpush1.bf16.msra.mxu0 %v6715_v34  ;;  %4655 = vmatpush1.bf16.msra.mxu1 %v6718_v43  ;;  %v6799_v34 = vld [vmem:[%s8966_s3] sm:$0xff]  }
 0x234   :  { %4246 = vmatprep.subr.bf16.mxu0 %v6723_v44  ;;  %4656 = vmatprep.subr.bf16.mxu1 %v6726_v45  ;;  %v6800_v43 = vld [vmem:[%s8966_s3 + $0x80] sm:$0xff]   ;;  %v6801_v44 = vld [vmem:[%s8966_s3 + $0x48] sm:$0xff]  }
 0x235   :  { %v6802_v45 = vld [vmem:[%s8966_s3 + $0xc8] sm:$0xff]  }
 0x237   :  { %4247 = vmatpush1.bf16.msra.mxu0 %v6721_v46  ;;  %4657 = vmatpush1.bf16.msra.mxu1 %v6724_v35  ;;  %v6803_v46 = vld [vmem:[%s8966_s3 + $0x8] sm:$0xff]  }
 0x238   :  { %4248 = vmatprep.subr.bf16.mxu0 %v6729_v51  ;;  %4658 = vmatprep.subr.bf16.mxu1 %v6732_v53  ;;  %v6804_v35 = vld [vmem:[%s8966_s3 + $0x88] sm:$0xff]   ;;  %v6805_v51 = vld [vmem:[%s8966_s3 + $0x50] sm:$0xff]  }
 0x239   :  { %v6806_v53 = vld [vmem:[%s8966_s3 + $0xd0] sm:$0xff]  }
 0x23b   :  { %4249 = vmatpush1.bf16.msra.mxu0 %v6727_v38  ;;  %4659 = vmatpush1.bf16.msra.mxu1 %v6730_v54  ;;  %v6807_v38 = vld [vmem:[%s8966_s3 + $0x10] sm:$0xff]  }
 0x23c   :  { %4250 = vmatprep.subr.bf16.mxu0 %v6735_v55  ;;  %4660 = vmatprep.subr.bf16.mxu1 %v6738_v56  ;;  %v6808_v54 = vld [vmem:[%s8966_s3 + $0x90] sm:$0xff]   ;;  %v6809_v55 = vld [vmem:[%s8966_s3 + $0x58] sm:$0xff]  }
 0x23d   :  { %v6810_v56 = vld [vmem:[%s8966_s3 + $0xd8] sm:$0xff]  }
 0x23f   :  { %4251 = vmatpush1.bf16.msra.mxu0 %v6733_v47  ;;  %4661 = vmatpush1.bf16.msra.mxu1 %v6736_v57  ;;  %v6811_v47 = vld [vmem:[%s8966_s3 + $0x18] sm:$0xff]  }
 0x240   :  { %4261 = vmatprep.subr.bf16.mxu0 %v6741_v58  ;;  %4671 = vmatprep.subr.bf16.mxu1 %v6744_v48  ;;  %v6812_v57 = vld [vmem:[%s8966_s3 + $0x98] sm:$0xff]   ;;  %v6813_v58 = vld [vmem:[%s8966_s3 + $0x60] sm:$0xff]  }
 0x241   :  { %v6814_v48 = vld [vmem:[%s8966_s3 + $0xe0] sm:$0xff]  }
 0x242   :  { %4253 = vmatmul.mubr.bf16.vlgmr.msra.gmra.mrb[0].mxu0 %v8726_v60  ;;  %4663 = vmatmul.mubr.bf16.vlgmr.msra.gmra.mrb[0].mxu1 %v8726_v60  ;;  %v6815_v60 = vld [vmem:[%s8966_s3 + $0x20] sm:$0xff]  }
 0x243   :  { %4262 = vmatpush1.bf16.msra.mxu0 %v6739_v61  ;;  %4672 = vmatpush1.bf16.msra.mxu1 %v6742_v62  ;;  %v6816_v61 = vld [vmem:[%s8966_s3 + $0xa0] sm:$0xff]   ;;  %v6817_v62 = vld [vmem:[%s8966_s3 + $0x68] sm:$0xff]  }
 0x244   :  { %4263 = vmatprep.subr.bf16.mxu0 %v6747_v63  ;;  %4673 = vmatprep.subr.bf16.mxu1 %v6750_v49  ;;  %v6818_v63 = vld [vmem:[%s8966_s3 + $0xe8] sm:$0xff]  }
 0x245   :  { %5713 = vmatprep.mubr.msk.bf16.mxu0 %vm3875_vm0, %v785_v50  ;;  %5715 = vmatprep.mubr.msk.bf16.mxu1 %vm3875_vm0, %v785_v50  ;;  %v6819_v49 = vld [vmem:[%s8966_s3 + $0x28] sm:$0xff]  }
 0x246   :  { %v6820_v50 = vld [vmem:[%s8966_s3 + $0xa8] sm:$0xff]  }
 0x247   :  { %4264 = vmatpush1.bf16.msra.mxu0 %v6745_v0  ;;  %4674 = vmatpush1.bf16.msra.mxu1 %v6748_v1  ;;  %v6821_v0 = vld [vmem:[%s8966_s3 + $0x70] sm:$0xff]  }
 0x248   :  { %4265 = vmatprep.subr.bf16.mxu0 %v6753_v59  ;;  %4675 = vmatprep.subr.bf16.mxu1 %v6756_v2  ;;  %v6822_v1 = vld [vmem:[%s8966_s3 + $0xf0] sm:$0xff]  }
 0x249   :  { %v6823_v59 = vld [vmem:[%s8966_s3 + $0x30] sm:$0xff]  }
 0x24a   :  { %v6824_v2 = vld [vmem:[%s8966_s3 + $0xb0] sm:$0xff]  }
 0x24b   :  { %4266 = vmatpush1.bf16.msra.mxu0 %v6751_v3  ;;  %4676 = vmatpush1.bf16.msra.mxu1 %v6754_v4  ;;  %v6825_v3 = vld [vmem:[%s8966_s3 + $0x78] sm:$0xff]  }
 0x24c   :  { %4267 = vmatprep.subr.bf16.mxu0 %v6759_v5  ;;  %4677 = vmatprep.subr.bf16.mxu1 %v6762_v6  ;;  %v6826_v4 = vld [vmem:[%s8966_s3 + $0xf8] ss:$0 sps:$4 sm:$0x33]  }
 0x24d   :  { %v6827_v5 = vld [vmem:[%s8966_s3 + $0x38] sm:$0xff]  }
 0x24e   :  { %v6828_v6 = vld [vmem:[%s8966_s3 + $0xb8] sm:$0xff]  }
 0x24f   :  { %4268 = vmatpush1.bf16.msra.mxu0 %v6757_v7  ;;  %4678 = vmatpush1.bf16.msra.mxu1 %v6760_v8  ;;  %v643_v7 = vsub.s32 0, %v7008_v42  ;;  %v651_v8 = vsub.s32 2, %v7008_v42 }
 0x250   :  { %4269 = vmatprep.subr.bf16.mxu0 %v6765_v9  ;;  %4679 = vmatprep.subr.bf16.mxu1 %v6768_v10  ;;  %v639_v9 = vld [vmem:[%s8965_s2] sm:$0xf]  ;;  %v647_v10 = vsub.s32 1, %v7008_v42 }
 0x253   :  { %4270 = vmatpush1.bf16.msra.mxu0 %v6763_v11  ;;  %4680 = vmatpush1.bf16.msra.mxu1 %v6766_v12  ;;  %v655_v11 = vsub.s32 3, %v7008_v42  ;;  %v644_v12 = vrot.slane %v639_v9, %v643_v7 }
 0x254   :  { %4271 = vmatprep.subr.bf16.mxu0 %v6771_v52  ;;  %4681 = vmatprep.subr.bf16.mxu1 %v6774_v15  ;;  %v652_v52 = vrot.slane %v639_v9, %v651_v8  ;;  %v648_v15 = vrot.slane %v639_v9, %v647_v10 }
 0x257   :  { %4272 = vmatpush1.bf16.msra.mxu0 %v6769_v16  ;;  %4682 = vmatpush1.bf16.msra.mxu1 %v6772_v17  ;;  %v656_v16 = vrot.slane %v639_v9, %v655_v11 }
 0x258   :  { %4273 = vmatprep.subr.bf16.mxu0 %v6777_v18  ;;  %4683 = vmatprep.subr.bf16.mxu1 %v6780_v19 }
 0x25b   :  { %4274 = vmatpush1.bf16.msra.mxu0 %v6775_v20  ;;  %4684 = vmatpush1.bf16.msra.mxu1 %v6778_v22 }
 0x25c   :  { %4275 = vmatprep.subr.bf16.mxu0 %v6783_v23  ;;  %4685 = vmatprep.subr.bf16.mxu1 %v6786_v24 }
 0x25f   :  { %4276 = vmatpush1.bf16.msra.mxu0 %v6781_v13  ;;  %4686 = vmatpush1.bf16.msra.mxu1 %v6784_v27 }
 0x260   :  { %4277 = vmatprep.subr.bf16.mxu0 %v6789_v28  ;;  %4687 = vmatprep.subr.bf16.mxu1 %v6792_v29 }
 0x263   :  { %4278 = vmatpush1.bf16.msra.mxu0 %v6787_v31  ;;  %4688 = vmatpush1.bf16.msra.mxu1 %v6790_v25 }
 0x264   :  { %5712 = vmatprep.subr.msk.bf16.mxu0 %vm3879_vm1, %v5709_v32  ;;  %5714 = vmatprep.subr.msk.bf16.mxu1 %vm3879_vm1, %v5711_v33 }
 0x267   :  { %4280 = vmatpush1.bf16.msra.mxu0 %v3881_v37  ;;  %4690 = vmatpush1.bf16.msra.mxu1 %v3887_v21 }
 0x268   :  { %5750 = vmatprep.subr.bf16.mxu0 %v6797_v39  ;;  %5772 = vmatprep.subr.bf16.mxu1 %v6798_v40  ;;  %v5716_v39 = vld [vmem:[%s8967_s4] ss:$0 sm:$0xff]  ;;  %s6860_s4 = smov [#allocation2]  }
 0x269   :  { %s5087_s6 = sshll.u32 %s6860_s4, 4  ;;  %s5088_s6 = int_to_ptr.vmem [resolvable:$true] %s5087_s6 }
 0x26a   :  { %4294 = vmatmul.mubr.bf16.vlgmr.msra.gmra.mrb[0].mxu0 %v784_v41  ;;  %4704 = vmatmul.mubr.bf16.vlgmr.msra.gmra.mrb[0].mxu1 %v784_v41  ;;  %s6835_s7 = scalar_lea.vmem %s5088_s6, 32  ;;  %p6840_p1 = scmp.lt.s32.totalorder %s5088_s6, %s5088_s6 }
 0x26b   :  { %5751 = vmatpush3.bf16.msra.mxu0 %v6799_v34  ;;  %5773 = vmatpush3.bf16.msra.mxu1 %v6800_v43  ;;  %p6836_p0 = scmp.ne.s32.totalorder %s5088_s6, %s6835_s7  ;;  %p6841_p2 = scmp.lt.s32.totalorder %s6835_s7, %s6835_s7 }
 0x26c   :  { %5752 = vmatprep.subr.bf16.mxu0 %v6801_v44  ;;  %5774 = vmatprep.subr.bf16.mxu1 %v6802_v45 }
 0x26d   :  { %p6842_p3 = por %p6841_p2, %p6840_p1 }
 0x26f   :  { %5753 = vmatpush3.bf16.msra.mxu0 %v6803_v46  ;;  %5775 = vmatpush3.bf16.msra.mxu1 %v6804_v35  ;;  %p6843_p4 = pnand %p6842_p3, %p6836_p0 }
 0x270   :  { %5754 = vmatprep.subr.bf16.mxu0 %v6805_v51  ;;  %5776 = vmatprep.subr.bf16.mxu1 %v6806_v53 }
 0x273   :  { %5755 = vmatpush3.bf16.msra.mxu0 %v6807_v38  ;;  %5777 = vmatpush3.bf16.msra.mxu1 %v6808_v54 }
 0x274   :  { %5756 = vmatprep.subr.bf16.mxu0 %v6809_v55  ;;  %5778 = vmatprep.subr.bf16.mxu1 %v6810_v56 }
 0x277   :  { %5757 = vmatpush3.bf16.msra.mxu0 %v6811_v47  ;;  %5779 = vmatpush3.bf16.msra.mxu1 %v6812_v57 }
 0x278   :  { %5758 = vmatprep.subr.bf16.mxu0 %v6813_v58  ;;  %5780 = vmatprep.subr.bf16.mxu1 %v6814_v48 }
 0x27b   :  { %5759 = vmatpush3.bf16.msra.mxu0 %v6815_v60  ;;  %5781 = vmatpush3.bf16.msra.mxu1 %v6816_v61 }
 0x27c   :  { %5760 = vmatprep.subr.bf16.mxu0 %v6817_v62  ;;  %5782 = vmatprep.subr.bf16.mxu1 %v6818_v63 }
 0x27f   :  { %5761 = vmatpush3.bf16.msra.mxu0 %v6819_v49  ;;  %5783 = vmatpush3.bf16.msra.mxu1 %v6820_v50 }
 0x280   :  { %5762 = vmatprep.subr.bf16.mxu0 %v6821_v0  ;;  %5784 = vmatprep.subr.bf16.mxu1 %v6822_v1 }
 0x283   :  { %5763 = vmatpush3.bf16.msra.mxu0 %v6823_v59  ;;  %5785 = vmatpush3.bf16.msra.mxu1 %v6824_v2 }
 0x284   :  { %5764 = vmatprep.subr.bf16.mxu0 %v6825_v3  ;;  %5870 = vmatprep.subr.msk.bf16.mxu1 %vm4983_vm2, %v6826_v4 }
 0x287   :  { %5765 = vmatpush3.bf16.msra.mxu0 %v6827_v5  ;;  %5787 = vmatpush3.bf16.msra.mxu1 %v6828_v6 }
 0x33d   :  { %v4295_v17 = vpop.f32.mrb[0].mxu0  ;;  %v4705_v18 = vpop.f32.mrb[0].mxu1 }
 0x33e   :  { %v5794_v19 = vadd.f32 %v4295_v17, %v644_v12  ;;  %v5796_v20 = vadd.f32 %v4705_v18, %v652_v52  ;;  %v4297_v22 = vpop.f32.mrb[1].mxu0  ;;  %v4707_v23 = vpop.f32.mrb[1].mxu1 }
 0x33f   :  { %v5795_v24 = vadd.f32 %v4297_v22, %v648_v15  ;;  %v5797_v13 = vadd.f32 %v4707_v23, %v656_v16  ;;  %v4299_v27 = vpop.f32.mrb[2].mxu0  ;;  %v4709_v28 = vpop.f32.mrb[2].mxu1 }
 0x340   :  { %v4712_v29 = vmax.f32 %v5794_v19, 0.0  ;;  %v4714_v14 = vmax.f32 %v5796_v20, 0.0  ;;  %v4300_v30 = vpop.f32.mrb[3].mxu0  ;;  %v4710_v31 = vpop.f32.mrb[3].mxu1 }
 0x341   :  { %v4713_v25 = vmax.f32 %v5795_v24, 0.0  ;;  %v4715_v42 = vmax.f32 %v5797_v13, 0.0 }
 0x342   :  { %v4716_v26 = vpack.c.bf16 %v4712_v29, %v4712_v29  ;;  %v4718_v36 = vpack.c.bf16 %v4714_v14, %v4714_v14 }
 0x343   :  { %v4717_v32 = vpack.c.bf16 %v4713_v25, %v4713_v25  ;;  %v4719_v33 = vpack.c.bf16 %v4715_v42, %v4715_v42 }
 0x345   :  { %5019 = vmatprep.mubr.bf16.mxu0 %v4717_v32  ;;  %5749 = vmatprep.mubr.msk.bf16.mxu1 %vm4979_vm3, %v4719_v33 }
 0x346   :  { %5020 = vmatmul.mubr.bf16.vlgmr.msra.gmra.mrb[4].mxu0 %v4716_v26  ;;  %5060 = vmatmul.mubr.bf16.vlgmr.msra.gmra.mrb[4].mxu1 %v4718_v36 }
 0x419   :  { %v5766_v37 = vpop.f32.mrb[4].mxu0  ;;  %v5788_v21 = vpop.f32.mrb[4].mxu1 }
 0x41a   :  { %v5767_v40 = vpop.f32.mrb[5].mxu0  ;;  %v5789_v41 = vpop.f32.mrb[5].mxu1 }
 0x41b   :  { %v5768_v34 = vadd.f32 %v5767_v40, %v5766_v37  ;;  %v5790_v43 = vadd.f32 %v5789_v41, %v5788_v21  ;;  %v5769_v44 = vpop.f32.mrb[6].mxu0  ;;  %v5791_v45 = vpop.f32.mrb[6].mxu1 }
 0x41c   :  { %v5770_v46 = vpop.f32.mrb[7].mxu0  ;;  %v5792_v35 = vpop.f32.mrb[7].mxu1 }
 0x41d   :  { %v5022_v51 = vadd.f32 %v5768_v34, %v5716_v39 }
 0x41f   :  { %v5062_v53 = vadd.f32 %v5790_v43, %v5022_v51 }
 0x421   :  { %v5068_v38 = vsel %vm5067_vm4, %v5062_v53, -inf }
 0x422   :  { %5069 = vmax.xlane.f32.xlu0 %v5068_v38 }
 0x4af   :  { %v5070_v54 = vpop.xlane.xlu0 %5069 }
 0x4b0   :  { %v5071_v55 = vsub.f32 %v5062_v53, %v5070_v54 }
 0x4b2   :  { %v5072_v56 = vmul.f32 1.442695, %v5071_v55 }
 0x4b4   :  { %6829 = vpow2.f32 %v5072_v56 }
 0x4be   :  { %v6830_v47 = vpop.eup %6829 }
 0x4bf   :  { %v5074_v57 = vsel %vm5067_vm4, %v6830_v47, 0.0 }
 0x4c0   :  { %5075 = vadd.xlane.f32.xlu0 %v5074_v57 }
 0x54d   :  { %v5076_v58 = vpop.xlane.xlu0 %5075 }
 0x54e   :  { %6831 = vlog2.f32 %v5076_v58 }
 0x558   :  { %v6832_v48 = vpop.eup %6831 }
 0x559   :  { %v5078_v60 = vmul.f32 0.6931472, %v6832_v48 }
 0x55b   :  { %v5079_v61 = vsub.f32 %v5071_v55, %v5078_v60 }
 0x55d   :  { %5080 = vst.msk [vmem:[#allocation2] sm:$0x3] %vm5067_vm4, %v5079_v61 }
 0x55e   :  { %6846 = shalt.err (!%p6843_p4)
}
 0x55f   :  { %s6847_s10 = scalar_lea.hbm %s8968_s5, 32 }
 0x560   :  { %p6848_p5 = scmp.ne.s32.totalorder %s8968_s5, %s6847_s10  ;;  %p6851_p6 = scmp.lt.u32.totalorder %s6847_s10, %s8968_s5 }
 0x562   :  { %p6853_p7 = pnand %p6851_p6, %p6848_p5 }
 0x564   :  { %6856 = shalt.err (!%p6853_p7)
}
 0x565   :  { %5090 = dma.vmem_to_hbm [thread:$0]  %s5088_s6, 32, %s8968_s5, [#allocation3]  }
 0x566   :  { %6857 = dma.done.wait [#allocation3], 32  }
 0x567   :  { %6858 = vsyncadd [#allocation3], 4294967264 }
 0x568   :  { %5094 = vsyncpa [#allocation3], 1 }

// kernel: deepnet_forward.2
= control target key start
LH: loop header
LB: loop body
LE: loop exit
PB: predicated region body
PF: predicated region fallthrough
CT: control target
= control target key end

     0   :  { %10 = vsyncpa [#allocation4], 0  ;;  %s11340_s0 = inlined_call_operand.vmem [shape: f32[2,32,32], index: 0, kind: input, shape index: {}]   ;;  %s11341_s1 = inlined_call_operand.hbm [shape: bf16[2,5,32,280], index: 1, kind: input, shape index: {}]   ;;  %s11342_s2 = inlined_call_operand.hbm [shape: f32[1,280], index: 2, kind: input, shape index: {}]   ;;  %s11343_s3 = inlined_call_operand.hbm [shape: bf16[2,5,280,350], index: 3, kind: input, shape index: {}]   ;;  %s11344_s4 = inlined_call_operand.hbm [shape: f32[1,350], index: 4, kind: input, shape index: {}]   ;;  %s11345_s5 = inlined_call_operand.vmem [shape: bf16[2,7,350], index: 5, kind: output, shape index: {}]  }
   0x1   :  { %11 = vsyncpa [#allocation6], 0 }
   0x2   :  { %12 = vsyncpa [#allocation9], 0  ;;  %s10734_s18 = smov 0  }
   0x3 LB: > { %s10693_s19 = smov [#allocation5]   ;;  %s10740_s21 = sadd.s32 4294967295, %s10691_s18   ;;  %s10691_s18 = sphi %s10734_s18, %s18_s18  }
   0x4   : > { %s185_s20 = sshll.u32 %s10693_s19, 4  ;;  %p8208_p0 = scmp.ge.s32.totalorder %s10691_s18, 1  ;;  %s10745_s20 = int_to_ptr.vmem [resolvable:$true] %s185_s20 }
   0x5   : > { %p159_p1 = scmp.lt.s32.totalorder %s10691_s18, 3  ;;  %p11346_p2 = scmp.eq.s32.totalorder %s10740_s21, 0 }
   0x6   : > { %s10694_s23 = smov [#allocation3]   ;;  %s10695_s26 = smov [#allocation7]  }
   0x7   : > { %p10747_p3 = pnand %p8208_p0, %p159_p1  ;;  %s171_s24 = sshll.u32 %s10694_s23, 4  ;;  %s10753_s24 = int_to_ptr.vmem [resolvable:$true] %s171_s24 }
   0x8   : > { %s195_s27 = sshll.u32 %s10695_s26, 4  ;;  %s10696_s28 = smov [#allocation8]   ;;  %s10761_s27 = int_to_ptr.vmem [resolvable:$true] %s195_s27 }
   0x9   : > { %s11348_s22 = scalar_select %p10747_p3, 1, 0 }
   0xa   : > { %p9728_p4 = pneg %p10747_p3  ;;  %s10763_s29 = sshll.u32 %s10696_s28, 4  ;;  %s210_s29 = int_to_ptr.vmem [resolvable:$true] %s10763_s29 }
   0xb   : > { %s10561_s7 = scalar_lea.hbm %s11342_s2, 48 }
   0xc   : > { %p10757_p5 = pnand %p11346_p2, %p9728_p4  ;;  %p10562_p6 = scmp.ne.s32.totalorder %s11342_s2, %s10561_s7 }
   0xd   : > { %p10568_p10 = scmp.lt.u32.totalorder %s10561_s7, %s11342_s2 }
   0xe   : > { %p10773_p7 = pneg %p10757_p5 }
  0x10   : > { %p10564_p8 = pnand %p10773_p7, %p10562_p6 }
  0x12   : > { %p10565_p9 = pneg %p10564_p8 }
  0x14   : > { %p10570_p11 = pnand %p10568_p10, %p10565_p9 }
  0x16   : > { %10573 = shalt.err (!%p10570_p11)
}
  0x17   : > { %s10574_s13 = scalar_lea.vmem %s10745_s20, 48  ;;  %s10581_s14 = scalar_lea.vmem %s10745_s20, 64 }
  0x18   : > { %p10575_p12 = scmp.ne.s32.totalorder %s10745_s20, %s10574_s13  ;;  %p10582_p1 = scmp.lt.s32.totalorder %s10745_s20, %s10745_s20 }
  0x19   : > { %p10583_p4 = scmp.lt.s32.totalorder %s10581_s14, %s10574_s13 }
  0x1a   : > { %p10577_p13 = pnand %p10575_p12, %p10773_p7 }
  0x1b   : > { %p10584_p6 = por %p10583_p4, %p10582_p1 }
  0x1c   : > { %p10578_p0 = pneg %p10577_p13 }
  0x1e   : > { %p10585_p8 = pnand %p10584_p6, %p10578_p0 }
  0x20   : > { %10588 = shalt.err (!%p10585_p8)
}
  0x21   : > { %9734 = dma.hbm_to_vmem [thread:$0]  (!%p10757_p5), %s11342_s2, 48, %s10745_s20, [#allocation6]  }
  0x22   : > { %s10589_s23 = scalar_lea.hbm %s11341_s1, 7680 }
  0x23   : > { %p10590_p9 = scmp.ne.s32.totalorder %s11341_s1, %s10589_s23  ;;  %p10596_p12 = scmp.lt.u32.totalorder %s10589_s23, %s11341_s1 }
  0x25   : > { %p10592_p10 = pnand %p10590_p9, %p10773_p7 }
  0x27   : > { %p10593_p11 = pneg %p10592_p10 }
  0x29   : > { %p10598_p13 = pnand %p10596_p12, %p10593_p11 }
  0x2b   : > { %10601 = shalt.err (!%p10598_p13)
}
  0x2c   : > { %s10602_s20 = scalar_lea.vmem %s10753_s24, 7680  ;;  %p10610_p6 = scmp.lt.s32.totalorder %s10753_s24, %s10753_s24 }
  0x2d   : > { %p10603_p0 = scmp.ne.s32.totalorder %s10753_s24, %s10602_s20  ;;  %p10611_p8 = scmp.lt.s32.totalorder %s10602_s20, %s10602_s20 }
  0x2f   : > { %p10605_p1 = pnand %p10603_p0, %p10773_p7  ;;  %p10612_p9 = por %p10611_p8, %p10610_p6 }
  0x31   : > { %p10606_p4 = pneg %p10605_p1 }
  0x33   : > { %p10613_p10 = pnand %p10612_p9, %p10606_p4 }
  0x35   : > { %10616 = shalt.err (!%p10613_p10)
}
  0x36   : > { %s10697_s7 = smov 192   ;;  %s10698_s8 = smov 12  }
  0x37   : > { %9731 = dma.hbm_to_vmem [thread:$0]  (!%p10757_p5), %s11341_s1, 7680, %s10753_s24, [#allocation4], %s10697_s7, %s10697_s7, %s10698_s8  }
  0x38   : > { %s10617_s14 = scalar_lea.hbm %s11343_s3, 67200 }
  0x39   : > { %p10618_p11 = scmp.ne.s32.totalorder %s11343_s3, %s10617_s14  ;;  %p10624_p0 = scmp.lt.u32.totalorder %s10617_s14, %s11343_s3 }
  0x3b   : > { %p10620_p12 = pnand %p10618_p11, %p10773_p7 }
  0x3d   : > { %p10621_p13 = pneg %p10620_p12 }
  0x3f   : > { %p10626_p1 = pnand %p10624_p0, %p10621_p13 }
  0x41   : > { %10629 = shalt.err (!%p10626_p1)
}
  0x42   : > { %s10630_s24 = scalar_lea.vmem %s10761_s27, 67200  ;;  %p10638_p9 = scmp.lt.s32.totalorder %s10761_s27, %s10761_s27 }
  0x43   : > { %p10631_p4 = scmp.ne.s32.totalorder %s10761_s27, %s10630_s24  ;;  %p10639_p10 = scmp.lt.s32.totalorder %s10630_s24, %s10630_s24 }
  0x45   : > { %p10633_p6 = pnand %p10631_p4, %p10773_p7  ;;  %p10640_p11 = por %p10639_p10, %p10638_p9 }
  0x47   : > { %p10634_p8 = pneg %p10633_p6 }
  0x49   : > { %p10641_p12 = pnand %p10640_p11, %p10634_p8 }
  0x4b   : > { %10644 = shalt.err (!%p10641_p12)
}
  0x4c   : > { %9737 = dma.hbm_to_vmem [thread:$0]  (!%p10757_p5), %s11343_s3, 67200, %s10761_s27, [#allocation6], %s10697_s7, %s10697_s7, %s10698_s8  }
  0x4d   : > { %s10645_s6 = scalar_lea.hbm %s11344_s4, 48 }
  0x4e   : > { %p10646_p13 = scmp.ne.s32.totalorder %s11344_s4, %s10645_s6  ;;  %p10652_p4 = scmp.lt.u32.totalorder %s10645_s6, %s11344_s4 }
  0x50   : > { %p10648_p0 = pnand %p10646_p13, %p10773_p7 }
  0x52   : > { %p10649_p1 = pneg %p10648_p0 }
  0x54   : > { %p10654_p6 = pnand %p10652_p4, %p10649_p1 }
  0x56   : > { %10657 = shalt.err (!%p10654_p6)
}
  0x57   : > { %s10658_s13 = scalar_lea.vmem %s210_s29, 48  ;;  %s10665_s27 = scalar_lea.vmem %s210_s29, 64 }
  0x58   : > { %p10659_p8 = scmp.ne.s32.totalorder %s210_s29, %s10658_s13  ;;  %p10666_p11 = scmp.lt.s32.totalorder %s210_s29, %s210_s29 }
  0x59   : > { %p10667_p12 = scmp.lt.s32.totalorder %s10665_s27, %s10658_s13 }
  0x5a   : > { %p10661_p9 = pnand %p10659_p8, %p10773_p7 }
  0x5b   : > { %p10668_p2 = por %p10667_p12, %p10666_p11 }
  0x5c   : > { %p10662_p10 = pneg %p10661_p9 }
  0x5e   : > { %p10669_p3 = pnand %p10668_p2, %p10662_p10 }
  0x60   : > { %10672 = shalt.err (!%p10669_p3)
}
  0x61   : > { %9740 = dma.hbm_to_vmem [thread:$0]  (!%p10757_p5), %s11344_s4, 48, %s210_s29, [#allocation9]  }
  0x62   : > { %p11351_p13 = scmp.ne.s32.totalorder %s11348_s22, 0 }
  0x63   : > { %p11352_p0 = scmp.eq.s32.totalorder (!%p11351_p13), %s10740_s21, 0 }
  0x64   : > { %230 = sbr.rel (%p11351_p13) target bundleno = 1745 (0x6d1), region = 40 }
  0x6b   : > { %10678 = dma.done.wait (%p11352_p0), [#allocation4], 7680   ;;  %p11353_p7 = pmov %p11352_p0 }
  0x6c   : > { %p11354_p1 = pmov %p11352_p0 }
  0x6d   : > { %10680 = vsyncadd (%p11353_p7), [#allocation4], 4294959616 }
  0x6e   : > { %10682 = dma.done.wait (%p11354_p1), [#allocation6], 67248   ;;  %p11355_p2 = pmov %p11352_p0 }
  0x6f   : > { %p11356_p3 = pmov %p11352_p0 }
  0x70   : > { %10684 = vsyncadd (%p11355_p2), [#allocation6], 4294900048 }
  0x71   : > { %10686 = dma.done.wait (%p11356_p3), [#allocation9], 48   ;;  %p11357_p5 = pmov %p11352_p0 }
  0x72   : > { %p270_p4 = scmp.lt.s32.totalorder %s10740_s21, 1  ;;  %v10699_v0 = vmov 0   ;;  %v9768_v1 = vld [vmem:[#allocation3 + $0x34] ss:$12 sps:$4 sm:$0xff]   ;;  %v9770_v2 = vld [vmem:[#allocation3 + $0x38] ss:$12 sps:$4 sm:$0xff]  }
  0x73   : > { %10688 = vsyncadd (%p11357_p5), [#allocation9], 4294967248  ;;  %390 = vmatprep.mubr.bf16.mxu0 %v10699_v0  ;;  %358 = vmatprep.subr.bf16.mxu0 %v9768_v1  ;;  %v9771_v3 = vld [vmem:[#allocation3 + $0x30] ss:$12 sps:$4 sm:$0xff]   ;;  %v9772_v4 = vld [vmem:[#allocation3 + $0x4c] ss:$12 sps:$4 sm:$0xff]  }
  0x74   : > { %s11365_s21 = smov (!%p270_p4, %s10740_s21), 1  ;;  %9235 = vmatprep.subr.bf16.mxu1 %v9770_v2  ;;  %359 = vmatpush1.bf16.msra.mxu0 %v9771_v3  ;;  %v9774_v5 = vld [vmem:[#allocation3 + $0x50] ss:$12 sps:$4 sm:$0xff]   ;;  %v9775_v6 = vld [vmem:[#allocation3 + $0x48] ss:$12 sps:$4 sm:$0xff]   ;;  %vm351_vm0 = vcmask 261120  }
  0x75   : > { %s8924_s22 = sshll.u32 %s11365_s21, 5  ;;  %9236 = vmatpush3.bf16.msra.mxu1 %v9770_v2  ;;  %360 = vmatprep.subr.bf16.mxu0 %v9772_v4  ;;  %v9776_v12 = vld [vmem:[#allocation3 + $0x8] ss:$12 sps:$4 sm:$0xff]   ;;  %v9777_v14 = vld [vmem:[#allocation3] ss:$12 sps:$4 sm:$0xff]   ;;  %vm1876_vm2 = vcmask 228352  }
  0x76   : > { %s10883_s10 = scalar_lea.vmem %s11340_s0, %s8924_s22  ;;  %9237 = vmatprep.subr.bf16.mxu1 %v9774_v5  ;;  %v9779_v15 = vld [vmem:[#allocation3 + $0x4] ss:$12 sps:$4 sm:$0xff]   ;;  %v9780_v16 = vld [vmem:[#allocation3 + $0x20] ss:$12 sps:$4 sm:$0xff]   ;;  %v9783_v20 = vld [vmem:[#allocation3 + $0x1c] ss:$12 sps:$4 sm:$0xff]  }
  0x77   : > { %v304_v7 = vld [vmem:[%s10883_s10 + $0x1] sm:$0xff]  ;;  %v305_v8 = vld [vmem:[%s10883_s10 + $0x9] sm:$0xff]  ;;  %v306_v9 = vld [vmem:[%s10883_s10 + $0x11] sm:$0xff]  ;;  %vm1883_vm4 = vcmask 1043456   ;;  %vm10701_vm5 = vmmov 1   ;;  %vm2240_vm9 = vcmask 195584  }
  0x78   : > { %v307_v10 = vld [vmem:[%s10883_s10 + $0x19] sm:$0xf]  ;;  %v308_v11 = vpack.c.bf16 %v305_v8, %v304_v7  ;;  %361 = vmatpush1.bf16.msra.mxu0 %v9775_v6  ;;  %v281_v17 = vld [vmem:[%s10883_s10] sm:$0xff]  ;;  %v282_v18 = vld [vmem:[%s10883_s10 + $0x8] sm:$0xff]  ;;  %vm10702_vm10 = vmmov 0   ;;  %vm2247_vm11 = vcmask 189440  }
  0x79   : > { %v10889_v13 = vpack.c.bf16 %v307_v10, %v306_v9  ;;  %9238 = vmatpush3.bf16.msra.mxu1 %v9774_v5  ;;  %498 = vmatprep.subr.bf16.mxu0 %v9779_v15  ;;  %v285_v19 = vpack.c.bf16 %v282_v18, %v281_v17  ;;  %v9781_v21 = vld [vmem:[#allocation3 + $0x18] ss:$12 sps:$4 sm:$0xff]   ;;  %v283_v23 = vld [vmem:[%s10883_s10 + $0x10] sm:$0xff]  ;;  %v284_v25 = vld [vmem:[%s10883_s10 + $0x18] sm:$0xf]  ;;  %vm2255_vm12 = vcmask 1041408  }
  0x7a   : > { %9239 = vmatprep.mubr.msk.bf16.mxu1 %vm351_vm0, %v308_v11  ;;  %9243 = vmatprep.subr.bf16.mxu1 %v9776_v12  ;;  %v9786_v22 = vld [vmem:[#allocation3 + $0x124] ss:$12 sps:$4 sm:$0xff]   ;;  %v9790_v24 = vld [vmem:[#allocation3 + $0x128] ss:$12 sps:$4 sm:$0xff]   ;;  %v286_v26 = vpack.c.bf16 %v284_v25, %v283_v23  ;;  %v9784_v27 = vld [vmem:[#allocation3 + $0x120] ss:$12 sps:$4 sm:$0xff]  }
  0x7b   : > { %8228 = vmatmul.mubr.msk.bf16.vlgmr.msra.gmra.mrb[0].mxu0 %vm351_vm0, %v308_v11  ;;  %v9789_v28 = vld [vmem:[#allocation3 + $0x13c] ss:$12 sps:$4 sm:$0xff]   ;;  %v9787_v29 = vld [vmem:[#allocation3 + $0x138] ss:$12 sps:$4 sm:$0xff]   ;;  %v9794_v30 = vld [vmem:[#allocation3 + $0xf4] ss:$12 sps:$4 sm:$0xff]  }
  0x7c   : > { %9240 = vmatmul.mubr.msk.bf16.vlgmr.msra.gmra.mrb[0].mxu1 %vm351_vm0, %v10889_v13  ;;  %400 = vmatprep.mubr.bf16.mxu0 %v10699_v0  ;;  %v9791_v31 = vld [vmem:[#allocation3 + $0x140] ss:$12 sps:$4 sm:$0xff]   ;;  %v9792_v32 = vld [vmem:[#allocation3 + $0xf0] ss:$12 sps:$4 sm:$0xff]   ;;  %v9798_v34 = vld [vmem:[#allocation3 + $0xf8] ss:$12 sps:$4 sm:$0xff]  }
  0x7d   : > { %9244 = vmatpush3.bf16.msra.mxu1 %v9776_v12  ;;  %499 = vmatpush1.bf16.msra.mxu0 %v9777_v14  ;;  %v9797_v33 = vld [vmem:[#allocation3 + $0x10c] ss:$12 sps:$4 sm:$0xff]   ;;  %v9795_v35 = vld [vmem:[#allocation3 + $0x108] ss:$12 sps:$4 sm:$0xff]   ;;  %v9799_v37 = vld [vmem:[#allocation3 + $0x110] ss:$12 sps:$4 sm:$0xff]  }
  0x7e   : > { %9245 = vmatprep.subr.bf16.mxu1 %v9780_v16  ;;  %9247 = vmatprep.mubr.msk.bf16.mxu1 %vm351_vm0, %v285_v19  ;;  %v9803_v36 = vld [vmem:[#allocation3 + $0x68] ss:$12 sps:$4 sm:$0xff]   ;;  %v9802_v38 = vld [vmem:[#allocation3 + $0x64] ss:$12 sps:$4 sm:$0xff]   ;;  %v9807_v39 = vld [vmem:[#allocation3 + $0x80] ss:$12 sps:$4 sm:$0xff]  }
  0x7f   : > { %500 = vmatprep.subr.bf16.mxu0 %v9783_v20  ;;  %v877_v40 = vld [vmem:[%s10883_s10 + $0x2] sm:$0xff]  ;;  %v878_v41 = vld [vmem:[%s10883_s10 + $0xa] sm:$0xff]  ;;  %v879_v47 = vld [vmem:[%s10883_s10 + $0x12] sm:$0xff]  ;;  %vm2273_vm13 = vcmask 195586   ;;  %vm5610_vm14 = vsmask.f32 6400 }
  0x80   : > { %v9810_v42 = vld [vmem:[#allocation3 + $0x154] ss:$12 sps:$4 sm:$0xff]   ;;  %v9806_v44 = vld [vmem:[#allocation3 + $0x7c] ss:$12 sps:$4 sm:$0xff]   ;;  %v881_v45 = vpack.c.bf16 %v878_v41, %v877_v40  ;;  %v9804_v46 = vld [vmem:[#allocation3 + $0x78] ss:$12 sps:$4 sm:$0xff]  }
  0x81   : > { %9246 = vmatpush3.bf16.msra.mxu1 %v9780_v16  ;;  %501 = vmatpush1.bf16.msra.mxu0 %v9781_v21  ;;  %v9800_v43 = vld [vmem:[#allocation3 + $0x60] ss:$12 sps:$4 sm:$0xff]   ;;  %v880_v48 = vld [vmem:[%s10883_s10 + $0x1a] sm:$0xf]  ;;  %v9814_v49 = vld [vmem:[#allocation3 + $0x158] ss:$12 sps:$4 sm:$0xff]  }
  0x82   : > { %641 = vmatprep.subr.bf16.mxu1 %v9786_v22  ;;  %9251 = vmatprep.subr.bf16.mxu0 %v9790_v24  ;;  %v9808_v50 = vld [vmem:[#allocation3 + $0x150] ss:$12 sps:$4 sm:$0xff]   ;;  %v882_v51 = vpack.c.bf16 %v880_v48, %v879_v47  ;;  %v9813_v52 = vld [vmem:[#allocation3 + $0x16c] ss:$12 sps:$4 sm:$0xff]   ;;  %v9811_v54 = vld [vmem:[#allocation3 + $0x168] ss:$12 sps:$4 sm:$0xff]  }
  0x83   : > { %8229 = vmatmul.mubr.msk.bf16.gmra.mrb[4].mxu0 %vm351_vm0, %v10889_v13  ;;  %v9815_v53 = vld [vmem:[#allocation3 + $0x170] ss:$12 sps:$4 sm:$0xff]   ;;  %v9819_v55 = vld [vmem:[#allocation3 + $0x98] ss:$12 sps:$4 sm:$0xff]   ;;  %v9818_v56 = vld [vmem:[#allocation3 + $0x94] ss:$12 sps:$4 sm:$0xff]  }
  0x84   : > { %530 = vmatprep.mubr.bf16.mxu0 %v10699_v0  ;;  %v9823_v57 = vld [vmem:[#allocation3 + $0xb0] ss:$12 sps:$4 sm:$0xff]   ;;  %v1200_v59 = vld [vmem:[%s10883_s10 + $0xb] sm:$0xff]  ;;  %v9822_v62 = vld [vmem:[#allocation3 + $0xac] ss:$12 sps:$4 sm:$0xff]   ;;  %vm6741_vm15 = vcmask 1045504  }
  0x85   : > { %v1199_v58 = vld [vmem:[%s10883_s10 + $0x3] sm:$0xff]  ;;  %v9826_v60 = vld [vmem:[#allocation3 + $0x184] ss:$12 sps:$4 sm:$0xff]   ;;  %v9820_v1 = vld [vmem:[#allocation3 + $0xa8] ss:$12 sps:$4 sm:$0xff]   ;;  %s9711_s14 = smul.u32 12, %s11365_s21 }
  0x86   : > { %v9816_v61 = vld [vmem:[#allocation3 + $0x90] ss:$12 sps:$4 sm:$0xff]   ;;  %v1203_v63 = vpack.c.bf16 %v1200_v59, %v1199_v58  ;;  %v9830_v4 = vld [vmem:[#allocation3 + $0x188] ss:$12 sps:$4 sm:$0xff]   ;;  %v9824_v5 = vld [vmem:[#allocation3 + $0x180] ss:$12 sps:$4 sm:$0xff]  }
  0x87   : > { %v1201_v2 = vld [vmem:[%s10883_s10 + $0x13] sm:$0xff]  ;;  %v1202_v3 = vld [vmem:[%s10883_s10 + $0x1b] sm:$0xf]  ;;  %v9827_v9 = vld [vmem:[#allocation3 + $0x198] ss:$12 sps:$4 sm:$0xff]   ;;  %s279_s16 = scalar_lea.vmem %s11345_s5, %s9711_s14 }
  0x88   : > { %9248 = vmatmul.mubr.msk.bf16.vlgmr.msra.gmra.mrb[0].mxu1 %vm351_vm0, %v286_v26  ;;  %v1204_v6 = vpack.c.bf16 %v1202_v3, %v1201_v2  ;;  %v9829_v7 = vld [vmem:[#allocation3 + $0x19c] ss:$12 sps:$4 sm:$0xff]   ;;  %v9831_v8 = vld [vmem:[#allocation3 + $0x1a0] ss:$12 sps:$4 sm:$0xff]   ;;  %v1524_v21 = vld [vmem:[%s10883_s10 + $0x1c] sm:$0xf] }
  0x89   : > { %642 = vmatpush1.bf16.msra.mxu1 %v9784_v27  ;;  %673 = vmatprep.mubr.bf16.mxu1 %v10699_v0  ;;  %v9835_v10 = vld [vmem:[#allocation3 + $0xc8] ss:$12 sps:$4 sm:$0xff]   ;;  %v9839_v12 = vld [vmem:[#allocation3 + $0xe0] ss:$12 sps:$4 sm:$0xff]   ;;  %v9846_v22 = vld [vmem:[#allocation3 + $0x1b8] ss:$12 sps:$4 sm:$0xff]  }
  0x8a   : > { %643 = vmatprep.subr.bf16.mxu1 %v9789_v28  ;;  %v1522_v14 = vld [vmem:[%s10883_s10 + $0xc] sm:$0xff]  ;;  %v9842_v15 = vld [vmem:[#allocation3 + $0x1b4] ss:$12 sps:$4 sm:$0xff]   ;;  %v1523_v20 = vld [vmem:[%s10883_s10 + $0x14] sm:$0xff]  ;;  %v1855_v28 = vlaneseq }
  0x8b   : > { %8238 = vmatmul.mubr.msk.bf16.vlgmr.msra.gmra.mrb[0].mxu0 %vm351_vm0, %v285_v19  ;;  %v9832_v16 = vld [vmem:[#allocation3 + $0xc0] ss:$12 sps:$4 sm:$0xff]   ;;  %v9838_v17 = vld [vmem:[#allocation3 + $0xdc] ss:$12 sps:$4 sm:$0xff]   ;;  %vm10993_vm6 = vmpackc.low %vm1883_vm4, %vm10701_vm5 }
  0x8c   : > { %540 = vmatprep.mubr.bf16.mxu0 %v10699_v0  ;;  %9252 = vmatpush3.bf16.msra.mxu0 %v9790_v24  ;;  %v9840_v23 = vld [vmem:[#allocation3 + $0x1b0] ss:$12 sps:$4 sm:$0xff]   ;;  %v1526_v24 = vpack.c.bf16 %v1524_v21, %v1523_v20  ;;  %v9845_v25 = vld [vmem:[#allocation3 + $0x1cc] ss:$12 sps:$4 sm:$0xff]   ;;  %v9843_v27 = vld [vmem:[#allocation3 + $0x1c8] ss:$12 sps:$4 sm:$0xff]  }
  0x8d   : > { %644 = vmatpush1.bf16.msra.mxu1 %v9787_v29  ;;  %9253 = vmatprep.subr.bf16.mxu0 %v9791_v31  ;;  %v10970_v29 = vshrl.u32 %v1855_v28, 7  ;;  %v9848_v21 = vld [vmem:[#allocation7 + $0x1a4] ss:$12 sps:$4 sm:$0xff]  }
  0x8e   : > { %775 = vmatprep.subr.bf16.mxu1 %v9794_v30  ;;  %v10972_v30 = vand.u32 127, %v1855_v28  ;;  %v9857_v28 = vld [vmem:[#allocation7 + $0x1ec] ss:$12 sps:$4 sm:$0xff]  }
  0x90   : > { %8248 = vmatmul.mubr.msk.bf16.vlgmr.msra.gmra.mrb[4].mxu1 %vm351_vm0, %v308_v11  ;;  %9254 = vmatpush3.bf16.msra.mxu0 %v9791_v31  ;;  %v1860_v31 = vmul.u32 2, %v10970_v29 }
  0x91   : > { %683 = vmatprep.mubr.bf16.mxu1 %v10699_v0  ;;  %776 = vmatpush1.bf16.msra.mxu1 %v9792_v32  ;;  %v10700_v32 = vmov 0.0  }
  0x92   : > { %777 = vmatprep.subr.bf16.mxu1 %v9797_v33  ;;  %9259 = vmatprep.subr.bf16.mxu0 %v9798_v34  ;;  %vm1862_vm1 = vcmp.eq.s32.totalorder %v10972_v30, %v1860_v31  ;;  %2238 = vst [vmem:[#allocation2] sm:$0xff] %v10700_v32  ;;  %2239 = vst [vmem:[#allocation2 + $0x8] sm:$0xff] %v10700_v32 }
  0x93   : > { %8239 = vmatmul.mubr.msk.bf16.gmra.mrb[4].mxu0 %vm351_vm0, %v286_v26  ;;  %2245 = vst [vmem:[#allocation2 + $0x30] sm:$0x3] %v10700_v32  ;;  %2246 = vst [vmem:[#allocation2 + $0x38] sm:$0x3] %v10700_v32  ;;  %v10982_v33 = vsel %vm1862_vm1, 1.0, %v10700_v32  ;;  %vm7759_vm1 = vcmask 113664  }
  0x94   : > { %9255 = vmatprep.mubr.msk.bf16.mxu0 %vm351_vm0, %v308_v11  ;;  %v9834_v11 = vld [vmem:[#allocation3 + $0xc4] ss:$12 sps:$4 sm:$0xff]   ;;  %2241 = vst.msk [vmem:[#allocation2 + $0x10] sm:$0xff] %vm2240_vm9, %v10700_v32  ;;  %2244 = vst.msk [vmem:[#allocation2 + $0x28] sm:$0xff] %vm2240_vm9, %v10700_v32 }
  0x95   : > { %778 = vmatpush1.bf16.msra.mxu1 %v9795_v35  ;;  %2248 = vst.msk [vmem:[#allocation2 + $0x40] sm:$0x3] %vm2247_vm11, %v10700_v32 }
  0x96   : > { %9267 = vmatprep.subr.bf16.mxu1 %v9803_v36 }
  0x98   : > { %8249 = vmatmul.mubr.msk.bf16.gmra.mrb[8].mxu1 %vm351_vm0, %v10889_v13 }
  0x99   : > { %807 = vmatprep.mubr.bf16.mxu1 %v10699_v0 }
  0x9b   : > { %9256 = vmatmul.mubr.msk.bf16.vlgmr.msra.gmra.mrb[8].mxu0 %vm351_vm0, %v10889_v13  ;;  %v1521_v13 = vld [vmem:[%s10883_s10 + $0x4] sm:$0xff] }
  0x9c   : > { %9260 = vmatpush3.bf16.msra.mxu0 %v9798_v34  ;;  %9263 = vmatprep.mubr.msk.bf16.mxu0 %vm351_vm0, %v285_v19  ;;  %v1525_v18 = vpack.c.bf16 %v1522_v14, %v1521_v13  ;;  %v10986_v34 = vadd.s32 1, %v1860_v31  ;;  %v9860_v31 = vld [vmem:[#allocation7 + $0x204] ss:$12 sps:$4 sm:$0xff]  }
  0x9d   : > { %9261 = vmatprep.subr.bf16.mxu0 %v9799_v37 }
  0x9e   : > { %vm1870_vm3 = vcmp.eq.s32.totalorder %v10972_v30, %v10986_v34  ;;  %v9865_v34 = vld [vmem:[#allocation7 + $0x220] ss:$12 sps:$4 sm:$0xff]  }
  0x9f   : > { %v11020_v20 = vsel %vm1870_vm3, 1.0, %v10700_v32  ;;  %vm8098_vm3 = vcmask 1047556  }
  0xa0   : > { %8258 = vmatmul.mubr.msk.bf16.vlgmr.msra.gmra.mrb[4].mxu1 %vm351_vm0, %v285_v19  ;;  %9262 = vmatpush3.bf16.msra.mxu0 %v9799_v37  ;;  %v9836_v19 = vld [vmem:[#allocation3 + $0xd8] ss:$12 sps:$4 sm:$0xff]  }
  0xa1   : > { %817 = vmatprep.mubr.bf16.mxu1 %v10699_v0  ;;  %930 = vmatprep.subr.bf16.mxu0 %v9802_v38 }
  0xa2   : > { %9268 = vmatpush3.bf16.msra.mxu1 %v9803_v36 }
  0xa3   : > { %9269 = vmatprep.subr.bf16.mxu1 %v9807_v39 }
  0xa6   : > { %9270 = vmatpush3.bf16.msra.mxu1 %v9807_v39 }
  0xa7   : > { %1085 = vmatprep.subr.bf16.mxu1 %v9810_v42  ;;  %9264 = vmatmul.mubr.msk.bf16.vlgmr.msra.gmra.mrb[8].mxu0 %vm351_vm0, %v286_v26 }
  0xa8   : > { %8259 = vmatmul.mubr.msk.bf16.gmra.mrb[8].mxu1 %vm351_vm0, %v286_v26  ;;  %931 = vmatpush1.bf16.msra.mxu0 %v9800_v43  ;;  %v9847_v26 = vld [vmem:[#allocation3 + $0x1d0] ss:$12 sps:$4 sm:$0xff]  }
  0xa9   : > { %962 = vmatprep.mubr.bf16.mxu0 %v10699_v0  ;;  %932 = vmatprep.subr.bf16.mxu0 %v9806_v44 }
  0xaa   : > { %9271 = vmatprep.mubr.msk.bf16.mxu1 %vm351_vm0, %v881_v45 }
  0xac   : > { %933 = vmatpush1.bf16.msra.mxu0 %v9804_v46 }
  0xad   : > { %9275 = vmatprep.subr.bf16.mxu0 %v9814_v49 }
  0xaf   : > { %8268 = vmatmul.mubr.msk.bf16.vlgmr.msra.gmra.mrb[0].mxu0 %vm351_vm0, %v881_v45 }
  0xb0   : > { %9272 = vmatmul.mubr.msk.bf16.vlgmr.msra.gmra.mrb[0].mxu1 %vm351_vm0, %v882_v51  ;;  %972 = vmatprep.mubr.bf16.mxu0 %v10699_v0 }
  0xb1   : > { %1086 = vmatpush1.bf16.msra.mxu1 %v9808_v50  ;;  %1117 = vmatprep.mubr.bf16.mxu1 %v10699_v0 }
  0xb2   : > { %1087 = vmatprep.subr.bf16.mxu1 %v9813_v52  ;;  %9276 = vmatpush3.bf16.msra.mxu0 %v9814_v49 }
  0xb3   : > { %9277 = vmatprep.subr.bf16.mxu0 %v9815_v53 }
  0xb5   : > { %1088 = vmatpush1.bf16.msra.mxu1 %v9811_v54 }
  0xb6   : > { %9283 = vmatprep.subr.bf16.mxu1 %v9819_v55  ;;  %9278 = vmatpush3.bf16.msra.mxu0 %v9815_v53 }
  0xb7   : > { %8269 = vmatmul.mubr.msk.bf16.gmra.mrb[4].mxu0 %vm351_vm0, %v882_v51  ;;  %1252 = vmatprep.subr.bf16.mxu0 %v9818_v56 }
  0xb8   : > { %8278 = vmatmul.mubr.msk.bf16.vlgmr.msra.gmra.mrb[4].mxu1 %vm351_vm0, %v881_v45  ;;  %9279 = vmatprep.mubr.msk.bf16.mxu0 %vm351_vm0, %v881_v45 }
  0xb9   : > { %1127 = vmatprep.mubr.bf16.mxu1 %v10699_v0  ;;  %9284 = vmatpush3.bf16.msra.mxu1 %v9819_v55 }
  0xba   : > { %9285 = vmatprep.subr.bf16.mxu1 %v9823_v57 }
  0xbd   : > { %9286 = vmatpush3.bf16.msra.mxu1 %v9823_v57 }
  0xbe   : > { %1407 = vmatprep.subr.bf16.mxu1 %v9826_v60 }
  0xbf   : > { %9280 = vmatmul.mubr.msk.bf16.vlgmr.msra.gmra.mrb[8].mxu0 %vm351_vm0, %v882_v51 }
  0xc0   : > { %8279 = vmatmul.mubr.msk.bf16.gmra.mrb[8].mxu1 %vm351_vm0, %v882_v51  ;;  %1253 = vmatpush1.bf16.msra.mxu0 %v9816_v61 }
  0xc1   : > { %1284 = vmatprep.mubr.bf16.mxu0 %v10699_v0  ;;  %1254 = vmatprep.subr.bf16.mxu0 %v9822_v62 }
  0xc2   : > { %9287 = vmatprep.mubr.msk.bf16.mxu1 %vm351_vm0, %v1203_v63 }
  0xc4   : > { %1255 = vmatpush1.bf16.msra.mxu0 %v9820_v1 }
  0xc5   : > { %9291 = vmatprep.subr.bf16.mxu0 %v9830_v4 }
  0xc7   : > { %8288 = vmatmul.mubr.msk.bf16.vlgmr.msra.gmra.mrb[0].mxu0 %vm351_vm0, %v1203_v63 }
  0xc8   : > { %9288 = vmatmul.mubr.msk.bf16.vlgmr.msra.gmra.mrb[0].mxu1 %vm351_vm0, %v1204_v6  ;;  %1294 = vmatprep.mubr.bf16.mxu0 %v10699_v0 }
  0xc9   : > { %1408 = vmatpush1.bf16.msra.mxu1 %v9824_v5  ;;  %1439 = vmatprep.mubr.bf16.mxu1 %v10699_v0 }
  0xca   : > { %1409 = vmatprep.subr.bf16.mxu1 %v9829_v7  ;;  %9292 = vmatpush3.bf16.msra.mxu0 %v9830_v4  ;;  %v1857_v4 = vadd.s32 8, %v10970_v29 }
  0xcb   : > { %9293 = vmatprep.subr.bf16.mxu0 %v9831_v8 }
  0xcd   : > { %1410 = vmatpush1.bf16.msra.mxu1 %v9827_v9 }
  0xce   : > { %9299 = vmatprep.subr.bf16.mxu1 %v9835_v10  ;;  %9294 = vmatpush3.bf16.msra.mxu0 %v9831_v8 }
  0xcf   : > { %8289 = vmatmul.mubr.msk.bf16.gmra.mrb[4].mxu0 %vm351_vm0, %v1204_v6  ;;  %1574 = vmatprep.subr.bf16.mxu0 %v9834_v11 }
  0xd0   : > { %8298 = vmatmul.mubr.msk.bf16.vlgmr.msra.gmra.mrb[4].mxu1 %vm351_vm0, %v1203_v63  ;;  %9295 = vmatprep.mubr.msk.bf16.mxu0 %vm351_vm0, %v1203_v63 }
  0xd1   : > { %1449 = vmatprep.mubr.bf16.mxu1 %v10699_v0  ;;  %9300 = vmatpush3.bf16.msra.mxu1 %v9835_v10 }
  0xd2   : > { %9301 = vmatprep.subr.bf16.mxu1 %v9839_v12 }
  0xd5   : > { %9302 = vmatpush3.bf16.msra.mxu1 %v9839_v12 }
  0xd6   : > { %1729 = vmatprep.subr.bf16.mxu1 %v9842_v15 }
  0xd7   : > { %9296 = vmatmul.mubr.msk.bf16.vlgmr.msra.gmra.mrb[8].mxu0 %vm351_vm0, %v1204_v6 }
  0xd8   : > { %8299 = vmatmul.mubr.msk.bf16.gmra.mrb[8].mxu1 %vm351_vm0, %v1204_v6  ;;  %1575 = vmatpush1.bf16.msra.mxu0 %v9832_v16  ;;  %v1861_v16 = vmul.u32 2, %v1857_v4 }
  0xd9   : > { %1606 = vmatprep.mubr.bf16.mxu0 %v10699_v0  ;;  %1576 = vmatprep.subr.bf16.mxu0 %v9838_v17 }
  0xda   : > { %9303 = vmatprep.mubr.msk.bf16.mxu1 %vm351_vm0, %v1525_v18  ;;  %vm1863_vm7 = vcmp.eq.s32.totalorder %v10972_v30, %v1861_v16 }
  0xdb   : > { %v8323_v17 = vsel %vm1863_vm7, 1.0, %v10700_v32 }
  0xdc   : > { %1577 = vmatpush1.bf16.msra.mxu0 %v9836_v19  ;;  %v9850_v19 = vld [vmem:[#allocation7 + $0x1a8] ss:$12 sps:$4 sm:$0xff]  }
  0xdd   : > { %9307 = vmatprep.subr.bf16.mxu0 %v9846_v22 }
  0xdf   : > { %8308 = vmatmul.mubr.msk.bf16.vlgmr.msra.gmra.mrb[0].mxu0 %vm351_vm0, %v1525_v18 }
  0xe0   : > { %9304 = vmatmul.mubr.msk.bf16.vlgmr.msra.gmra.mrb[0].mxu1 %vm351_vm0, %v1526_v24  ;;  %1616 = vmatprep.mubr.bf16.mxu0 %v10699_v0 }
  0xe1   : > { %1730 = vmatpush1.bf16.msra.mxu1 %v9840_v23  ;;  %1761 = vmatprep.mubr.bf16.mxu1 %v10699_v0 }
  0xe2   : > { %1731 = vmatprep.subr.bf16.mxu1 %v9845_v25  ;;  %9308 = vmatpush3.bf16.msra.mxu0 %v9846_v22  ;;  %v9853_v22 = vld [vmem:[#allocation7 + $0x1c0] ss:$12 sps:$4 sm:$0xff]   ;;  %v9856_v25 = vld [vmem:[#allocation7 + $0x1d8] ss:$12 sps:$4 sm:$0xff]  }
  0xe3   : > { %9309 = vmatprep.subr.bf16.mxu0 %v9847_v26 }
  0xe5   : > { %1732 = vmatpush1.bf16.msra.mxu1 %v9843_v27  ;;  %v9859_v27 = vld [vmem:[#allocation7 + $0x1f0] ss:$12 sps:$4 sm:$0xff]  }
  0xe6   : > { %9310 = vmatpush3.bf16.msra.mxu0 %v9847_v26  ;;  %v9854_v26 = vld [vmem:[#allocation7 + $0x1d4] ss:$12 sps:$4 sm:$0xff]  }
  0xe7   : > { %8309 = vmatmul.mubr.msk.bf16.gmra.mrb[4].mxu0 %vm351_vm0, %v1526_v24 }
  0xe8   : > { %8318 = vmatmul.mubr.msk.bf16.vlgmr.msra.gmra.mrb[4].mxu1 %vm351_vm0, %v1525_v18  ;;  %9311 = vmatprep.mubr.msk.bf16.mxu0 %vm351_vm0, %v1525_v18  ;;  %v1869_v18 = vadd.s32 1, %v1861_v16 }
  0xe9   : > { %1771 = vmatprep.mubr.bf16.mxu1 %v10699_v0 }
  0xea   : > { %vm1871_vm8 = vcmp.eq.s32.totalorder %v10972_v30, %v1869_v18  ;;  %v9862_v30 = vld [vmem:[#allocation7 + $0x208] ss:$12 sps:$4 sm:$0xff]  }
  0xeb   : > { %v8325_v23 = vsel %vm1871_vm8, 1.0, %v10700_v32  ;;  %vm8105_vm8 = vcmask 764928  }
  0xef   : > { %9312 = vmatmul.mubr.msk.bf16.vlgmr.msra.gmra.mrb[8].mxu0 %vm351_vm0, %v1526_v24 }
  0xf0   : > { %8319 = vmatmul.mubr.msk.bf16.gmra.mrb[8].mxu1 %vm351_vm0, %v1526_v24  ;;  %1957 = vmatprep.mubr.f32.mxu0 %v10700_v32  ;;  %v9851_v24 = vld [vmem:[#allocation7 + $0x1bc] ss:$12 sps:$4 sm:$0xff]   ;;  %vm11289_vm0 = vmpackc.low %vm6741_vm15, %vm10701_vm5  ;;  %vm8099_vm5 = vsmask.f32 7424 }
  0xf1   : > { %9323 = vmatprep.mubr.msk.f32.mxu1 %vm1876_vm2, %v10982_v33  ;;  %vm8100_vm7 = vmand %vm8098_vm3, %vm8099_vm5 }
 0x1b2   : > { %v1608_v35 = vpop.f32.mrb[0].mxu0 }
 0x1b3   : > { %v9305_v36 = vpop.f32.mrb[0].mxu1  ;;  %v1610_v37 = vpop.f32.mrb[1].mxu0 }
 0x1b4   : > { %v1661_v38 = vpop.f32.mrb[1].mxu1  ;;  %v1612_v39 = vpop.f32.mrb[2].mxu0 }
 0x1b5   : > { %v9306_v40 = vpop.f32.mrb[2].mxu1  ;;  %v1614_v41 = vpop.f32.mrb[3].mxu0 }
 0x1b6   : > { %v1664_v42 = vpop.f32.mrb[3].mxu1 }
 0x1ba   : > { %v1618_v43 = vpop.f32.mrb[4].mxu0 }
 0x1bb   : > { %v1763_v44 = vpop.f32.mrb[4].mxu1  ;;  %v1620_v46 = vpop.f32.mrb[5].mxu0 }
 0x1bc   : > { %v1843_v45 = vmax.f32 %v1608_v35, %v1763_v44  ;;  %v1765_v47 = vpop.f32.mrb[5].mxu1  ;;  %v1622_v49 = vpop.f32.mrb[6].mxu0  ;;  %v9863_v35 = vld [vmem:[#allocation7 + $0x21c] ss:$12 sps:$4 sm:$0xff]   ;;  %v9880_v44 = vld [vmem:[#allocation7 + $0x298] ss:$12 sps:$4 sm:$0xff]  }
 0x1bd   : > { %v1844_v48 = vmax.f32 %v1610_v37, %v1765_v47  ;;  %v1767_v50 = vpop.f32.mrb[6].mxu1  ;;  %v1624_v52 = vpop.f32.mrb[7].mxu0  ;;  %v9866_v37 = vld [vmem:[#allocation7 + $0x234] ss:$12 sps:$4 sm:$0xff]   ;;  %v9881_v47 = vld [vmem:[#allocation7 + $0x2ac] ss:$12 sps:$4 sm:$0xff]  }
 0x1be   : > { %v1846_v51 = vmax.f32 %v1612_v39, %v1767_v50  ;;  %v1769_v53 = vpop.f32.mrb[7].mxu1  ;;  %v9869_v39 = vld [vmem:[#allocation7 + $0x24c] ss:$12 sps:$4 sm:$0xff]  }
 0x1bf   : > { %v1847_v54 = vmax.f32 %v1614_v41, %v1769_v53  ;;  %v9874_v41 = vld [vmem:[#allocation7 + $0x268] ss:$12 sps:$4 sm:$0xff]   ;;  %v9889_v50 = vld [vmem:[#allocation7 + $0x2e0] ss:$12 sps:$4 sm:$0xff]   ;;  %v9894_v53 = vld [vmem:[#allocation7 + $0x344] ss:$0 sps:$4 sm:$0xff]  }
 0x1c0   : > { %v9433_v55 = vpack.c.bf16 %v1846_v51, %v1843_v45  ;;  %v9878_v45 = vld [vmem:[#allocation7 + $0x294] ss:$12 sps:$4 sm:$0xff]   ;;  %v9890_v51 = vld [vmem:[#allocation7 + $0x32c] ss:$12 sps:$4 sm:$0xff]  }
 0x1c1   : > { %v9431_v56 = vpack.c.bf16 %v1847_v54, %v1844_v48  ;;  %v9886_v48 = vld [vmem:[#allocation7 + $0x2c8] ss:$12 sps:$4 sm:$0xff]   ;;  %v9893_v54 = vld [vmem:[#allocation7 + $0x2f8] ss:$12 sps:$4 sm:$0xff]  }
 0x1c2   : > { %v9313_v58 = vpop.f32.mrb[8].mxu0 }
 0x1c3   : > { %v1773_v57 = vpop.f32.mrb[8].mxu1  ;;  %9432 = vmatprep.subr.bf16.mxu0 %v9431_v56  ;;  %v1851_v60 = vmax.f32 %v9305_v36, %v9313_v58  ;;  %v1816_v62 = vpop.f32.mrb[9].mxu0  ;;  %v9868_v36 = vld [vmem:[#allocation7 + $0x238] ss:$12 sps:$4 sm:$0xff]   ;;  %v9897_v58 = vld [vmem:[#allocation7 + $0x310] ss:$12 sps:$4 sm:$0xff]  }
 0x1c4   : > { %v1849_v59 = vmax.f32 %v1618_v43, %v1773_v57  ;;  %v1775_v61 = vpop.f32.mrb[9].mxu1  ;;  %9434 = vmatpush1.bf16.msra.mxu0 %v9433_v55  ;;  %v1845_v1 = vmax.f32 %v1661_v38, %v1816_v62  ;;  %v9314_v3 = vpop.f32.mrb[10].mxu0  ;;  %v9871_v38 = vld [vmem:[#allocation7 + $0x250] ss:$12 sps:$4 sm:$0xff]   ;;  %v9891_v57 = vld [vmem:[#allocation7 + $0x2f4] ss:$12 sps:$4 sm:$0xff]  }
 0x1c5   : > { %v1850_v63 = vmax.f32 %v1620_v46, %v1775_v61  ;;  %v1777_v2 = vpop.f32.mrb[10].mxu1  ;;  %v1854_v6 = vmax.f32 %v9306_v40, %v9314_v3  ;;  %v1819_v8 = vpop.f32.mrb[11].mxu0  ;;  %v9872_v40 = vld [vmem:[#allocation7 + $0x264] ss:$12 sps:$4 sm:$0xff]   ;;  %v9875_v43 = vld [vmem:[#allocation7 + $0x27c] ss:$12 sps:$4 sm:$0xff]  }
 0x1c6   : > { %v1852_v5 = vmax.f32 %v1622_v49, %v1777_v2  ;;  %v1779_v7 = vpop.f32.mrb[11].mxu1  ;;  %v1848_v10 = vmax.f32 %v1664_v42, %v1819_v8  ;;  %v9877_v42 = vld [vmem:[#allocation7 + $0x280] ss:$12 sps:$4 sm:$0xff]   ;;  %v9883_v46 = vld [vmem:[#allocation7 + $0x2b0] ss:$12 sps:$4 sm:$0xff]   ;;  %v2217_v3 = vsub.s32 1, %v10970_v29 }
 0x1c7   : > { %v1853_v9 = vmax.f32 %v1624_v52, %v1779_v7  ;;  %v9445_v12 = vpack.c.bf16 %v1854_v6, %v1851_v60  ;;  %v9884_v49 = vld [vmem:[#allocation7 + $0x2c4] ss:$12 sps:$4 sm:$0xff]   ;;  %v9887_v52 = vld [vmem:[#allocation7 + $0x2dc] ss:$12 sps:$4 sm:$0xff]   ;;  %v2221_v8 = vsub.s32 2, %v10970_v29 }
 0x1c8   : > { %v9438_v11 = vpack.c.bf16 %v1852_v5, %v1849_v59  ;;  %v9441_v15 = vpack.c.bf16 %v1848_v10, %v1845_v1  ;;  %v9895_v59 = vld [vmem:[#allocation7 + $0x30c] ss:$12 sps:$4 sm:$0xff]   ;;  %v9903_v60 = vld [vmem:[#allocation7 + $0x328] ss:$12 sps:$4 sm:$0xff]   ;;  %v2209_v5 = vld [vmem:[#allocation5] sm:$0x7] }
 0x1c9   : > { %v9435_v14 = vpack.c.bf16 %v1853_v9, %v1850_v63  ;;  %v2213_v63 = vsub.s32 0, %v10970_v29  ;;  %v2218_v10 = vrot.slane %v2209_v5, %v2217_v3 }
 0x1ca   : > { %9442 = vmatprep.subr.bf16.mxu1 %v9441_v15 }
 0x1cb   : > { %9437 = vmatprep.subr.msk.bf16.mxu0 %vm10993_vm6, %v9435_v14  ;;  %9444 = vmatpush3.bf16.msra.mxu1 %v9441_v15  ;;  %v2214_v7 = vrot.slane %v2209_v5, %v2213_v63 }
 0x1cc   : > { %9440 = vmatpush1.bf16.msk.msra.mxu0 %vm10993_vm6, %v9438_v11  ;;  %9447 = vmatprep.subr.msk.bf16.mxu1 %vm10993_vm6, %v9445_v12 }
 0x1cd   : > { %9452 = vmatprep.subr.bf16.mxu0 %v9431_v56  ;;  %v9898_v56 = vld [vmem:[#allocation7 + $0xc8] ss:$12 sps:$4 sm:$0xff]  }
 0x1cf   : > { %8328 = vmatmul.mubr.msk.f32.vlgmr.msra.gmra.mrb[12].mxu0 %vm1876_vm2, %v10982_v33  ;;  %9450 = vmatpush3.bf16.msk.msra.mxu1 %vm10993_vm6, %v9445_v12 }
 0x1d0   : > { %9454 = vmatpush1.bf16.msra.mxu0 %v9433_v55  ;;  %9462 = vmatprep.subr.bf16.mxu1 %v9441_v15  ;;  %v2821_v55 = vsel %vm1883_vm4, %v9894_v53, 0 }
 0x1d1   : > { %9457 = vmatprep.subr.msk.bf16.mxu0 %vm10993_vm6, %v9435_v14  ;;  %1963 = vmatprep.mubr.f32.mxu0 %v10700_v32 }
 0x1d2   : > { %9324 = vmatmul.mubr.msk.f32.vlgmr.msra.gmra.mrb[12].mxu1 %vm1876_vm2, %v8323_v17 }
 0x1d3   : > { %8329 = vmatmul.mubr.msk.f32.gmra.mrb[14].mxu0 %vm1876_vm2, %v8323_v17  ;;  %9464 = vmatpush3.bf16.msra.mxu1 %v9441_v15  ;;  %v2222_v15 = vrot.slane %v2209_v5, %v2221_v8 }
 0x1d4   : > { %9460 = vmatpush1.bf16.msk.msra.mxu0 %vm10993_vm6, %v9438_v11  ;;  %9467 = vmatprep.subr.msk.bf16.mxu1 %vm10993_vm6, %v9445_v12 }
 0x1d5   : > { %2115 = vmatprep.mubr.f32.mxu0 %v10700_v32  ;;  %9334 = vmatprep.mubr.msk.f32.mxu1 %vm1876_vm2, %v11020_v20 }
 0x1d6   : > { %2823 = vmatprep.subr.bf16.mxu0 %v9850_v19 }
 0x1d7   : > { %8335 = vmatmul.mubr.msk.f32.vlgmr.msra.gmra.mrb[16].mxu0 %vm1876_vm2, %v11020_v20  ;;  %9470 = vmatpush3.bf16.msk.msra.mxu1 %vm10993_vm6, %v9445_v12 }
 0x1d8   : > { %2121 = vmatprep.mubr.f32.mxu0 %v10700_v32  ;;  %2824 = vmatpush1.bf16.msra.mxu0 %v9848_v21 }
 0x1d9   : > { %9337 = vmatprep.subr.bf16.mxu1 %v10700_v32  ;;  %2825 = vmatprep.subr.bf16.mxu0 %v9853_v22 }
 0x1da   : > { %9335 = vmatmul.mubr.msk.f32.vlgmr.msra.gmra.mrb[14].mxu1 %vm1876_vm2, %v8325_v23 }
 0x1db   : > { %8336 = vmatmul.mubr.msk.f32.gmra.mrb[18].mxu0 %vm1876_vm2, %v8325_v23  ;;  %9338 = vmatpush3.bf16.msra.mxu1 %v9890_v51  ;;  %vm8096_vm2 = vsmask.f32 3328 }
 0x1dc   : > { %2826 = vmatpush1.bf16.msra.mxu0 %v9851_v24  ;;  %9339 = vmatprep.subr.bf16.mxu1 %v10700_v32  ;;  %vm11325_vm6 = vmand %vm1883_vm4, %vm8096_vm2 }
 0x1dd   : > { %2827 = vmatprep.subr.bf16.mxu0 %v9856_v25  ;;  %9341 = vmatprep.mubr.msk.bf16.mxu1 %vm10702_vm10, %v10700_v32 }
 0x1df   : > { %9340 = vmatpush3.bf16.msra.mxu1 %v2821_v55 }
 0x1e0   : > { %2828 = vmatpush1.bf16.msra.mxu0 %v9854_v26  ;;  %9004 = vmatprep.subr.bf16.mxu1 %v9898_v56 }
 0x1e1   : > { %2829 = vmatprep.subr.bf16.mxu0 %v9859_v27 }
 0x1e4   : > { %2830 = vmatpush1.bf16.msra.mxu0 %v9857_v28 }
 0x1e5   : > { %2831 = vmatprep.subr.bf16.mxu0 %v9862_v30 }
 0x1e8   : > { %2832 = vmatpush1.bf16.msra.mxu0 %v9860_v31 }
 0x1e9   : > { %2833 = vmatprep.subr.bf16.mxu0 %v9865_v34 }
 0x1ec   : > { %2834 = vmatpush1.bf16.msra.mxu0 %v9863_v35 }
 0x1ed   : > { %2835 = vmatprep.subr.bf16.mxu0 %v9868_v36 }
 0x1f0   : > { %2836 = vmatpush1.bf16.msra.mxu0 %v9866_v37 }
 0x1f1   : > { %2837 = vmatprep.subr.bf16.mxu0 %v9871_v38 }
 0x1f4   : > { %2838 = vmatpush1.bf16.msra.mxu0 %v9869_v39 }
 0x1f5   : > { %2839 = vmatprep.subr.bf16.mxu0 %v9874_v41 }
 0x1f8   : > { %2840 = vmatpush1.bf16.msra.mxu0 %v9872_v40 }
 0x1f9   : > { %2841 = vmatprep.subr.bf16.mxu0 %v9877_v42 }
 0x1fc   : > { %2842 = vmatpush1.bf16.msra.mxu0 %v9875_v43 }
 0x1fd   : > { %2843 = vmatprep.subr.bf16.mxu0 %v9880_v44 }
 0x200   : > { %2844 = vmatpush1.bf16.msra.mxu0 %v9878_v45 }
 0x201   : > { %2845 = vmatprep.subr.bf16.mxu0 %v9883_v46 }
 0x204   : > { %2846 = vmatpush1.bf16.msra.mxu0 %v9881_v47 }
 0x205   : > { %2847 = vmatprep.subr.bf16.mxu0 %v9886_v48 }
 0x208   : > { %2848 = vmatpush1.bf16.msra.mxu0 %v9884_v49 }
 0x209   : > { %2849 = vmatprep.subr.bf16.mxu0 %v9889_v50 }
 0x20c   : > { %2850 = vmatpush1.bf16.msra.mxu0 %v9887_v52 }
 0x20d   : > { %2851 = vmatprep.subr.bf16.mxu0 %v9893_v54 }
 0x210   : > { %2852 = vmatpush1.bf16.msra.mxu0 %v9891_v57 }
 0x211   : > { %2853 = vmatprep.subr.bf16.mxu0 %v9897_v58 }
 0x214   : > { %2854 = vmatpush1.bf16.msra.mxu0 %v9895_v59 }
 0x215   : > { %2866 = vmatprep.subr.bf16.mxu0 %v9903_v60 }
 0x2a2   : > { %v1959_v61 = vpop.f32.mrb[12].mxu0 }
 0x2a3   : > { %v1961_v62 = vpop.f32.mrb[13].mxu0 }
 0x2a5   : > { %v9325_v2 = vpop.f32.mrb[12].mxu1 }
 0x2a6   : > { %v1965_v1 = vpop.f32.mrb[14].mxu0  ;;  %v2036_v6 = vpop.f32.mrb[13].mxu1 }
 0x2a7   : > { %v1967_v4 = vpop.f32.mrb[15].mxu0 }
 0x2aa   : > { %v2117_v9 = vpop.f32.mrb[16].mxu0 }
 0x2ab   : > { %v2203_v11 = vmax.f32 %v1959_v61, %v2117_v9  ;;  %v2119_v12 = vpop.f32.mrb[17].mxu0 }
 0x2ac   : > { %v2204_v13 = vmax.f32 %v1961_v62, %v2119_v12  ;;  %v9899_v62 = vld [vmem:[#allocation7 + $0x8] ss:$12 sps:$4 sm:$0xff]  }
 0x2ad   : > { %v2226_v14 = vadd.f32 %v2214_v7, %v2203_v11  ;;  %v9336_v18 = vpop.f32.mrb[14].mxu1 }
 0x2ae   : > { %v2227_v16 = vadd.f32 %v2218_v10, %v2204_v13  ;;  %v2123_v17 = vpop.f32.mrb[18].mxu0  ;;  %v2208_v22 = vmax.f32 %v9325_v2, %v9336_v18  ;;  %v2194_v24 = vpop.f32.mrb[15].mxu1  ;;  %v5532_v2 = vld [vmem:[#allocation2 + $0x40] sm:$0x1] }
 0x2af   : > { %v2232_v19 = vmax.f32 %v2226_v14, 0.0  ;;  %v2206_v21 = vmax.f32 %v1965_v1, %v2123_v17  ;;  %v2125_v23 = vpop.f32.mrb[19].mxu0  ;;  %v2205_v27 = vmax.f32 %v2036_v6, %v2194_v24  ;;  %v9901_v17 = vld [vmem:[#allocation7 + $0x324] ss:$12 sps:$4 sm:$0xff]   ;;  %v9904_v24 = vld [vmem:[#allocation7 + $0x20] ss:$12 sps:$4 sm:$0xff]  }
 0x2b0   : > { %v2233_v25 = vmax.f32 %v2227_v16, 0.0  ;;  %v2207_v26 = vmax.f32 %v1967_v4, %v2125_v23  ;;  %v2231_v31 = vadd.f32 %v2222_v15, %v2208_v22  ;;  %v9900_v16 = vld [vmem:[#allocation7 + $0xe0] ss:$12 sps:$4 sm:$0xff]  }
 0x2b1   : > { %v2256_v28 = vrot.slane %v2232_v19, 6  ;;  %v2229_v30 = vadd.f32 %v2214_v7, %v2206_v21  ;;  %v2228_v36 = vadd.f32 %v2222_v15, %v2205_v27  ;;  %v2506_v7 = vld [vmem:[#allocation7 + $0x33c] sm:$0xff]  ;;  %v5538_v21 = vpack.c.bf16 %v5532_v2, %v5532_v2  ;;  %v9910_v27 = vld [vmem:[#allocation7 + $0x26c] ss:$12 sps:$4 sm:$0xff]   ;;  %v9931_v2 = vld [vmem:[#allocation7 + $0x224] ss:$12 sps:$4 sm:$0xff]  }
 0x2b2   : > { %v2257_v34 = vrot.slane %v2233_v25, 6  ;;  %v2230_v35 = vadd.f32 %v2218_v10, %v2207_v26  ;;  %v2237_v38 = vmax.f32 %v2231_v31, 0.0  ;;  %v8392_v18 = vcombine.high %v2506_v7, %v2506_v7  ;;  %v9905_v25 = vld [vmem:[#allocation7 + $0xf8] ss:$12 sps:$4 sm:$0xff]  }
 0x2b3   : > { %2271 = vst [vmem:[#allocation2] sm:$0xfc] %v2256_v28  ;;  %v2235_v37 = vmax.f32 %v2229_v30, 0.0  ;;  %v2234_v40 = vmax.f32 %v2228_v36, 0.0  ;;  %v8391_v19 = vcombine.low %v2506_v7, %v2506_v7  ;;  %v5646_v30 = vshll.u32 %v5538_v21, 16 }
 0x2b4   : > { %2272 = vst [vmem:[#allocation2 + $0x8] sm:$0xfc] %v2257_v34  ;;  %v2236_v39 = vmax.f32 %v2230_v35, 0.0  ;;  %v2263_v42 = vrot.slane %v2237_v38, 6  ;;  %v9909_v36 = vld [vmem:[#allocation7 + $0x110] ss:$12 sps:$4 sm:$0xff]  }
 0x2b5   : > { %v2259_v41 = vrot.slane %v2235_v37, 6  ;;  %v2258_v44 = vrot.slane %v2234_v40, 6  ;;  %v2815_v26 = vsel %vm1883_vm4, %v8391_v19, 0  ;;  %v5648_v38 = vrot.slane %v5646_v30, 2  ;;  %v9934_v7 = vld [vmem:[#allocation7 + $0x23c] ss:$12 sps:$4 sm:$0xff]  }
 0x2b6   : > { %v2261_v43 = vrot.slane %v2236_v39, 6  ;;  %v9911_v39 = vld [vmem:[#allocation7 + $0x50] ss:$12 sps:$4 sm:$0xff]   ;;  %v9942_v19 = vld [vmem:[#allocation7 + $0x9f4] ss:$12 sps:$4 sm:$0xff]  }
 0x2b7   : > { %v2260_v45 = vsel %vm2255_vm12, %v2256_v28, %v2259_v41  ;;  %v2264_v47 = vsel %vm2255_vm12, %v2258_v44, %v2263_v42  ;;  %2274 = vst.msk [vmem:[#allocation2 + $0x10] sm:$0xfc] %vm2273_vm13, %v2258_v44  ;;  %v9912_v41 = vld [vmem:[#allocation7 + $0x1ac] ss:$12 sps:$4 sm:$0xff]   ;;  %v9913_v42 = vld [vmem:[#allocation7 + $0x128] ss:$12 sps:$4 sm:$0xff]  }
 0x2b8   : > { %2275 = vst [vmem:[#allocation2 + $0x18] sm:$0xff] %v2260_v45  ;;  %v2262_v46 = vsel %vm2255_vm12, %v2257_v34, %v2261_v43  ;;  %2277 = vst.msk [vmem:[#allocation2 + $0x28] sm:$0xff] %vm2240_vm9, %v2264_v47  ;;  %v9907_v34 = vld [vmem:[#allocation7 + $0x38] ss:$12 sps:$4 sm:$0xff]   ;;  %v9915_v45 = vld [vmem:[#allocation7 + $0x68] ss:$12 sps:$4 sm:$0xff]  }
 0x2b9   : > { %2276 = vst [vmem:[#allocation2 + $0x20] sm:$0xff] %v2262_v46  ;;  %v9914_v43 = vld [vmem:[#allocation7 + $0x284] ss:$12 sps:$4 sm:$0xff]   ;;  %v9917_v47 = vld [vmem:[#allocation7 + $0x140] ss:$12 sps:$4 sm:$0xff]  }
 0x2ba   : > { %v2428_v48 = vld [vmem:[#allocation2] sm:$0xfe]  ;;  %v9916_v46 = vld [vmem:[#allocation7 + $0x1c4] ss:$12 sps:$4 sm:$0xff]  }
 0x2bb   : > { %v2429_v49 = vld [vmem:[#allocation2 + $0x8] sm:$0xfe]  ;;  %v9945_v21 = vld [vmem:[#allocation7 + $0x4] ss:$12 sps:$4 sm:$0xff]  }
 0x2bc   : > { %v2279_v9 = vld [vmem:[#allocation2 + $0x8] sm:$0xff]  ;;  %v9954_v30 = vld [vmem:[#allocation7 + $0xa24] ss:$12 sps:$4 sm:$0xff]  }
 0x2be   : > { %v2430_v50 = vld [vmem:[#allocation2 + $0x10] sm:$0xfe] }
 0x2bf   : > { %v2431_v51 = vld [vmem:[#allocation2 + $0x18] sm:$0x7f]  ;;  %v2433_v53 = vld [vmem:[#allocation2 + $0x28] sm:$0x7f]  ;;  %v5526_v13 = vld [vmem:[#allocation2 + $0x10] sm:$0xf8] }
 0x2c0   : > { %v2432_v52 = vld [vmem:[#allocation2 + $0x20] sm:$0x7f]  ;;  %v2434_v54 = vpack.c.bf16 %v2431_v51, %v2428_v48  ;;  %v2436_v56 = vpack.c.bf16 %v2433_v53, %v2430_v50  ;;  %v4441_v12 = vld [vmem:[#allocation2 + $0x28] sm:$0xff] }
 0x2c1   : > { %v2435_v55 = vpack.c.bf16 %v2432_v52, %v2429_v49  ;;  %v2282_v11 = vld [vmem:[#allocation2 + $0x20] sm:$0x3f]  ;;  %v5535_v23 = vpack.c.bf16 %v4441_v12, %v5526_v13  ;;  %v9918_v48 = vld [vmem:[#allocation7 + $0x29c] ss:$12 sps:$4 sm:$0xff]   ;;  %v9919_v49 = vld [vmem:[#allocation7 + $0x80] ss:$12 sps:$4 sm:$0xff]  }
 0x2c2   : > { %v2509_v57 = vshrl.u32 %v2434_v54, 16  ;;  %v2511_v58 = vshll.u32 %v2434_v54, 16  ;;  %v2525_v61 = vshll.u32 %v2436_v56, 16  ;;  %v2523_v5 = vshrl.u32 %v2436_v56, 16  ;;  %v9920_v50 = vld [vmem:[#allocation7 + $0x1dc] ss:$12 sps:$4 sm:$0xff]  }
 0x2c3   : > { %v2516_v59 = vshrl.u32 %v2435_v55, 16  ;;  %v2518_v60 = vshll.u32 %v2435_v55, 16  ;;  %v11065_v22 = vpack.c.bf16 %v2282_v11, %v2279_v9  ;;  %v5638_v28 = vshrl.u32 %v5535_v23, 16  ;;  %v9921_v51 = vld [vmem:[#allocation7 + $0x158] ss:$12 sps:$4 sm:$0xff]  }
 0x2c4   : > { %v2513_v1 = vrot.slane %v2511_v58, 1  ;;  %v2527_v6 = vrot.slane %v2525_v61, 1  ;;  %v5641_v31 = vshll.u32 %v5535_v23, 16  ;;  %v9922_v52 = vld [vmem:[#allocation7 + $0x2b4] ss:$12 sps:$4 sm:$0xff]   ;;  %v2280_v11 = vld [vmem:[#allocation2 + $0x10] sm:$0xff] }
 0x2c5   : > { %v2520_v4 = vrot.slane %v2518_v60, 1  ;;  %v5640_v35 = vrot.slane %v5638_v28, 1  ;;  %v9923_v53 = vld [vmem:[#allocation7 + $0x98] ss:$12 sps:$4 sm:$0xff]   ;;  %v9924_v54 = vld [vmem:[#allocation7 + $0x1f4] ss:$12 sps:$4 sm:$0xff]  }
 0x2c6   : > { %v11056_v10 = vor.u32 %v2513_v1, %v2509_v57  ;;  %v11060_v15 = vor.u32 %v2527_v6, %v2523_v5  ;;  %v5643_v37 = vrot.slane %v5641_v31, 2  ;;  %v9925_v55 = vld [vmem:[#allocation7 + $0x170] ss:$12 sps:$4 sm:$0xff]   ;;  %v9926_v56 = vld [vmem:[#allocation7 + $0x2cc] ss:$12 sps:$4 sm:$0xff]  }
 0x2c7   : > { %v11058_v14 = vor.u32 %v2520_v4, %v2516_v59  ;;  %v9927_v57 = vld [vmem:[#allocation7 + $0xb0] ss:$12 sps:$4 sm:$0xff]   ;;  %v9928_v58 = vld [vmem:[#allocation7 + $0x20c] ss:$12 sps:$4 sm:$0xff]   ;;  %v9933_v4 = vld [vmem:[#allocation7 + $0x1a0] ss:$0 sps:$4 sm:$0xff]  }
 0x2c8   : > { %9342 = vmatmul.mubr.msk.bf16.vlgmr.msra.gmra.mrb[16].mxu1 %vm2240_vm9, %v11060_v15  ;;  %v5644_v40 = vor.u32 %v5643_v37, %v5640_v35  ;;  %v2278_v59 = vld [vmem:[#allocation2] sm:$0xff]  ;;  %v2281_v60 = vld [vmem:[#allocation2 + $0x18] sm:$0x3f]  ;;  %v9932_v5 = vld [vmem:[#allocation7 + $0x2fc] ss:$12 sps:$4 sm:$0xff]   ;;  %v3281_v6 = vsel %vm1883_vm4, %v9933_v4, 0 }
 0x2c9   : > { %2855 = vmatprep.mubr.bf16.mxu0 %v11058_v14  ;;  %9005 = vmatpush3.bf16.msra.mxu1 %v9899_v62  ;;  %v9929_v61 = vld [vmem:[#allocation7 + $0x2e4] ss:$12 sps:$4 sm:$0xff]   ;;  %v9930_v62 = vld [vmem:[#allocation7 + $0x188] ss:$12 sps:$4 sm:$0xff]   ;;  %v11078_v1 = vpack.c.bf16 %v2281_v60, %v2278_v59  ;;  %v2283_v12 = vld [vmem:[#allocation2 + $0x28] sm:$0x3f] }
 0x2ca   : > { %2856 = vmatmul.mubr.bf16.vlgmr.msra.gmra.mrb[20].mxu0 %v11056_v10  ;;  %9006 = vmatprep.subr.bf16.mxu1 %v9900_v16  ;;  %v11073_v44 = vsel %vm5610_vm14, %v5644_v40, %v5648_v38  ;;  %v9937_v9 = vld [vmem:[#allocation7 + $0x9dc] ss:$12 sps:$4 sm:$0xff]   ;;  %v9938_v13 = vld [vmem:[#allocation7 + $0x314] ss:$12 sps:$4 sm:$0xff]   ;;  %v9935_v16 = vld [vmem:[#allocation7 + $0x9d8] ss:$12 sps:$4 sm:$0xff]  }
 0x2cb   : > { %2867 = vmatpush1.bf16.msra.mxu0 %v9901_v17  ;;  %2898 = vmatprep.mubr.bf16.mxu0 %v10699_v0  ;;  %v11086_v17 = vpack.c.bf16 %v2283_v12, %v2280_v11  ;;  %v9940_v23 = vld [vmem:[#allocation7 + $0x9f0] ss:$12 sps:$4 sm:$0xff]   ;;  %v9949_v28 = vld [vmem:[#allocation7 + $0x18] ss:$12 sps:$4 sm:$0xff]   ;;  %v9957_v31 = vld [vmem:[#allocation7 + $0x34] ss:$12 sps:$4 sm:$0xff]  }
 0x2cc   : > { %8394 = vmatprep.subr.msk.bf16.mxu0 %vm1883_vm4, %v8392_v18  ;;  %3401 = vmatprep.mubr.bf16.mxu1 %v11065_v22  ;;  %v9939_v18 = vld [vmem:[#allocation7 + $0x254] ss:$12 sps:$4 sm:$0xff]   ;;  %v9955_v35 = vld [vmem:[#allocation7 + $0x30] ss:$12 sps:$4 sm:$0xff]   ;;  %v9963_v37 = vld [vmem:[#allocation7 + $0x4c] ss:$12 sps:$4 sm:$0xff]  }
 0x2cd   : > { %9007 = vmatpush3.bf16.msra.mxu1 %v9904_v24  ;;  %v9943_v24 = vld [vmem:[#allocation7] ss:$12 sps:$4 sm:$0xff]   ;;  %v9958_v38 = vld [vmem:[#allocation7 + $0xa38] ss:$12 sps:$4 sm:$0xff]   ;;  %v9988_v59 = vld [vmem:[#allocation7 + $0xab0] ss:$12 sps:$4 sm:$0xff]  }
 0x2ce   : > { %9008 = vmatprep.subr.bf16.mxu1 %v9905_v25  ;;  %v9948_v25 = vld [vmem:[#allocation7 + $0xa0c] ss:$12 sps:$4 sm:$0xff]   ;;  %v9966_v40 = vld [vmem:[#allocation7 + $0xa54] ss:$12 sps:$4 sm:$0xff]   ;;  %v10008_v11 = vld [vmem:[#allocation7 + $0xafc] ss:$12 sps:$4 sm:$0xff]  }
 0x2cf   : > { %2869 = vmatpush1.bf16.msra.mxu0 %v2815_v26  ;;  %v9951_v26 = vld [vmem:[#allocation7 + $0x1c] ss:$12 sps:$4 sm:$0xff]   ;;  %v9991_v60 = vld [vmem:[#allocation7 + $0xc0] ss:$12 sps:$4 sm:$0xff]   ;;  %v9997_v4 = vld [vmem:[#allocation7 + $0xd8] ss:$12 sps:$4 sm:$0xff]  }
 0x2d0   : > { %8979 = vmatprep.subr.bf16.mxu0 %v9910_v27  ;;  %v9946_v27 = vld [vmem:[#allocation7 + $0xa08] ss:$12 sps:$4 sm:$0xff]   ;;  %v10011_v12 = vld [vmem:[#allocation7 + $0x10c] ss:$12 sps:$4 sm:$0xff]  }
 0x2d1   : > { %9009 = vmatpush3.bf16.msra.mxu1 %v9907_v34  ;;  %v9952_v34 = vld [vmem:[#allocation7 + $0xa20] ss:$12 sps:$4 sm:$0xff]  }
 0x2d2   : > { %9010 = vmatprep.subr.bf16.mxu1 %v9909_v36  ;;  %v9960_v36 = vld [vmem:[#allocation7 + $0xa3c] ss:$12 sps:$4 sm:$0xff]  }
 0x2d5   : > { %9011 = vmatpush3.bf16.msra.mxu1 %v9911_v39  ;;  %v9961_v39 = vld [vmem:[#allocation7 + $0x48] ss:$12 sps:$4 sm:$0xff]  }
 0x2d6   : > { %8395 = vmatmul.mubr.msk.bf16.vlgmr.msra.gmra.mrb[20].mxu0 %vm2240_vm9, %v11060_v15  ;;  %9012 = vmatprep.subr.bf16.mxu1 %v9913_v42  ;;  %v9964_v42 = vld [vmem:[#allocation7 + $0xa50] ss:$12 sps:$4 sm:$0xff]  }
 0x2d7   : > { %8980 = vmatpush3.bf16.msra.mxu0 %v9912_v41  ;;  %2941 = vmatprep.mubr.bf16.mxu0 %v11058_v14  ;;  %v9969_v41 = vld [vmem:[#allocation7 + $0x64] ss:$12 sps:$4 sm:$0xff]  }
 0x2d8   : > { %8981 = vmatprep.subr.bf16.mxu0 %v9914_v43  ;;  %v9967_v43 = vld [vmem:[#allocation7 + $0x60] ss:$12 sps:$4 sm:$0xff]  }
 0x2d9   : > { %9013 = vmatpush3.bf16.msra.mxu1 %v9915_v45  ;;  %v9972_v45 = vld [vmem:[#allocation7 + $0xa6c] ss:$12 sps:$4 sm:$0xff]  }
 0x2da   : > { %9014 = vmatprep.subr.bf16.mxu1 %v9917_v47  ;;  %v9970_v47 = vld [vmem:[#allocation7 + $0xa68] ss:$12 sps:$4 sm:$0xff]  }
 0x2db   : > { %8982 = vmatpush3.bf16.msra.mxu0 %v9916_v46  ;;  %v9975_v46 = vld [vmem:[#allocation7 + $0x7c] ss:$12 sps:$4 sm:$0xff]  }
 0x2dc   : > { %8983 = vmatprep.subr.bf16.mxu0 %v9918_v48  ;;  %v9973_v48 = vld [vmem:[#allocation7 + $0x78] ss:$12 sps:$4 sm:$0xff]  }
 0x2dd   : > { %9015 = vmatpush3.bf16.msra.mxu1 %v9919_v49  ;;  %v9978_v49 = vld [vmem:[#allocation7 + $0xa84] ss:$12 sps:$4 sm:$0xff]  }
 0x2de   : > { %9016 = vmatprep.subr.bf16.mxu1 %v9921_v51  ;;  %v9976_v51 = vld [vmem:[#allocation7 + $0xa80] ss:$12 sps:$4 sm:$0xff]  }
 0x2df   : > { %8984 = vmatpush3.bf16.msra.mxu0 %v9920_v50  ;;  %v9981_v50 = vld [vmem:[#allocation7 + $0x94] ss:$12 sps:$4 sm:$0xff]  }
 0x2e0   : > { %8985 = vmatprep.subr.bf16.mxu0 %v9922_v52  ;;  %v9979_v52 = vld [vmem:[#allocation7 + $0x90] ss:$12 sps:$4 sm:$0xff]  }
 0x2e1   : > { %9017 = vmatpush3.bf16.msra.mxu1 %v9923_v53  ;;  %v9984_v53 = vld [vmem:[#allocation7 + $0xa9c] ss:$12 sps:$4 sm:$0xff]  }
 0x2e2   : > { %9018 = vmatprep.subr.bf16.mxu1 %v9925_v55  ;;  %v9982_v55 = vld [vmem:[#allocation7 + $0xa98] ss:$12 sps:$4 sm:$0xff]  }
 0x2e3   : > { %8986 = vmatpush3.bf16.msra.mxu0 %v9924_v54  ;;  %v9987_v54 = vld [vmem:[#allocation7 + $0xac] ss:$12 sps:$4 sm:$0xff]  }
 0x2e4   : > { %8987 = vmatprep.subr.bf16.mxu0 %v9926_v56  ;;  %v9985_v56 = vld [vmem:[#allocation7 + $0xa8] ss:$12 sps:$4 sm:$0xff]  }
 0x2e5   : > { %9019 = vmatpush3.bf16.msra.mxu1 %v9927_v57  ;;  %v9990_v57 = vld [vmem:[#allocation7 + $0xab4] ss:$12 sps:$4 sm:$0xff]  }
 0x2e6   : > { %9345 = vmatprep.subr.bf16.mxu1 %v10700_v32 }
 0x2e7   : > { %8988 = vmatpush3.bf16.msra.mxu0 %v9928_v58  ;;  %v9993_v58 = vld [vmem:[#allocation7 + $0xc4] ss:$12 sps:$4 sm:$0xff]  }
 0x2e8   : > { %8989 = vmatprep.subr.bf16.mxu0 %v9929_v61  ;;  %3402 = vmatmul.mubr.bf16.vlgmr.msra.gmra.mrb[20].mxu1 %v11078_v1  ;;  %v9996_v61 = vld [vmem:[#allocation7 + $0xacc] ss:$12 sps:$4 sm:$0xff]  }
 0x2e9   : > { %9346 = vmatpush3.bf16.msra.mxu1 %v9930_v62  ;;  %9349 = vmatprep.mubr.msk.bf16.mxu1 %vm10702_vm10, %v10700_v32  ;;  %v9999_v62 = vld [vmem:[#allocation7 + $0xdc] ss:$12 sps:$4 sm:$0xff]  }
 0x2ea   : > { %9347 = vmatprep.subr.bf16.mxu1 %v10700_v32 }
 0x2eb   : > { %8990 = vmatpush3.bf16.msra.mxu0 %v9931_v2  ;;  %v9994_v2 = vld [vmem:[#allocation7 + $0xac8] ss:$12 sps:$4 sm:$0xff]  }
 0x2ec   : > { %8991 = vmatprep.subr.bf16.mxu0 %v9932_v5  ;;  %v10002_v5 = vld [vmem:[#allocation7 + $0xae4] ss:$12 sps:$4 sm:$0xff]  }
 0x2ed   : > { %9348 = vmatpush3.bf16.msra.mxu1 %v3281_v6  ;;  %v10005_v6 = vld [vmem:[#allocation7 + $0xf4] ss:$12 sps:$4 sm:$0xff]  }
 0x2ee   : > { %3811 = vmatprep.subr.bf16.mxu1 %v9937_v9  ;;  %v10003_v9 = vld [vmem:[#allocation7 + $0xf0] ss:$12 sps:$4 sm:$0xff]  }
 0x2ef   : > { %8992 = vmatpush3.bf16.msra.mxu0 %v9934_v7  ;;  %v10000_v7 = vld [vmem:[#allocation7 + $0xae0] ss:$12 sps:$4 sm:$0xff]  }
 0x2f0   : > { %8993 = vmatprep.subr.bf16.mxu0 %v9938_v13  ;;  %9350 = vmatmul.mubr.msk.bf16.vlgmr.msra.gmra.mrb[16].mxu1 %vm2240_vm9, %v11086_v17  ;;  %v10006_v13 = vld [vmem:[#allocation7 + $0xaf8] ss:$12 sps:$4 sm:$0xff]  }
 0x2f1   : > { %3812 = vmatpush1.bf16.msra.mxu1 %v9935_v16  ;;  %3843 = vmatprep.mubr.bf16.mxu1 %v11058_v14  ;;  %v10009_v16 = vld [vmem:[#allocation7 + $0x108] ss:$12 sps:$4 sm:$0xff]  }
 0x2f2   : > { %3813 = vmatprep.subr.bf16.mxu1 %v9942_v19  ;;  %v10017_v19 = vld [vmem:[#allocation7 + $0x124] ss:$12 sps:$4 sm:$0xff]  }
 0x2f3   : > { %8994 = vmatpush3.bf16.msra.mxu0 %v9939_v18  ;;  %v10014_v18 = vld [vmem:[#allocation7 + $0xb14] ss:$12 sps:$4 sm:$0xff]  }
 0x2f4   : > { %3283 = vmatprep.subr.bf16.mxu0 %v9945_v21  ;;  %v10012_v21 = vld [vmem:[#allocation7 + $0xb10] ss:$12 sps:$4 sm:$0xff]  }
 0x2f5   : > { %3814 = vmatpush1.bf16.msra.mxu1 %v9940_v23  ;;  %v10015_v23 = vld [vmem:[#allocation7 + $0x120] ss:$12 sps:$4 sm:$0xff]  }
 0x2f6   : > { %2942 = vmatmul.mubr.bf16.vlgmr.msra.gmra.mrb[24].mxu0 %v11056_v10  ;;  %3815 = vmatprep.subr.bf16.mxu1 %v9948_v25  ;;  %v10023_v25 = vld [vmem:[#allocation7 + $0x13c] ss:$12 sps:$4 sm:$0xff]  }
 0x2f7   : > { %3284 = vmatpush1.bf16.msra.mxu0 %v9943_v24  ;;  %3315 = vmatprep.mubr.bf16.mxu0 %v11065_v22  ;;  %v10020_v24 = vld [vmem:[#allocation7 + $0xb2c] ss:$12 sps:$4 sm:$0xff]  }
 0x2f8   : > { %3285 = vmatprep.subr.bf16.mxu0 %v9951_v26  ;;  %v10018_v26 = vld [vmem:[#allocation7 + $0xb28] ss:$12 sps:$4 sm:$0xff]  }
 0x2f9   : > { %3816 = vmatpush1.bf16.msra.mxu1 %v9946_v27  ;;  %v10021_v27 = vld [vmem:[#allocation7 + $0x138] ss:$12 sps:$4 sm:$0xff]  }
 0x2fa   : > { %3817 = vmatprep.subr.bf16.mxu1 %v9954_v30  ;;  %v10029_v30 = vld [vmem:[#allocation7 + $0x154] ss:$12 sps:$4 sm:$0xff]  }
 0x2fb   : > { %3286 = vmatpush1.bf16.msra.mxu0 %v9949_v28  ;;  %v10026_v28 = vld [vmem:[#allocation7 + $0xb44] ss:$12 sps:$4 sm:$0xff]  }
 0x2fc   : > { %3287 = vmatprep.subr.bf16.mxu0 %v9957_v31  ;;  %v10024_v31 = vld [vmem:[#allocation7 + $0xb40] ss:$12 sps:$4 sm:$0xff]  }
 0x2fd   : > { %3818 = vmatpush1.bf16.msra.mxu1 %v9952_v34  ;;  %v10027_v34 = vld [vmem:[#allocation7 + $0x150] ss:$12 sps:$4 sm:$0xff]  }
 0x2fe   : > { %3819 = vmatprep.subr.bf16.mxu1 %v9960_v36  ;;  %v10032_v36 = vld [vmem:[#allocation7 + $0x16c] ss:$12 sps:$4 sm:$0xff]  }
 0x2ff   : > { %3288 = vmatpush1.bf16.msra.mxu0 %v9955_v35  ;;  %v10035_v35 = vld [vmem:[#allocation7 + $0xb5c] ss:$12 sps:$4 sm:$0xff]  }
 0x300   : > { %3289 = vmatprep.subr.bf16.mxu0 %v9963_v37  ;;  %v3520_v37 = vld [vmem:[#allocation7 + $0xb70] sm:$0xff] }
 0x301   : > { %3820 = vmatpush1.bf16.msra.mxu1 %v9958_v38  ;;  %v10033_v38 = vld [vmem:[#allocation7 + $0xb58] ss:$12 sps:$4 sm:$0xff]  }
 0x302   : > { %3821 = vmatprep.subr.bf16.mxu1 %v9966_v40  ;;  %v8506_v40 = vcombine.high %v3520_v37, %v3520_v37 }
 0x303   : > { %3290 = vmatpush1.bf16.msra.mxu0 %v9961_v39  ;;  %v10030_v39 = vld [vmem:[#allocation7 + $0x168] ss:$12 sps:$4 sm:$0xff]  }
 0x304   : > { %3291 = vmatprep.subr.bf16.mxu0 %v9969_v41  ;;  %v8505_v41 = vcombine.low %v3520_v37, %v3520_v37  ;;  %v10087_v37 = vld [vmem:[#allocation7 + $0x8f4] ss:$12 sps:$4 sm:$0xff]  }
 0x305   : > { %3822 = vmatpush1.bf16.msra.mxu1 %v9964_v42  ;;  %v10039_v42 = vld [vmem:[#allocation7 + $0x184] ss:$12 sps:$4 sm:$0xff]  }
 0x306   : > { %3823 = vmatprep.subr.bf16.mxu1 %v9972_v45  ;;  %v10037_v45 = vld [vmem:[#allocation7 + $0x180] ss:$12 sps:$4 sm:$0xff]  }
 0x307   : > { %3292 = vmatpush1.bf16.msra.mxu0 %v9967_v43  ;;  %v2355_v43 = vld [vmem:[#allocation7 + $0x198] sm:$0xff] }
 0x308   : > { %3293 = vmatprep.subr.bf16.mxu0 %v9975_v46  ;;  %v3803_v46 = vsel %vm1883_vm4, %v8505_v41, 0  ;;  %v10092_v41 = vld [vmem:[#allocation7 + $0x90c] ss:$12 sps:$4 sm:$0xff]  }
 0x309   : > { %3824 = vmatpush1.bf16.msra.mxu1 %v9970_v47  ;;  %v8449_v47 = vcombine.high %v2355_v43, %v2355_v43 }
 0x30a   : > { %3825 = vmatprep.subr.bf16.mxu1 %v9978_v49 }
 0x30b   : > { %3294 = vmatpush1.bf16.msra.mxu0 %v9973_v48  ;;  %v8448_v48 = vcombine.low %v2355_v43, %v2355_v43  ;;  %v10099_v43 = vld [vmem:[#allocation7 + $0x928] ss:$12 sps:$4 sm:$0xff]  }
 0x30c   : > { %3295 = vmatprep.subr.bf16.mxu0 %v9981_v50  ;;  %v10044_v50 = vld [vmem:[#allocation7 + $0xaa0] ss:$12 sps:$4 sm:$0xff]  }
 0x30d   : > { %3826 = vmatpush1.bf16.msra.mxu1 %v9976_v51  ;;  %v3275_v49 = vsel %vm1883_vm4, %v8448_v48, 0  ;;  %v10042_v51 = vld [vmem:[#allocation7 + $0xb60] ss:$12 sps:$4 sm:$0xff]   ;;  %v10102_v48 = vld [vmem:[#allocation7 + $0x93c] ss:$12 sps:$4 sm:$0xff]  }
 0x30e   : > { %3827 = vmatprep.subr.bf16.mxu1 %v9984_v53 }
 0x30f   : > { %3296 = vmatpush1.bf16.msra.mxu0 %v9979_v52  ;;  %v10045_v52 = vld [vmem:[#allocation7 + $0xb78] ss:$0 sps:$4 sm:$0xff]  }
 0x310   : > { %3297 = vmatprep.subr.bf16.mxu0 %v9987_v54  ;;  %v3809_v53 = vsel %vm1883_vm4, %v10045_v52, 0  ;;  %v10046_v54 = vld [vmem:[#allocation7 + $0x9e0] ss:$12 sps:$4 sm:$0xff]  }
 0x311   : > { %3828 = vmatpush1.bf16.msra.mxu1 %v9982_v55  ;;  %v10049_v55 = vld [vmem:[#allocation7 + $0x838] ss:$12 sps:$4 sm:$0xff]   ;;  %v10107_v52 = vld [vmem:[#allocation7 + $0x954] ss:$12 sps:$4 sm:$0xff]  }
 0x312   : > { %3829 = vmatprep.subr.bf16.mxu1 %v9990_v57  ;;  %v10047_v57 = vld [vmem:[#allocation7 + $0x834] ss:$12 sps:$4 sm:$0xff]  }
 0x313   : > { %3298 = vmatpush1.bf16.msra.mxu0 %v9985_v56  ;;  %v10050_v56 = vld [vmem:[#allocation7 + $0xab8] ss:$12 sps:$4 sm:$0xff]  }
 0x314   : > { %3299 = vmatprep.subr.bf16.mxu0 %v9993_v58  ;;  %v10051_v58 = vld [vmem:[#allocation7 + $0x9f8] ss:$12 sps:$4 sm:$0xff]  }
 0x315   : > { %3830 = vmatpush1.bf16.msra.mxu1 %v9988_v59  ;;  %v10054_v59 = vld [vmem:[#allocation7 + $0x850] ss:$12 sps:$4 sm:$0xff]  }
 0x316   : > { %3831 = vmatprep.subr.bf16.mxu1 %v9996_v61  ;;  %v10052_v61 = vld [vmem:[#allocation7 + $0x84c] ss:$12 sps:$4 sm:$0xff]  }
 0x317   : > { %3300 = vmatpush1.bf16.msra.mxu0 %v9991_v60  ;;  %v10055_v60 = vld [vmem:[#allocation7 + $0xad0] ss:$12 sps:$4 sm:$0xff]  }
 0x318   : > { %3301 = vmatprep.subr.bf16.mxu0 %v9999_v62  ;;  %v10056_v62 = vld [vmem:[#allocation7 + $0xa10] ss:$12 sps:$4 sm:$0xff]  }
 0x319   : > { %3832 = vmatpush1.bf16.msra.mxu1 %v9994_v2  ;;  %v10059_v2 = vld [vmem:[#allocation7 + $0x868] ss:$12 sps:$4 sm:$0xff]  }
 0x31a   : > { %3833 = vmatprep.subr.bf16.mxu1 %v10002_v5  ;;  %v10061_v5 = vld [vmem:[#allocation7 + $0xa28] ss:$12 sps:$4 sm:$0xff]  }
 0x31b   : > { %3302 = vmatpush1.bf16.msra.mxu0 %v9997_v4  ;;  %v10060_v4 = vld [vmem:[#allocation7 + $0xae8] ss:$12 sps:$4 sm:$0xff]  }
 0x31c   : > { %3303 = vmatprep.subr.bf16.mxu0 %v10005_v6  ;;  %v10064_v6 = vld [vmem:[#allocation7 + $0x880] ss:$12 sps:$4 sm:$0xff]  }
 0x31d   : > { %3834 = vmatpush1.bf16.msra.mxu1 %v10000_v7  ;;  %v10065_v7 = vld [vmem:[#allocation7 + $0xb00] ss:$12 sps:$4 sm:$0xff]  }
 0x31e   : > { %3835 = vmatprep.subr.bf16.mxu1 %v10008_v11  ;;  %v10069_v11 = vld [vmem:[#allocation7 + $0x898] ss:$12 sps:$4 sm:$0xff]  }
 0x31f   : > { %3304 = vmatpush1.bf16.msra.mxu0 %v10003_v9  ;;  %v10066_v9 = vld [vmem:[#allocation7 + $0xa40] ss:$12 sps:$4 sm:$0xff]  }
 0x320   : > { %3305 = vmatprep.subr.bf16.mxu0 %v10011_v12  ;;  %v10070_v12 = vld [vmem:[#allocation7 + $0xb18] ss:$12 sps:$4 sm:$0xff]  }
 0x321   : > { %3836 = vmatpush1.bf16.msra.mxu1 %v10006_v13  ;;  %v10067_v13 = vld [vmem:[#allocation7 + $0x894] ss:$12 sps:$4 sm:$0xff]  }
 0x322   : > { %3837 = vmatprep.subr.bf16.mxu1 %v10014_v18  ;;  %v10074_v18 = vld [vmem:[#allocation7 + $0x8b0] ss:$12 sps:$4 sm:$0xff]  }
 0x323   : > { %3306 = vmatpush1.bf16.msra.mxu0 %v10009_v16  ;;  %v10071_v16 = vld [vmem:[#allocation7 + $0xa58] ss:$12 sps:$4 sm:$0xff]  }
 0x324   : > { %3307 = vmatprep.subr.bf16.mxu0 %v10017_v19  ;;  %v10075_v19 = vld [vmem:[#allocation7 + $0xb30] ss:$12 sps:$4 sm:$0xff]  }
 0x325   : > { %3838 = vmatpush1.bf16.msra.mxu1 %v10012_v21  ;;  %v10072_v21 = vld [vmem:[#allocation7 + $0x8ac] ss:$12 sps:$4 sm:$0xff]  }
 0x326   : > { %3839 = vmatprep.subr.bf16.mxu1 %v10020_v24  ;;  %v10079_v24 = vld [vmem:[#allocation7 + $0x8c8] ss:$12 sps:$4 sm:$0xff]  }
 0x327   : > { %3308 = vmatpush1.bf16.msra.mxu0 %v10015_v23  ;;  %v10076_v23 = vld [vmem:[#allocation7 + $0xa70] ss:$12 sps:$4 sm:$0xff]  }
 0x328   : > { %3309 = vmatprep.subr.bf16.mxu0 %v10023_v25  ;;  %v10080_v25 = vld [vmem:[#allocation7 + $0xb48] ss:$12 sps:$4 sm:$0xff]  }
 0x329   : > { %3840 = vmatpush1.bf16.msra.mxu1 %v10018_v26  ;;  %v10077_v26 = vld [vmem:[#allocation7 + $0x8c4] ss:$12 sps:$4 sm:$0xff]  }
 0x32a   : > { %3841 = vmatprep.subr.bf16.mxu1 %v10026_v28  ;;  %v10084_v28 = vld [vmem:[#allocation7 + $0x8e0] ss:$12 sps:$4 sm:$0xff]  }
 0x32b   : > { %3310 = vmatpush1.bf16.msra.mxu0 %v10021_v27  ;;  %v10081_v27 = vld [vmem:[#allocation7 + $0xa88] ss:$12 sps:$4 sm:$0xff]  }
 0x32c   : > { %3311 = vmatprep.subr.bf16.mxu0 %v10029_v30  ;;  %v10085_v30 = vld [vmem:[#allocation7 + $0x8fc] ss:$12 sps:$4 sm:$0xff]  }
 0x32d   : > { %3842 = vmatpush1.bf16.msra.mxu1 %v10024_v31  ;;  %v10082_v31 = vld [vmem:[#allocation7 + $0x8dc] ss:$12 sps:$4 sm:$0xff]  }
 0x32e   : > { %3854 = vmatprep.subr.bf16.mxu1 %v10035_v35  ;;  %v10089_v35 = vld [vmem:[#allocation7 + $0x8f8] ss:$12 sps:$4 sm:$0xff]  }
 0x32f   : > { %3312 = vmatpush1.bf16.msra.mxu0 %v10027_v34  ;;  %v10086_v34 = vld [vmem:[#allocation7 + $0x83c] ss:$12 sps:$4 sm:$0xff]  }
 0x330   : > { %3313 = vmatprep.subr.bf16.mxu0 %v10032_v36  ;;  %3844 = vmatmul.mubr.bf16.vlgmr.msra.gmra.mrb[24].mxu1 %v11056_v10  ;;  %v10090_v36 = vld [vmem:[#allocation7 + $0x914] ss:$12 sps:$4 sm:$0xff]  }
 0x331   : > { %3855 = vmatpush1.bf16.msra.mxu1 %v10033_v38  ;;  %3886 = vmatprep.mubr.bf16.mxu1 %v10699_v0  ;;  %v10091_v38 = vld [vmem:[#allocation7 + $0x854] ss:$12 sps:$4 sm:$0xff]  }
 0x332   : > { %8508 = vmatprep.subr.msk.bf16.mxu1 %vm1883_vm4, %v8506_v40  ;;  %v10095_v40 = vld [vmem:[#allocation7 + $0x92c] ss:$12 sps:$4 sm:$0xff]  }
 0x333   : > { %3314 = vmatpush1.bf16.msra.mxu0 %v10030_v39  ;;  %v10094_v39 = vld [vmem:[#allocation7 + $0x910] ss:$12 sps:$4 sm:$0xff]  }
 0x334   : > { %3326 = vmatprep.subr.bf16.mxu0 %v10039_v42  ;;  %v10096_v42 = vld [vmem:[#allocation7 + $0x86c] ss:$12 sps:$4 sm:$0xff]  }
 0x335   : > { %3857 = vmatpush1.bf16.msra.mxu1 %v3803_v46  ;;  %v10101_v46 = vld [vmem:[#allocation7 + $0x884] ss:$12 sps:$4 sm:$0xff]  }
 0x336   : > { %3316 = vmatmul.mubr.bf16.vlgmr.msra.gmra.mrb[20].mxu0 %v11078_v1  ;;  %9353 = vmatprep.subr.bf16.mxu1 %v10700_v32 }
 0x337   : > { %3327 = vmatpush1.bf16.msra.mxu0 %v10037_v45  ;;  %3358 = vmatprep.mubr.bf16.mxu0 %v10699_v0  ;;  %v10100_v45 = vld [vmem:[#allocation7 + $0x944] ss:$12 sps:$4 sm:$0xff]  }
 0x338   : > { %8451 = vmatprep.subr.msk.bf16.mxu0 %vm1883_vm4, %v8449_v47  ;;  %v10104_v47 = vld [vmem:[#allocation7 + $0x940] ss:$12 sps:$4 sm:$0xff]  }
 0x33b   : > { %3329 = vmatpush1.bf16.msra.mxu0 %v3275_v49  ;;  %v10106_v49 = vld [vmem:[#allocation7 + $0x89c] ss:$12 sps:$4 sm:$0xff]  }
 0x33c   : > { %9029 = vmatprep.subr.bf16.mxu0 %v10044_v50  ;;  %8509 = vmatmul.mubr.msk.bf16.vlgmr.msra.gmra.mrb[24].mxu1 %vm2240_vm9, %v11060_v15  ;;  %v10109_v50 = vld [vmem:[#allocation7 + $0x958] ss:$12 sps:$4 sm:$0xff]  }
 0x33d   : > { %9354 = vmatpush3.bf16.msra.mxu1 %v10042_v51  ;;  %9357 = vmatprep.mubr.msk.bf16.mxu1 %vm10702_vm10, %v10700_v32  ;;  %v10110_v51 = vld [vmem:[#allocation7 + $0x974] ss:$12 sps:$4 sm:$0xff]  }
 0x33e   : > { %9355 = vmatprep.subr.bf16.mxu1 %v10700_v32 }
 0x341   : > { %9356 = vmatpush3.bf16.msra.mxu1 %v3809_v53  ;;  %v10111_v53 = vld [vmem:[#allocation7 + $0x8b4] ss:$12 sps:$4 sm:$0xff]  }
 0x342   : > { %8452 = vmatmul.mubr.msk.bf16.vlgmr.msra.gmra.mrb[20].mxu0 %vm2240_vm9, %v11086_v17  ;;  %4268 = vmatprep.subr.bf16.mxu1 %v10049_v55  ;;  %v10115_v55 = vld [vmem:[#allocation7 + $0x98c] ss:$12 sps:$4 sm:$0xff]  }
 0x343   : > { %9030 = vmatpush3.bf16.msra.mxu0 %v10046_v54  ;;  %3929 = vmatprep.mubr.bf16.mxu0 %v11058_v14  ;;  %v10057_v14 = vld [vmem:[#allocation7 + $0x864] ss:$12 sps:$4 sm:$0xff]  }
 0x344   : > { %9031 = vmatprep.subr.bf16.mxu0 %v10050_v56  ;;  %9358 = vmatmul.mubr.msk.bf16.vlgmr.msra.gmra.mrb[28].mxu1 %vm2240_vm9, %v11060_v15  ;;  %v10062_v15 = vld [vmem:[#allocation7 + $0x87c] ss:$12 sps:$4 sm:$0xff]   ;;  %v10112_v56 = vld [vmem:[#allocation7 + $0x96c] ss:$12 sps:$4 sm:$0xff]  }
 0x345   : > { %4269 = vmatpush1.bf16.msra.mxu1 %v10047_v57  ;;  %4300 = vmatprep.mubr.bf16.mxu1 %v11065_v22  ;;  %v10114_v54 = vld [vmem:[#allocation7 + $0x970] ss:$12 sps:$4 sm:$0xff]   ;;  %v10116_v57 = vld [vmem:[#allocation7 + $0x8cc] ss:$12 sps:$4 sm:$0xff]  }
 0x346   : > { %4270 = vmatprep.subr.bf16.mxu1 %v10054_v59  ;;  %v10120_v59 = vld [vmem:[#allocation7 + $0x9a4] ss:$12 sps:$4 sm:$0xff]  }
 0x347   : > { %9032 = vmatpush3.bf16.msra.mxu0 %v10051_v58  ;;  %v10119_v58 = vld [vmem:[#allocation7 + $0x988] ss:$12 sps:$4 sm:$0xff]  }
 0x348   : > { %9033 = vmatprep.subr.bf16.mxu0 %v10055_v60  ;;  %v10117_v60 = vld [vmem:[#allocation7 + $0x984] ss:$12 sps:$4 sm:$0xff]  }
 0x349   : > { %4271 = vmatpush1.bf16.msra.mxu1 %v10052_v61  ;;  %v4437_v61 = vld [vmem:[#allocation2 + $0x8] sm:$0xfc] }
 0x34a   : > { %4272 = vmatprep.subr.bf16.mxu1 %v10059_v2  ;;  %v10121_v2 = vld [vmem:[#allocation7 + $0x8e4] ss:$12 sps:$4 sm:$0xff]  }
 0x34b   : > { %9034 = vmatpush3.bf16.msra.mxu0 %v10056_v62  ;;  %v11116_v62 = vld [vmem:[#allocation2 + $0x20] sm:$0xff] }
 0x34c   : > { %9035 = vmatprep.subr.bf16.mxu0 %v10060_v4  ;;  %v10124_v4 = vld [vmem:[#allocation7 + $0x9a0] ss:$12 sps:$4 sm:$0xff]  }
 0x34d   : > { %4273 = vmatpush1.bf16.msra.mxu1 %v10057_v14  ;;  %v10127_v14 = vld [vmem:[#allocation7 + $0x34c] ss:$12 sps:$4 sm:$0xff]  }
 0x34e   : > { %4274 = vmatprep.subr.bf16.mxu1 %v10064_v6  ;;  %v10122_v6 = vld [vmem:[#allocation7 + $0x99c] ss:$12 sps:$4 sm:$0xff]  }
 0x34f   : > { %9036 = vmatpush3.bf16.msra.mxu0 %v10061_v5  ;;  %v4443_v5 = vpack.c.bf16 %v11116_v62, %v4437_v61  ;;  %v10182_v61 = vld [vmem:[#allocation7 + $0x468] ss:$12 sps:$4 sm:$0xff]  }
 0x350   : > { %9037 = vmatprep.subr.bf16.mxu0 %v10065_v7  ;;  %v10125_v7 = vld [vmem:[#allocation7 + $0x348] ss:$12 sps:$4 sm:$0xff]  }
 0x351   : > { %4275 = vmatpush1.bf16.msra.mxu1 %v10062_v15  ;;  %v10130_v15 = vld [vmem:[#allocation7 + $0x364] ss:$12 sps:$4 sm:$0xff]  }
 0x352   : > { %4276 = vmatprep.subr.bf16.mxu1 %v10069_v11  ;;  %v2426_v11 = vld [vmem:[#allocation7 + $0x9cc] sm:$0xff] }
 0x353   : > { %9038 = vmatpush3.bf16.msra.mxu0 %v10066_v9  ;;  %v10133_v9 = vld [vmem:[#allocation7 + $0x9b8] ss:$12 sps:$4 sm:$0xff]  }
 0x354   : > { %9039 = vmatprep.subr.bf16.mxu0 %v10070_v12  ;;  %v11119_v12 = vrot.slane %v4443_v5, 1  ;;  %v11137_v5 = vld [vmem:[#allocation2 + $0x18] sm:$0xff] }
 0x355   : > { %4277 = vmatpush1.bf16.msra.mxu1 %v10067_v13  ;;  %v10131_v13 = vld [vmem:[#allocation7 + $0x9b4] ss:$12 sps:$4 sm:$0xff]  }
 0x356   : > { %4278 = vmatprep.subr.bf16.mxu1 %v10074_v18  ;;  %v8563_v18 = vcombine.high %v2426_v11, %v2426_v11 }
 0x357   : > { %9040 = vmatpush3.bf16.msra.mxu0 %v10071_v16  ;;  %v10128_v16 = vld [vmem:[#allocation7 + $0x360] ss:$12 sps:$4 sm:$0xff]  }
 0x358   : > { %9041 = vmatprep.subr.bf16.mxu0 %v10075_v19  ;;  %v8562_v19 = vcombine.low %v2426_v11, %v2426_v11  ;;  %v10190_v11 = vld [vmem:[#allocation7 + $0x4d0] ss:$12 sps:$4 sm:$0xff]  }
 0x359   : > { %4279 = vmatpush1.bf16.msra.mxu1 %v10072_v21  ;;  %v10136_v21 = vld [vmem:[#allocation7 + $0x37c] ss:$12 sps:$4 sm:$0xff]  }
 0x35a   : > { %4280 = vmatprep.subr.bf16.mxu1 %v10079_v24  ;;  %v4260_v24 = vsel %vm1883_vm4, %v8562_v19, 0  ;;  %v10197_v19 = vld [vmem:[#allocation7 + $0x4b4] ss:$12 sps:$4 sm:$0xff]  }
 0x35b   : > { %9042 = vmatpush3.bf16.msra.mxu0 %v10076_v23  ;;  %v10134_v23 = vld [vmem:[#allocation7 + $0x378] ss:$12 sps:$4 sm:$0xff]  }
 0x35c   : > { %9043 = vmatprep.subr.bf16.mxu0 %v10080_v25  ;;  %v10141_v25 = vld [vmem:[#allocation7 + $0x394] ss:$12 sps:$4 sm:$0xff]  }
 0x35d   : > { %4281 = vmatpush1.bf16.msra.mxu1 %v10077_v26  ;;  %v10139_v26 = vld [vmem:[#allocation7 + $0x390] ss:$12 sps:$4 sm:$0xff]  }
 0x35e   : > { %4282 = vmatprep.subr.bf16.mxu1 %v10084_v28  ;;  %v10142_v28 = vld [vmem:[#allocation7 + $0x9bc] ss:$12 sps:$4 sm:$0xff]  }
 0x35f   : > { %9044 = vmatpush3.bf16.msra.mxu0 %v10081_v27  ;;  %v10145_v27 = vld [vmem:[#allocation7 + $0x3ac] ss:$12 sps:$4 sm:$0xff]  }
 0x360   : > { %9054 = vmatprep.subr.bf16.mxu0 %v10085_v30  ;;  %v10146_v30 = vld [vmem:[#allocation7 + $0x9d4] ss:$0 sps:$4 sm:$0xff]  }
 0x361   : > { %4283 = vmatpush1.bf16.msra.mxu1 %v10082_v31  ;;  %v10149_v31 = vld [vmem:[#allocation7 + $0x3c4] ss:$12 sps:$4 sm:$0xff]  }
 0x362   : > { %3930 = vmatmul.mubr.bf16.vlgmr.msra.gmra.mrb[28].mxu0 %v11056_v10  ;;  %4284 = vmatprep.subr.bf16.mxu1 %v10089_v35  ;;  %v10097_v10 = vld [vmem:[#allocation7 + $0x924] ss:$12 sps:$4 sm:$0xff]   ;;  %v10147_v35 = vld [vmem:[#allocation7 + $0x3c0] ss:$12 sps:$4 sm:$0xff]  }
 0x363   : > { %9055 = vmatpush3.bf16.msra.mxu0 %v10086_v34  ;;  %4386 = vmatprep.mubr.bf16.mxu0 %v11065_v22  ;;  %v10105_v22 = vld [vmem:[#allocation7 + $0x95c] ss:$12 sps:$4 sm:$0xff]   ;;  %v4266_v34 = vsel %vm1883_vm4, %v10146_v30, 0 }
 0x364   : > { %9056 = vmatprep.subr.bf16.mxu0 %v10090_v36  ;;  %v10150_v36 = vld [vmem:[#allocation7 + $0x410] ss:$12 sps:$4 sm:$0xff]  }
 0x365   : > { %4285 = vmatpush1.bf16.msra.mxu1 %v10087_v37  ;;  %v10154_v37 = vld [vmem:[#allocation7 + $0x3dc] ss:$12 sps:$4 sm:$0xff]  }
 0x366   : > { %4286 = vmatprep.subr.bf16.mxu1 %v10094_v39  ;;  %v10152_v39 = vld [vmem:[#allocation7 + $0x3d8] ss:$12 sps:$4 sm:$0xff]  }
 0x367   : > { %9057 = vmatpush3.bf16.msra.mxu0 %v10091_v38  ;;  %v10151_v38 = vld [vmem:[#allocation7 + $0x350] ss:$12 sps:$4 sm:$0xff]  }
 0x368   : > { %9058 = vmatprep.subr.bf16.mxu0 %v10095_v40  ;;  %v10155_v40 = vld [vmem:[#allocation7 + $0x428] ss:$12 sps:$4 sm:$0xff]  }
 0x369   : > { %4287 = vmatpush1.bf16.msra.mxu1 %v10092_v41  ;;  %v10159_v41 = vld [vmem:[#allocation7 + $0x3f4] ss:$12 sps:$4 sm:$0xff]  }
 0x36a   : > { %4288 = vmatprep.subr.bf16.mxu1 %v10099_v43  ;;  %v10157_v43 = vld [vmem:[#allocation7 + $0x3f0] ss:$12 sps:$4 sm:$0xff]  }
 0x36b   : > { %9059 = vmatpush3.bf16.msra.mxu0 %v10096_v42  ;;  %v10156_v42 = vld [vmem:[#allocation7 + $0x368] ss:$12 sps:$4 sm:$0xff]  }
 0x36c   : > { %9060 = vmatprep.subr.bf16.mxu0 %v10100_v45  ;;  %v10160_v45 = vld [vmem:[#allocation7 + $0x440] ss:$12 sps:$4 sm:$0xff]  }
 0x36d   : > { %4289 = vmatpush1.bf16.msra.mxu1 %v10097_v10  ;;  %v10164_v10 = vld [vmem:[#allocation7 + $0x40c] ss:$12 sps:$4 sm:$0xff]  }
 0x36e   : > { %4290 = vmatprep.subr.bf16.mxu1 %v10104_v47  ;;  %v10162_v47 = vld [vmem:[#allocation7 + $0x408] ss:$12 sps:$4 sm:$0xff]  }
 0x36f   : > { %9061 = vmatpush3.bf16.msra.mxu0 %v10101_v46  ;;  %v10161_v46 = vld [vmem:[#allocation7 + $0x380] ss:$12 sps:$4 sm:$0xff]  }
 0x370   : > { %9062 = vmatprep.subr.bf16.mxu0 %v10105_v22  ;;  %v10165_v22 = vld [vmem:[#allocation7 + $0x458] ss:$12 sps:$4 sm:$0xff]  }
 0x371   : > { %4291 = vmatpush1.bf16.msra.mxu1 %v10102_v48  ;;  %v10169_v48 = vld [vmem:[#allocation7 + $0x424] ss:$12 sps:$4 sm:$0xff]  }
 0x372   : > { %4292 = vmatprep.subr.bf16.mxu1 %v10109_v50  ;;  %v10170_v50 = vld [vmem:[#allocation7 + $0x470] ss:$12 sps:$4 sm:$0xff]  }
 0x373   : > { %9063 = vmatpush3.bf16.msra.mxu0 %v10106_v49  ;;  %v10167_v49 = vld [vmem:[#allocation7 + $0x420] ss:$12 sps:$4 sm:$0xff]  }
 0x374   : > { %9064 = vmatprep.subr.bf16.mxu0 %v10110_v51  ;;  %v10174_v51 = vld [vmem:[#allocation7 + $0x43c] ss:$12 sps:$4 sm:$0xff]  }
 0x375   : > { %4293 = vmatpush1.bf16.msra.mxu1 %v10107_v52  ;;  %v10171_v52 = vld [vmem:[#allocation7 + $0x3b0] ss:$12 sps:$4 sm:$0xff]  }
 0x376   : > { %4294 = vmatprep.subr.bf16.mxu1 %v10114_v54  ;;  %v10175_v54 = vld [vmem:[#allocation7 + $0x488] ss:$12 sps:$4 sm:$0xff]  }
 0x377   : > { %9065 = vmatpush3.bf16.msra.mxu0 %v10111_v53  ;;  %v10172_v53 = vld [vmem:[#allocation7 + $0x438] ss:$12 sps:$4 sm:$0xff]  }
 0x378   : > { %9066 = vmatprep.subr.bf16.mxu0 %v10115_v55  ;;  %v10179_v55 = vld [vmem:[#allocation7 + $0x454] ss:$12 sps:$4 sm:$0xff]  }
 0x379   : > { %4295 = vmatpush1.bf16.msra.mxu1 %v10112_v56  ;;  %v10176_v56 = vld [vmem:[#allocation7 + $0x3c8] ss:$12 sps:$4 sm:$0xff]  }
 0x37a   : > { %4296 = vmatprep.subr.bf16.mxu1 %v10119_v58  ;;  %v10180_v58 = vld [vmem:[#allocation7 + $0x4a0] ss:$12 sps:$4 sm:$0xff]  }
 0x37b   : > { %9067 = vmatpush3.bf16.msra.mxu0 %v10116_v57  ;;  %v10177_v57 = vld [vmem:[#allocation7 + $0x450] ss:$12 sps:$4 sm:$0xff]  }
 0x37c   : > { %9068 = vmatprep.subr.bf16.mxu0 %v10120_v59  ;;  %v10184_v59 = vld [vmem:[#allocation7 + $0x46c] ss:$12 sps:$4 sm:$0xff]  }
 0x37d   : > { %4297 = vmatpush1.bf16.msra.mxu1 %v10117_v60  ;;  %v10181_v60 = vld [vmem:[#allocation7 + $0x3e0] ss:$12 sps:$4 sm:$0xff]  }
 0x37e   : > { %4298 = vmatprep.subr.bf16.mxu1 %v10124_v4  ;;  %v10189_v4 = vld [vmem:[#allocation7 + $0x484] ss:$12 sps:$4 sm:$0xff]  }
 0x37f   : > { %9069 = vmatpush3.bf16.msra.mxu0 %v10121_v2  ;;  %v10185_v2 = vld [vmem:[#allocation7 + $0x4b8] ss:$12 sps:$4 sm:$0xff]  }
 0x380   : > { %4816 = vmatprep.subr.bf16.mxu0 %v10127_v14  ;;  %v4436_v14 = vld [vmem:[#allocation2] sm:$0xfc] }
 0x381   : > { %4299 = vmatpush1.bf16.msra.mxu1 %v10122_v6  ;;  %v10186_v6 = vld [vmem:[#allocation7 + $0x3f8] ss:$12 sps:$4 sm:$0xff]  }
 0x382   : > { %4387 = vmatmul.mubr.bf16.vlgmr.msra.gmra.mrb[32].mxu0 %v11078_v1  ;;  %4311 = vmatprep.subr.bf16.mxu1 %v10133_v9  ;;  %v10193_v9 = vld [vmem:[#allocation7 + $0x49c] ss:$12 sps:$4 sm:$0xff]  }
 0x383   : > { %4817 = vmatpush1.bf16.msra.mxu0 %v10125_v7  ;;  %4848 = vmatprep.mubr.bf16.mxu0 %v11119_v12  ;;  %v10187_v7 = vld [vmem:[#allocation7 + $0x480] ss:$12 sps:$4 sm:$0xff]  }
 0x384   : > { %4818 = vmatprep.subr.bf16.mxu0 %v10130_v15  ;;  %4301 = vmatmul.mubr.bf16.vlgmr.msra.gmra.mrb[24].mxu1 %v11078_v1  ;;  %v10143_v1 = vld [vmem:[#allocation7 + $0x3a8] ss:$12 sps:$4 sm:$0xff]   ;;  %v4442_v15 = vpack.c.bf16 %v11137_v5, %v4436_v14 }
 0x385   : > { %4312 = vmatpush1.bf16.msra.mxu1 %v10131_v13  ;;  %4343 = vmatprep.mubr.bf16.mxu1 %v10699_v0  ;;  %v10222_v14 = vld [vmem:[#allocation7 + $0xbf4] ss:$12 sps:$4 sm:$0xff]  }
 0x386   : > { %8565 = vmatprep.subr.msk.bf16.mxu1 %vm1883_vm4, %v8563_v18  ;;  %v11140_v13 = vrot.slane %v4442_v15, 1  ;;  %v10194_v18 = vld [vmem:[#allocation7 + $0x4e8] ss:$0 sps:$4 sm:$0xff]   ;;  %v10230_v15 = vld [vmem:[#allocation7 + $0xc8c] ss:$12 sps:$4 sm:$0xff]  }
 0x387   : > { %4819 = vmatpush1.bf16.msra.mxu0 %v10128_v16  ;;  %v10191_v16 = vld [vmem:[#allocation7 + $0x498] ss:$12 sps:$4 sm:$0xff]  }
 0x388   : > { %4820 = vmatprep.subr.bf16.mxu0 %v10136_v21  ;;  %v4438_v21 = vld [vmem:[#allocation2 + $0x10] sm:$0xfc] }
 0x389   : > { %4314 = vmatpush1.bf16.msra.mxu1 %v4260_v24  ;;  %v10195_v24 = vld [vmem:[#allocation7 + $0x4b0] ss:$12 sps:$4 sm:$0xff]  }
 0x38a   : > { %9361 = vmatprep.subr.bf16.mxu1 %v10700_v32 }
 0x38b   : > { %4821 = vmatpush1.bf16.msra.mxu0 %v10134_v23  ;;  %v4814_v23 = vsel %vm1883_vm4, %v10194_v18, 0  ;;  %v10235_v18 = vld [vmem:[#allocation7 + $0xca4] ss:$12 sps:$4 sm:$0xff]  }
 0x38c   : > { %4822 = vmatprep.subr.bf16.mxu0 %v10141_v25  ;;  %v10558_v25 = vld [vmem:[#allocation2 + $0x28] sm:$0xff] }
 0x38f   : > { %4823 = vmatpush1.bf16.msra.mxu0 %v10139_v26  ;;  %v4444_v26 = vpack.c.bf16 %v10558_v25, %v4438_v21  ;;  %v10236_v21 = vld [vmem:[#allocation7 + $0xbe4] ss:$12 sps:$4 sm:$0xff]   ;;  %v10237_v25 = vld [vmem:[#allocation7 + $0xc3c] ss:$12 sps:$4 sm:$0xff]  }
 0x390   : > { %4824 = vmatprep.subr.bf16.mxu0 %v10145_v27  ;;  %8566 = vmatmul.mubr.msk.bf16.vlgmr.msra.gmra.mrb[24].mxu1 %vm2240_vm9, %v11086_v17  ;;  %v10200_v27 = vld [vmem:[#allocation7 + $0xb80] ss:$12 sps:$4 sm:$0xff]  }
 0x391   : > { %9362 = vmatpush3.bf16.msra.mxu1 %v10142_v28  ;;  %9365 = vmatprep.mubr.msk.bf16.mxu1 %vm10702_vm10, %v10700_v32 }
 0x392   : > { %9363 = vmatprep.subr.bf16.mxu1 %v10700_v32 }
 0x393   : > { %4825 = vmatpush1.bf16.msra.mxu0 %v10143_v1  ;;  %v10206_v1 = vld [vmem:[#allocation7 + $0x4cc] ss:$12 sps:$4 sm:$0xff]  }
 0x394   : > { %4826 = vmatprep.subr.bf16.mxu0 %v10149_v31 }
 0x395   : > { %9364 = vmatpush3.bf16.msra.mxu1 %v4266_v34 }
 0x396   : > { %9079 = vmatprep.subr.bf16.mxu1 %v10150_v36  ;;  %v4514_v36 = vld [vmem:[#allocation7 + $0x4e0] sm:$0xff] }
 0x397   : > { %4827 = vmatpush1.bf16.msra.mxu0 %v10147_v35  ;;  %v10198_v35 = vld [vmem:[#allocation7 + $0xb7c] ss:$12 sps:$4 sm:$0xff]  }
 0x398   : > { %4828 = vmatprep.subr.bf16.mxu0 %v10154_v37  ;;  %9366 = vmatmul.mubr.msk.bf16.vlgmr.msra.gmra.mrb[28].mxu1 %vm2240_vm9, %v11086_v17  ;;  %v10166_v17 = vld [vmem:[#allocation7 + $0x398] ss:$12 sps:$4 sm:$0xff]  }
 0x399   : > { %9080 = vmatpush3.bf16.msra.mxu1 %v10151_v38  ;;  %4934 = vmatprep.mubr.bf16.mxu1 %v11119_v12  ;;  %v11148_v38 = vrot.slane %v4444_v26, 1  ;;  %v10244_v26 = vld [vmem:[#allocation7 + $0xc58] ss:$12 sps:$4 sm:$0xff]  }
 0x39a   : > { %9081 = vmatprep.subr.bf16.mxu1 %v10155_v40 }
 0x39b   : > { %4829 = vmatpush1.bf16.msra.mxu0 %v10152_v39  ;;  %v10203_v39 = vld [vmem:[#allocation7 + $0xb98] ss:$12 sps:$4 sm:$0xff]  }
 0x39c   : > { %4830 = vmatprep.subr.bf16.mxu0 %v10159_v41  ;;  %v10204_v41 = vld [vmem:[#allocation7 + $0x4c8] ss:$12 sps:$4 sm:$0xff]  }
 0x39d   : > { %9082 = vmatpush3.bf16.msra.mxu1 %v10156_v42  ;;  %v8620_v42 = vcombine.high %v4514_v36, %v4514_v36 }
 0x39e   : > { %9083 = vmatprep.subr.bf16.mxu1 %v10160_v45  ;;  %v10201_v45 = vld [vmem:[#allocation7 + $0xb94] ss:$12 sps:$4 sm:$0xff]  }
 0x39f   : > { %4831 = vmatpush1.bf16.msra.mxu0 %v10157_v43  ;;  %v8619_v43 = vcombine.low %v4514_v36, %v4514_v36 }
 0x3a0   : > { %4832 = vmatprep.subr.bf16.mxu0 %v10164_v10  ;;  %v10209_v10 = vld [vmem:[#allocation7 + $0xbb0] ss:$12 sps:$4 sm:$0xff]  }
 0x3a1   : > { %9084 = vmatpush3.bf16.msra.mxu1 %v10161_v46  ;;  %v4808_v46 = vsel %vm1883_vm4, %v8619_v43, 0 }
 0x3a2   : > { %9085 = vmatprep.subr.bf16.mxu1 %v10165_v22  ;;  %v10207_v22 = vld [vmem:[#allocation7 + $0xbac] ss:$12 sps:$4 sm:$0xff]  }
 0x3a3   : > { %4833 = vmatpush1.bf16.msra.mxu0 %v10162_v47  ;;  %v10215_v47 = vld [vmem:[#allocation7 + $0xc44] ss:$12 sps:$4 sm:$0xff]  }
 0x3a4   : > { %4834 = vmatprep.subr.bf16.mxu0 %v10169_v48  ;;  %v10214_v48 = vld [vmem:[#allocation7 + $0xbc8] ss:$12 sps:$4 sm:$0xff]  }
 0x3a5   : > { %9086 = vmatpush3.bf16.msra.mxu1 %v10166_v17 }
 0x3a6   : > { %9087 = vmatprep.subr.bf16.mxu1 %v10170_v50  ;;  %v10212_v50 = vld [vmem:[#allocation7 + $0xbc4] ss:$12 sps:$4 sm:$0xff]  }
 0x3a7   : > { %4835 = vmatpush1.bf16.msra.mxu0 %v10167_v49 }
 0x3a8   : > { %4836 = vmatprep.subr.bf16.mxu0 %v10174_v51 }
 0x3a9   : > { %9088 = vmatpush3.bf16.msra.mxu1 %v10171_v52 }
 0x3aa   : > { %9089 = vmatprep.subr.bf16.mxu1 %v10175_v54 }
 0x3ab   : > { %4837 = vmatpush1.bf16.msra.mxu0 %v10172_v53  ;;  %v10219_v53 = vld [vmem:[#allocation7 + $0xbe0] ss:$12 sps:$4 sm:$0xff]  }
 0x3ac   : > { %4838 = vmatprep.subr.bf16.mxu0 %v10179_v55  ;;  %v10216_v55 = vld [vmem:[#allocation7 + $0xb84] ss:$12 sps:$4 sm:$0xff]  }
 0x3ad   : > { %9090 = vmatpush3.bf16.msra.mxu1 %v10176_v56 }
 0x3ae   : > { %9091 = vmatprep.subr.bf16.mxu1 %v10180_v58  ;;  %v10220_v58 = vld [vmem:[#allocation7 + $0xc5c] ss:$12 sps:$4 sm:$0xff]  }
 0x3af   : > { %4839 = vmatpush1.bf16.msra.mxu0 %v10177_v57 }
 0x3b0   : > { %4840 = vmatprep.subr.bf16.mxu0 %v10184_v59  ;;  %v10217_v59 = vld [vmem:[#allocation7 + $0xbdc] ss:$12 sps:$4 sm:$0xff]  }
 0x3b1   : > { %9092 = vmatpush3.bf16.msra.mxu1 %v10181_v60 }
 0x3b2   : > { %9093 = vmatprep.subr.bf16.mxu1 %v10185_v2  ;;  %v10221_v2 = vld [vmem:[#allocation7 + $0xb9c] ss:$12 sps:$4 sm:$0xff]  }
 0x3b3   : > { %4841 = vmatpush1.bf16.msra.mxu0 %v10182_v61  ;;  %v10224_v61 = vld [vmem:[#allocation7 + $0xbf8] ss:$12 sps:$4 sm:$0xff]  }
 0x3b4   : > { %4842 = vmatprep.subr.bf16.mxu0 %v10189_v4  ;;  %v10225_v4 = vld [vmem:[#allocation7 + $0xc74] ss:$12 sps:$4 sm:$0xff]  }
 0x3b5   : > { %9094 = vmatpush3.bf16.msra.mxu1 %v10186_v6  ;;  %v10229_v6 = vld [vmem:[#allocation7 + $0xc10] ss:$12 sps:$4 sm:$0xff]  }
 0x3b6   : > { %9369 = vmatprep.subr.bf16.mxu1 %v10700_v32 }
 0x3b7   : > { %4843 = vmatpush1.bf16.msra.mxu0 %v10187_v7  ;;  %v10226_v7 = vld [vmem:[#allocation7 + $0xbb4] ss:$12 sps:$4 sm:$0xff]  }
 0x3b8   : > { %4844 = vmatprep.subr.bf16.mxu0 %v10193_v9  ;;  %4935 = vmatmul.mubr.bf16.vlgmr.msra.gmra.mrb[32].mxu1 %v11140_v13  ;;  %v10227_v9 = vld [vmem:[#allocation7 + $0xc0c] ss:$12 sps:$4 sm:$0xff]  }
 0x3b9   : > { %9370 = vmatpush3.bf16.msra.mxu1 %v10190_v11  ;;  %9373 = vmatprep.mubr.msk.bf16.mxu1 %vm10702_vm10, %v10700_v32  ;;  %v10234_v11 = vld [vmem:[#allocation7 + $0xc28] ss:$12 sps:$4 sm:$0xff]  }
 0x3ba   : > { %9371 = vmatprep.subr.bf16.mxu1 %v10700_v32 }
 0x3bb   : > { %4845 = vmatpush1.bf16.msra.mxu0 %v10191_v16  ;;  %v9020_v28 = vpop.f32.mrb[20].mxu1  ;;  %v10231_v16 = vld [vmem:[#allocation7 + $0xbcc] ss:$12 sps:$4 sm:$0xff]  }
 0x3bc   : > { %4846 = vmatprep.subr.bf16.mxu0 %v10197_v19  ;;  %v9021_v30 = vpop.f32.mrb[21].mxu1  ;;  %v10239_v19 = vld [vmem:[#allocation7 + $0xc40] ss:$12 sps:$4 sm:$0xff]  }
 0x3bd   : > { %9372 = vmatpush3.bf16.msra.mxu1 %v4814_v23  ;;  %v9022_v31 = vadd.f32 %v9021_v30, %v9020_v28  ;;  %v9023_v34 = vpop.f32.mrb[22].mxu1  ;;  %v5525_v23 = vld [vmem:[#allocation2 + $0x8] sm:$0xf8] }
 0x3be   : > { %v9024_v37 = vpop.f32.mrb[23].mxu1  ;;  %5350 = vmatprep.subr.bf16.mxu1 %v10200_v27  ;;  %v5534_v27 = vpack.c.bf16 %v11116_v62, %v5525_v23  ;;  %v10241_v28 = vld [vmem:[#allocation7 + $0xbfc] ss:$12 sps:$4 sm:$0xff]   ;;  %v10245_v30 = vld [vmem:[#allocation7 + $0xcd4] ss:$12 sps:$4 sm:$0xff]  }
 0x3bf   : > { %4847 = vmatpush1.bf16.msra.mxu0 %v10195_v24  ;;  %v9025_v40 = vadd.f32 %v9024_v37, %v9023_v34  ;;  %v10240_v24 = vld [vmem:[#allocation7 + $0xcbc] ss:$12 sps:$4 sm:$0xff]   ;;  %v10282_v23 = vld [vmem:[#allocation7 + $0x564] ss:$12 sps:$4 sm:$0xff]  }
 0x3c0   : > { %4859 = vmatprep.subr.bf16.mxu0 %v10206_v1  ;;  %9374 = vmatmul.mubr.msk.bf16.vlgmr.msra.gmra.mrb[16].mxu1 %vm2240_vm9, %v11148_v38  ;;  %v5531_v1 = vld [vmem:[#allocation2 + $0x38] sm:$0x1]  ;;  %v10249_v34 = vld [vmem:[#allocation7 + $0xc70] ss:$12 sps:$4 sm:$0xff]   ;;  %v5625_v36 = vshrl.u32 %v5534_v27, 16  ;;  %v5628_v37 = vshll.u32 %v5534_v27, 16 }
 0x3c1   : > { %5351 = vmatpush1.bf16.msra.mxu1 %v10198_v35  ;;  %5382 = vmatprep.mubr.bf16.mxu1 %v11119_v12  ;;  %v5537_v35 = vpack.c.bf16 %v5531_v1, %v5531_v1  ;;  %v10295_v27 = vld [vmem:[#allocation7 + $0x598] ss:$12 sps:$4 sm:$0xff]  }
 0x3c2   : > { %4849 = vmatmul.mubr.bf16.vlgmr.msra.gmra.mrb[20].mxu0 %v11140_v13  ;;  %5352 = vmatprep.subr.bf16.mxu1 %v10203_v39  ;;  %v10246_v39 = vld [vmem:[#allocation7 + $0xc14] ss:$12 sps:$4 sm:$0xff]   ;;  %v5627_v43 = vrot.slane %v5625_v36, 1  ;;  %v10296_v1 = vld [vmem:[#allocation7 + $0xd04] ss:$12 sps:$4 sm:$0xff]  }
 0x3c3   : > { %4860 = vmatpush1.bf16.msra.mxu0 %v10204_v41  ;;  %4891 = vmatprep.mubr.bf16.mxu0 %v10699_v0  ;;  %v10247_v41 = vld [vmem:[#allocation7 + $0xc6c] ss:$12 sps:$4 sm:$0xff]   ;;  %v10304_v36 = vld [vmem:[#allocation7 + $0x5b4] ss:$12 sps:$4 sm:$0xff]  }
 0x3c4   : > { %8622 = vmatprep.subr.msk.bf16.mxu0 %vm1883_vm4, %v8620_v42  ;;  %v10254_v42 = vld [vmem:[#allocation7 + $0xc88] ss:$12 sps:$4 sm:$0xff]  }
 0x3c5   : > { %5353 = vmatpush1.bf16.msra.mxu1 %v10201_v45  ;;  %v5630_v45 = vrot.slane %v5628_v37, 2  ;;  %v10301_v37 = vld [vmem:[#allocation7 + $0x5c4] ss:$12 sps:$4 sm:$0xff]  }
 0x3c6   : > { %5354 = vmatprep.subr.bf16.mxu1 %v10209_v10  ;;  %v5633_v10 = vshll.u32 %v5537_v35, 16 }
 0x3c7   : > { %4862 = vmatpush1.bf16.msra.mxu0 %v4808_v46  ;;  %v10251_v46 = vld [vmem:[#allocation7 + $0xc2c] ss:$12 sps:$4 sm:$0xff]  }
 0x3c8   : > { %9104 = vmatprep.subr.bf16.mxu0 %v10215_v47  ;;  %v10257_v47 = vld [vmem:[#allocation7 + $0x4f0] ss:$12 sps:$4 sm:$0xff]  }
 0x3c9   : > { %v8995_v17 = vpop.f32.mrb[24].mxu0  ;;  %5355 = vmatpush1.bf16.msra.mxu1 %v10207_v22  ;;  %v10252_v22 = vld [vmem:[#allocation7 + $0xc84] ss:$12 sps:$4 sm:$0xff]  }
 0x3ca   : > { %v8996_v49 = vpop.f32.mrb[25].mxu0  ;;  %5356 = vmatprep.subr.bf16.mxu1 %v10214_v48  ;;  %v5631_v48 = vor.u32 %v5630_v45, %v5627_v43  ;;  %v10313_v43 = vld [vmem:[#allocation7 + $0x5f8] ss:$12 sps:$4 sm:$0xff]  }
 0x3cb   : > { %v8997_v51 = vadd.f32 %v8996_v49, %v8995_v17  ;;  %v8998_v52 = vpop.f32.mrb[26].mxu0  ;;  %v5635_v17 = vrot.slane %v5633_v10, 2  ;;  %v10260_v49 = vld [vmem:[#allocation7 + $0xca0] ss:$12 sps:$4 sm:$0xff]   ;;  %v10314_v10 = vld [vmem:[#allocation7 + $0x5e4] ss:$12 sps:$4 sm:$0xff]  }
 0x3cc   : > { %v8999_v54 = vpop.f32.mrb[27].mxu0  ;;  %v10310_v45 = vld [vmem:[#allocation7 + $0x50c] ss:$12 sps:$4 sm:$0xff]  }
 0x3cd   : > { %v11157_v56 = vadd.f32 %v9022_v31, %v8997_v51  ;;  %v9000_v57 = vadd.f32 %v8999_v54, %v8998_v52  ;;  %5357 = vmatpush1.bf16.msra.mxu1 %v10212_v50  ;;  %v10242_v31 = vld [vmem:[#allocation7 + $0xc54] ss:$12 sps:$4 sm:$0xff]   ;;  %v10255_v50 = vld [vmem:[#allocation7 + $0x4ec] ss:$12 sps:$4 sm:$0xff]   ;;  %v10258_v52 = vld [vmem:[#allocation7 + $0xc9c] ss:$12 sps:$4 sm:$0xff]  }
 0x3ce   : > { %8623 = vmatmul.mubr.msk.bf16.vlgmr.msra.gmra.mrb[20].mxu0 %vm2240_vm9, %v11148_v38  ;;  %5358 = vmatprep.subr.bf16.mxu1 %v10219_v53  ;;  %v10263_v51 = vld [vmem:[#allocation7 + $0x508] ss:$12 sps:$4 sm:$0xff]   ;;  %v11167_v53 = vsel %vm5610_vm14, %v5631_v48, %v5635_v17  ;;  %v10266_v54 = vld [vmem:[#allocation7 + $0xcb8] ss:$12 sps:$4 sm:$0xff]  }
 0x3cf   : > { %v11159_v60 = vadd.f32 %v9025_v40, %v9000_v57  ;;  %9105 = vmatpush3.bf16.msra.mxu0 %v10216_v55  ;;  %5468 = vmatprep.mubr.bf16.mxu0 %v11119_v12  ;;  %v10232_v12 = vld [vmem:[#allocation7 + $0xc24] ss:$12 sps:$4 sm:$0xff]   ;;  %v10250_v40 = vld [vmem:[#allocation7 + $0xcec] ss:$12 sps:$4 sm:$0xff]   ;;  %v10319_v48 = vld [vmem:[#allocation7 + $0x5fc] ss:$12 sps:$4 sm:$0xff]  }
 0x3d0   : > { %9106 = vmatprep.subr.bf16.mxu0 %v10220_v58  ;;  %v10261_v55 = vld [vmem:[#allocation7 + $0x504] ss:$12 sps:$4 sm:$0xff]   ;;  %v10269_v57 = vld [vmem:[#allocation7 + $0x520] ss:$12 sps:$4 sm:$0xff]   ;;  %v5524_v17 = vld [vmem:[#allocation2] sm:$0xf8] }
 0x3d1   : > { %5359 = vmatpush1.bf16.msra.mxu1 %v10217_v59  ;;  %v10264_v58 = vld [vmem:[#allocation7 + $0xcb4] ss:$12 sps:$4 sm:$0xff]   ;;  %v10272_v59 = vld [vmem:[#allocation7 + $0xcd0] ss:$12 sps:$4 sm:$0xff]  }
 0x3d2   : > { %5360 = vmatprep.subr.bf16.mxu1 %v10224_v61  ;;  %v10267_v61 = vld [vmem:[#allocation7 + $0x51c] ss:$12 sps:$4 sm:$0xff]  }
 0x3d3   : > { %9107 = vmatpush3.bf16.msra.mxu0 %v10221_v2  ;;  %v10275_v2 = vld [vmem:[#allocation7 + $0x538] ss:$12 sps:$4 sm:$0xff]  }
 0x3d4   : > { %9108 = vmatprep.subr.bf16.mxu0 %v10225_v4  ;;  %v10270_v4 = vld [vmem:[#allocation7 + $0xccc] ss:$12 sps:$4 sm:$0xff]  }
 0x3d5   : > { %5361 = vmatpush1.bf16.msra.mxu1 %v10222_v14  ;;  %v10278_v14 = vld [vmem:[#allocation7 + $0xce8] ss:$12 sps:$4 sm:$0xff]  }
 0x3d6   : > { %5362 = vmatprep.subr.bf16.mxu1 %v10229_v6  ;;  %v10273_v6 = vld [vmem:[#allocation7 + $0x534] ss:$12 sps:$4 sm:$0xff]  }
 0x3d7   : > { %9109 = vmatpush3.bf16.msra.mxu0 %v10226_v7  ;;  %v10281_v7 = vld [vmem:[#allocation7 + $0x550] ss:$12 sps:$4 sm:$0xff]  }
 0x3d8   : > { %9110 = vmatprep.subr.bf16.mxu0 %v10230_v15  ;;  %v10276_v15 = vld [vmem:[#allocation7 + $0xce4] ss:$12 sps:$4 sm:$0xff]  }
 0x3d9   : > { %5363 = vmatpush1.bf16.msra.mxu1 %v10227_v9  ;;  %v10287_v9 = vld [vmem:[#allocation7 + $0xd00] ss:$12 sps:$4 sm:$0xff]  }
 0x3da   : > { %5364 = vmatprep.subr.bf16.mxu1 %v10234_v11  ;;  %v10279_v11 = vld [vmem:[#allocation7 + $0x54c] ss:$12 sps:$4 sm:$0xff]  }
 0x3db   : > { %9111 = vmatpush3.bf16.msra.mxu0 %v10231_v16  ;;  %v5059_v16 = vld [vmem:[#allocation7 + $0xd14] sm:$0xff] }
 0x3dc   : > { %9112 = vmatprep.subr.bf16.mxu0 %v10235_v18  ;;  %v10284_v18 = vld [vmem:[#allocation7 + $0x568] ss:$12 sps:$4 sm:$0xff]  }
 0x3dd   : > { %5365 = vmatpush1.bf16.msra.mxu1 %v10232_v12  ;;  %v10285_v12 = vld [vmem:[#allocation7 + $0xcfc] ss:$12 sps:$4 sm:$0xff]  }
 0x3de   : > { %5366 = vmatprep.subr.bf16.mxu1 %v10239_v19  ;;  %v8677_v19 = vcombine.high %v5059_v16, %v5059_v16 }
 0x3df   : > { %9113 = vmatpush3.bf16.msra.mxu0 %v10236_v21  ;;  %v8676_v21 = vcombine.low %v5059_v16, %v5059_v16  ;;  %v10331_v16 = vld [vmem:[#allocation7 + $0x654] ss:$12 sps:$4 sm:$0xff]  }
 0x3e0   : > { %9114 = vmatprep.subr.bf16.mxu0 %v10240_v24  ;;  %v10290_v24 = vld [vmem:[#allocation7 + $0x580] ss:$12 sps:$4 sm:$0xff]  }
 0x3e1   : > { %5367 = vmatpush1.bf16.msra.mxu1 %v10237_v25  ;;  %v5342_v25 = vsel %vm1883_vm4, %v8676_v21, 0 }
 0x3e2   : > { %5368 = vmatprep.subr.bf16.mxu1 %v10244_v26  ;;  %v10288_v26 = vld [vmem:[#allocation7 + $0x57c] ss:$12 sps:$4 sm:$0xff]  }
 0x3e3   : > { %9115 = vmatpush3.bf16.msra.mxu0 %v10241_v28  ;;  %v10293_v28 = vld [vmem:[#allocation7 + $0x594] ss:$12 sps:$4 sm:$0xff]  }
 0x3e4   : > { %9116 = vmatprep.subr.bf16.mxu0 %v10245_v30  ;;  %v10300_v30 = vld [vmem:[#allocation7 + $0xd1c] ss:$0 sps:$4 sm:$0xff]  }
 0x3e5   : > { %5369 = vmatpush1.bf16.msra.mxu1 %v10242_v31  ;;  %v10297_v31 = vld [vmem:[#allocation7 + $0x5ac] ss:$12 sps:$4 sm:$0xff]   ;;  %v5348_v35 = vsel %vm1883_vm4, %v10300_v30, 0  ;;  %v10345_v30 = vld [vmem:[#allocation7 + $0xde8] ss:$12 sps:$4 sm:$0xff]  }
 0x3e6   : > { %5370 = vmatprep.subr.bf16.mxu1 %v10249_v34  ;;  %v10303_v34 = vld [vmem:[#allocation7 + $0x5c8] ss:$12 sps:$4 sm:$0xff]  }
 0x3e7   : > { %9117 = vmatpush3.bf16.msra.mxu0 %v10246_v39  ;;  %v10308_v39 = vld [vmem:[#allocation7 + $0x5e0] ss:$12 sps:$4 sm:$0xff]  }
 0x3e8   : > { %9118 = vmatprep.subr.bf16.mxu0 %v10250_v40  ;;  %v10305_v40 = vld [vmem:[#allocation7 + $0x4f4] ss:$12 sps:$4 sm:$0xff]  }
 0x3e9   : > { %5371 = vmatpush1.bf16.msra.mxu1 %v10247_v41  ;;  %v10309_v41 = vld [vmem:[#allocation7 + $0x5cc] ss:$12 sps:$4 sm:$0xff]  }
 0x3ea   : > { %5372 = vmatprep.subr.bf16.mxu1 %v10254_v42  ;;  %v10306_v42 = vld [vmem:[#allocation7 + $0x5dc] ss:$12 sps:$4 sm:$0xff]  }
 0x3eb   : > { %9119 = vmatpush3.bf16.msra.mxu0 %v10251_v46  ;;  %v10311_v46 = vld [vmem:[#allocation7 + $0x5f4] ss:$12 sps:$4 sm:$0xff]  }
 0x3ec   : > { %5944 = vmatprep.subr.bf16.mxu0 %v10257_v47  ;;  %v10318_v47 = vld [vmem:[#allocation7 + $0x610] ss:$12 sps:$4 sm:$0xff]  }
 0x3ed   : > { %5373 = vmatpush1.bf16.msra.mxu1 %v10252_v22  ;;  %v10315_v22 = vld [vmem:[#allocation7 + $0x524] ss:$12 sps:$4 sm:$0xff]  }
 0x3ee   : > { %5469 = vmatmul.mubr.bf16.vlgmr.msra.gmra.mrb[36].mxu0 %v11140_v13  ;;  %5374 = vmatprep.subr.bf16.mxu1 %v10260_v49  ;;  %v10316_v49 = vld [vmem:[#allocation7 + $0x60c] ss:$12 sps:$4 sm:$0xff]  }
 0x3ef   : > { %5945 = vmatpush1.bf16.msra.mxu0 %v10255_v50  ;;  %5976 = vmatprep.mubr.bf16.mxu0 %v11167_v53  ;;  %v10320_v50 = vld [vmem:[#allocation7 + $0x53c] ss:$12 sps:$4 sm:$0xff]  }
 0x3f0   : > { %5946 = vmatprep.subr.bf16.mxu0 %v10263_v51  ;;  %v5533_v51 = vpack.c.bf16 %v11137_v5, %v5524_v17  ;;  %v10330_v5 = vld [vmem:[#allocation7 + $0x56c] ss:$12 sps:$4 sm:$0xff]  }
 0x3f1   : > { %5375 = vmatpush1.bf16.msra.mxu1 %v10258_v52  ;;  %v10324_v52 = vld [vmem:[#allocation7 + $0x614] ss:$12 sps:$4 sm:$0xff]   ;;  %v10352_v17 = vld [vmem:[#allocation7 + $0xd38] ss:$12 sps:$4 sm:$0xff]  }
 0x3f2   : > { %5376 = vmatprep.subr.bf16.mxu1 %v10266_v54  ;;  %v5530_v54 = vld [vmem:[#allocation2 + $0x30] sm:$0x1] }
 0x3f3   : > { %5947 = vmatpush1.bf16.msra.mxu0 %v10261_v55  ;;  %v10321_v55 = vld [vmem:[#allocation7 + $0x624] ss:$12 sps:$4 sm:$0xff]  }
 0x3f4   : > { %5948 = vmatprep.subr.bf16.mxu0 %v10269_v57  ;;  %v10328_v57 = vld [vmem:[#allocation7 + $0x640] ss:$12 sps:$4 sm:$0xff]  }
 0x3f5   : > { %5377 = vmatpush1.bf16.msra.mxu1 %v10264_v58  ;;  %v10325_v58 = vld [vmem:[#allocation7 + $0x554] ss:$12 sps:$4 sm:$0xff]  }
 0x3f6   : > { %5378 = vmatprep.subr.bf16.mxu1 %v10272_v59  ;;  %v5536_v59 = vpack.c.bf16 %v5530_v54, %v5530_v54  ;;  %v10361_v54 = vld [vmem:[#allocation7 + $0xd70] ss:$12 sps:$4 sm:$0xff]  }
 0x3f7   : > { %5949 = vmatpush1.bf16.msra.mxu0 %v10267_v61  ;;  %v5612_v61 = vshrl.u32 %v5533_v51, 16 }
 0x3f8   : > { %5950 = vmatprep.subr.bf16.mxu0 %v10275_v2  ;;  %v5615_v2 = vshll.u32 %v5533_v51, 16  ;;  %v10357_v51 = vld [vmem:[#allocation7 + $0xd50] ss:$12 sps:$4 sm:$0xff]  }
 0x3f9   : > { %5379 = vmatpush1.bf16.msra.mxu1 %v10270_v4  ;;  %v10329_v4 = vld [vmem:[#allocation7 + $0x62c] ss:$12 sps:$4 sm:$0xff]  }
 0x3fa   : > { %5380 = vmatprep.subr.bf16.mxu1 %v10278_v14  ;;  %v10326_v14 = vld [vmem:[#allocation7 + $0x63c] ss:$12 sps:$4 sm:$0xff]  }
 0x3fb   : > { %5951 = vmatpush1.bf16.msra.mxu0 %v10273_v6  ;;  %v10333_v6 = vld [vmem:[#allocation7 + $0x658] ss:$12 sps:$4 sm:$0xff]  }
 0x3fc   : > { %5952 = vmatprep.subr.bf16.mxu0 %v10281_v7  ;;  %v5614_v7 = vrot.slane %v5612_v61, 1  ;;  %v10367_v61 = vld [vmem:[#allocation7 + $0xd80] ss:$12 sps:$4 sm:$0xff]  }
 0x3fd   : > { %5381 = vmatpush1.bf16.msra.mxu1 %v10276_v15  ;;  %v5617_v15 = vrot.slane %v5615_v2, 2  ;;  %v10374_v2 = vld [vmem:[#allocation7 + $0xd9c] ss:$12 sps:$4 sm:$0xff]  }
 0x3fe   : > { %5393 = vmatprep.subr.bf16.mxu1 %v10287_v9  ;;  %v5620_v9 = vshll.u32 %v5536_v59, 16  ;;  %v10370_v59 = vld [vmem:[#allocation7 + $0xe60] ss:$12 sps:$4 sm:$0xff]  }
 0x3ff   : > { %5953 = vmatpush1.bf16.msra.mxu0 %v10279_v11  ;;  %v10334_v11 = vld [vmem:[#allocation7 + $0x644] ss:$12 sps:$4 sm:$0xff]  }
 0x400   : > { %5383 = vmatmul.mubr.bf16.vlgmr.msra.gmra.mrb[24].mxu1 %v11140_v13  ;;  %5954 = vmatprep.subr.bf16.mxu0 %v10284_v18  ;;  %v10299_v13 = vld [vmem:[#allocation7 + $0x5b0] ss:$12 sps:$4 sm:$0xff]   ;;  %v5622_v21 = vrot.slane %v5620_v9, 2  ;;  %v6656_v9 = vld [vmem:[#allocation2 + $0x38] sm:$0x3] }
 0x401   : > { %5394 = vmatpush1.bf16.msra.mxu1 %v10285_v12  ;;  %5425 = vmatprep.mubr.bf16.mxu1 %v10699_v0  ;;  %v10339_v18 = vld [vmem:[#allocation7 + $0x670] ss:$12 sps:$4 sm:$0xff]  }
 0x402   : > { %8679 = vmatprep.subr.msk.bf16.mxu1 %vm1883_vm4, %v8677_v19  ;;  %v10335_v12 = vld [vmem:[#allocation7 + $0x584] ss:$12 sps:$4 sm:$0xff]   ;;  %v5618_v19 = vor.u32 %v5617_v15, %v5614_v7  ;;  %v6653_v15 = vld [vmem:[#allocation2 + $0x8] sm:$0xf0] }
 0x403   : > { %5955 = vmatpush1.bf16.msra.mxu0 %v10282_v23  ;;  %v5608_v23 = vld [vmem:[#allocation7 + $0x684] sm:$0xff] }
 0x404   : > { %5956 = vmatprep.subr.bf16.mxu0 %v10290_v24  ;;  %v10336_v24 = vld [vmem:[#allocation7 + $0x65c] ss:$12 sps:$4 sm:$0xff]   ;;  %v10376_v7 = vld [vmem:[#allocation7 + $0xdb8] ss:$12 sps:$4 sm:$0xff]  }
 0x405   : > { %5396 = vmatpush1.bf16.msra.mxu1 %v5342_v25  ;;  %v10337_v25 = vld [vmem:[#allocation7 + $0x66c] ss:$12 sps:$4 sm:$0xff]  }
 0x406   : > { %9377 = vmatprep.subr.bf16.mxu1 %v10700_v32 }
 0x407   : > { %5957 = vmatpush1.bf16.msra.mxu0 %v10288_v26  ;;  %v8734_v26 = vcombine.high %v5608_v23, %v5608_v23 }
 0x408   : > { %5958 = vmatprep.subr.bf16.mxu0 %v10295_v27  ;;  %v8733_v27 = vcombine.low %v5608_v23, %v5608_v23 }
 0x40b   : > { %5959 = vmatpush1.bf16.msra.mxu0 %v10293_v28  ;;  %v11186_v28 = vsel %vm5610_vm14, %v5618_v19, %v5622_v21  ;;  %v6662_v19 = vpack.c.bf16 %v6656_v9, %v6656_v9  ;;  %v10381_v21 = vld [vmem:[#allocation7 + $0xdd0] ss:$12 sps:$4 sm:$0xff]  }
 0x40c   : > { %8680 = vmatmul.mubr.msk.bf16.vlgmr.msra.gmra.mrb[24].mxu1 %vm2240_vm9, %v11148_v38  ;;  %5960 = vmatprep.subr.bf16.mxu0 %v10299_v13  ;;  %v10340_v13 = vld [vmem:[#allocation7 + $0x59c] ss:$12 sps:$4 sm:$0xff]   ;;  %v10441_v9 = vld [vmem:[#allocation7 + $0xea4] ss:$12 sps:$4 sm:$0xff]  }
 0x40d   : > { %9378 = vmatpush3.bf16.msra.mxu1 %v10296_v1  ;;  %9381 = vmatprep.mubr.msk.bf16.mxu1 %vm10702_vm10, %v10700_v32  ;;  %v5936_v1 = vsel %vm1883_vm4, %v8733_v27, 0 }
 0x40e   : > { %9379 = vmatprep.subr.bf16.mxu1 %v10700_v32 }
 0x40f   : > { %5961 = vmatpush1.bf16.msra.mxu0 %v10297_v31  ;;  %v10342_v31 = vld [vmem:[#allocation7 + $0x674] ss:$12 sps:$4 sm:$0xff]  }
 0x410   : > { %5962 = vmatprep.subr.bf16.mxu0 %v10303_v34  ;;  %v10344_v34 = vld [vmem:[#allocation7 + $0x68c] ss:$0 sps:$4 sm:$0xff]  }
 0x411   : > { %9380 = vmatpush3.bf16.msra.mxu1 %v5348_v35 }
 0x412   : > { %9129 = vmatprep.subr.bf16.mxu1 %v10304_v36 }
 0x413   : > { %5963 = vmatpush1.bf16.msra.mxu0 %v10301_v37 }
 0x414   : > { %9382 = vmatmul.mubr.msk.bf16.vlgmr.msra.gmra.mrb[28].mxu1 %vm2240_vm9, %v11148_v38  ;;  %5964 = vmatprep.subr.bf16.mxu0 %v10308_v39  ;;  %v10323_v38 = vld [vmem:[#allocation7 + $0x628] ss:$12 sps:$4 sm:$0xff]  }
 0x415   : > { %9130 = vmatpush3.bf16.msra.mxu1 %v10305_v40  ;;  %6062 = vmatprep.mubr.bf16.mxu1 %v11167_v53  ;;  %v5942_v40 = vsel %vm1883_vm4, %v10344_v34, 0 }
 0x416   : > { %9131 = vmatprep.subr.bf16.mxu1 %v10309_v41  ;;  %v10349_v41 = vld [vmem:[#allocation7 + $0xd24] ss:$12 sps:$4 sm:$0xff]  }
 0x417   : > { %5965 = vmatpush1.bf16.msra.mxu0 %v10306_v42 }
 0x418   : > { %5966 = vmatprep.subr.bf16.mxu0 %v10313_v43  ;;  %v10346_v43 = vld [vmem:[#allocation7 + $0xd28] ss:$12 sps:$4 sm:$0xff]  }
 0x419   : > { %9132 = vmatpush3.bf16.msra.mxu1 %v10310_v45 }
 0x41a   : > { %9133 = vmatprep.subr.bf16.mxu1 %v10314_v10  ;;  %v10350_v10 = vld [vmem:[#allocation7 + $0xe00] ss:$12 sps:$4 sm:$0xff]  }
 0x41b   : > { %5967 = vmatpush1.bf16.msra.mxu0 %v10311_v46  ;;  %v10347_v46 = vld [vmem:[#allocation7 + $0xd20] ss:$12 sps:$4 sm:$0xff]  }
 0x41c   : > { %5968 = vmatprep.subr.bf16.mxu0 %v10318_v47  ;;  %v10354_v47 = vld [vmem:[#allocation7 + $0xd3c] ss:$12 sps:$4 sm:$0xff]  }
 0x41d   : > { %9134 = vmatpush3.bf16.msra.mxu1 %v10315_v22  ;;  %v10351_v22 = vld [vmem:[#allocation7 + $0xd40] ss:$12 sps:$4 sm:$0xff]  }
 0x41e   : > { %9135 = vmatprep.subr.bf16.mxu1 %v10319_v48  ;;  %v10355_v48 = vld [vmem:[#allocation7 + $0xe18] ss:$12 sps:$4 sm:$0xff]  }
 0x41f   : > { %5969 = vmatpush1.bf16.msra.mxu0 %v10316_v49  ;;  %v10359_v49 = vld [vmem:[#allocation7 + $0xd54] ss:$12 sps:$4 sm:$0xff]  }
 0x420   : > { %5970 = vmatprep.subr.bf16.mxu0 %v10323_v38  ;;  %v10356_v38 = vld [vmem:[#allocation7 + $0xd58] ss:$12 sps:$4 sm:$0xff]  }
 0x421   : > { %9136 = vmatpush3.bf16.msra.mxu1 %v10320_v50  ;;  %v10360_v50 = vld [vmem:[#allocation7 + $0xe30] ss:$12 sps:$4 sm:$0xff]  }
 0x422   : > { %9137 = vmatprep.subr.bf16.mxu1 %v10324_v52  ;;  %v10364_v52 = vld [vmem:[#allocation7 + $0xd6c] ss:$12 sps:$4 sm:$0xff]  }
 0x423   : > { %5971 = vmatpush1.bf16.msra.mxu0 %v10321_v55  ;;  %v10365_v55 = vld [vmem:[#allocation7 + $0xe48] ss:$12 sps:$4 sm:$0xff]  }
 0x424   : > { %5972 = vmatprep.subr.bf16.mxu0 %v10328_v57  ;;  %v10362_v57 = vld [vmem:[#allocation7 + $0xd68] ss:$12 sps:$4 sm:$0xff]  }
 0x425   : > { %9138 = vmatpush3.bf16.msra.mxu1 %v10325_v58  ;;  %v10369_v58 = vld [vmem:[#allocation7 + $0xd84] ss:$12 sps:$4 sm:$0xff]  }
 0x426   : > { %9139 = vmatprep.subr.bf16.mxu1 %v10329_v4  ;;  %v10371_v4 = vld [vmem:[#allocation7 + $0xda0] ss:$12 sps:$4 sm:$0xff]  }
 0x427   : > { %5973 = vmatpush1.bf16.msra.mxu0 %v10326_v14  ;;  %v10375_v14 = vld [vmem:[#allocation7 + $0xe78] ss:$12 sps:$4 sm:$0xff]  }
 0x428   : > { %5974 = vmatprep.subr.bf16.mxu0 %v10333_v6  ;;  %v10372_v6 = vld [vmem:[#allocation7 + $0xd98] ss:$12 sps:$4 sm:$0xff]  }
 0x429   : > { %9140 = vmatpush3.bf16.msra.mxu1 %v10330_v5  ;;  %v10379_v5 = vld [vmem:[#allocation7 + $0xdb4] ss:$12 sps:$4 sm:$0xff]  }
 0x42a   : > { %9141 = vmatprep.subr.bf16.mxu1 %v10334_v11  ;;  %v10380_v11 = vld [vmem:[#allocation7 + $0xe90] ss:$12 sps:$4 sm:$0xff]  }
 0x42b   : > { %5975 = vmatpush1.bf16.msra.mxu0 %v10331_v16  ;;  %v10377_v16 = vld [vmem:[#allocation7 + $0xdb0] ss:$12 sps:$4 sm:$0xff]  }
 0x42c   : > { %5987 = vmatprep.subr.bf16.mxu0 %v10339_v18  ;;  %v10384_v18 = vld [vmem:[#allocation7 + $0xdcc] ss:$12 sps:$4 sm:$0xff]  }
 0x42d   : > { %9142 = vmatpush3.bf16.msra.mxu1 %v10335_v12  ;;  %v6659_v12 = vpack.c.bf16 %v11116_v62, %v6653_v15  ;;  %v10430_v15 = vld [vmem:[#allocation7 + $0xe88] ss:$12 sps:$4 sm:$0xff]  }
 0x42e   : > { %5977 = vmatmul.mubr.bf16.vlgmr.msra.gmra.mrb[20].mxu0 %v11186_v28  ;;  %9143 = vmatprep.subr.bf16.mxu1 %v10336_v24  ;;  %v10387_v24 = vld [vmem:[#allocation7 + $0x694] ss:$12 sps:$4 sm:$0xff]  }
 0x42f   : > { %5988 = vmatpush1.bf16.msra.mxu0 %v10337_v25  ;;  %6019 = vmatprep.mubr.bf16.mxu0 %v10699_v0 }
 0x430   : > { %8736 = vmatprep.subr.msk.bf16.mxu0 %vm1883_vm4, %v8734_v26  ;;  %v10382_v26 = vld [vmem:[#allocation7 + $0xdc8] ss:$12 sps:$4 sm:$0xff]  }
 0x431   : > { %9144 = vmatpush3.bf16.msra.mxu1 %v10340_v13 }
 0x432   : > { %9385 = vmatprep.subr.bf16.mxu1 %v10700_v32 }
 0x433   : > { %5990 = vmatpush1.bf16.msra.mxu0 %v5936_v1  ;;  %v6745_v1 = vrot.slane %v6659_v12, 2  ;;  %v10439_v12 = vld [vmem:[#allocation7 + $0xea0] ss:$12 sps:$4 sm:$0xff]  }
 0x434   : > { %6063 = vmatmul.mubr.bf16.vlgmr.msra.gmra.mrb[36].mxu1 %v11186_v28  ;;  %9154 = vmatprep.subr.bf16.mxu0 %v10345_v30  ;;  %v6746_v30 = vrot.slane %v6662_v19, 2 }
 0x435   : > { %v9045_v35 = vpop.f32.mrb[28].mxu0  ;;  %9386 = vmatpush3.bf16.msra.mxu1 %v10342_v31  ;;  %9389 = vmatprep.mubr.msk.bf16.mxu1 %vm10702_vm10, %v10700_v32  ;;  %v10390_v31 = vld [vmem:[#allocation7 + $0xde4] ss:$12 sps:$4 sm:$0xff]  }
 0x436   : > { %v9046_v36 = vpop.f32.mrb[29].mxu0  ;;  %9387 = vmatprep.subr.bf16.mxu1 %v10700_v32 }
 0x437   : > { %v11196_v37 = vadd.f32 %v9046_v36, %v9045_v35  ;;  %v9048_v39 = vpop.f32.mrb[30].mxu0  ;;  %v10385_v35 = vld [vmem:[#allocation7 + $0x690] ss:$12 sps:$4 sm:$0xff]  }
 0x438   : > { %v9049_v42 = vpop.f32.mrb[31].mxu0 }
 0x439   : > { %v11200_v45 = vadd.f32 %v9049_v42, %v9048_v39  ;;  %9388 = vmatpush3.bf16.msra.mxu1 %v5942_v40  ;;  %v10393_v39 = vld [vmem:[#allocation7 + $0x6ac] ss:$12 sps:$4 sm:$0xff]   ;;  %v11217_v42 = vsel %vm6741_vm15, %v6745_v1, %v6746_v30  ;;  %v10450_v1 = vld [vmem:[#allocation7 + $0xea8] ss:$12 sps:$4 sm:$0xff]   ;;  %v10454_v30 = vld [vmem:[#allocation7 + $0xec0] ss:$0 sps:$4 sm:$0xff]  }
 0x43a   : > { %8737 = vmatmul.mubr.msk.bf16.vlgmr.msra.gmra.mrb[20].mxu0 %vm2240_vm9, %v11073_v44  ;;  %6478 = vmatprep.subr.bf16.mxu1 %v10349_v41  ;;  %v10388_v40 = vld [vmem:[#allocation7 + $0xde0] ss:$12 sps:$4 sm:$0xff]  }
 0x43b   : > { %9155 = vmatpush3.bf16.msra.mxu0 %v10346_v43  ;;  %6596 = vmatprep.mubr.bf16.mxu0 %v11167_v53  ;;  %v10396_v43 = vld [vmem:[#allocation7 + $0xdfc] ss:$12 sps:$4 sm:$0xff]  }
 0x43c   : > { %9390 = vmatmul.mubr.msk.bf16.vlgmr.msra.gmra.mrb[16].mxu1 %vm2240_vm9, %v11073_v44  ;;  %9156 = vmatprep.subr.bf16.mxu0 %v10350_v10  ;;  %v10399_v10 = vld [vmem:[#allocation7 + $0x6c4] ss:$12 sps:$4 sm:$0xff]  }
 0x43d   : > { %6479 = vmatpush1.bf16.msra.mxu1 %v10347_v46  ;;  %6510 = vmatprep.mubr.bf16.mxu1 %v11167_v53  ;;  %v10366_v53 = vld [vmem:[#allocation7 + $0xd88] ss:$12 sps:$4 sm:$0xff]   ;;  %v10394_v46 = vld [vmem:[#allocation7 + $0xdf8] ss:$12 sps:$4 sm:$0xff]  }
 0x43e   : > { %6480 = vmatprep.subr.bf16.mxu1 %v10354_v47  ;;  %v10402_v47 = vld [vmem:[#allocation7 + $0xe14] ss:$12 sps:$4 sm:$0xff]  }
 0x43f   : > { %9157 = vmatpush3.bf16.msra.mxu0 %v10351_v22  ;;  %v10405_v22 = vld [vmem:[#allocation7 + $0x6dc] ss:$12 sps:$4 sm:$0xff]  }
 0x440   : > { %9158 = vmatprep.subr.bf16.mxu0 %v10355_v48  ;;  %v10400_v48 = vld [vmem:[#allocation7 + $0xe10] ss:$12 sps:$4 sm:$0xff]  }
 0x441   : > { %6481 = vmatpush1.bf16.msra.mxu1 %v10352_v17  ;;  %v10408_v17 = vld [vmem:[#allocation7 + $0xe2c] ss:$12 sps:$4 sm:$0xff]  }
 0x442   : > { %6482 = vmatprep.subr.bf16.mxu1 %v10359_v49  ;;  %v10403_v49 = vld [vmem:[#allocation7 + $0x6d8] ss:$12 sps:$4 sm:$0xff]  }
 0x443   : > { %9159 = vmatpush3.bf16.msra.mxu0 %v10356_v38  ;;  %v10411_v38 = vld [vmem:[#allocation7 + $0x6f4] ss:$12 sps:$4 sm:$0xff]  }
 0x444   : > { %9160 = vmatprep.subr.bf16.mxu0 %v10360_v50  ;;  %v10406_v50 = vld [vmem:[#allocation7 + $0xe28] ss:$12 sps:$4 sm:$0xff]  }
 0x445   : > { %6483 = vmatpush1.bf16.msra.mxu1 %v10357_v51  ;;  %v10414_v51 = vld [vmem:[#allocation7 + $0xe44] ss:$12 sps:$4 sm:$0xff]  }
 0x446   : > { %6484 = vmatprep.subr.bf16.mxu1 %v10364_v52  ;;  %v10409_v52 = vld [vmem:[#allocation7 + $0x6f0] ss:$12 sps:$4 sm:$0xff]  }
 0x447   : > { %9161 = vmatpush3.bf16.msra.mxu0 %v10361_v54  ;;  %v10417_v54 = vld [vmem:[#allocation7 + $0x70c] ss:$12 sps:$4 sm:$0xff]  }
 0x448   : > { %9162 = vmatprep.subr.bf16.mxu0 %v10365_v55  ;;  %v10412_v55 = vld [vmem:[#allocation7 + $0xe40] ss:$12 sps:$4 sm:$0xff]  }
 0x449   : > { %6485 = vmatpush1.bf16.msra.mxu1 %v10362_v57  ;;  %v10420_v57 = vld [vmem:[#allocation7 + $0xe5c] ss:$12 sps:$4 sm:$0xff]  }
 0x44a   : > { %6486 = vmatprep.subr.bf16.mxu1 %v10369_v58  ;;  %v10415_v58 = vld [vmem:[#allocation7 + $0x708] ss:$12 sps:$4 sm:$0xff]  }
 0x44b   : > { %9163 = vmatpush3.bf16.msra.mxu0 %v10366_v53  ;;  %v10423_v53 = vld [vmem:[#allocation7 + $0x724] ss:$12 sps:$4 sm:$0xff]  }
 0x44c   : > { %9164 = vmatprep.subr.bf16.mxu0 %v10370_v59  ;;  %v10418_v59 = vld [vmem:[#allocation7 + $0xe58] ss:$12 sps:$4 sm:$0xff]  }
 0x44d   : > { %6487 = vmatpush1.bf16.msra.mxu1 %v10367_v61  ;;  %v10426_v61 = vld [vmem:[#allocation7 + $0xe74] ss:$12 sps:$4 sm:$0xff]  }
 0x44e   : > { %6488 = vmatprep.subr.bf16.mxu1 %v10374_v2  ;;  %v10421_v2 = vld [vmem:[#allocation7 + $0x720] ss:$12 sps:$4 sm:$0xff]  }
 0x44f   : > { %9165 = vmatpush3.bf16.msra.mxu0 %v10371_v4  ;;  %v10429_v4 = vld [vmem:[#allocation7 + $0x73c] ss:$12 sps:$4 sm:$0xff]  }
 0x450   : > { %9166 = vmatprep.subr.bf16.mxu0 %v10375_v14  ;;  %v10424_v14 = vld [vmem:[#allocation7 + $0xe70] ss:$12 sps:$4 sm:$0xff]  }
 0x451   : > { %6489 = vmatpush1.bf16.msra.mxu1 %v10372_v6  ;;  %v10432_v6 = vld [vmem:[#allocation7 + $0xe8c] ss:$12 sps:$4 sm:$0xff]  }
 0x452   : > { %6490 = vmatprep.subr.bf16.mxu1 %v10379_v5  ;;  %v10427_v5 = vld [vmem:[#allocation7 + $0x738] ss:$12 sps:$4 sm:$0xff]  }
 0x453   : > { %9167 = vmatpush3.bf16.msra.mxu0 %v10376_v7  ;;  %v10435_v7 = vld [vmem:[#allocation7 + $0x754] ss:$12 sps:$4 sm:$0xff]  }
 0x454   : > { %9168 = vmatprep.subr.bf16.mxu0 %v10380_v11  ;;  %v10433_v11 = vld [vmem:[#allocation7 + $0x750] ss:$12 sps:$4 sm:$0xff]  }
 0x455   : > { %v9070_v23 = vpop.f32.mrb[32].mxu0  ;;  %6491 = vmatpush1.bf16.msra.mxu1 %v10377_v16  ;;  %v6187_v16 = vld [vmem:[#allocation7 + $0xeb8] sm:$0xff] }
 0x456   : > { %v9071_v25 = vpop.f32.mrb[33].mxu0  ;;  %6492 = vmatprep.subr.bf16.mxu1 %v10384_v18  ;;  %v10438_v18 = vld [vmem:[#allocation7 + $0x76c] ss:$12 sps:$4 sm:$0xff]   ;;  %v8791_v19 = vcombine.high %v6187_v16, %v6187_v16 }
 0x457   : > { %v9072_v27 = vadd.f32 %v9071_v25, %v9070_v23  ;;  %v9073_v13 = vpop.f32.mrb[34].mxu0  ;;  %9169 = vmatpush3.bf16.msra.mxu0 %v10381_v21  ;;  %v8790_v21 = vcombine.low %v6187_v16, %v6187_v16  ;;  %v10436_v23 = vld [vmem:[#allocation7 + $0x768] ss:$12 sps:$4 sm:$0xff]  }
 0x458   : > { %v9074_v34 = vpop.f32.mrb[35].mxu0  ;;  %7045 = vmatprep.subr.bf16.mxu0 %v10387_v24  ;;  %v10444_v24 = vld [vmem:[#allocation7 + $0x784] ss:$12 sps:$4 sm:$0xff]   ;;  %v6657_v16 = vld [vmem:[#allocation2 + $0x40] sm:$0x3] }
 0x459   : > { %v11210_v62 = vadd.f32 %v9072_v27, %v11196_v37  ;;  %v9075_v36 = vadd.f32 %v9074_v34, %v9073_v13  ;;  %6493 = vmatpush1.bf16.msra.mxu1 %v10382_v26  ;;  %v10391_v37 = vld [vmem:[#allocation7 + $0x6a8] ss:$12 sps:$4 sm:$0xff]   ;;  %v6470_v25 = vsel %vm1883_vm4, %v8790_v21, 0  ;;  %v10442_v26 = vld [vmem:[#allocation7 + $0x780] ss:$12 sps:$4 sm:$0xff]  }
 0x45a   : > { %6597 = vmatmul.mubr.bf16.vlgmr.msra.gmra.mrb[40].mxu0 %v11186_v28  ;;  %6494 = vmatprep.subr.bf16.mxu1 %v10390_v31  ;;  %v10449_v27 = vld [vmem:[#allocation7 + $0x79c] ss:$12 sps:$4 sm:$0xff]   ;;  %v10447_v13 = vld [vmem:[#allocation7 + $0x798] ss:$12 sps:$4 sm:$0xff]  }
 0x45b   : > { %v11213_v41 = vadd.f32 %v9075_v36, %v11200_v45  ;;  %7046 = vmatpush1.bf16.msra.mxu0 %v10385_v35  ;;  %7077 = vmatprep.mubr.bf16.mxu0 %v11217_v42  ;;  %v10397_v45 = vld [vmem:[#allocation7 + $0x6c0] ss:$12 sps:$4 sm:$0xff]   ;;  %v10451_v31 = vld [vmem:[#allocation7 + $0x7b0] ss:$12 sps:$4 sm:$0xff]   ;;  %v6476_v35 = vsel %vm1883_vm4, %v10454_v30, 0 }
 0x45c   : > { %7047 = vmatprep.subr.bf16.mxu0 %v10393_v39  ;;  %v10457_v34 = vld [vmem:[#allocation7 + $0x7cc] ss:$12 sps:$4 sm:$0xff]   ;;  %v10560_v21 = vld [vmem:[#allocation2 + $0x28] sm:$0xff]  ;;  %v10485_v30 = vld [vmem:[#allocation7 + $0xfa4] ss:$12 sps:$4 sm:$0xff]  }
 0x45d   : > { %6495 = vmatpush1.bf16.msra.mxu1 %v10388_v40  ;;  %v10458_v36 = vld [vmem:[#allocation7 + $0x758] ss:$12 sps:$4 sm:$0xff]   ;;  %v10455_v40 = vld [vmem:[#allocation7 + $0x7c8] ss:$12 sps:$4 sm:$0xff]  }
 0x45e   : > { %6496 = vmatprep.subr.bf16.mxu1 %v10396_v43 }
 0x45f   : > { %7048 = vmatpush1.bf16.msra.mxu0 %v10391_v37  ;;  %v10462_v37 = vld [vmem:[#allocation7 + $0x7e4] ss:$12 sps:$4 sm:$0xff]  }
 0x460   : > { %7049 = vmatprep.subr.bf16.mxu0 %v10399_v10 }
 0x461   : > { %6497 = vmatpush1.bf16.msra.mxu1 %v10394_v46 }
 0x462   : > { %6498 = vmatprep.subr.bf16.mxu1 %v10402_v47  ;;  %v10459_v47 = vld [vmem:[#allocation7 + $0x698] ss:$12 sps:$4 sm:$0xff]  }
 0x463   : > { %7050 = vmatpush1.bf16.msra.mxu0 %v10397_v45  ;;  %v6655_v45 = vld [vmem:[#allocation2 + $0x30] sm:$0x3] }
 0x464   : > { %7051 = vmatprep.subr.bf16.mxu0 %v10405_v22 }
 0x465   : > { %6499 = vmatpush1.bf16.msra.mxu1 %v10400_v48  ;;  %v10463_v48 = vld [vmem:[#allocation7 + $0x770] ss:$12 sps:$4 sm:$0xff]  }
 0x466   : > { %6500 = vmatprep.subr.bf16.mxu1 %v10408_v17  ;;  %v6652_v17 = vld [vmem:[#allocation2] sm:$0xf0] }
 0x467   : > { %7052 = vmatpush1.bf16.msra.mxu0 %v10403_v49 }
 0x468   : > { %7053 = vmatprep.subr.bf16.mxu0 %v10411_v38 }
 0x469   : > { %6501 = vmatpush1.bf16.msra.mxu1 %v10406_v50  ;;  %v10460_v50 = vld [vmem:[#allocation7 + $0x7e0] ss:$12 sps:$4 sm:$0xff]  }
 0x46a   : > { %6502 = vmatprep.subr.bf16.mxu1 %v10414_v51  ;;  %v10467_v51 = vld [vmem:[#allocation7 + $0x7fc] ss:$12 sps:$4 sm:$0xff]  }
 0x46b   : > { %7054 = vmatpush1.bf16.msra.mxu0 %v10409_v52 }
 0x46c   : > { %7055 = vmatprep.subr.bf16.mxu0 %v10417_v54  ;;  %v10464_v54 = vld [vmem:[#allocation7 + $0x6b0] ss:$12 sps:$4 sm:$0xff]  }
 0x46d   : > { %6503 = vmatpush1.bf16.msra.mxu1 %v10412_v55  ;;  %v10559_v55 = vld [vmem:[#allocation2 + $0x18] sm:$0xff] }
 0x46e   : > { %6504 = vmatprep.subr.bf16.mxu1 %v10420_v57  ;;  %v6658_v57 = vpack.c.bf16 %v10559_v55, %v6652_v17  ;;  %v10496_v17 = vld [vmem:[#allocation7 + $0xf2c] ss:$12 sps:$4 sm:$0xff]   ;;  %v10505_v55 = vld [vmem:[#allocation7 + $0x101c] ss:$12 sps:$4 sm:$0xff]  }
 0x46f   : > { %7056 = vmatpush1.bf16.msra.mxu0 %v10415_v58  ;;  %v6661_v58 = vpack.c.bf16 %v6655_v45, %v6655_v45  ;;  %v10495_v45 = vld [vmem:[#allocation7 + $0xfec] ss:$12 sps:$4 sm:$0xff]  }
 0x470   : > { %7057 = vmatprep.subr.bf16.mxu0 %v10423_v53  ;;  %v10465_v53 = vld [vmem:[#allocation7 + $0x7f8] ss:$12 sps:$4 sm:$0xff]  }
 0x471   : > { %6505 = vmatpush1.bf16.msra.mxu1 %v10418_v59  ;;  %v10473_v59 = vld [vmem:[#allocation7 + $0x814] ss:$12 sps:$4 sm:$0xff]  }
 0x472   : > { %6506 = vmatprep.subr.bf16.mxu1 %v10426_v61  ;;  %v6742_v61 = vrot.slane %v6658_v57, 2  ;;  %v10502_v57 = vld [vmem:[#allocation7 + $0xedc] ss:$12 sps:$4 sm:$0xff]  }
 0x473   : > { %7058 = vmatpush1.bf16.msra.mxu0 %v10421_v2  ;;  %v6743_v2 = vrot.slane %v6661_v58, 2  ;;  %v10509_v58 = vld [vmem:[#allocation7 + $0xef8] ss:$12 sps:$4 sm:$0xff]  }
 0x474   : > { %7059 = vmatprep.subr.bf16.mxu0 %v10429_v4  ;;  %v6733_v4 = vld [vmem:[#allocation7 + $0x828] sm:$0xff] }
 0x475   : > { %6507 = vmatpush1.bf16.msra.mxu1 %v10424_v14  ;;  %v10471_v14 = vld [vmem:[#allocation7 + $0x810] ss:$12 sps:$4 sm:$0xff]  }
 0x476   : > { %6508 = vmatprep.subr.bf16.mxu1 %v10432_v6  ;;  %v8848_v6 = vcombine.high %v6733_v4, %v6733_v4 }
 0x477   : > { %7060 = vmatpush1.bf16.msra.mxu0 %v10427_v5  ;;  %v8847_v5 = vcombine.low %v6733_v4, %v6733_v4  ;;  %v10512_v4 = vld [vmem:[#allocation7 + $0xf0c] ss:$12 sps:$4 sm:$0xff]  }
 0x478   : > { %7061 = vmatprep.subr.bf16.mxu0 %v10435_v7  ;;  %v11241_v7 = vsel %vm6741_vm15, %v6742_v61, %v6743_v2  ;;  %v10511_v61 = vld [vmem:[#allocation7 + $0xf74] ss:$12 sps:$4 sm:$0xff]  }
 0x479   : > { %6509 = vmatpush1.bf16.msra.mxu1 %v10430_v15  ;;  %v10474_v15 = vld [vmem:[#allocation7 + $0x6e0] ss:$12 sps:$4 sm:$0xff]  }
 0x47a   : > { %6521 = vmatprep.subr.bf16.mxu1 %v10441_v9  ;;  %v10475_v9 = vld [vmem:[#allocation7 + $0x7b8] ss:$12 sps:$4 sm:$0xff]  }
 0x47b   : > { %7062 = vmatpush1.bf16.msra.mxu0 %v10433_v11  ;;  %v6654_v11 = vld [vmem:[#allocation2 + $0x10] sm:$0xf0] }
 0x47c   : > { %6511 = vmatmul.mubr.bf16.vlgmr.msra.gmra.mrb[24].mxu1 %v11186_v28  ;;  %7063 = vmatprep.subr.bf16.mxu0 %v10438_v18  ;;  %v10453_v28 = vld [vmem:[#allocation7 + $0x7b4] ss:$12 sps:$4 sm:$0xff]   ;;  %v7037_v18 = vsel %vm1883_vm4, %v8847_v5, 0 }
 0x47d   : > { %6522 = vmatpush1.bf16.msra.mxu1 %v10439_v12  ;;  %6553 = vmatprep.mubr.bf16.mxu1 %v10699_v0  ;;  %v10481_v12 = vld [vmem:[#allocation7 + $0xf8c] ss:$12 sps:$4 sm:$0xff]  }
 0x47e   : > { %8793 = vmatprep.subr.msk.bf16.mxu1 %vm1883_vm4, %v8791_v19  ;;  %v10477_v19 = vld [vmem:[#allocation7 + $0x6f8] ss:$12 sps:$4 sm:$0xff]  }
 0x47f   : > { %7064 = vmatpush1.bf16.msra.mxu0 %v10436_v23  ;;  %v6660_v23 = vpack.c.bf16 %v10560_v21, %v6654_v11  ;;  %v10515_v11 = vld [vmem:[#allocation7 + $0xf24] ss:$12 sps:$4 sm:$0xff]   ;;  %v10521_v21 = vld [vmem:[#allocation7 + $0xf54] ss:$12 sps:$4 sm:$0xff]  }
 0x480   : > { %7065 = vmatprep.subr.bf16.mxu0 %v10444_v24  ;;  %v6663_v24 = vpack.c.bf16 %v6657_v16, %v6657_v16  ;;  %v10520_v16 = vld [vmem:[#allocation7 + $0xf40] ss:$12 sps:$4 sm:$0xff]  }
 0x481   : > { %6524 = vmatpush1.bf16.msra.mxu1 %v6470_v25  ;;  %v10479_v25 = vld [vmem:[#allocation7 + $0x7d0] ss:$12 sps:$4 sm:$0xff]  }
 0x482   : > { %9393 = vmatprep.subr.bf16.mxu1 %v10700_v32 }
 0x483   : > { %7066 = vmatpush1.bf16.msra.mxu0 %v10442_v26  ;;  %v10480_v26 = vld [vmem:[#allocation7 + $0x710] ss:$12 sps:$4 sm:$0xff]  }
 0x484   : > { %7067 = vmatprep.subr.bf16.mxu0 %v10449_v27  ;;  %v6748_v27 = vrot.slane %v6660_v23, 2  ;;  %v10524_v23 = vld [vmem:[#allocation7 + $0xf6c] ss:$12 sps:$4 sm:$0xff]  }
 0x487   : > { %7068 = vmatpush1.bf16.msra.mxu0 %v10447_v13  ;;  %v6749_v13 = vrot.slane %v6663_v24, 2  ;;  %v10529_v24 = vld [vmem:[#allocation7 + $0xf88] ss:$12 sps:$4 sm:$0xff]  }
 0x488   : > { %8794 = vmatmul.mubr.msk.bf16.vlgmr.msra.gmra.mrb[24].mxu1 %vm2240_vm9, %v11073_v44  ;;  %7069 = vmatprep.subr.bf16.mxu0 %v10453_v28  ;;  %v10483_v28 = vld [vmem:[#allocation7 + $0x7e8] ss:$12 sps:$4 sm:$0xff]  }
 0x489   : > { %9394 = vmatpush3.bf16.msra.mxu1 %v10450_v1  ;;  %9397 = vmatprep.mubr.msk.bf16.mxu1 %vm10702_vm10, %v10700_v32  ;;  %v10482_v1 = vld [vmem:[#allocation7 + $0xecc] ss:$12 sps:$4 sm:$0xff]  }
 0x48a   : > { %9395 = vmatprep.subr.bf16.mxu1 %v10700_v32 }
 0x48b   : > { %7070 = vmatpush1.bf16.msra.mxu0 %v10451_v31  ;;  %v9095_v39 = vpop.f32.mrb[32].mxu1  ;;  %v11248_v31 = vsel %vm6741_vm15, %v6748_v27, %v6749_v13  ;;  %v10535_v27 = vld [vmem:[#allocation7 + $0xfb8] ss:$12 sps:$4 sm:$0xff]   ;;  %v10533_v13 = vld [vmem:[#allocation7 + $0xfb4] ss:$12 sps:$4 sm:$0xff]  }
 0x48c   : > { %v9096_v43 = vpop.f32.mrb[33].mxu1  ;;  %7071 = vmatprep.subr.bf16.mxu0 %v10457_v34  ;;  %v10484_v34 = vld [vmem:[#allocation7 + $0x728] ss:$12 sps:$4 sm:$0xff]  }
 0x48d   : > { %9396 = vmatpush3.bf16.msra.mxu1 %v6476_v35  ;;  %v9097_v10 = vadd.f32 %v9096_v43, %v9095_v39  ;;  %v9098_v46 = vpop.f32.mrb[34].mxu1  ;;  %v10487_v35 = vld [vmem:[#allocation7 + $0x800] ss:$12 sps:$4 sm:$0xff]   ;;  %v10489_v39 = vld [vmem:[#allocation7 + $0xfbc] ss:$12 sps:$4 sm:$0xff]  }
 0x48e   : > { %v9099_v22 = vpop.f32.mrb[35].mxu1  ;;  %9179 = vmatprep.subr.bf16.mxu1 %v10458_v36  ;;  %v10486_v36 = vld [vmem:[#allocation7 + $0xee4] ss:$12 sps:$4 sm:$0xff]   ;;  %v10490_v43 = vld [vmem:[#allocation7 + $0xefc] ss:$12 sps:$4 sm:$0xff]  }
 0x48f   : > { %v11232_v49 = vadd.f32 %v11157_v56, %v9097_v10  ;;  %7072 = vmatpush1.bf16.msra.mxu0 %v10455_v40  ;;  %v9100_v38 = vadd.f32 %v9099_v22, %v9098_v46  ;;  %v10468_v56 = vld [vmem:[#allocation7 + $0x788] ss:$12 sps:$4 sm:$0xff]   ;;  %v10488_v40 = vld [vmem:[#allocation7 + $0x740] ss:$12 sps:$4 sm:$0xff]   ;;  %v10491_v10 = vld [vmem:[#allocation7 + $0x818] ss:$12 sps:$4 sm:$0xff]  }
 0x490   : > { %9398 = vmatmul.mubr.msk.bf16.vlgmr.msra.gmra.mrb[28].mxu1 %vm2240_vm9, %v11073_v44  ;;  %7073 = vmatprep.subr.bf16.mxu0 %v10462_v37  ;;  %v10469_v44 = vld [vmem:[#allocation7 + $0x6c8] ss:$12 sps:$4 sm:$0xff]   ;;  %v10494_v46 = vld [vmem:[#allocation7 + $0x830] ss:$0 sps:$4 sm:$0xff]  }
 0x491   : > { %v11237_v52 = vadd.f32 %v11159_v60, %v9100_v38  ;;  %9180 = vmatpush3.bf16.msra.mxu1 %v10459_v47  ;;  %7163 = vmatprep.mubr.bf16.mxu1 %v11217_v42  ;;  %v10470_v60 = vld [vmem:[#allocation7 + $0x7a0] ss:$12 sps:$4 sm:$0xff]   ;;  %v7043_v22 = vsel %vm1883_vm4, %v10494_v46, 0  ;;  %v10500_v38 = vld [vmem:[#allocation7 + $0x1004] ss:$12 sps:$4 sm:$0xff]  }
 0x492   : > { %9181 = vmatprep.subr.bf16.mxu1 %v10463_v48  ;;  %v10492_v37 = vld [vmem:[#allocation7 + $0xfd4] ss:$12 sps:$4 sm:$0xff]  }
 0x493   : > { %7074 = vmatpush1.bf16.msra.mxu0 %v10460_v50  ;;  %v10493_v47 = vld [vmem:[#allocation7 + $0xf14] ss:$12 sps:$4 sm:$0xff]   ;;  %v10497_v50 = vld [vmem:[#allocation7 + $0xec4] ss:$12 sps:$4 sm:$0xff]  }
 0x494   : > { %7075 = vmatprep.subr.bf16.mxu0 %v10467_v51  ;;  %v10499_v48 = vld [vmem:[#allocation7 + $0xec8] ss:$12 sps:$4 sm:$0xff]   ;;  %v10504_v51 = vld [vmem:[#allocation7 + $0xee0] ss:$12 sps:$4 sm:$0xff]  }
 0x495   : > { %9182 = vmatpush3.bf16.msra.mxu1 %v10464_v54  ;;  %v10501_v54 = vld [vmem:[#allocation7 + $0xf44] ss:$12 sps:$4 sm:$0xff]   ;;  %v7288_v46 = vld [vmem:[#allocation7 + $0x105c] sm:$0xff] }
 0x496   : > { %9183 = vmatprep.subr.bf16.mxu1 %v10468_v56  ;;  %v10506_v56 = vld [vmem:[#allocation7 + $0xf5c] ss:$12 sps:$4 sm:$0xff]  }
 0x497   : > { %7076 = vmatpush1.bf16.msra.mxu0 %v10465_v53  ;;  %v10510_v53 = vld [vmem:[#allocation7 + $0x1034] ss:$12 sps:$4 sm:$0xff]  }
 0x498   : > { %7088 = vmatprep.subr.bf16.mxu0 %v10473_v59  ;;  %v10507_v59 = vld [vmem:[#allocation7 + $0xef4] ss:$12 sps:$4 sm:$0xff]  }
 0x499   : > { %9184 = vmatpush3.bf16.msra.mxu1 %v10469_v44  ;;  %v10514_v44 = vld [vmem:[#allocation7 + $0xf10] ss:$12 sps:$4 sm:$0xff]  }
 0x49a   : > { %7078 = vmatmul.mubr.bf16.vlgmr.msra.gmra.mrb[20].mxu0 %v11241_v7  ;;  %9185 = vmatprep.subr.bf16.mxu1 %v10470_v60 }
 0x49b   : > { %7089 = vmatpush1.bf16.msra.mxu0 %v10471_v14  ;;  %7120 = vmatprep.mubr.bf16.mxu0 %v10699_v0 }
 0x49c   : > { %8850 = vmatprep.subr.msk.bf16.mxu0 %vm1883_vm4, %v8848_v6 }
 0x49d   : > { %9186 = vmatpush3.bf16.msra.mxu1 %v10474_v15 }
 0x49e   : > { %9187 = vmatprep.subr.bf16.mxu1 %v10475_v9 }
 0x49f   : > { %7091 = vmatpush1.bf16.msra.mxu0 %v7037_v18 }
 0x4a0   : > { %9204 = vmatprep.subr.bf16.mxu0 %v10481_v12  ;;  %v10518_v12 = vld [vmem:[#allocation7 + $0xf3c] ss:$12 sps:$4 sm:$0xff]  }
 0x4a1   : > { %9188 = vmatpush3.bf16.msra.mxu1 %v10477_v19  ;;  %v10523_v19 = vld [vmem:[#allocation7 + $0xf58] ss:$12 sps:$4 sm:$0xff]  }
 0x4a2   : > { %9189 = vmatprep.subr.bf16.mxu1 %v10479_v25  ;;  %v10527_v25 = vld [vmem:[#allocation7 + $0xf84] ss:$12 sps:$4 sm:$0xff]  }
 0x4a5   : > { %9190 = vmatpush3.bf16.msra.mxu1 %v10480_v26  ;;  %v10532_v26 = vld [vmem:[#allocation7 + $0xfa0] ss:$12 sps:$4 sm:$0xff]  }
 0x4a6   : > { %8851 = vmatmul.mubr.msk.bf16.vlgmr.msra.gmra.mrb[20].mxu0 %vm2240_vm9, %v11248_v31  ;;  %9191 = vmatprep.subr.bf16.mxu1 %v10483_v28  ;;  %v10538_v28 = vld [vmem:[#allocation7 + $0xfd0] ss:$12 sps:$4 sm:$0xff]  }
 0x4a7   : > { %9205 = vmatpush3.bf16.msra.mxu0 %v10482_v1  ;;  %7697 = vmatprep.mubr.bf16.mxu0 %v11217_v42  ;;  %v10536_v1 = vld [vmem:[#allocation7 + $0xfcc] ss:$12 sps:$4 sm:$0xff]  }
 0x4a8   : > { %9206 = vmatprep.subr.bf16.mxu0 %v10485_v30  ;;  %v10541_v30 = vld [vmem:[#allocation7 + $0xfe8] ss:$12 sps:$4 sm:$0xff]  }
 0x4a9   : > { %9192 = vmatpush3.bf16.msra.mxu1 %v10484_v34  ;;  %v10539_v34 = vld [vmem:[#allocation7 + $0xfe4] ss:$12 sps:$4 sm:$0xff]  }
 0x4aa   : > { %9193 = vmatprep.subr.bf16.mxu1 %v10487_v35  ;;  %v10544_v35 = vld [vmem:[#allocation7 + $0x1000] ss:$12 sps:$4 sm:$0xff]  }
 0x4ab   : > { %9207 = vmatpush3.bf16.msra.mxu0 %v10486_v36  ;;  %v10542_v36 = vld [vmem:[#allocation7 + $0xffc] ss:$12 sps:$4 sm:$0xff]  }
 0x4ac   : > { %9208 = vmatprep.subr.bf16.mxu0 %v10489_v39  ;;  %v10547_v39 = vld [vmem:[#allocation7 + $0x1018] ss:$12 sps:$4 sm:$0xff]  }
 0x4ad   : > { %9194 = vmatpush3.bf16.msra.mxu1 %v10488_v40  ;;  %v10545_v40 = vld [vmem:[#allocation7 + $0x1014] ss:$12 sps:$4 sm:$0xff]  }
 0x4ae   : > { %9401 = vmatprep.subr.bf16.mxu1 %v10700_v32 }
 0x4af   : > { %9209 = vmatpush3.bf16.msra.mxu0 %v10490_v43  ;;  %v10550_v43 = vld [vmem:[#allocation7 + $0x1030] ss:$12 sps:$4 sm:$0xff]  }
 0x4b0   : > { %7164 = vmatmul.mubr.bf16.vlgmr.msra.gmra.mrb[40].mxu1 %v11241_v7  ;;  %9210 = vmatprep.subr.bf16.mxu0 %v10492_v37  ;;  %v10548_v37 = vld [vmem:[#allocation7 + $0x102c] ss:$12 sps:$4 sm:$0xff]  }
 0x4b1   : > { %9402 = vmatpush3.bf16.msra.mxu1 %v10491_v10  ;;  %9405 = vmatprep.mubr.msk.bf16.mxu1 %vm10702_vm10, %v10700_v32  ;;  %v10553_v10 = vld [vmem:[#allocation7 + $0x1048] ss:$12 sps:$4 sm:$0xff]  }
 0x4b2   : > { %9403 = vmatprep.subr.bf16.mxu1 %v10700_v32 }
 0x4b3   : > { %9211 = vmatpush3.bf16.msra.mxu0 %v10493_v47  ;;  %v10551_v47 = vld [vmem:[#allocation7 + $0x1044] ss:$12 sps:$4 sm:$0xff]  }
 0x4b4   : > { %9212 = vmatprep.subr.bf16.mxu0 %v10495_v45  ;;  %v8905_v45 = vcombine.high %v7288_v46, %v7288_v46 }
 0x4b5   : > { %9404 = vmatpush3.bf16.msra.mxu1 %v7043_v22  ;;  %v8904_v22 = vcombine.low %v7288_v46, %v7288_v46 }
 0x4b6   : > { %7579 = vmatprep.subr.bf16.mxu1 %v10499_v48 }
 0x4b7   : > { %9213 = vmatpush3.bf16.msra.mxu0 %v10496_v17  ;;  %v7571_v48 = vsel %vm1883_vm4, %v8904_v22, 0  ;;  %v10556_v17 = vld [vmem:[#allocation7 + $0x104c] ss:$12 sps:$4 sm:$0xff]  }
 0x4b8   : > { %9406 = vmatmul.mubr.msk.bf16.vlgmr.msra.gmra.mrb[16].mxu1 %vm2240_vm9, %v11248_v31  ;;  %9214 = vmatprep.subr.bf16.mxu0 %v10500_v38  ;;  %v10557_v38 = vld [vmem:[#allocation7 + $0x1064] ss:$0 sps:$4 sm:$0xff]  }
 0x4b9   : > { %7580 = vmatpush1.bf16.msra.mxu1 %v10497_v50  ;;  %7611 = vmatprep.mubr.bf16.mxu1 %v11217_v42  ;;  %v10517_v42 = vld [vmem:[#allocation7 + $0xf28] ss:$12 sps:$4 sm:$0xff]  }
 0x4ba   : > { %7581 = vmatprep.subr.bf16.mxu1 %v10504_v51 }
 0x4bb   : > { %9215 = vmatpush3.bf16.msra.mxu0 %v10501_v54 }
 0x4bc   : > { %9216 = vmatprep.subr.bf16.mxu0 %v10505_v55 }
 0x4bd   : > { %7582 = vmatpush1.bf16.msra.mxu1 %v10502_v57 }
 0x4be   : > { %7583 = vmatprep.subr.bf16.mxu1 %v10509_v58 }
 0x4bf   : > { %9217 = vmatpush3.bf16.msra.mxu0 %v10506_v56 }
 0x4c0   : > { %9218 = vmatprep.subr.bf16.mxu0 %v10510_v53 }
 0x4c1   : > { %7584 = vmatpush1.bf16.msra.mxu1 %v10507_v59  ;;  %v9120_v2 = vpop.f32.mrb[36].mxu0 }
 0x4c2   : > { %v9121_v60 = vpop.f32.mrb[37].mxu0  ;;  %7585 = vmatprep.subr.bf16.mxu1 %v10514_v44 }
 0x4c3   : > { %9219 = vmatpush3.bf16.msra.mxu0 %v10511_v61  ;;  %v9122_v14 = vadd.f32 %v9121_v60, %v9120_v2  ;;  %v9123_v6 = vpop.f32.mrb[38].mxu0 }
 0x4c4   : > { %v9124_v5 = vpop.f32.mrb[39].mxu0 }
 0x4c5   : > { %v11263_v15 = vadd.f32 %v11210_v62, %v9122_v14  ;;  %v9125_v9 = vadd.f32 %v9124_v5, %v9123_v6  ;;  %7586 = vmatpush1.bf16.msra.mxu1 %v10512_v4  ;;  %v10526_v62 = vld [vmem:[#allocation7 + $0xf70] ss:$12 sps:$4 sm:$0xff]  }
 0x4c6   : > { %7698 = vmatmul.mubr.bf16.vlgmr.msra.gmra.mrb[44].mxu0 %v11241_v7  ;;  %7587 = vmatprep.subr.bf16.mxu1 %v10517_v42 }
 0x4c7   : > { %v11267_v18 = vadd.f32 %v11213_v41, %v9125_v9  ;;  %7836 = vmatprep.mubr.f32.mxu0 %v10700_v32  ;;  %v10530_v41 = vld [vmem:[#allocation7 + $0xf9c] ss:$12 sps:$4 sm:$0xff]  }
 0x4c9   : > { %7588 = vmatpush1.bf16.msra.mxu1 %v10515_v11 }
 0x4ca   : > { %7589 = vmatprep.subr.bf16.mxu1 %v10520_v16 }
 0x4cd   : > { %7590 = vmatpush1.bf16.msra.mxu1 %v10518_v12 }
 0x4ce   : > { %7591 = vmatprep.subr.bf16.mxu1 %v10523_v19 }
 0x4d1   : > { %7592 = vmatpush1.bf16.msra.mxu1 %v10521_v21 }
 0x4d2   : > { %7593 = vmatprep.subr.bf16.mxu1 %v10526_v62 }
 0x4d5   : > { %7594 = vmatpush1.bf16.msra.mxu1 %v10524_v23 }
 0x4d6   : > { %7595 = vmatprep.subr.bf16.mxu1 %v10529_v24 }
 0x4d9   : > { %7596 = vmatpush1.bf16.msra.mxu1 %v10527_v25 }
 0x4da   : > { %7597 = vmatprep.subr.bf16.mxu1 %v10532_v26 }
 0x4dd   : > { %7598 = vmatpush1.bf16.msra.mxu1 %v10530_v41 }
 0x4de   : > { %7599 = vmatprep.subr.bf16.mxu1 %v10535_v27 }
 0x4e1   : > { %7600 = vmatpush1.bf16.msra.mxu1 %v10533_v13 }
 0x4e2   : > { %7601 = vmatprep.subr.bf16.mxu1 %v10538_v28 }
 0x4e5   : > { %7602 = vmatpush1.bf16.msra.mxu1 %v10536_v1 }
 0x4e6   : > { %7603 = vmatprep.subr.bf16.mxu1 %v10541_v30 }
 0x4e9   : > { %7604 = vmatpush1.bf16.msra.mxu1 %v10539_v34 }
 0x4ea   : > { %7605 = vmatprep.subr.bf16.mxu1 %v10544_v35 }
 0x4ed   : > { %7606 = vmatpush1.bf16.msra.mxu1 %v10542_v36 }
 0x4ee   : > { %7607 = vmatprep.subr.bf16.mxu1 %v10547_v39 }
 0x4f1   : > { %7608 = vmatpush1.bf16.msra.mxu1 %v10545_v40 }
 0x4f2   : > { %7609 = vmatprep.subr.bf16.mxu1 %v10550_v43 }
 0x4f5   : > { %7610 = vmatpush1.bf16.msra.mxu1 %v10548_v37 }
 0x4f6   : > { %7622 = vmatprep.subr.bf16.mxu1 %v10553_v10 }
 0x4f8   : > { %7612 = vmatmul.mubr.bf16.vlgmr.msra.gmra.mrb[24].mxu1 %v11241_v7 }
 0x4f9   : > { %7623 = vmatpush1.bf16.msra.mxu1 %v10551_v47  ;;  %7654 = vmatprep.mubr.bf16.mxu1 %v10699_v0  ;;  %v7577_v0 = vsel %vm1883_vm4, %v10557_v38, 0 }
 0x4fa   : > { %8907 = vmatprep.subr.msk.bf16.mxu1 %vm1883_vm4, %v8905_v45  ;;  %vm8101_vm4 = vmor %vm8100_vm7, %vm11325_vm6 }
 0x4fd   : > { %7625 = vmatpush1.bf16.msra.mxu1 %v7571_v48 }
 0x4fe   : > { %9409 = vmatprep.subr.bf16.mxu1 %v10700_v32 }
 0x504   : > { %8908 = vmatmul.mubr.msk.bf16.vlgmr.msra.gmra.mrb[24].mxu1 %vm2240_vm9, %v11248_v31 }
 0x505   : > { %9410 = vmatpush3.bf16.msra.mxu1 %v10556_v17  ;;  %9413 = vmatprep.mubr.msk.bf16.mxu1 %vm10702_vm10, %v10700_v32 }
 0x506   : > { %9411 = vmatprep.subr.bf16.mxu1 %v10700_v32 }
 0x507   : > { %v9145_v7 = vpop.f32.mrb[36].mxu1 }
 0x508   : > { %v9146_v50 = vpop.f32.mrb[37].mxu1 }
 0x509   : > { %v9147_v51 = vadd.f32 %v9146_v50, %v9145_v7  ;;  %9412 = vmatpush3.bf16.msra.mxu1 %v7577_v0  ;;  %v9148_v54 = vpop.f32.mrb[38].mxu1  ;;  %v10703_v7 = vmov 0.0|0.0  }
 0x50a   : > { %v9149_v55 = vpop.f32.mrb[39].mxu1 }
 0x50b   : > { %v9493_v57 = vadd.f32 %v11232_v49, %v9147_v51  ;;  %v9150_v58 = vadd.f32 %v9149_v55, %v9148_v54 }
 0x50c   : > { %9414 = vmatmul.mubr.msk.bf16.vlgmr.msra.gmra.mrb[28].mxu1 %vm2240_vm9, %v11248_v31  ;;  %vm8106_vm9 = vmand %vm8105_vm8, %vm8096_vm2 }
 0x50d   : > { %v9498_v56 = vadd.f32 %v11237_v52, %v9150_v58 }
 0x52d   : > { %v9170_v53 = vpop.f32.mrb[40].mxu0 }
 0x52e   : > { %v9171_v59 = vpop.f32.mrb[41].mxu0 }
 0x52f   : > { %v9172_v44 = vadd.f32 %v9171_v59, %v9170_v53  ;;  %v9173_v61 = vpop.f32.mrb[42].mxu0  ;;  %v8059_v53 = vld [vmem:[#allocation8] sm:$0x7] }
 0x530   : > { %v9174_v2 = vpop.f32.mrb[43].mxu0 }
 0x531   : > { %v9503_v4 = vadd.f32 %v11263_v15, %v9172_v44  ;;  %v9175_v60 = vadd.f32 %v9174_v2, %v9173_v61  ;;  %v8064_v44 = vrot.slane %v8059_v53, %v2213_v63  ;;  %v8068_v2 = vrot.slane %v8059_v53, %v2217_v3 }
 0x532   : > { %v8072_v63 = vrot.slane %v8059_v53, %v2221_v8 }
 0x533   : > { %v9508_v42 = vadd.f32 %v11267_v18, %v9175_v60 }
 0x579   : > { %v7122_v14 = vpop.f32.mrb[20].mxu0 }
 0x57a   : > { %v7124_v6 = vpop.f32.mrb[21].mxu0 }
 0x57b   : > { %v7126_v5 = vpop.f32.mrb[22].mxu0 }
 0x57c   : > { %v7128_v49 = vpop.f32.mrb[23].mxu0 }
 0x583   : > { %v9195_v9 = vpop.f32.mrb[40].mxu1 }
 0x584   : > { %v9196_v11 = vpop.f32.mrb[41].mxu1 }
 0x585   : > { %v9197_v16 = vadd.f32 %v9196_v11, %v9195_v9  ;;  %v9198_v31 = vpop.f32.mrb[42].mxu1  ;;  %v8102_v11 = vld [vmem:[%s279_s16] sm:$0xff] }
 0x586   : > { %v9199_v12 = vpop.f32.mrb[43].mxu1 }
 0x587   : > { %v9200_v52 = vadd.f32 %v9199_v12, %v9198_v31  ;;  %v9494_v19 = vadd.f32 %v9493_v57, %v9197_v16  ;;  %v8107_v12 = vld [vmem:[%s279_s16 + $0x8] sm:$0xf] }
 0x589   : > { %v9499_v21 = vadd.f32 %v9498_v56, %v9200_v52 }
 0x58b   : > { %v7206_v62 = vpop.f32.mrb[16].mxu1 }
 0x58c   : > { %v9495_v23 = vadd.f32 %v9494_v19, %v7206_v62  ;;  %v9407_v24 = vpop.f32.mrb[17].mxu1 }
 0x58d   : > { %v7209_v25 = vpop.f32.mrb[18].mxu1 }
 0x58e   : > { %v9500_v15 = vadd.f32 %v9499_v21, %v7209_v25  ;;  %v9408_v26 = vpop.f32.mrb[19].mxu1 }
 0x599   : > { %v9220_v41 = vpop.f32.mrb[44].mxu0 }
 0x59a   : > { %v9221_v18 = vpop.f32.mrb[45].mxu0 }
 0x59b   : > { %v9222_v27 = vadd.f32 %v9221_v18, %v9220_v41  ;;  %v9223_v13 = vpop.f32.mrb[46].mxu0 }
 0x59c   : > { %v9224_v28 = vpop.f32.mrb[47].mxu0 }
 0x59d   : > { %v9225_v1 = vadd.f32 %v9224_v28, %v9223_v13  ;;  %v9504_v30 = vadd.f32 %v9503_v4, %v9222_v27 }
 0x59f   : > { %v9509_v34 = vadd.f32 %v9508_v42, %v9225_v1 }
 0x5d7   : > { %v7656_v35 = vpop.f32.mrb[24].mxu1 }
 0x5d8   : > { %v7753_v36 = vmax.f32 %v7122_v14, %v7656_v35  ;;  %v7658_v39 = vpop.f32.mrb[25].mxu1 }
 0x5d9   : > { %v7754_v40 = vmax.f32 %v7124_v6, %v7658_v39  ;;  %v7660_v43 = vpop.f32.mrb[26].mxu1 }
 0x5da   : > { %v7756_v37 = vmax.f32 %v7126_v5, %v7660_v43  ;;  %v7662_v10 = vpop.f32.mrb[27].mxu1 }
 0x5db   : > { %v7757_v46 = vmax.f32 %v7128_v49, %v7662_v10 }
 0x5dc   : > { %v9474_v47 = vpack.c.bf16 %v7756_v37, %v7753_v36 }
 0x5dd   : > { %v9471_v22 = vpack.c.bf16 %v7757_v46, %v7754_v40 }
 0x5df   : > { %v7740_v48 = vpop.f32.mrb[28].mxu1  ;;  %9473 = vmatprep.subr.msk.bf16.mxu0 %vm11289_vm0, %v9471_v22 }
 0x5e0   : > { %v9505_v17 = vadd.f32 %v9504_v30, %v7740_v48  ;;  %v9415_v38 = vpop.f32.mrb[29].mxu1  ;;  %9476 = vmatpush1.bf16.msk.msra.mxu0 %vm11289_vm0, %v9474_v47 }
 0x5e1   : > { %v7743_v0 = vpop.f32.mrb[30].mxu1  ;;  %9477 = vmatprep.subr.bf16.mxu0 %v10703_v7 }
 0x5e2   : > { %v7755_v50 = vmax.f32 %v9495_v23, %v9505_v17  ;;  %v9510_v51 = vadd.f32 %v9509_v34, %v7743_v0  ;;  %v9416_v54 = vpop.f32.mrb[31].mxu1 }
 0x5e3   : > { %8912 = vmatmul.mubr.msk.f32.vlgmr.msra.gmra.mrb[48].mxu0 %vm7759_vm1, %v10982_v33 }
 0x5e4   : > { %v7758_v55 = vmax.f32 %v9500_v15, %v9510_v51  ;;  %9421 = vmatprep.mubr.msk.f32.mxu0 %vm10702_vm10, %v10700_v32 }
 0x5e6   : > { %v9478_v57 = vpack.c.bf16 %v7758_v55, %v7755_v50 }
 0x5e8   : > { %9480 = vmatpush3.bf16.msk.msra.mxu0 %vm11289_vm0, %v9478_v57 }
 0x5e9   : > { %9483 = vmatprep.subr.msk.bf16.mxu0 %vm11289_vm0, %v9471_v22 }
 0x5eb   : > { %9422 = vmatmul.mubr.msk.f32.vlgmr.msra.gmra.mrb[50].mxu0 %vm7759_vm1, %v10982_v33 }
 0x5ec   : > { %9486 = vmatpush1.bf16.msk.msra.mxu0 %vm11289_vm0, %v9474_v47  ;;  %7979 = vmatprep.mubr.f32.mxu0 %v10700_v32 }
 0x5ed   : > { %9487 = vmatprep.subr.bf16.mxu0 %v10703_v7 }
 0x5ef   : > { %8917 = vmatmul.mubr.msk.f32.vlgmr.msra.gmra.mrb[52].mxu0 %vm7759_vm1, %v11020_v20 }
 0x5f0   : > { %9490 = vmatpush3.bf16.msk.msra.mxu0 %vm11289_vm0, %v9478_v57  ;;  %9428 = vmatprep.mubr.msk.f32.mxu0 %vm10702_vm10, %v10700_v32 }
 0x5f3   : > { %9429 = vmatmul.mubr.msk.f32.vlgmr.msra.gmra.mrb[54].mxu0 %vm7759_vm1, %v11020_v20 }
 0x6b6   : > { %v7838_v58 = vpop.f32.mrb[48].mxu0 }
 0x6b7   : > { %v7840_v33 = vpop.f32.mrb[49].mxu0 }
 0x6be   : > { %v7909_v56 = vpop.f32.mrb[50].mxu0 }
 0x6bf   : > { %v9423_v59 = vpop.f32.mrb[51].mxu0 }
 0x6c2   : > { %v7981_v61 = vpop.f32.mrb[52].mxu0 }
 0x6c3   : > { %v8056_v4 = vmax.f32 %v7838_v58, %v7981_v61  ;;  %v7983_v60 = vpop.f32.mrb[53].mxu0 }
 0x6c4   : > { %v8057_v32 = vmax.f32 %v7840_v33, %v7983_v60 }
 0x6c5   : > { %v8076_v20 = vadd.f32 %v8064_v44, %v8056_v4 }
 0x6c6   : > { %v8077_v3 = vadd.f32 %v8068_v2, %v8057_v32  ;;  %v8052_v14 = vpop.f32.mrb[54].mxu0 }
 0x6c7   : > { %v8079_v6 = vmax.f32 %v8076_v20, 0.0  ;;  %v8058_v5 = vmax.f32 %v7909_v56, %v8052_v14  ;;  %v9430_v49 = vpop.f32.mrb[55].mxu0 }
 0x6c8   : > { %v8080_v9 = vmax.f32 %v8077_v3, 0.0 }
 0x6c9   : > { %v8078_v16 = vadd.f32 %v8072_v63, %v8058_v5 }
 0x6ca   : > { %v8925_v31 = vpack.c.bf16 %v8080_v9, %v8079_v6 }
 0x6cb   : > { %v8081_v29 = vmax.f32 %v8078_v16, 0.0 }
 0x6cc   : > { %v8103_v8 = vsel %vm8101_vm4, %v8925_v31, %v8102_v11 }
 0x6cd   : > { %8104 = vst [vmem:[%s279_s16] sm:$0xff] %v8103_v8  ;;  %v8926_v52 = vpack.c.bf16 %v8081_v29, %v8081_v29 }
 0x6cf   : > { %v8108_v19 = vsel %vm8106_vm9, %v8926_v52, %v8107_v12 }
 0x6d0   : > { %8109 = vst [vmem:[%s279_s16 + $0x8] sm:$0xf] %v8108_v19 }
 0x6d1 PF: > { %s18_s18 = sadd.s32 1, %s10691_s18  }
 0x6d2   : > { %p15_p6 = scmp.ge.s32.totalorder %s18_s18, 4  }
 0x6d4   :  { %17 = sbr.rel (!%p15_p6) target bundleno = 3 (0x3), region = 105 }
 0x6db   :  { %8131 = vsyncpa [#allocation4], 1 }
 0x6dc   :  { %8133 = vsyncpa [#allocation4 + $0x1], 1 }
 0x6dd   :  { %8134 = vsyncpa [#allocation6], 1 }
 0x6de   :  { %8135 = vsyncpa [#allocation9], 1 }

</bundles_post_ra>
